<compile_context>
chip_gen: v5e
topology: v5e:2x2
jax: 0.10.0
libtpu: 0.0.40
codegen_flags: <defaults>
</compile_context>

<pallas_src>
import numpy as np

import jax
import jax.numpy as jnp
from jax import lax
from jax.experimental import pallas as pl
from jax.experimental.pallas import tpu as pltpu


# Static geometry implied by the classifier (62*62*16 flattened features).
H = W = 124
CIN, COUT = 3, 16
PH = 62                        # pooled spatial size
NPOS = 31 * 31                 # pooled positions per phase (961)
NPOS_PAD = 968                 # padded to a multiple of 8 (lane dim of conv out)
KFEAT = 4 * COUT * NPOS_PAD    # 61952 = 484 * 128, fc1 K dimension
TK_FC1 = 242 * 128             # 30976 -> 2 K steps, ~7.9 MB bf16 weight block
VMEM_LIMIT = 28 * 1024 * 1024  # fits the 15.9 MB fc1 double-buffer on v5e too


def _use_v7x_split():
    """True only on TPU v7x (2 TensorCores/chip) -> split the fc1 K stream."""
    try:
        kind = jax.devices()[0].device_kind
    except Exception:  # pragma: no cover
        return False
    return "v7" in kind.lower()


# ----------------------------------------------------------------------------
# features: fused Conv2d(3->16, k=3, pad=1) + ReLU + MaxPool2d(2, 2)
# ----------------------------------------------------------------------------
def _conv_pool_kernel(pT_ref, wT_ref, b_ref, o_ref):
    # pT_ref: (4, 48, 968)  im2col'd 4x4x3 windows, positions on the lane axis
    # wT_ref: (64, 48)      rows = (2x2 pool tap) x 16 channels, cols = taps
    # b_ref : (64, 1)       conv bias replicated per pool tap
    # o_ref : (4, 16, 968)  pooled + ReLU'd features (bf16)
    for q in range(4):  # 4 phases, unrolled
        y = jnp.dot(wT_ref[...], pT_ref[q], preferred_element_type=jnp.float32)
        y = jnp.maximum(y + b_ref[...], 0.0)      # conv bias + ReLU
        # 2x2 max pool == max over the four 16-row sublane groups.
        o_ref[q] = jnp.maximum(
            jnp.maximum(y[0:16, :], y[16:32, :]),
            jnp.maximum(y[32:48, :], y[48:64, :])).astype(o_ref.dtype)


def conv_relu_pool(patches_t, w4t, b4):
    # patches_t: (N, 4, 48, 968); returns (N, 4, 16, 968) bf16
    n = patches_t.shape[0]
    return pl.pallas_call(
        _conv_pool_kernel,
        out_shape=jax.ShapeDtypeStruct((n, 4, COUT, NPOS_PAD), jnp.bfloat16),
        grid_spec=pltpu.PrefetchScalarGridSpec(
            num_scalar_prefetch=0,
            grid=(n,),
            in_specs=[
                pl.BlockSpec((None, 4, 48, NPOS_PAD), lambda b: (b, 0, 0, 0)),
                pl.BlockSpec((64, 48), lambda b: (0, 0)),
                pl.BlockSpec((64, 1), lambda b: (0, 0)),
            ],
            out_specs=pl.BlockSpec((None, 4, COUT, NPOS_PAD),
                                   lambda b: (b, 0, 0, 0)),
        ),
        compiler_params=pltpu.CompilerParams(
            dimension_semantics=("parallel",)),
    )(patches_t, w4t, b4)


def build_patches(x_nchw):
    """im2col of the 4 non-overlapping 4x4-window phases (pure layout glue).

    Returns (N, 4, 48, 968): per phase, 48 window taps (dh, dw, ci) on the
    sublane axis and pooled positions (bi*31+bj, zero-padded to 968) on lanes.
    """
    n = x_nchw.shape[0]
    xh = jnp.transpose(x_nchw, (0, 2, 3, 1))                    # (N,124,124,3)
    xp = jnp.pad(xh, ((0, 0), (1, 1), (1, 1), (0, 0)))          # (N,126,126,3)
    phases = []
    for pr in (0, 2):
        for pc in (0, 2):
            t = xp[:, pr:pr + 124, pc:pc + 124, :]              # (N,124,124,3)
            t = t.reshape(n, 31, 4, 31, 4, 3)                   # (N,bi,dh,bj,dw,ci)
            t = jnp.transpose(t, (0, 2, 4, 5, 1, 3))            # (N,dh,dw,ci,bi,bj)
            phases.append(t.reshape(n, 48, NPOS))
    p = jnp.stack(phases, axis=1)                               # (N,4,48,961)
    return jnp.pad(p, ((0, 0), (0, 0), (0, 0), (0, NPOS_PAD - NPOS)))


# ----------------------------------------------------------------------------
# classifier: fc1 (K-tiled, bf16) + ReLU + fc2 + ReLU + fc3
# ----------------------------------------------------------------------------
def _classifier_kernel(x_ref, w1_ref, b1_ref, w2_ref, b2_ref, w3_ref, b3_ref,
                       o_ref, acc_ref):
    k = pl.program_id(0)

    @pl.when(k == 0)
    def _():
        acc_ref[...] = jnp.zeros_like(acc_ref)

    # x and w1 are both bf16; accumulate in f32.
    acc_ref[...] += jnp.dot(x_ref[...], w1_ref[...],
                            preferred_element_type=jnp.float32)

    @pl.when(k == pl.num_programs(0) - 1)
    def _():
        h1 = jnp.maximum(acc_ref[...] + b1_ref[...], 0.0)                # fc1+ReLU
        h2 = jnp.dot(h1, w2_ref[...], preferred_element_type=jnp.float32)
        h2 = jnp.maximum(h2 + b2_ref[...], 0.0)                          # fc2+ReLU
        o_ref[...] = (jnp.dot(h2, w3_ref[...],
                              preferred_element_type=jnp.float32)
                      + b3_ref[...])                                     # fc3


def _fc1_split_kernel(x_ref, w1_ref, o_ref):
    # Per-core fc1 partial: each core streams its half of the K range into its
    # own resident output slice.  K axis is "arbitrary"; core axis "parallel".
    @pl.when(pl.program_id(1) == 0)
    def _():
        o_ref[...] = jnp.zeros_like(o_ref)
    o_ref[...] += jnp.dot(x_ref[...], w1_ref[...],
                          preferred_element_type=jnp.float32)


def _classifier_split(x, w1, b1, w2, b2, w3, b3, tk, cost):
    # v7x path: split the HBM-bound fc1 weight stream across the 2 TensorCores.
    m, k_dim = x.shape
    h1d = w1.shape[1]
    steps = k_dim // tk
    spc = steps // 2                      # K steps per core
    partials = pl.pallas_call(
        _fc1_split_kernel,
        out_shape=jax.ShapeDtypeStruct((2, m, h1d), jnp.float32),
        grid_spec=pltpu.PrefetchScalarGridSpec(
            num_scalar_prefetch=0,
            grid=(2, spc),
            in_specs=[
                pl.BlockSpec((m, tk), lambda c, kk: (0, c * spc + kk)),
                pl.BlockSpec((tk, h1d), lambda c, kk: (c * spc + kk, 0)),
            ],
            out_specs=pl.BlockSpec((None, m, h1d), lambda c, kk: (c, 0, 0)),
        ),
        compiler_params=pltpu.CompilerParams(
            dimension_semantics=("parallel", "arbitrary"),
            vmem_limit_bytes=VMEM_LIMIT),
        cost_estimate=cost,
    )(x, w1)
    # Cross-core add + fc2/fc3 epilogue: microscopic, done in XLA.
    h1 = jnp.maximum(partials[0] + partials[1] + b1, 0.0)
    h2 = jnp.maximum(h1 @ w2 + b2, 0.0)
    return h2 @ w3 + b3


def classifier(x, w1, b1, w2, b2, w3, b3, *, tk=TK_FC1, split_cores=None):
    # x: (M, K) bf16; w1: (K, 128) bf16; w2: (128, 64) f32; w3: (64, ncls) f32.
    m0, k_dim = x.shape
    assert k_dim % tk == 0, (k_dim, tk)
    steps = k_dim // tk
    h1d, h2d, ncls = w1.shape[1], w2.shape[1], w3.shape[1]

    # Pad M (batch) to a sublane multiple.
    m = max(8, -(-m0 // 8) * 8)
    if m != m0:
        x = jnp.pad(x, ((0, m - m0), (0, 0)))

    cost = pl.CostEstimate(
        flops=2 * m * (k_dim * h1d + h1d * h2d + h2d * ncls),
        transcendentals=0,
        bytes_accessed=int(k_dim * h1d * 2 + m * k_dim * 2
                           + (h1d * h2d + h2d * ncls + h1d + h2d + ncls) * 4
                           + m * ncls * 4),
    )

    if split_cores is None:
        split_cores = _use_v7x_split()

    if split_cores and steps % 2 == 0:
        out = _classifier_split(x, w1, b1, w2, b2, w3, b3, tk, cost)
    else:
        out = pl.pallas_call(
            _classifier_kernel,
            out_shape=jax.ShapeDtypeStruct((m, ncls), jnp.float32),
            grid_spec=pltpu.PrefetchScalarGridSpec(
                num_scalar_prefetch=0,
                grid=(steps,),
                in_specs=[
                    pl.BlockSpec((m, tk), lambda kk: (0, kk)),
                    pl.BlockSpec((tk, h1d), lambda kk: (kk, 0)),
                    pl.BlockSpec((1, h1d), lambda kk: (0, 0)),
                    pl.BlockSpec((h1d, h2d), lambda kk: (0, 0)),
                    pl.BlockSpec((1, h2d), lambda kk: (0, 0)),
                    pl.BlockSpec((h2d, ncls), lambda kk: (0, 0)),
                    pl.BlockSpec((1, ncls), lambda kk: (0, 0)),
                ],
                out_specs=pl.BlockSpec((m, ncls), lambda kk: (0, 0)),
                scratch_shapes=[pltpu.VMEM((m, h1d), jnp.float32)],
            ),
            compiler_params=pltpu.CompilerParams(
                dimension_semantics=("arbitrary",),
                vmem_limit_bytes=VMEM_LIMIT),
            cost_estimate=cost,
        )(x, w1, b1, w2, b2, w3, b3)
    return out[:m0]


# ----------------------------------------------------------------------------
# full VGG forward
# ----------------------------------------------------------------------------
def vgg_forward(x, params):
    patches = build_patches(x)                                   # (N,4,48,968)
    feat = conv_relu_pool(patches, params["conv_w4t"], params["conv_b4"])
    feat = feat.reshape(x.shape[0], -1)                          # (N, 61952) bf16
    # TODO(synk): Dropout(p=0.5) implemented as eval-mode identity (no RNG drop).
    return classifier(feat, params["fc1_w"], params["fc1_b"],
                      params["fc2_w"], params["fc2_b"],
                      params["fc3_w"], params["fc3_b"])


# ----------------------------------------------------------------------------
# one-time parameter preparation (torch layouts -> kernel layouts)
# ----------------------------------------------------------------------------
def prepare_params(tp):
    conv_w = np.asarray(tp["conv_w"], np.float32)                # (16,3,3,3) OIHW
    conv_b = np.asarray(tp["conv_b"], np.float32)                # (16,)

    # (64, 48): rows = (rr,pp) pool tap x 16 channels, cols = 4x4x3 window taps.
    w4 = np.zeros((4, 4, 3, 2, 2, 16), np.float32)
    wt = conv_w.transpose(2, 3, 1, 0)                            # (kh,kw,ci,co)
    for rr in range(2):
        for pp in range(2):
            w4[rr:rr + 3, pp:pp + 3, :, rr, pp, :] = wt
    w4t = np.ascontiguousarray(w4.reshape(48, 64).T)             # (64, 48)
    b4 = np.tile(conv_b, 4).reshape(64, 1)

    # fc1: permute rows from torch's CHW-flatten order into the conv kernel's
    # (phase, channel, position) order, zero the padded-position rows, bf16.
    w1 = np.asarray(tp["fc1_w"], np.float32).T                   # (61504, 128)
    ph, cc, mm = np.meshgrid(np.arange(4), np.arange(COUT), np.arange(NPOS_PAD),
                             indexing="ij")
    bi, bj = mm // 31, mm % 31
    ii = 2 * bi + ph // 2
    jj = 2 * bj + ph % 2
    valid = mm < NPOS
    g = np.where(valid, cc * (PH * PH) + ii * PH + jj, 0).reshape(-1)
    w1p = w1[g] * valid.reshape(-1, 1).astype(np.float32)        # (61952, 128)

    return {
        "conv_w4t": jnp.asarray(w4t),
        "conv_b4": jnp.asarray(b4),
        "fc1_w": jnp.asarray(w1p, dtype=jnp.bfloat16),
        "fc1_b": jnp.asarray(np.asarray(tp["fc1_b"], np.float32).reshape(1, -1)),
        "fc2_w": jnp.asarray(np.asarray(tp["fc2_w"], np.float32).T),
        "fc2_b": jnp.asarray(np.asarray(tp["fc2_b"], np.float32).reshape(1, -1)),
        "fc3_w": jnp.asarray(np.asarray(tp["fc3_w"], np.float32).T),
        "fc3_b": jnp.asarray(np.asarray(tp["fc3_b"], np.float32).reshape(1, -1)),
    }


# ----------------------------------------------------------------------------
# pure-JAX reference (torch semantics, f32) for a sanity check
# ----------------------------------------------------------------------------
def vgg_reference(x, tp):
    conv = lax.conv_general_dilated(
        x, tp["conv_w"], window_strides=(1, 1), padding=((1, 1), (1, 1)),
        dimension_numbers=("NCHW", "OIHW", "NCHW"))
    conv = conv + tp["conv_b"].reshape(1, COUT, 1, 1)
    act = jnp.maximum(conv, 0.0)
    pooled = lax.reduce_window(act, -jnp.inf, lax.max,
                               (1, 1, 2, 2), (1, 1, 2, 2), "VALID")
    h = pooled.reshape(x.shape[0], -1)                           # CHW flatten
    h = jnp.maximum(h @ tp["fc1_w"].T + tp["fc1_b"], 0.0)
    h = jnp.maximum(h @ tp["fc2_w"].T + tp["fc2_b"], 0.0)
    return h @ tp["fc3_w"].T + tp["fc3_b"]


def xavier_uniform(key, shape, fan_in, fan_out):
    bound = (6.0 / (fan_in + fan_out)) ** 0.5
    return jax.random.uniform(key, shape, jnp.float32, -bound, bound)


if __name__ == "__main__":
    key = jax.random.PRNGKey(0)
    k_x, k_cw, k_1, k_2, k_3 = jax.random.split(key, 5)

    N = 2
    num_classes = 2
    x = jax.random.normal(k_x, (N, CIN, H, W), jnp.float32)

    # Torch-layout parameters, initialized as in VGG._initialize_weights.
    torch_params = {
        "conv_w": xavier_uniform(k_cw, (COUT, CIN, 3, 3), CIN * 9, COUT * 9),
        "conv_b": jnp.zeros((COUT,), jnp.float32),
        "fc1_w": xavier_uniform(k_1, (128, PH * PH * COUT), PH * PH * COUT, 128),
        "fc1_b": jnp.zeros((128,), jnp.float32),
        "fc2_w": xavier_uniform(k_2, (64, 128), 128, 64),
        "fc2_b": jnp.zeros((64,), jnp.float32),
        "fc3_w": xavier_uniform(k_3, (num_classes, 64), 64, num_classes),
        "fc3_b": jnp.zeros((num_classes,), jnp.float32),
    }
    params = prepare_params(torch_params)

    out = jax.jit(vgg_forward)(x, params)
    jax.block_until_ready(out)
    assert out.shape == (N, num_classes)

    # Loose tolerance: conv output and fc1 weights/activations go through bf16.
    ref = vgg_reference(x, torch_params)
    err = float(jnp.max(jnp.abs(out - ref)))
    assert err < 0.2, f"max abs err vs reference: {err}"

    print("KERNEL_OK")
</pallas_src>

<mosaic_0001>
module attributes {stable_mosaic.version = 11 : i64} {
  func.func @_conv_pool_kernel(%arg0: i32, %arg1: memref<1x4x48x968xf32, #tpu.memory_space<vmem>>, %arg2: memref<64x48xf32, #tpu.memory_space<vmem>>, %arg3: memref<64x1xf32, #tpu.memory_space<vmem>>, %arg4: memref<1x4x16x968xbf16, #tpu.memory_space<vmem>>) attributes {dimension_semantics = [#tpu.dimension_semantics<parallel>], iteration_bounds = array<i64: 2>, scalar_prefetch = 0 : i64, scratch_operands = 0 : i64, tpu.core_type = #tpu.core_type<tc>, window_params = [{transform_indices = @transform_0, window_bounds = array<i64: 1, 4, 48, 968>}, {pipeline_mode = #tpu.pipeline_mode<synchronous>, transform_indices = @transform_1, window_bounds = array<i64: 64, 48>}, {pipeline_mode = #tpu.pipeline_mode<synchronous>, transform_indices = @transform_2, window_bounds = array<i64: 64, 1>}, {transform_indices = @transform_3, window_bounds = array<i64: 1, 4, 16, 968>}]} {
    %c0 = arith.constant 0 : index
    %c0_0 = arith.constant 0 : index
    %0 = vector.load %arg2[%c0, %c0_0] : memref<64x48xf32, #tpu.memory_space<vmem>>, vector<64x48xf32>
    %c0_1 = arith.constant 0 : index
    %c0_2 = arith.constant 0 : index
    %c0_3 = arith.constant 0 : index
    %c0_4 = arith.constant 0 : index
    %1 = vector.load %arg1[%c0_1, %c0_2, %c0_3, %c0_4] : memref<1x4x48x968xf32, #tpu.memory_space<vmem>>, vector<1x1x48x968xf32>
    %2 = vector.shape_cast %1 : vector<1x1x48x968xf32> to vector<48x968xf32>
    %cst = arith.constant dense<0.000000e+00> : vector<64x968xf32>
    %3 = tpu.matmul %0, %2, %cst {dimension_numbers = #tpu.dot_dimension_numbers<[1], [0], [0], [1], [0, 0, 1, 1], [], []>} : vector<64x48xf32>, vector<48x968xf32>, vector<64x968xf32> -> vector<64x968xf32>
    %c0_5 = arith.constant 0 : index
    %c0_6 = arith.constant 0 : index
    %4 = vector.load %arg3[%c0_5, %c0_6] : memref<64x1xf32, #tpu.memory_space<vmem>>, vector<64x1xf32>
    %5 = vector.broadcast %4 : vector<64x1xf32> to vector<64x968xf32>
    %6 = arith.addf %3, %5 : vector<64x968xf32>
    %cst_7 = arith.constant 0.000000e+00 : f32
    %7 = vector.broadcast %cst_7 : f32 to vector<64x968xf32>
    %8 = arith.maximumf %6, %7 : vector<64x968xf32>
    %9 = vector.extract_strided_slice %8 {offsets = [0, 0], sizes = [16, 968], strides = [1, 1]} : vector<64x968xf32> to vector<16x968xf32>
    %10 = vector.extract_strided_slice %8 {offsets = [16, 0], sizes = [16, 968], strides = [1, 1]} : vector<64x968xf32> to vector<16x968xf32>
    %11 = arith.maximumf %9, %10 : vector<16x968xf32>
    %12 = vector.extract_strided_slice %8 {offsets = [32, 0], sizes = [16, 968], strides = [1, 1]} : vector<64x968xf32> to vector<16x968xf32>
    %13 = vector.extract_strided_slice %8 {offsets = [48, 0], sizes = [16, 968], strides = [1, 1]} : vector<64x968xf32> to vector<16x968xf32>
    %14 = arith.maximumf %12, %13 : vector<16x968xf32>
    %15 = arith.maximumf %11, %14 : vector<16x968xf32>
    %16 = arith.truncf %15 : vector<16x968xf32> to vector<16x968xbf16>
    %c0_8 = arith.constant 0 : index
    %c0_9 = arith.constant 0 : index
    %c0_10 = arith.constant 0 : index
    %c0_11 = arith.constant 0 : index
    %17 = vector.load %arg4[%c0_8, %c0_9, %c0_10, %c0_11] : memref<1x4x16x968xbf16, #tpu.memory_space<vmem>>, vector<1x1x16x968xbf16>
    %18 = vector.shape_cast %17 : vector<1x1x16x968xbf16> to vector<16x968xbf16>
    %19 = vector.shape_cast %16 : vector<16x968xbf16> to vector<1x1x16x968xbf16>
    tpu.vector_store %arg4[%c0_8, %c0_9, %c0_10, %c0_11], %19 {strides = array<i32>} : memref<1x4x16x968xbf16, #tpu.memory_space<vmem>>, vector<1x1x16x968xbf16>,
    %c0_12 = arith.constant 0 : index
    %c0_13 = arith.constant 0 : index
    %20 = vector.load %arg2[%c0_12, %c0_13] : memref<64x48xf32, #tpu.memory_space<vmem>>, vector<64x48xf32>
    %c0_14 = arith.constant 0 : index
    %c1 = arith.constant 1 : index
    %c0_15 = arith.constant 0 : index
    %c0_16 = arith.constant 0 : index
    %21 = vector.load %arg1[%c0_14, %c1, %c0_15, %c0_16] : memref<1x4x48x968xf32, #tpu.memory_space<vmem>>, vector<1x1x48x968xf32>
    %22 = vector.shape_cast %21 : vector<1x1x48x968xf32> to vector<48x968xf32>
    %cst_17 = arith.constant dense<0.000000e+00> : vector<64x968xf32>
    %23 = tpu.matmul %20, %22, %cst_17 {dimension_numbers = #tpu.dot_dimension_numbers<[1], [0], [0], [1], [0, 0, 1, 1], [], []>} : vector<64x48xf32>, vector<48x968xf32>, vector<64x968xf32> -> vector<64x968xf32>
    %c0_18 = arith.constant 0 : index
    %c0_19 = arith.constant 0 : index
    %24 = vector.load %arg3[%c0_18, %c0_19] : memref<64x1xf32, #tpu.memory_space<vmem>>, vector<64x1xf32>
    %25 = vector.broadcast %24 : vector<64x1xf32> to vector<64x968xf32>
    %26 = arith.addf %23, %25 : vector<64x968xf32>
    %cst_20 = arith.constant 0.000000e+00 : f32
    %27 = vector.broadcast %cst_20 : f32 to vector<64x968xf32>
    %28 = arith.maximumf %26, %27 : vector<64x968xf32>
    %29 = vector.extract_strided_slice %28 {offsets = [0, 0], sizes = [16, 968], strides = [1, 1]} : vector<64x968xf32> to vector<16x968xf32>
    %30 = vector.extract_strided_slice %28 {offsets = [16, 0], sizes = [16, 968], strides = [1, 1]} : vector<64x968xf32> to vector<16x968xf32>
    %31 = arith.maximumf %29, %30 : vector<16x968xf32>
    %32 = vector.extract_strided_slice %28 {offsets = [32, 0], sizes = [16, 968], strides = [1, 1]} : vector<64x968xf32> to vector<16x968xf32>
    %33 = vector.extract_strided_slice %28 {offsets = [48, 0], sizes = [16, 968], strides = [1, 1]} : vector<64x968xf32> to vector<16x968xf32>
    %34 = arith.maximumf %32, %33 : vector<16x968xf32>
    %35 = arith.maximumf %31, %34 : vector<16x968xf32>
    %36 = arith.truncf %35 : vector<16x968xf32> to vector<16x968xbf16>
    %c0_21 = arith.constant 0 : index
    %c1_22 = arith.constant 1 : index
    %c0_23 = arith.constant 0 : index
    %c0_24 = arith.constant 0 : index
    %37 = vector.load %arg4[%c0_21, %c1_22, %c0_23, %c0_24] : memref<1x4x16x968xbf16, #tpu.memory_space<vmem>>, vector<1x1x16x968xbf16>
    %38 = vector.shape_cast %37 : vector<1x1x16x968xbf16> to vector<16x968xbf16>
    %39 = vector.shape_cast %36 : vector<16x968xbf16> to vector<1x1x16x968xbf16>
    tpu.vector_store %arg4[%c0_21, %c1_22, %c0_23, %c0_24], %39 {strides = array<i32>} : memref<1x4x16x968xbf16, #tpu.memory_space<vmem>>, vector<1x1x16x968xbf16>,
    %c0_25 = arith.constant 0 : index
    %c0_26 = arith.constant 0 : index
    %40 = vector.load %arg2[%c0_25, %c0_26] : memref<64x48xf32, #tpu.memory_space<vmem>>, vector<64x48xf32>
    %c0_27 = arith.constant 0 : index
    %c2 = arith.constant 2 : index
    %c0_28 = arith.constant 0 : index
    %c0_29 = arith.constant 0 : index
    %41 = vector.load %arg1[%c0_27, %c2, %c0_28, %c0_29] : memref<1x4x48x968xf32, #tpu.memory_space<vmem>>, vector<1x1x48x968xf32>
    %42 = vector.shape_cast %41 : vector<1x1x48x968xf32> to vector<48x968xf32>
    %cst_30 = arith.constant dense<0.000000e+00> : vector<64x968xf32>
    %43 = tpu.matmul %40, %42, %cst_30 {dimension_numbers = #tpu.dot_dimension_numbers<[1], [0], [0], [1], [0, 0, 1, 1], [], []>} : vector<64x48xf32>, vector<48x968xf32>, vector<64x968xf32> -> vector<64x968xf32>
    %c0_31 = arith.constant 0 : index
    %c0_32 = arith.constant 0 : index
    %44 = vector.load %arg3[%c0_31, %c0_32] : memref<64x1xf32, #tpu.memory_space<vmem>>, vector<64x1xf32>
    %45 = vector.broadcast %44 : vector<64x1xf32> to vector<64x968xf32>
    %46 = arith.addf %43, %45 : vector<64x968xf32>
    %cst_33 = arith.constant 0.000000e+00 : f32
    %47 = vector.broadcast %cst_33 : f32 to vector<64x968xf32>
    %48 = arith.maximumf %46, %47 : vector<64x968xf32>
    %49 = vector.extract_strided_slice %48 {offsets = [0, 0], sizes = [16, 968], strides = [1, 1]} : vector<64x968xf32> to vector<16x968xf32>
    %50 = vector.extract_strided_slice %48 {offsets = [16, 0], sizes = [16, 968], strides = [1, 1]} : vector<64x968xf32> to vector<16x968xf32>
    %51 = arith.maximumf %49, %50 : vector<16x968xf32>
    %52 = vector.extract_strided_slice %48 {offsets = [32, 0], sizes = [16, 968], strides = [1, 1]} : vector<64x968xf32> to vector<16x968xf32>
    %53 = vector.extract_strided_slice %48 {offsets = [48, 0], sizes = [16, 968], strides = [1, 1]} : vector<64x968xf32> to vector<16x968xf32>
    %54 = arith.maximumf %52, %53 : vector<16x968xf32>
    %55 = arith.maximumf %51, %54 : vector<16x968xf32>
    %56 = arith.truncf %55 : vector<16x968xf32> to vector<16x968xbf16>
    %c0_34 = arith.constant 0 : index
    %c2_35 = arith.constant 2 : index
    %c0_36 = arith.constant 0 : index
    %c0_37 = arith.constant 0 : index
    %57 = vector.load %arg4[%c0_34, %c2_35, %c0_36, %c0_37] : memref<1x4x16x968xbf16, #tpu.memory_space<vmem>>, vector<1x1x16x968xbf16>
    %58 = vector.shape_cast %57 : vector<1x1x16x968xbf16> to vector<16x968xbf16>
    %59 = vector.shape_cast %56 : vector<16x968xbf16> to vector<1x1x16x968xbf16>
    tpu.vector_store %arg4[%c0_34, %c2_35, %c0_36, %c0_37], %59 {strides = array<i32>} : memref<1x4x16x968xbf16, #tpu.memory_space<vmem>>, vector<1x1x16x968xbf16>,
    %c0_38 = arith.constant 0 : index
    %c0_39 = arith.constant 0 : index
    %60 = vector.load %arg2[%c0_38, %c0_39] : memref<64x48xf32, #tpu.memory_space<vmem>>, vector<64x48xf32>
    %c0_40 = arith.constant 0 : index
    %c3 = arith.constant 3 : index
    %c0_41 = arith.constant 0 : index
    %c0_42 = arith.constant 0 : index
    %61 = vector.load %arg1[%c0_40, %c3, %c0_41, %c0_42] : memref<1x4x48x968xf32, #tpu.memory_space<vmem>>, vector<1x1x48x968xf32>
    %62 = vector.shape_cast %61 : vector<1x1x48x968xf32> to vector<48x968xf32>
    %cst_43 = arith.constant dense<0.000000e+00> : vector<64x968xf32>
    %63 = tpu.matmul %60, %62, %cst_43 {dimension_numbers = #tpu.dot_dimension_numbers<[1], [0], [0], [1], [0, 0, 1, 1], [], []>} : vector<64x48xf32>, vector<48x968xf32>, vector<64x968xf32> -> vector<64x968xf32>
    %c0_44 = arith.constant 0 : index
    %c0_45 = arith.constant 0 : index
    %64 = vector.load %arg3[%c0_44, %c0_45] : memref<64x1xf32, #tpu.memory_space<vmem>>, vector<64x1xf32>
    %65 = vector.broadcast %64 : vector<64x1xf32> to vector<64x968xf32>
    %66 = arith.addf %63, %65 : vector<64x968xf32>
    %cst_46 = arith.constant 0.000000e+00 : f32
    %67 = vector.broadcast %cst_46 : f32 to vector<64x968xf32>
    %68 = arith.maximumf %66, %67 : vector<64x968xf32>
    %69 = vector.extract_strided_slice %68 {offsets = [0, 0], sizes = [16, 968], strides = [1, 1]} : vector<64x968xf32> to vector<16x968xf32>
    %70 = vector.extract_strided_slice %68 {offsets = [16, 0], sizes = [16, 968], strides = [1, 1]} : vector<64x968xf32> to vector<16x968xf32>
    %71 = arith.maximumf %69, %70 : vector<16x968xf32>
    %72 = vector.extract_strided_slice %68 {offsets = [32, 0], sizes = [16, 968], strides = [1, 1]} : vector<64x968xf32> to vector<16x968xf32>
    %73 = vector.extract_strided_slice %68 {offsets = [48, 0], sizes = [16, 968], strides = [1, 1]} : vector<64x968xf32> to vector<16x968xf32>
    %74 = arith.maximumf %72, %73 : vector<16x968xf32>
    %75 = arith.maximumf %71, %74 : vector<16x968xf32>
    %76 = arith.truncf %75 : vector<16x968xf32> to vector<16x968xbf16>
    %c0_47 = arith.constant 0 : index
    %c3_48 = arith.constant 3 : index
    %c0_49 = arith.constant 0 : index
    %c0_50 = arith.constant 0 : index
    %77 = vector.load %arg4[%c0_47, %c3_48, %c0_49, %c0_50] : memref<1x4x16x968xbf16, #tpu.memory_space<vmem>>, vector<1x1x16x968xbf16>
    %78 = vector.shape_cast %77 : vector<1x1x16x968xbf16> to vector<16x968xbf16>
    %79 = vector.shape_cast %76 : vector<16x968xbf16> to vector<1x1x16x968xbf16>
    tpu.vector_store %arg4[%c0_47, %c3_48, %c0_49, %c0_50], %79 {strides = array<i32>} : memref<1x4x16x968xbf16, #tpu.memory_space<vmem>>, vector<1x1x16x968xbf16>,
    return
  }
  func.func @transform_0(%arg0: i32) -> (i32, i32, i32, i32) {
    %c0_i32 = arith.constant 0 : i32
    %c0_i32_0 = arith.constant 0 : i32
    %c0_i32_1 = arith.constant 0 : i32
    %c0_i32_2 = arith.constant 0 : i32
    return %arg0, %c0_i32, %c0_i32_0, %c0_i32_1 : i32, i32, i32, i32
  }
  func.func @transform_1(%arg0: i32) -> (i32, i32) {
    %c0_i32 = arith.constant 0 : i32
    %c0_i32_0 = arith.constant 0 : i32
    %c0_i32_1 = arith.constant 0 : i32
    return %c0_i32, %c0_i32_0 : i32, i32
  }
  func.func @transform_2(%arg0: i32) -> (i32, i32) {
    %c0_i32 = arith.constant 0 : i32
    %c0_i32_0 = arith.constant 0 : i32
    %c0_i32_1 = arith.constant 0 : i32
    return %c0_i32, %c0_i32_0 : i32, i32
  }
  func.func @transform_3(%arg0: i32) -> (i32, i32, i32, i32) {
    %c0_i32 = arith.constant 0 : i32
    %c0_i32_0 = arith.constant 0 : i32
    %c0_i32_1 = arith.constant 0 : i32
    %c0_i32_2 = arith.constant 0 : i32
    return %arg0, %c0_i32, %c0_i32_0, %c0_i32_1 : i32, i32, i32, i32
  }
}

module attributes {stable_mosaic.version = 11 : i64} {
  func.func @_classifier_kernel(%arg0: i32, %arg1: memref<8x30976xbf16, #tpu.memory_space<vmem>>, %arg2: memref<30976x128xbf16, #tpu.memory_space<vmem>>, %arg3: memref<1x128xf32, #tpu.memory_space<vmem>>, %arg4: memref<128x64xf32, #tpu.memory_space<vmem>>, %arg5: memref<1x64xf32, #tpu.memory_space<vmem>>, %arg6: memref<64x2xf32, #tpu.memory_space<vmem>>, %arg7: memref<1x2xf32, #tpu.memory_space<vmem>>, %arg8: memref<8x2xf32, #tpu.memory_space<vmem>>, %arg9: memref<8x128xf32, #tpu.memory_space<vmem>>) attributes {dimension_semantics = [#tpu.dimension_semantics<arbitrary>], iteration_bounds = array<i64: 2>, scalar_prefetch = 0 : i64, scratch_operands = 1 : i64, tpu.core_type = #tpu.core_type<tc>, window_params = [{transform_indices = @transform_0, window_bounds = array<i64: 8, 30976>}, {transform_indices = @transform_1, window_bounds = array<i64: 30976, 128>}, {pipeline_mode = #tpu.pipeline_mode<synchronous>, transform_indices = @transform_2, window_bounds = array<i64: 1, 128>}, {pipeline_mode = #tpu.pipeline_mode<synchronous>, transform_indices = @transform_3, window_bounds = array<i64: 128, 64>}, {pipeline_mode = #tpu.pipeline_mode<synchronous>, transform_indices = @transform_4, window_bounds = array<i64: 1, 64>}, {pipeline_mode = #tpu.pipeline_mode<synchronous>, transform_indices = @transform_5, window_bounds = array<i64: 64, 2>}, {pipeline_mode = #tpu.pipeline_mode<synchronous>, transform_indices = @transform_6, window_bounds = array<i64: 1, 2>}, {pipeline_mode = #tpu.pipeline_mode<synchronous>, transform_indices = @transform_7, window_bounds = array<i64: 8, 2>}]} {
    %c0_i32 = arith.constant 0 : i32
    %0 = arith.cmpi eq, %arg0, %c0_i32 : i32
    %1 = arith.extui %0 : i1 to i32
    %c0_i32_0 = arith.constant 0 : i32
    %2 = arith.cmpi ne, %1, %c0_i32_0 : i32
    scf.if %2 {
      %cst_9 = arith.constant 0.000000e+00 : f32
      %12 = vector.broadcast %cst_9 : f32 to vector<8x128xf32>
      %c0_10 = arith.constant 0 : index
      %c0_11 = arith.constant 0 : index
      %13 = vector.load %arg9[%c0_10, %c0_11] : memref<8x128xf32, #tpu.memory_space<vmem>>, vector<8x128xf32>
      tpu.vector_store %arg9[%c0_10, %c0_11], %12 {strides = array<i32>} : memref<8x128xf32, #tpu.memory_space<vmem>>, vector<8x128xf32>,
    } else {
    }
    %c0 = arith.constant 0 : index
    %c0_1 = arith.constant 0 : index
    %3 = vector.load %arg9[%c0, %c0_1] : memref<8x128xf32, #tpu.memory_space<vmem>>, vector<8x128xf32>
    %c0_2 = arith.constant 0 : index
    %c0_3 = arith.constant 0 : index
    %4 = vector.load %arg1[%c0_2, %c0_3] : memref<8x30976xbf16, #tpu.memory_space<vmem>>, vector<8x30976xbf16>
    %c0_4 = arith.constant 0 : index
    %c0_5 = arith.constant 0 : index
    %5 = vector.load %arg2[%c0_4, %c0_5] : memref<30976x128xbf16, #tpu.memory_space<vmem>>, vector<30976x128xbf16>
    %cst = arith.constant dense<0.000000e+00> : vector<8x128xf32>
    %6 = tpu.matmul %4, %5, %cst {dimension_numbers = #tpu.dot_dimension_numbers<[1], [0], [0], [1], [0, 0, 1, 1], [], []>} : vector<8x30976xbf16>, vector<30976x128xbf16>, vector<8x128xf32> -> vector<8x128xf32>
    %7 = arith.addf %3, %6 : vector<8x128xf32>
    %c0_6 = arith.constant 0 : index
    %c0_7 = arith.constant 0 : index
    %8 = vector.load %arg9[%c0_6, %c0_7] : memref<8x128xf32, #tpu.memory_space<vmem>>, vector<8x128xf32>
    tpu.vector_store %arg9[%c0_6, %c0_7], %7 {strides = array<i32>} : memref<8x128xf32, #tpu.memory_space<vmem>>, vector<8x128xf32>,
    %c1_i32 = arith.constant 1 : i32
    %9 = arith.cmpi eq, %arg0, %c1_i32 : i32
    %10 = arith.extui %9 : i1 to i32
    %c0_i32_8 = arith.constant 0 : i32
    %11 = arith.cmpi ne, %10, %c0_i32_8 : i32
    scf.if %11 {
      %c0_9 = arith.constant 0 : index
      %c0_10 = arith.constant 0 : index
      %12 = vector.load %arg9[%c0_9, %c0_10] : memref<8x128xf32, #tpu.memory_space<vmem>>, vector<8x128xf32>
      %c0_11 = arith.constant 0 : index
      %c0_12 = arith.constant 0 : index
      %13 = vector.load %arg3[%c0_11, %c0_12] : memref<1x128xf32, #tpu.memory_space<vmem>>, vector<1x128xf32>
      %14 = vector.broadcast %13 : vector<1x128xf32> to vector<8x128xf32>
      %15 = arith.addf %12, %14 : vector<8x128xf32>
      %cst_13 = arith.constant 0.000000e+00 : f32
      %16 = vector.broadcast %cst_13 : f32 to vector<8x128xf32>
      %17 = arith.maximumf %15, %16 : vector<8x128xf32>
      %c0_14 = arith.constant 0 : index
      %c0_15 = arith.constant 0 : index
      %18 = vector.load %arg4[%c0_14, %c0_15] : memref<128x64xf32, #tpu.memory_space<vmem>>, vector<128x64xf32>
      %cst_16 = arith.constant dense<0.000000e+00> : vector<8x64xf32>
      %19 = tpu.matmul %17, %18, %cst_16 {dimension_numbers = #tpu.dot_dimension_numbers<[1], [0], [0], [1], [0, 0, 1, 1], [], []>} : vector<8x128xf32>, vector<128x64xf32>, vector<8x64xf32> -> vector<8x64xf32>
      %c0_17 = arith.constant 0 : index
      %c0_18 = arith.constant 0 : index
      %20 = vector.load %arg5[%c0_17, %c0_18] : memref<1x64xf32, #tpu.memory_space<vmem>>, vector<1x64xf32>
      %21 = vector.broadcast %20 : vector<1x64xf32> to vector<8x64xf32>
      %22 = arith.addf %19, %21 : vector<8x64xf32>
      %cst_19 = arith.constant 0.000000e+00 : f32
      %23 = vector.broadcast %cst_19 : f32 to vector<8x64xf32>
      %24 = arith.maximumf %22, %23 : vector<8x64xf32>
      %c0_20 = arith.constant 0 : index
      %c0_21 = arith.constant 0 : index
      %25 = vector.load %arg6[%c0_20, %c0_21] : memref<64x2xf32, #tpu.memory_space<vmem>>, vector<64x2xf32>
      %cst_22 = arith.constant dense<0.000000e+00> : vector<8x2xf32>
      %26 = tpu.matmul %24, %25, %cst_22 {dimension_numbers = #tpu.dot_dimension_numbers<[1], [0], [0], [1], [0, 0, 1, 1], [], []>} : vector<8x64xf32>, vector<64x2xf32>, vector<8x2xf32> -> vector<8x2xf32>
      %c0_23 = arith.constant 0 : index
      %c0_24 = arith.constant 0 : index
      %27 = vector.load %arg7[%c0_23, %c0_24] : memref<1x2xf32, #tpu.memory_space<vmem>>, vector<1x2xf32>
      %28 = vector.broadcast %27 : vector<1x2xf32> to vector<8x2xf32>
      %29 = arith.addf %26, %28 : vector<8x2xf32>
      %c0_25 = arith.constant 0 : index
      %c0_26 = arith.constant 0 : index
      %30 = vector.load %arg8[%c0_25, %c0_26] : memref<8x2xf32, #tpu.memory_space<vmem>>, vector<8x2xf32>
      tpu.vector_store %arg8[%c0_25, %c0_26], %29 {strides = array<i32>} : memref<8x2xf32, #tpu.memory_space<vmem>>, vector<8x2xf32>,
    } else {
    }
    return
  }
  func.func @transform_0(%arg0: i32) -> (i32, i32) {
    %c0_i32 = arith.constant 0 : i32
    %c0_i32_0 = arith.constant 0 : i32
    return %c0_i32, %arg0 : i32, i32
  }
  func.func @transform_1(%arg0: i32) -> (i32, i32) {
    %c0_i32 = arith.constant 0 : i32
    %c0_i32_0 = arith.constant 0 : i32
    return %arg0, %c0_i32 : i32, i32
  }
  func.func @transform_2(%arg0: i32) -> (i32, i32) {
    %c0_i32 = arith.constant 0 : i32
    %c0_i32_0 = arith.constant 0 : i32
    %c0_i32_1 = arith.constant 0 : i32
    return %c0_i32, %c0_i32_0 : i32, i32
  }
  func.func @transform_3(%arg0: i32) -> (i32, i32) {
    %c0_i32 = arith.constant 0 : i32
    %c0_i32_0 = arith.constant 0 : i32
    %c0_i32_1 = arith.constant 0 : i32
    return %c0_i32, %c0_i32_0 : i32, i32
  }
  func.func @transform_4(%arg0: i32) -> (i32, i32) {
    %c0_i32 = arith.constant 0 : i32
    %c0_i32_0 = arith.constant 0 : i32
    %c0_i32_1 = arith.constant 0 : i32
    return %c0_i32, %c0_i32_0 : i32, i32
  }
  func.func @transform_5(%arg0: i32) -> (i32, i32) {
    %c0_i32 = arith.constant 0 : i32
    %c0_i32_0 = arith.constant 0 : i32
    %c0_i32_1 = arith.constant 0 : i32
    return %c0_i32, %c0_i32_0 : i32, i32
  }
  func.func @transform_6(%arg0: i32) -> (i32, i32) {
    %c0_i32 = arith.constant 0 : i32
    %c0_i32_0 = arith.constant 0 : i32
    %c0_i32_1 = arith.constant 0 : i32
    return %c0_i32, %c0_i32_0 : i32, i32
  }
  func.func @transform_7(%arg0: i32) -> (i32, i32) {
    %c0_i32 = arith.constant 0 : i32
    %c0_i32_0 = arith.constant 0 : i32
    %c0_i32_1 = arith.constant 0 : i32
    return %c0_i32, %c0_i32_0 : i32, i32
  }
}

</mosaic_0001>

<bundles_post_ra>
// kernel: vgg_forward.2
= control target key start
LH: loop header
LB: loop body
LE: loop exit
PB: predicated region body
PF: predicated region fallthrough
CT: control target
= control target key end

     0   :  { %s3057_s12 = smov 0   ;;  %s4759_s0 = inlined_call_operand.vmem [shape: f32[2,4,48,968], index: 0, kind: input, shape index: {}]   ;;  %s4760_s1 = inlined_call_operand.vmem [shape: f32[64,48], index: 1, kind: input, shape index: {}]   ;;  %s4761_s2 = inlined_call_operand.vmem [shape: f32[64,1], index: 2, kind: input, shape index: {}]   ;;  %s4762_s3 = inlined_call_operand.vmem [shape: bf16[2,4,16,968], index: 3, kind: output, shape index: {}]  }
   0x1 LB: > { %s2572_s13 = sadd.s32 4294967295, %s3034_s12   ;;  %p2576_p0 = scmp.ge.s32.totalorder %s3034_s12, 1  ;;  %s3034_s12 = sphi %s3057_s12, %s13_s12  }
   0x2   : > { %p137_p1 = scmp.lt.s32.totalorder %s3034_s12, 3 }
   0x4   : > { %p138_p2 = pnand %p2576_p0, %p137_p1 }
   0x5   : > { %p161_p3 = scmp.lt.s32.totalorder (!%p138_p2), %s2572_s13, 1 }
   0x6   : > { %141 = sbr.rel (%p138_p2) target bundleno = 676 (0x2a4), region = 32 }
   0xb   : > { %v3036_v0 = vmov 0   ;;  %s4766_s13 = smov (!%p161_p3, %s2572_s13), 1  ;;  %v3071_v1 = vld [vmem:[%s4761_s2] sm:$0xff]  ;;  %vm275_vm0 = vcmask 392192   ;;  %v3129_v37 = vld [vmem:[%s4761_s2 + $0x8] sm:$0xff]  ;;  %v3134_v38 = vld [vmem:[%s4761_s2 + $0x10] sm:$0xff] }
   0xc   : > { %3017 = vset.pattern.permute.xlu0 %v3036_v0  ;;  %3018 = vset.pattern.permute.xlu1 %v3036_v0  ;;  %s3007_s14 = smul.u32 1536, %s4766_s13  ;;  %v3106_v26 = vld [vmem:[%s4760_s1] sm:$0xff]  ;;  %v3139_v39 = vld [vmem:[%s4760_s1 + $0x8] sm:$0xff]  ;;  %v3162_v48 = vld [vmem:[%s4761_s2 + $0x18] sm:$0xff]  ;;  %s3006_s26 = sshll.u32 %s4766_s13, 8  ;;  %vm751_vm1 = vcmask 1043456  }
   0xd   : > { %3019 = vset.pattern.permute.xlu2 %v3036_v0  ;;  %237 = vperm.xlu0 %3017, %v3071_v1   ;;  %v3167_v49 = vld [vmem:[%s4760_s1 + $0x10] sm:$0xff]  ;;  %v3185_v54 = vld [vmem:[%s4760_s1 + $0x18] sm:$0xff]  ;;  %v3206_v58 = vld [vmem:[%s4760_s1 + $0x20] sm:$0xff]  ;;  %s3556_s28 = scalar_lea.vmem %s4762_s3, %s3006_s26  ;;  %vm752_vm2 = vcmask 588804  }
   0xe   : > { %s3076_s19 = scalar_lea.vmem %s4759_s0, %s3007_s14  ;;  %247 = vperm.xlu1 %3018, %v3134_v38   ;;  %v3198_v55 = vld [vmem:[%s4761_s2 + $0x30] sm:$0xff]  ;;  %v234_v61 = vld [vmem:[%s4761_s2 + $0x38] sm:$0xff]  ;;  %v3227_v0 = vld [vmem:[%s4760_s1 + $0x28] sm:$0xff] }
   0xf   : > { %v219_v2 = vld [vmem:[%s3076_s19 + $0x140] sm:$0xff]  ;;  %v220_v3 = vld [vmem:[%s3076_s19 + $0x148] sm:$0xff]  ;;  %v221_v4 = vld [vmem:[%s3076_s19 + $0x150] sm:$0xff] }
  0x10   : > { %310 = vmatpush.msra.mxu0 %v219_v2  ;;  %351 = vmatpush.msra.mxu1 %v220_v3  ;;  %v222_v5 = vld [vmem:[%s3076_s19 + $0x158] sm:$0xff]  ;;  %v211_v6 = vld [vmem:[%s3076_s19 + $0x100] sm:$0xff]  ;;  %v212_v7 = vld [vmem:[%s3076_s19 + $0x108] sm:$0xff] }
  0x11   : > { %392 = vmatpush.msra.mxu2 %v221_v4  ;;  %433 = vmatpush.msra.mxu3 %v222_v5  ;;  %v213_v8 = vld [vmem:[%s3076_s19 + $0x110] sm:$0xff]  ;;  %v214_v9 = vld [vmem:[%s3076_s19 + $0x118] sm:$0xff]  ;;  %v203_v10 = vld [vmem:[%s3076_s19 + $0xc0] sm:$0xff] }
  0x12   : > { %311 = vmatpush.msra.mxu0 %v211_v6  ;;  %352 = vmatpush.msra.mxu1 %v212_v7  ;;  %v204_v11 = vld [vmem:[%s3076_s19 + $0xc8] sm:$0xff]  ;;  %v205_v12 = vld [vmem:[%s3076_s19 + $0xd0] sm:$0xff]  ;;  %v206_v13 = vld [vmem:[%s3076_s19 + $0xd8] sm:$0xff] }
  0x13   : > { %393 = vmatpush.msra.mxu2 %v213_v8  ;;  %434 = vmatpush.msra.mxu3 %v214_v9  ;;  %v195_v14 = vld [vmem:[%s3076_s19 + $0x80] sm:$0xff]  ;;  %v196_v15 = vld [vmem:[%s3076_s19 + $0x88] sm:$0xff]  ;;  %v197_v16 = vld [vmem:[%s3076_s19 + $0x90] sm:$0xff] }
  0x14   : > { %312 = vmatpush.msra.mxu0 %v203_v10  ;;  %353 = vmatpush.msra.mxu1 %v204_v11  ;;  %v198_v17 = vld [vmem:[%s3076_s19 + $0x98] sm:$0xff]  ;;  %v187_v18 = vld [vmem:[%s3076_s19 + $0x40] sm:$0xff]  ;;  %v188_v19 = vld [vmem:[%s3076_s19 + $0x48] sm:$0xff] }
  0x15   : > { %394 = vmatpush.msra.mxu2 %v205_v12  ;;  %435 = vmatpush.msra.mxu3 %v206_v13  ;;  %v189_v20 = vld [vmem:[%s3076_s19 + $0x50] sm:$0xff]  ;;  %v190_v21 = vld [vmem:[%s3076_s19 + $0x58] sm:$0xff]  ;;  %v179_v22 = vld [vmem:[%s3076_s19] sm:$0xff] }
  0x16   : > { %313 = vmatpush.msra.mxu0 %v195_v14  ;;  %354 = vmatpush.msra.mxu1 %v196_v15  ;;  %v180_v23 = vld [vmem:[%s3076_s19 + $0x8] sm:$0xff]  ;;  %v181_v24 = vld [vmem:[%s3076_s19 + $0x10] sm:$0xff]  ;;  %v182_v25 = vld [vmem:[%s3076_s19 + $0x18] sm:$0xff] }
  0x17   : > { %395 = vmatpush.msra.mxu2 %v197_v16  ;;  %436 = vmatpush.msra.mxu3 %v198_v17  ;;  %v225_v27 = vld [vmem:[%s3076_s19 + $0x170] sm:$0xff]  ;;  %v226_v28 = vld [vmem:[%s3076_s19 + $0x178] sm:$0xff]  ;;  %v223_v29 = vld [vmem:[%s3076_s19 + $0x160] sm:$0xff] }
  0x18   : > { %314 = vmatpush.msra.mxu0 %v187_v18  ;;  %355 = vmatpush.msra.mxu1 %v188_v19  ;;  %v224_v30 = vld [vmem:[%s3076_s19 + $0x168] sm:$0xff]  ;;  %v217_v31 = vld [vmem:[%s3076_s19 + $0x130] sm:$0xff]  ;;  %v218_v32 = vld [vmem:[%s3076_s19 + $0x138] sm:$0xff] }
  0x19   : > { %396 = vmatpush.msra.mxu2 %v189_v20  ;;  %437 = vmatpush.msra.mxu3 %v190_v21  ;;  %v215_v33 = vld [vmem:[%s3076_s19 + $0x120] sm:$0xff]  ;;  %v216_v34 = vld [vmem:[%s3076_s19 + $0x128] sm:$0xff]  ;;  %v209_v35 = vld [vmem:[%s3076_s19 + $0xf0] sm:$0xff] }
  0x1a   : > { %315 = vmatpush.msra.mxu0 %v179_v22  ;;  %356 = vmatpush.msra.mxu1 %v180_v23  ;;  %v210_v36 = vld [vmem:[%s3076_s19 + $0xf8] sm:$0xff]  ;;  %v207_v40 = vld [vmem:[%s3076_s19 + $0xe0] sm:$0xff]  ;;  %v208_v41 = vld [vmem:[%s3076_s19 + $0xe8] sm:$0xff] }
  0x1b   : > { %397 = vmatpush.msra.mxu2 %v181_v24  ;;  %438 = vmatpush.msra.mxu3 %v182_v25  ;;  %v201_v42 = vld [vmem:[%s3076_s19 + $0xb0] sm:$0xff]  ;;  %v202_v43 = vld [vmem:[%s3076_s19 + $0xb8] sm:$0xff]  ;;  %v199_v44 = vld [vmem:[%s3076_s19 + $0xa0] sm:$0xff] }
  0x1c   : > { %2580 = vmatmul.msk.f32.vlgmr.msra.gmra.mxu0 %vm275_vm0, %v3106_v26  ;;  %2588 = vmatmul.msk.f32.vlgmr.msra.gmra.mxu1 %vm275_vm0, %v3106_v26  ;;  %v200_v45 = vld [vmem:[%s3076_s19 + $0xa8] sm:$0xff]  ;;  %v193_v46 = vld [vmem:[%s3076_s19 + $0x70] sm:$0xff]  ;;  %v194_v47 = vld [vmem:[%s3076_s19 + $0x78] sm:$0xff] }
  0x1d   : > { %2596 = vmatmul.msk.f32.vlgmr.msra.gmra.mxu2 %vm275_vm0, %v3106_v26  ;;  %2604 = vmatmul.msk.f32.vlgmr.msra.gmra.mxu3 %vm275_vm0, %v3106_v26  ;;  %v191_v50 = vld [vmem:[%s3076_s19 + $0x60] sm:$0xff]  ;;  %v192_v51 = vld [vmem:[%s3076_s19 + $0x68] sm:$0xff]  ;;  %v185_v52 = vld [vmem:[%s3076_s19 + $0x30] sm:$0xff] }
  0x1e   : > { %556 = vmatpush.msrb.mxu2 %v225_v27  ;;  %597 = vmatpush.msrb.mxu3 %v226_v28  ;;  %v186_v53 = vld [vmem:[%s3076_s19 + $0x38] sm:$0xff]  ;;  %v183_v56 = vld [vmem:[%s3076_s19 + $0x20] sm:$0xff]  ;;  %v184_v57 = vld [vmem:[%s3076_s19 + $0x28] sm:$0xff] }
  0x1f   : > { %474 = vmatpush.msrb.mxu0 %v223_v29  ;;  %515 = vmatpush.msrb.mxu1 %v224_v30  ;;  %v2686_v59 = vld [vmem:[%s3076_s19 + $0x2d0] sm:$0xff]  ;;  %v2687_v60 = vld [vmem:[%s3076_s19 + $0x2d8] sm:$0xff]  ;;  %v2684_v62 = vld [vmem:[%s3076_s19 + $0x2c0] sm:$0xff] }
  0x20   : > { %557 = vmatpush.msrb.mxu2 %v217_v31  ;;  %598 = vmatpush.msrb.mxu3 %v218_v32  ;;  %v2685_v63 = vld [vmem:[%s3076_s19 + $0x2c8] sm:$0xff]  ;;  %v231_v2 = vld [vmem:[%s4761_s2 + $0x20] sm:$0xff]  ;;  %v2678_v3 = vld [vmem:[%s3076_s19 + $0x290] sm:$0xff] }
  0x21   : > { %475 = vmatpush.msrb.mxu0 %v215_v33  ;;  %516 = vmatpush.msrb.mxu1 %v216_v34  ;;  %v2679_v4 = vld [vmem:[%s3076_s19 + $0x298] sm:$0xff]  ;;  %v3246_v5 = vld [vmem:[%s4760_s1 + $0x30] sm:$0xff]  ;;  %v232_v6 = vld [vmem:[%s4761_s2 + $0x28] sm:$0xff] }
  0x22   : > { %558 = vmatpush.msrb.mxu2 %v209_v35  ;;  %599 = vmatpush.msrb.mxu3 %v210_v36  ;;  %v2676_v7 = vld [vmem:[%s3076_s19 + $0x280] sm:$0xff]  ;;  %v2677_v8 = vld [vmem:[%s3076_s19 + $0x288] sm:$0xff]  ;;  %v2670_v9 = vld [vmem:[%s3076_s19 + $0x250] sm:$0xff] }
  0x23   : > { %242 = vperm.xlu0 %3017, %v3129_v37   ;;  %476 = vmatpush.msrb.mxu0 %v207_v40  ;;  %v2671_v10 = vld [vmem:[%s3076_s19 + $0x258] sm:$0xff]  ;;  %v2668_v12 = vld [vmem:[%s3076_s19 + $0x240] sm:$0xff]  ;;  %v2669_v13 = vld [vmem:[%s3076_s19 + $0x248] sm:$0xff] }
  0x24   : > { %2581 = vmatmul.msk.f32.gmra.mxu0 %vm275_vm0, %v3139_v39  ;;  %2589 = vmatmul.msk.f32.gmra.mxu1 %vm275_vm0, %v3139_v39  ;;  %v3266_v11 = vld [vmem:[%s4760_s1 + $0x38] sm:$0xff]  ;;  %v2662_v14 = vld [vmem:[%s3076_s19 + $0x210] sm:$0xff]  ;;  %v2660_v16 = vld [vmem:[%s3076_s19 + $0x200] sm:$0xff] }
  0x25   : > { %2597 = vmatmul.msk.f32.gmra.mxu2 %vm275_vm0, %v3139_v39  ;;  %2605 = vmatmul.msk.f32.gmra.mxu3 %vm275_vm0, %v3139_v39  ;;  %v2663_v15 = vld [vmem:[%s3076_s19 + $0x218] sm:$0xff]  ;;  %v2654_v17 = vld [vmem:[%s3076_s19 + $0x1d0] sm:$0xff]  ;;  %v2652_v19 = vld [vmem:[%s3076_s19 + $0x1c0] sm:$0xff] }
  0x26   : > { %517 = vmatpush.msrb.mxu1 %v208_v41  ;;  %559 = vmatpush.msrb.mxu2 %v201_v42  ;;  %v2655_v18 = vld [vmem:[%s3076_s19 + $0x1d8] sm:$0xff]  ;;  %v2653_v20 = vld [vmem:[%s3076_s19 + $0x1c8] sm:$0xff]  ;;  %v2646_v21 = vld [vmem:[%s3076_s19 + $0x190] sm:$0xff] }
  0x27   : > { %600 = vmatpush.msrb.mxu3 %v202_v43  ;;  %477 = vmatpush.msrb.mxu0 %v199_v44  ;;  %v2647_v22 = vld [vmem:[%s3076_s19 + $0x198] sm:$0xff]  ;;  %v2644_v23 = vld [vmem:[%s3076_s19 + $0x180] sm:$0xff]  ;;  %v2645_v24 = vld [vmem:[%s3076_s19 + $0x188] sm:$0xff] }
  0x28   : > { %518 = vmatpush.msrb.mxu1 %v200_v45  ;;  %560 = vmatpush.msrb.mxu2 %v193_v46  ;;  %v2690_v25 = vld [vmem:[%s3076_s19 + $0x2f0] sm:$0xff]  ;;  %v2691_v27 = vld [vmem:[%s3076_s19 + $0x2f8] sm:$0xff]  ;;  %v2688_v28 = vld [vmem:[%s3076_s19 + $0x2e0] sm:$0xff] }
  0x29   : > { %601 = vmatpush.msrb.mxu3 %v194_v47  ;;  %252 = vperm.xlu1 %3018, %v3162_v48   ;;  %v2689_v29 = vld [vmem:[%s3076_s19 + $0x2e8] sm:$0xff]  ;;  %v2682_v30 = vld [vmem:[%s3076_s19 + $0x2b0] sm:$0xff]  ;;  %v2683_v31 = vld [vmem:[%s3076_s19 + $0x2b8] sm:$0xff] }
  0x2a   : > { %478 = vmatpush.msrb.mxu0 %v191_v50  ;;  %519 = vmatpush.msrb.mxu1 %v192_v51  ;;  %v2680_v32 = vld [vmem:[%s3076_s19 + $0x2a0] sm:$0xff]  ;;  %v2681_v33 = vld [vmem:[%s3076_s19 + $0x2a8] sm:$0xff]  ;;  %v2674_v34 = vld [vmem:[%s3076_s19 + $0x270] sm:$0xff] }
  0x2b   : > { %561 = vmatpush.msrb.mxu2 %v185_v52  ;;  %602 = vmatpush.msrb.mxu3 %v186_v53  ;;  %v2675_v35 = vld [vmem:[%s3076_s19 + $0x278] sm:$0xff]  ;;  %v2673_v40 = vld [vmem:[%s3076_s19 + $0x268] sm:$0xff]  ;;  %v2666_v41 = vld [vmem:[%s3076_s19 + $0x230] sm:$0xff] }
  0x2c   : > { %2582 = vmatmul.msk.f32.gmra.mxu0 %vm275_vm0, %v3167_v49  ;;  %2590 = vmatmul.msk.f32.gmra.mxu1 %vm275_vm0, %v3167_v49  ;;  %v2667_v42 = vld [vmem:[%s3076_s19 + $0x238] sm:$0xff]  ;;  %v2664_v47 = vld [vmem:[%s3076_s19 + $0x220] sm:$0xff]  ;;  %vm3782_vm3 = vmor %vm752_vm2, %vm751_vm1 }
  0x2d   : > { %2598 = vmatmul.msk.f32.gmra.mxu2 %vm275_vm0, %v3167_v49  ;;  %2606 = vmatmul.msk.f32.gmra.mxu3 %vm275_vm0, %v3167_v49 }
  0x2e   : > { %267 = vperm.xlu0 %3017, %v3198_v55   ;;  %479 = vmatpush.msrb.mxu0 %v183_v56  ;;  %v2659_v56 = vld [vmem:[%s3076_s19 + $0x1f8] sm:$0xff] }
  0x2f   : > { %520 = vmatpush.msrb.mxu1 %v184_v57  ;;  %980 = vmatpush.msra.mxu2 %v2686_v59 }
  0x30   : > { %1021 = vmatpush.msra.mxu3 %v2687_v60  ;;  %898 = vmatpush.msra.mxu0 %v2684_v62  ;;  %v2656_v62 = vld [vmem:[%s3076_s19 + $0x1e0] sm:$0xff] }
  0x31   : > { %272 = vperm.xlu1 %3018, %v234_v61   ;;  %939 = vmatpush.msra.mxu1 %v2685_v63  ;;  %v2657_v63 = vld [vmem:[%s3076_s19 + $0x1e8] sm:$0xff] }
  0x32   : > { %257 = vperm.xlu2 %3019, %v231_v2   ;;  %981 = vmatpush.msra.mxu2 %v2678_v3 }
  0x33   : > { %1022 = vmatpush.msra.mxu3 %v2679_v4  ;;  %899 = vmatpush.msra.mxu0 %v2676_v7 }
  0x34   : > { %2583 = vmatmul.msk.f32.gmra.mxu0 %vm275_vm0, %v3185_v54  ;;  %2591 = vmatmul.msk.f32.gmra.mxu1 %vm275_vm0, %v3185_v54 }
  0x35   : > { %2599 = vmatmul.msk.f32.gmra.mxu2 %vm275_vm0, %v3185_v54  ;;  %2607 = vmatmul.msk.f32.gmra.mxu3 %vm275_vm0, %v3185_v54 }
  0x36   : > { %831 = vperm.xlu0 %3017, %v3129_v37   ;;  %940 = vmatpush.msra.mxu1 %v2677_v8  ;;  %v2650_v8 = vld [vmem:[%s3076_s19 + $0x1b0] sm:$0xff] }
  0x37   : > { %982 = vmatpush.msra.mxu2 %v2670_v9  ;;  %1023 = vmatpush.msra.mxu3 %v2671_v10  ;;  %v2651_v9 = vld [vmem:[%s3076_s19 + $0x1b8] sm:$0xff] }
  0x38   : > { %900 = vmatpush.msra.mxu0 %v2668_v12  ;;  %941 = vmatpush.msra.mxu1 %v2669_v13  ;;  %v2648_v12 = vld [vmem:[%s3076_s19 + $0x1a0] sm:$0xff]  ;;  %v2649_v13 = vld [vmem:[%s3076_s19 + $0x1a8] sm:$0xff] }
  0x39   : > { %836 = vperm.xlu1 %3018, %v3134_v38   ;;  %983 = vmatpush.msra.mxu2 %v2662_v14  ;;  %v2672_v38 = vld [vmem:[%s3076_s19 + $0x260] sm:$0xff] }
  0x3a   : > { %262 = vperm.xlu2 %3019, %v232_v6   ;;  %1024 = vmatpush.msra.mxu3 %v2663_v15 }
  0x3b   : > { %901 = vmatpush.msra.mxu0 %v2660_v16  ;;  %984 = vmatpush.msra.mxu2 %v2654_v17 }
  0x3c   : > { %2584 = vmatmul.msk.f32.gmra.mxu0 %vm275_vm0, %v3206_v58  ;;  %2592 = vmatmul.msk.f32.gmra.mxu1 %vm275_vm0, %v3206_v58 }
  0x3d   : > { %2600 = vmatmul.msk.f32.gmra.mxu2 %vm275_vm0, %v3206_v58  ;;  %2608 = vmatmul.msk.f32.gmra.mxu3 %vm275_vm0, %v3206_v58 }
  0x3e   : > { %846 = vperm.xlu0 %3017, %v231_v2   ;;  %1025 = vmatpush.msra.mxu3 %v2655_v18 }
  0x3f   : > { %902 = vmatpush.msra.mxu0 %v2652_v19  ;;  %985 = vmatpush.msra.mxu2 %v2646_v21  ;;  %v2807_v21 = vld [vmem:[%s3076_s19 + $0x458] sm:$0xff] }
  0x40   : > { %1026 = vmatpush.msra.mxu3 %v2647_v22 }
  0x41   : > { %851 = vperm.xlu1 %3018, %v232_v6   ;;  %903 = vmatpush.msra.mxu0 %v2644_v23  ;;  %v2804_v23 = vld [vmem:[%s3076_s19 + $0x440] sm:$0xff] }
  0x42   : > { %826 = vperm.xlu2 %3019, %v3071_v1   ;;  %v2661_v1 = vld [vmem:[%s3076_s19 + $0x208] sm:$0xff] }
  0x43   : > { %942 = vmatpush.msra.mxu1 %v2661_v1 }
  0x44   : > { %2585 = vmatmul.msk.f32.gmra.mxu0 %vm275_vm0, %v3227_v0  ;;  %2593 = vmatmul.msk.f32.gmra.mxu1 %vm275_vm0, %v3227_v0 }
  0x45   : > { %2601 = vmatmul.msk.f32.gmra.mxu2 %vm275_vm0, %v3227_v0  ;;  %2609 = vmatmul.msk.f32.gmra.mxu3 %vm275_vm0, %v3227_v0 }
  0x46   : > { %861 = vperm.xlu0 %3017, %v234_v61   ;;  %943 = vmatpush.msra.mxu1 %v2653_v20  ;;  %v2806_v20 = vld [vmem:[%s3076_s19 + $0x450] sm:$0xff] }
  0x48   : > { %944 = vmatpush.msra.mxu1 %v2645_v24  ;;  %v2805_v24 = vld [vmem:[%s3076_s19 + $0x448] sm:$0xff] }
  0x4a   : > { %841 = vperm.xlu2 %3019, %v3162_v48   ;;  %v2665_v48 = vld [vmem:[%s3076_s19 + $0x228] sm:$0xff] }
  0x4c   : > { %2586 = vmatmul.msk.f32.gmra.mxu0 %vm275_vm0, %v3246_v5  ;;  %2594 = vmatmul.msk.f32.gmra.mxu1 %vm275_vm0, %v3246_v5 }
  0x4d   : > { %2602 = vmatmul.msk.f32.gmra.mxu2 %vm275_vm0, %v3246_v5  ;;  %2610 = vmatmul.msk.f32.gmra.mxu3 %vm275_vm0, %v3246_v5 }
  0x52   : > { %856 = vperm.xlu2 %3019, %v3198_v55   ;;  %v2658_v55 = vld [vmem:[%s3076_s19 + $0x1f0] sm:$0xff] }
  0x54   : > { %2587 = vmatmul.msk.f32.gmra.mxu0 %vm275_vm0, %v3266_v11  ;;  %2595 = vmatmul.msk.f32.gmra.mxu1 %vm275_vm0, %v3266_v11 }
  0x55   : > { %2603 = vmatmul.msk.f32.gmra.mxu2 %vm275_vm0, %v3266_v11  ;;  %2611 = vmatmul.msk.f32.gmra.mxu3 %vm275_vm0, %v3266_v11 }
  0x5c   : > { %2612 = vmatmul.msk.f32.vlgmr.msrb.gmra.mxu0 %vm275_vm0, %v3106_v26  ;;  %2620 = vmatmul.msk.f32.vlgmr.msrb.gmra.mxu1 %vm275_vm0, %v3106_v26 }
  0x5d   : > { %2628 = vmatmul.msk.f32.vlgmr.msrb.gmra.mxu2 %vm275_vm0, %v3106_v26  ;;  %2636 = vmatmul.msk.f32.vlgmr.msrb.gmra.mxu3 %vm275_vm0, %v3106_v26 }
  0x5e   : > { %1144 = vmatpush.msrb.mxu2 %v2690_v25  ;;  %1185 = vmatpush.msrb.mxu3 %v2691_v27 }
  0x5f   : > { %1062 = vmatpush.msrb.mxu0 %v2688_v28  ;;  %1103 = vmatpush.msrb.mxu1 %v2689_v29 }
  0x60   : > { %1145 = vmatpush.msrb.mxu2 %v2682_v30  ;;  %1186 = vmatpush.msrb.mxu3 %v2683_v31 }
  0x61   : > { %1063 = vmatpush.msrb.mxu0 %v2680_v32  ;;  %1104 = vmatpush.msrb.mxu1 %v2681_v33 }
  0x62   : > { %1146 = vmatpush.msrb.mxu2 %v2674_v34  ;;  %1187 = vmatpush.msrb.mxu3 %v2675_v35 }
  0x63   : > { %1064 = vmatpush.msrb.mxu0 %v2672_v38  ;;  %1105 = vmatpush.msrb.mxu1 %v2673_v40 }
  0x64   : > { %2613 = vmatmul.msk.f32.gmra.mxu0 %vm275_vm0, %v3139_v39  ;;  %2621 = vmatmul.msk.f32.gmra.mxu1 %vm275_vm0, %v3139_v39 }
  0x65   : > { %2629 = vmatmul.msk.f32.gmra.mxu2 %vm275_vm0, %v3139_v39  ;;  %2637 = vmatmul.msk.f32.gmra.mxu3 %vm275_vm0, %v3139_v39 }
  0x66   : > { %1147 = vmatpush.msrb.mxu2 %v2666_v41  ;;  %1188 = vmatpush.msrb.mxu3 %v2667_v42 }
  0x67   : > { %1065 = vmatpush.msrb.mxu0 %v2664_v47  ;;  %1106 = vmatpush.msrb.mxu1 %v2665_v48 }
  0x68   : > { %1148 = vmatpush.msrb.mxu2 %v2658_v55  ;;  %1189 = vmatpush.msrb.mxu3 %v2659_v56 }
  0x69   : > { %1066 = vmatpush.msrb.mxu0 %v2656_v62  ;;  %1107 = vmatpush.msrb.mxu1 %v2657_v63  ;;  %v2799_v63 = vld [vmem:[%s3076_s19 + $0x418] sm:$0xff] }
  0x6a   : > { %1149 = vmatpush.msrb.mxu2 %v2650_v8  ;;  %1190 = vmatpush.msrb.mxu3 %v2651_v9 }
  0x6b   : > { %1067 = vmatpush.msrb.mxu0 %v2648_v12  ;;  %1108 = vmatpush.msrb.mxu1 %v2649_v13 }
  0x6c   : > { %2614 = vmatmul.msk.f32.gmra.mxu0 %vm275_vm0, %v3167_v49  ;;  %2622 = vmatmul.msk.f32.gmra.mxu1 %vm275_vm0, %v3167_v49 }
  0x6d   : > { %2630 = vmatmul.msk.f32.gmra.mxu2 %vm275_vm0, %v3167_v49  ;;  %2638 = vmatmul.msk.f32.gmra.mxu3 %vm275_vm0, %v3167_v49 }
  0x74   : > { %2615 = vmatmul.msk.f32.gmra.mxu0 %vm275_vm0, %v3185_v54  ;;  %2623 = vmatmul.msk.f32.gmra.mxu1 %vm275_vm0, %v3185_v54 }
  0x75   : > { %2631 = vmatmul.msk.f32.gmra.mxu2 %vm275_vm0, %v3185_v54  ;;  %2639 = vmatmul.msk.f32.gmra.mxu3 %vm275_vm0, %v3185_v54 }
  0x7c   : > { %2616 = vmatmul.msk.f32.gmra.mxu0 %vm275_vm0, %v3206_v58  ;;  %2624 = vmatmul.msk.f32.gmra.mxu1 %vm275_vm0, %v3206_v58 }
  0x7d   : > { %2632 = vmatmul.msk.f32.gmra.mxu2 %vm275_vm0, %v3206_v58  ;;  %2640 = vmatmul.msk.f32.gmra.mxu3 %vm275_vm0, %v3206_v58 }
  0x7f   : > { %v3427_v2 = vpop.permute.xlu0 %237 }
  0x80   : > { %v3439_v10 = vpop.permute.xlu1 %247 }
  0x84   : > { %2617 = vmatmul.msk.f32.gmra.mxu0 %vm275_vm0, %v3227_v0  ;;  %2625 = vmatmul.msk.f32.gmra.mxu1 %vm275_vm0, %v3227_v0 }
  0x85   : > { %2633 = vmatmul.msk.f32.gmra.mxu2 %vm275_vm0, %v3227_v0  ;;  %2641 = vmatmul.msk.f32.gmra.mxu3 %vm275_vm0, %v3227_v0 }
  0x8c   : > { %2618 = vmatmul.msk.f32.gmra.mxu0 %vm275_vm0, %v3246_v5  ;;  %2626 = vmatmul.msk.f32.gmra.mxu1 %vm275_vm0, %v3246_v5  ;;  %v3463_v19 = vpop.permute.xlu2 %257 }
  0x8d   : > { %2634 = vmatmul.msk.f32.gmra.mxu2 %vm275_vm0, %v3246_v5  ;;  %2642 = vmatmul.msk.f32.gmra.mxu3 %vm275_vm0, %v3246_v5 }
  0x94   : > { %2619 = vmatmul.msk.f32.gmra.mxu0 %vm275_vm0, %v3266_v11  ;;  %2627 = vmatmul.msk.f32.gmra.mxu1 %vm275_vm0, %v3266_v11 }
  0x95   : > { %2635 = vmatmul.msk.f32.gmra.mxu2 %vm275_vm0, %v3266_v11  ;;  %2643 = vmatmul.msk.f32.gmra.mxu3 %vm275_vm0, %v3266_v11  ;;  %v3451_v14 = vpop.permute.xlu0 %242 }
  0x99   : > { %v3367_v36 = vpop.f32.mrf.mxu0  ;;  %v3369_v37 = vpop.f32.mrf.mxu1 }
  0x9a   : > { %v318_v18 = vadd.f32 %v3367_v36, %v3427_v2  ;;  %v359_v22 = vadd.f32 %v3369_v37, %v3427_v2 }
  0x9b   : > { %v3487_v30 = vpop.permute.xlu1 %252 }
  0x9c   : > { %2692 = vmatmul.msk.f32.vlgmr.msra.gmra.mxu0 %vm275_vm0, %v3106_v26  ;;  %2700 = vmatmul.msk.f32.vlgmr.msra.gmra.mxu1 %vm275_vm0, %v3106_v26  ;;  %v628_v31 = vmax.f32 %v318_v18, 0.0  ;;  %v629_v35 = vmax.f32 %v359_v22, 0.0  ;;  %v3532_v18 = vpop.permute.xlu2 %262 }
  0x9d   : > { %2708 = vmatmul.msk.f32.vlgmr.msra.gmra.mxu2 %vm275_vm0, %v3106_v26  ;;  %2716 = vmatmul.msk.f32.vlgmr.msra.gmra.mxu3 %vm275_vm0, %v3106_v26 }
  0x9e   : > { %1566 = vmatpush.msra.mxu2 %v2806_v20  ;;  %1607 = vmatpush.msra.mxu3 %v2807_v21 }
  0x9f   : > { %1484 = vmatpush.msra.mxu0 %v2804_v23  ;;  %1525 = vmatpush.msra.mxu1 %v2805_v24  ;;  %v2797_v24 = vld [vmem:[%s3076_s19 + $0x408] sm:$0xff] }
  0xa0   : > { %v3383_v43 = vpop.f32.mrf.mxu2  ;;  %v3385_v44 = vpop.f32.mrf.mxu3  ;;  %1608 = vmatpush.msra.mxu3 %v2799_v63 }
  0xa1   : > { %v3387_v45 = vpop.f32.mrf.mxu0  ;;  %v3389_v46 = vpop.f32.mrf.mxu1  ;;  %v400_v25 = vadd.f32 %v3383_v43, %v3427_v2  ;;  %v3484_v28 = vadd.f32 %v3385_v44, %v3427_v2  ;;  %1526 = vmatpush.msra.mxu1 %v2797_v24 }
  0xa2   : > { %v3492_v33 = vadd.f32 %v3387_v45, %v3451_v14  ;;  %v3494_v34 = vpop.permute.xlu0 %267  ;;  %v3498_v36 = vadd.f32 %v3389_v46, %v3451_v14 }
  0xa3   : > { %v630_v42 = vmax.f32 %v400_v25, 0.0  ;;  %v631_v48 = vmax.f32 %v3484_v28, 0.0 }
  0xa4   : > { %2693 = vmatmul.msk.f32.gmra.mxu0 %vm275_vm0, %v3139_v39  ;;  %2701 = vmatmul.msk.f32.gmra.mxu1 %vm275_vm0, %v3139_v39  ;;  %v636_v62 = vmax.f32 %v3492_v33, 0.0  ;;  %v637_v21 = vmax.f32 %v3498_v36, 0.0 }
  0xa5   : > { %2709 = vmatmul.msk.f32.gmra.mxu2 %vm275_vm0, %v3139_v39  ;;  %2717 = vmatmul.msk.f32.gmra.mxu3 %vm275_vm0, %v3139_v39 }
  0xa8   : > { %v3401_v50 = vpop.f32.mrf.mxu2  ;;  %v3403_v51 = vpop.f32.mrf.mxu3 }
  0xa9   : > { %v323_v52 = vpop.f32.mrf.mxu0  ;;  %v364_v53 = vpop.f32.mrf.mxu1  ;;  %v3515_v56 = vadd.f32 %v3401_v50, %v3451_v14  ;;  %v3530_v50 = vadd.f32 %v3403_v51, %v3451_v14  ;;  %v2796_v51 = vld [vmem:[%s3076_s19 + $0x400] sm:$0xff] }
  0xaa   : > { %v324_v27 = vadd.f32 %v323_v52, %v3439_v10  ;;  %v365_v29 = vadd.f32 %v364_v53, %v3439_v10  ;;  %1485 = vmatpush.msra.mxu0 %v2796_v51 }
  0xac   : > { %2694 = vmatmul.msk.f32.gmra.mxu0 %vm275_vm0, %v3167_v49  ;;  %2702 = vmatmul.msk.f32.gmra.mxu1 %vm275_vm0, %v3167_v49  ;;  %v644_v43 = vmax.f32 %v324_v27, 0.0  ;;  %v645_v52 = vmax.f32 %v365_v29, 0.0 }
  0xad   : > { %2710 = vmatmul.msk.f32.gmra.mxu2 %vm275_vm0, %v3167_v49  ;;  %2718 = vmatmul.msk.f32.gmra.mxu3 %vm275_vm0, %v3167_v49 }
  0xae   : > { %v693_v20 = vmax.f32 %v629_v35, %v645_v52 }
  0xb0   : > { %v405_v57 = vpop.f32.mrf.mxu2  ;;  %v3415_v59 = vpop.f32.mrf.mxu3 }
  0xb1   : > { %v3417_v60 = vpop.f32.mrf.mxu0  ;;  %v3419_v61 = vpop.f32.mrf.mxu1  ;;  %v406_v32 = vadd.f32 %v405_v57, %v3439_v10  ;;  %v447_v44 = vadd.f32 %v3415_v59, %v3439_v10 }
  0xb2   : > { %v327_v45 = vadd.f32 %v3417_v60, %v3487_v30  ;;  %v3520_v59 = vadd.f32 %v3419_v61, %v3487_v30  ;;  %v2798_v60 = vld [vmem:[%s3076_s19 + $0x410] sm:$0xff]  ;;  %v692_v61 = vmax.f32 %v628_v31, %v644_v43  ;;  %v3547_v31 = vpop.permute.xlu1 %272 }
  0xb3   : > { %v646_v57 = vmax.f32 %v406_v32, 0.0  ;;  %v647_v12 = vmax.f32 %v447_v44, 0.0  ;;  %1567 = vmatpush.msra.mxu2 %v2798_v60 }
  0xb4   : > { %2695 = vmatmul.msk.f32.gmra.mxu0 %vm275_vm0, %v3185_v54  ;;  %2703 = vmatmul.msk.f32.gmra.mxu1 %vm275_vm0, %v3185_v54  ;;  %v652_v13 = vmax.f32 %v327_v45, 0.0  ;;  %v653_v27 = vmax.f32 %v3520_v59, 0.0 }
  0xb5   : > { %2711 = vmatmul.msk.f32.gmra.mxu2 %vm275_vm0, %v3185_v54  ;;  %2719 = vmatmul.msk.f32.gmra.mxu3 %vm275_vm0, %v3185_v54  ;;  %v694_v25 = vmax.f32 %v630_v42, %v646_v57  ;;  %v695_v42 = vmax.f32 %v631_v48, %v647_v12  ;;  %v2790_v12 = vld [vmem:[%s3076_s19 + $0x3d0] sm:$0xff] }
  0xb6   : > { %v700_v43 = vmax.f32 %v636_v62, %v652_v13  ;;  %v2791_v13 = vld [vmem:[%s3076_s19 + $0x3d8] sm:$0xff]  ;;  %1568 = vmatpush.msra.mxu2 %v2790_v12  ;;  %v2772_v12 = vld [vmem:[%s3076_s19 + $0x340] sm:$0xff] }
  0xb7   : > { %1609 = vmatpush.msra.mxu3 %v2791_v13  ;;  %v2773_v13 = vld [vmem:[%s3076_s19 + $0x348] sm:$0xff] }
  0xb8   : > { %v3433_v3 = vpop.f32.mrf.mxu2  ;;  %v3435_v4 = vpop.f32.mrf.mxu3 }
  0xb9   : > { %v329_v6 = vpop.f32.mrf.mxu0  ;;  %v370_v7 = vpop.f32.mrf.mxu1 }
  0xba   : > { %v330_v40 = vadd.f32 %v329_v6, %v3463_v19  ;;  %v371_v41 = vadd.f32 %v370_v7, %v3463_v19 }
  0xbc   : > { %2696 = vmatmul.msk.f32.gmra.mxu0 %vm275_vm0, %v3206_v58  ;;  %2704 = vmatmul.msk.f32.gmra.mxu1 %vm275_vm0, %v3206_v58  ;;  %v660_v6 = vmax.f32 %v330_v40, 0.0  ;;  %v661_v8 = vmax.f32 %v371_v41, 0.0 }
  0xbd   : > { %2712 = vmatmul.msk.f32.gmra.mxu2 %vm275_vm0, %v3206_v58  ;;  %2720 = vmatmul.msk.f32.gmra.mxu3 %vm275_vm0, %v3206_v58 }
  0xc0   : > { %v3453_v15 = vpop.f32.mrf.mxu2  ;;  %v3455_v16 = vpop.f32.mrf.mxu3 }
  0xc1   : > { %v3457_v1 = vpop.f32.mrf.mxu0  ;;  %v3459_v17 = vpop.f32.mrf.mxu1  ;;  %v412_v28 = vadd.f32 %v3453_v15, %v3463_v19  ;;  %v453_v29 = vadd.f32 %v3455_v16, %v3463_v19 }
  0xc2   : > { %v333_v40 = vadd.f32 %v3457_v1, %v3532_v18  ;;  %v374_v41 = vadd.f32 %v3459_v17, %v3532_v18  ;;  %v409_v1 = vadd.f32 %v3433_v3, %v3487_v30  ;;  %v450_v3 = vadd.f32 %v3435_v4, %v3487_v30 }
  0xc3   : > { %v662_v48 = vmax.f32 %v412_v28, 0.0  ;;  %v663_v52 = vmax.f32 %v453_v29, 0.0 }
  0xc4   : > { %2697 = vmatmul.msk.f32.gmra.mxu0 %vm275_vm0, %v3227_v0  ;;  %2705 = vmatmul.msk.f32.gmra.mxu1 %vm275_vm0, %v3227_v0  ;;  %v668_v57 = vmax.f32 %v333_v40, 0.0  ;;  %v669_v59 = vmax.f32 %v374_v41, 0.0 }
  0xc5   : > { %2713 = vmatmul.msk.f32.gmra.mxu2 %vm275_vm0, %v3227_v0  ;;  %2721 = vmatmul.msk.f32.gmra.mxu3 %vm275_vm0, %v3227_v0 }
  0xc8   : > { %v3500_v37 = vpop.f32.mrf.mxu2  ;;  %v3502_v38 = vpop.f32.mrf.mxu3 }
  0xc9   : > { %v335_v46 = vpop.f32.mrf.mxu0  ;;  %v376_v47 = vpop.f32.mrf.mxu1 }
  0xca   : > { %v336_v53 = vadd.f32 %v335_v46, %v3494_v34  ;;  %v377_v55 = vadd.f32 %v376_v47, %v3494_v34 }
  0xcc   : > { %v676_v7 = vmax.f32 %v336_v53, 0.0  ;;  %v677_v9 = vmax.f32 %v377_v55, 0.0  ;;  %2698 = vmatmul.msk.f32.gmra.mxu0 %vm275_vm0, %v3246_v5  ;;  %2706 = vmatmul.msk.f32.gmra.mxu1 %vm275_vm0, %v3246_v5 }
  0xcd   : > { %2714 = vmatmul.msk.f32.gmra.mxu2 %vm275_vm0, %v3246_v5  ;;  %2722 = vmatmul.msk.f32.gmra.mxu3 %vm275_vm0, %v3246_v5 }
  0xce   : > { %v708_v22 = vmax.f32 %v660_v6, %v676_v7  ;;  %v709_v23 = vmax.f32 %v661_v8, %v677_v9  ;;  %v701_v7 = vmax.f32 %v637_v21, %v653_v27  ;;  %v415_v8 = vadd.f32 %v3500_v37, %v3532_v18 }
  0xcf   : > { %v655_v27 = vmax.f32 %v450_v3, 0.0 }
  0xd0   : > { %v724_v32 = vmax.f32 %v692_v61, %v708_v22  ;;  %v725_v33 = vmax.f32 %v693_v20, %v709_v23  ;;  %v417_v35 = vpop.f32.mrf.mxu2  ;;  %v458_v36 = vpop.f32.mrf.mxu3  ;;  %v456_v20 = vadd.f32 %v3502_v38, %v3532_v18  ;;  %v654_v23 = vmax.f32 %v409_v1, 0.0  ;;  %v2782_v1 = vld [vmem:[%s3076_s19 + $0x390] sm:$0xff] }
  0xd1   : > { %v418_v15 = vadd.f32 %v417_v35, %v3494_v34  ;;  %v459_v16 = vadd.f32 %v458_v36, %v3494_v34  ;;  %v338_v44 = vpop.f32.mrf.mxu0  ;;  %v379_v45 = vpop.f32.mrf.mxu1  ;;  %v639_v35 = vmax.f32 %v3530_v50, 0.0  ;;  %v670_v40 = vmax.f32 %v415_v8, 0.0  ;;  %1569 = vmatpush.msra.mxu2 %v2782_v1 }
  0xd2   : > { %v740_v46 = vpack.c.bf16 %v725_v33, %v724_v32  ;;  %v339_v17 = vadd.f32 %v338_v44, %v3547_v31  ;;  %v380_v47 = vadd.f32 %v379_v45, %v3547_v31  ;;  %v671_v41 = vmax.f32 %v456_v20, 0.0  ;;  %v2788_v44 = vld [vmem:[%s3076_s19 + $0x3c0] sm:$0xff]  ;;  %v2789_v45 = vld [vmem:[%s3076_s19 + $0x3c8] sm:$0xff] }
  0xd3   : > { %v678_v53 = vmax.f32 %v418_v15, 0.0  ;;  %v679_v55 = vmax.f32 %v459_v16, 0.0  ;;  %1486 = vmatpush.msra.mxu0 %v2788_v44  ;;  %1527 = vmatpush.msra.mxu1 %v2789_v45 }
  0xd4   : > { %748 = vst [vmem:[%s3556_s28] sm:$0xff] %v740_v46  ;;  %v684_v62 = vmax.f32 %v339_v17, 0.0  ;;  %v685_v60 = vmax.f32 %v380_v47, 0.0  ;;  %2699 = vmatmul.msk.f32.gmra.mxu0 %vm275_vm0, %v3266_v11  ;;  %2707 = vmatmul.msk.f32.gmra.mxu1 %vm275_vm0, %v3266_v11  ;;  %v2783_v46 = vld [vmem:[%s3076_s19 + $0x398] sm:$0xff] }
  0xd5   : > { %v710_v63 = vmax.f32 %v662_v48, %v678_v53  ;;  %v711_v6 = vmax.f32 %v663_v52, %v679_v55  ;;  %2715 = vmatmul.msk.f32.gmra.mxu2 %vm275_vm0, %v3266_v11  ;;  %2723 = vmatmul.msk.f32.gmra.mxu3 %vm275_vm0, %v3266_v11 }
  0xd6   : > { %v716_v9 = vmax.f32 %v668_v57, %v684_v62  ;;  %v717_v61 = vmax.f32 %v669_v59, %v685_v60  ;;  %1610 = vmatpush.msra.mxu3 %v2783_v46  ;;  %v2780_v57 = vld [vmem:[%s3076_s19 + $0x380] sm:$0xff]  ;;  %v2781_v62 = vld [vmem:[%s3076_s19 + $0x388] sm:$0xff] }
  0xd7   : > { %v726_v4 = vmax.f32 %v694_v25, %v710_v63  ;;  %v727_v22 = vmax.f32 %v695_v42, %v711_v6  ;;  %v638_v25 = vmax.f32 %v3515_v56, 0.0  ;;  %v703_v56 = vmax.f32 %v639_v35, %v655_v27  ;;  %1487 = vmatpush.msra.mxu0 %v2780_v57  ;;  %1528 = vmatpush.msra.mxu1 %v2781_v62  ;;  %v2774_v6 = vld [vmem:[%s3076_s19 + $0x350] sm:$0xff]  ;;  %v2808_v35 = vld [vmem:[%s3076_s19 + $0x460] sm:$0xff] }
  0xd8   : > { %v732_v51 = vmax.f32 %v700_v43, %v716_v9  ;;  %v733_v24 = vmax.f32 %v701_v7, %v717_v61  ;;  %v420_v28 = vpop.f32.mrf.mxu2  ;;  %v461_v21 = vpop.f32.mrf.mxu3  ;;  %v2775_v7 = vld [vmem:[%s3076_s19 + $0x358] sm:$0xff]  ;;  %1570 = vmatpush.msra.mxu2 %v2774_v6  ;;  %v2802_v6 = vld [vmem:[%s3076_s19 + $0x430] sm:$0xff] }
  0xd9   : > { %v741_v37 = vpack.c.bf16 %v727_v22, %v726_v4  ;;  %v421_v29 = vadd.f32 %v420_v28, %v3547_v31  ;;  %v462_v32 = vadd.f32 %v461_v21, %v3547_v31  ;;  %v3583_v33 = vpop.f32.mrf.mxu0  ;;  %v3585_v38 = vpop.f32.mrf.mxu1  ;;  %v702_v15 = vmax.f32 %v638_v25, %v654_v23  ;;  %1611 = vmatpush.msra.mxu3 %v2775_v7  ;;  %v2766_v23 = vld [vmem:[%s3076_s19 + $0x310] sm:$0xff]  ;;  %v2811_v25 = vld [vmem:[%s3076_s19 + $0x478] sm:$0xff] }
  0xda   : > { %v744_v36 = vpack.c.bf16 %v733_v24, %v732_v51  ;;  %1488 = vmatpush.msra.mxu0 %v2772_v12  ;;  %1529 = vmatpush.msra.mxu1 %v2773_v13  ;;  %v2767_v51 = vld [vmem:[%s3076_s19 + $0x318] sm:$0xff]  ;;  %v2764_v24 = vld [vmem:[%s3076_s19 + $0x300] sm:$0xff] }
  0xdb   : > { %749 = vst [vmem:[%s3556_s28 + $0x8] sm:$0xff] %v741_v37  ;;  %v686_v42 = vmax.f32 %v421_v29, 0.0  ;;  %v687_v43 = vmax.f32 %v462_v32, 0.0  ;;  %1571 = vmatpush.msra.mxu2 %v2766_v23  ;;  %1612 = vmatpush.msra.mxu3 %v2767_v51  ;;  %v482_v29 = vadd.f32 %v3583_v33, %v3427_v2  ;;  %v2810_v32 = vld [vmem:[%s3076_s19 + $0x470] sm:$0xff]  ;;  %v2803_v7 = vld [vmem:[%s3076_s19 + $0x438] sm:$0xff] }
  0xdc   : > { %755 = vst [vmem:[%s3556_s28 + $0x20] sm:$0xff] %v744_v36  ;;  %2724 = vmatmul.msk.f32.vlgmr.msrb.gmra.mxu0 %vm275_vm0, %v3106_v26  ;;  %2732 = vmatmul.msk.f32.vlgmr.msrb.gmra.mxu1 %vm275_vm0, %v3106_v26  ;;  %v2809_v36 = vld [vmem:[%s3076_s19 + $0x468] sm:$0xff] }
  0xdd   : > { %v718_v50 = vmax.f32 %v670_v40, %v686_v42  ;;  %v719_v16 = vmax.f32 %v671_v41, %v687_v43  ;;  %2740 = vmatmul.msk.f32.vlgmr.msrb.gmra.mxu2 %vm275_vm0, %v3106_v26  ;;  %2748 = vmatmul.msk.f32.vlgmr.msrb.gmra.mxu3 %vm275_vm0, %v3106_v26  ;;  %v632_v43 = vmax.f32 %v482_v29, 0.0 }
  0xde   : > { %1489 = vmatpush.msra.mxu0 %v2764_v24  ;;  %1730 = vmatpush.msrb.mxu2 %v2810_v32  ;;  %v2800_v24 = vld [vmem:[%s3076_s19 + $0x420] sm:$0xff] }
  0xdf   : > { %v734_v17 = vmax.f32 %v702_v15, %v718_v50  ;;  %v735_v47 = vmax.f32 %v703_v56, %v719_v16  ;;  %1771 = vmatpush.msrb.mxu3 %v2811_v25 }
  0xe0   : > { %v3603_v48 = vpop.f32.mrf.mxu2  ;;  %v3605_v52 = vpop.f32.mrf.mxu3  ;;  %1648 = vmatpush.msrb.mxu0 %v2808_v35  ;;  %1731 = vmatpush.msrb.mxu2 %v2802_v6 }
  0xe1   : > { %v745_v53 = vpack.c.bf16 %v735_v47, %v734_v17  ;;  %v3607_v26 = vpop.f32.mrf.mxu0  ;;  %v3609_v55 = vpop.f32.mrf.mxu1  ;;  %v564_v40 = vadd.f32 %v3603_v48, %v3427_v2  ;;  %1772 = vmatpush.msrb.mxu3 %v2803_v7 }
  0xe2   : > { %v485_v15 = vadd.f32 %v3607_v26, %v3451_v14  ;;  %v3700_v16 = vadd.f32 %v3609_v55, %v3451_v14  ;;  %1649 = vmatpush.msrb.mxu0 %v2800_v24 }
  0xe3   : > { %756 = vst [vmem:[%s3556_s28 + $0x28] sm:$0xff] %v745_v53  ;;  %v634_v1 = vmax.f32 %v564_v40, 0.0 }
  0xe4   : > { %2725 = vmatmul.msk.f32.gmra.mxu0 %vm275_vm0, %v3139_v39  ;;  %2733 = vmatmul.msk.f32.gmra.mxu1 %vm275_vm0, %v3139_v39  ;;  %v640_v57 = vmax.f32 %v485_v15, 0.0  ;;  %v641_v23 = vmax.f32 %v3700_v16, 0.0 }
  0xe5   : > { %2741 = vmatmul.msk.f32.gmra.mxu2 %vm275_vm0, %v3139_v39  ;;  %2749 = vmatmul.msk.f32.gmra.mxu3 %vm275_vm0, %v3139_v39 }
  0xe8   : > { %v3622_v59 = vpop.f32.mrf.mxu2  ;;  %v3624_v60 = vpop.f32.mrf.mxu3 }
  0xe9   : > { %v487_v3 = vpop.f32.mrf.mxu0  ;;  %v528_v63 = vpop.f32.mrf.mxu1  ;;  %v3713_v62 = vadd.f32 %v3622_v59, %v3451_v14  ;;  %v3727_v59 = vadd.f32 %v3624_v60, %v3451_v14 }
  0xea   : > { %v488_v41 = vadd.f32 %v487_v3, %v3439_v10  ;;  %v529_v33 = vadd.f32 %v528_v63, %v3439_v10 }
  0xec   : > { %2726 = vmatmul.msk.f32.gmra.mxu0 %vm275_vm0, %v3167_v49  ;;  %2734 = vmatmul.msk.f32.gmra.mxu1 %vm275_vm0, %v3167_v49  ;;  %v648_v46 = vmax.f32 %v488_v41, 0.0 }
  0xed   : > { %2742 = vmatmul.msk.f32.gmra.mxu2 %vm275_vm0, %v3167_v49  ;;  %2750 = vmatmul.msk.f32.gmra.mxu3 %vm275_vm0, %v3167_v49 }
  0xf0   : > { %v569_v39 = vpop.f32.mrf.mxu2  ;;  %v610_v8 = vpop.f32.mrf.mxu3 }
  0xf1   : > { %v490_v9 = vpop.f32.mrf.mxu0  ;;  %v3636_v61 = vpop.f32.mrf.mxu1  ;;  %v570_v42 = vadd.f32 %v569_v39, %v3439_v10  ;;  %v611_v56 = vadd.f32 %v610_v8, %v3439_v10  ;;  %v649_v10 = vmax.f32 %v529_v33, 0.0 }
  0xf2   : > { %v491_v17 = vadd.f32 %v490_v9, %v3487_v30  ;;  %v3717_v63 = vadd.f32 %v3636_v61, %v3487_v30  ;;  %v696_v61 = vmax.f32 %v632_v43, %v648_v46 }
  0xf3   : > { %v650_v53 = vmax.f32 %v570_v42, 0.0  ;;  %v651_v3 = vmax.f32 %v611_v56, 0.0 }
  0xf4   : > { %2727 = vmatmul.msk.f32.gmra.mxu0 %vm275_vm0, %v3185_v54  ;;  %2735 = vmatmul.msk.f32.gmra.mxu1 %vm275_vm0, %v3185_v54  ;;  %v657_v32 = vmax.f32 %v3717_v63, 0.0 }
  0xf5   : > { %2743 = vmatmul.msk.f32.gmra.mxu2 %vm275_vm0, %v3185_v54  ;;  %2751 = vmatmul.msk.f32.gmra.mxu3 %vm275_vm0, %v3185_v54  ;;  %v2765_v54 = vld [vmem:[%s3076_s19 + $0x308] sm:$0xff]  ;;  %v3739_v51 = vmax.f32 %v634_v1, %v650_v53  ;;  %v2795_v53 = vld [vmem:[%s3076_s19 + $0x3f8] sm:$0xff] }
  0xf6   : > { %1530 = vmatpush.msra.mxu1 %v2765_v54  ;;  %v2801_v54 = vld [vmem:[%s3076_s19 + $0x428] sm:$0xff]  ;;  %1773 = vmatpush.msrb.mxu3 %v2795_v53 }
  0xf8   : > { %v3648_v49 = vpop.f32.mrf.mxu2  ;;  %v3650_v20 = vpop.f32.mrf.mxu3  ;;  %1689 = vmatpush.msrb.mxu1 %v2809_v36 }
  0xf9   : > { %v493_v4 = vpop.f32.mrf.mxu0  ;;  %v534_v22 = vpop.f32.mrf.mxu1 }
  0xfa   : > { %1690 = vmatpush.msrb.mxu1 %v2801_v54 }
  0xfc   : > { %2728 = vmatmul.msk.f32.gmra.mxu0 %vm275_vm0, %v3206_v58  ;;  %2736 = vmatmul.msk.f32.gmra.mxu1 %vm275_vm0, %v3206_v58 }
  0xfd   : > { %2744 = vmatmul.msk.f32.gmra.mxu2 %vm275_vm0, %v3206_v58  ;;  %2752 = vmatmul.msk.f32.gmra.mxu3 %vm275_vm0, %v3206_v58  ;;  %v523_v58 = vadd.f32 %v3585_v38, %v3427_v2  ;;  %v605_v38 = vadd.f32 %v3605_v52, %v3427_v2  ;;  %v535_v2 = vadd.f32 %v534_v22, %v3463_v19  ;;  %v3736_v22 = vld [vmem:[%s4761_s2] sm:$0xff] }
  0xfe   : > { %1412 = vperm.xlu1 %3018, %v3736_v22  }
  0xff   : > { %v633_v50 = vmax.f32 %v523_v58, 0.0  ;;  %v635_v52 = vmax.f32 %v605_v38, 0.0  ;;  %v665_v8 = vmax.f32 %v535_v2, 0.0 }
 0x100   : > { %v3664_v28 = vpop.f32.mrf.mxu2  ;;  %v3666_v21 = vpop.f32.mrf.mxu3 }
 0x101   : > { %v3668_v27 = vpop.f32.mrf.mxu0  ;;  %v3670_v37 = vpop.f32.mrf.mxu1  ;;  %v697_v13 = vmax.f32 %v633_v50, %v649_v10  ;;  %v699_v29 = vmax.f32 %v635_v52, %v651_v3  ;;  %v617_v25 = vadd.f32 %v3666_v21, %v3463_v19  ;;  %v705_v10 = vmax.f32 %v641_v23, %v657_v32  ;;  %v2794_v52 = vld [vmem:[%s3076_s19 + $0x3f0] sm:$0xff]  ;;  %v2792_v32 = vld [vmem:[%s3076_s19 + $0x3e0] sm:$0xff] }
 0x102   : > { %v497_v58 = vadd.f32 %v3668_v27, %v3532_v18  ;;  %v538_v35 = vadd.f32 %v3670_v37, %v3532_v18  ;;  %v614_v27 = vadd.f32 %v3650_v20, %v3487_v30  ;;  %1732 = vmatpush.msrb.mxu2 %v2794_v52  ;;  %v643_v23 = vmax.f32 %v3727_v59, 0.0  ;;  %1650 = vmatpush.msrb.mxu0 %v2792_v32 }
 0x103   : > { %v667_v16 = vmax.f32 %v617_v25, 0.0  ;;  %v2786_v25 = vld [vmem:[%s3076_s19 + $0x3b0] sm:$0xff] }
 0x104   : > { %2729 = vmatmul.msk.f32.gmra.mxu0 %vm275_vm0, %v3227_v0  ;;  %2737 = vmatmul.msk.f32.gmra.mxu1 %vm275_vm0, %v3227_v0  ;;  %v672_v1 = vmax.f32 %v497_v58, 0.0  ;;  %v2787_v58 = vld [vmem:[%s3076_s19 + $0x3b8] sm:$0xff] }
 0x105   : > { %2745 = vmatmul.msk.f32.gmra.mxu2 %vm275_vm0, %v3227_v0  ;;  %2753 = vmatmul.msk.f32.gmra.mxu3 %vm275_vm0, %v3227_v0  ;;  %v494_v0 = vadd.f32 %v493_v4, %v3463_v19  ;;  %v656_v4 = vmax.f32 %v491_v17, 0.0 }
 0x106   : > { %1733 = vmatpush.msrb.mxu2 %v2786_v25  ;;  %1774 = vmatpush.msrb.mxu3 %v2787_v58 }
 0x107   : > { %v664_v39 = vmax.f32 %v494_v0, 0.0  ;;  %v704_v38 = vmax.f32 %v640_v57, %v656_v4  ;;  %v642_v4 = vmax.f32 %v3713_v62, 0.0 }
 0x108   : > { %v3704_v44 = vpop.f32.mrf.mxu2  ;;  %v3706_v45 = vpop.f32.mrf.mxu3 }
 0x109   : > { %v499_v47 = vpop.f32.mrf.mxu0  ;;  %v540_v48 = vpop.f32.mrf.mxu1  ;;  %v579_v17 = vadd.f32 %v3704_v44, %v3532_v18 }
 0x10a   : > { %v500_v26 = vadd.f32 %v499_v47, %v3494_v34  ;;  %v541_v55 = vadd.f32 %v540_v48, %v3494_v34 }
 0x10c   : > { %v680_v9 = vmax.f32 %v500_v26, 0.0  ;;  %v681_v12 = vmax.f32 %v541_v55, 0.0  ;;  %2730 = vmatmul.msk.f32.gmra.mxu0 %vm275_vm0, %v3246_v5  ;;  %2738 = vmatmul.msk.f32.gmra.mxu1 %vm275_vm0, %v3246_v5  ;;  %v1404_v26 = vld [vmem:[%s4761_s2 + $0x10] sm:$0xff]  ;;  %v620_v55 = vadd.f32 %v3706_v45, %v3532_v18 }
 0x10d   : > { %2746 = vmatmul.msk.f32.gmra.mxu2 %vm275_vm0, %v3246_v5  ;;  %2754 = vmatmul.msk.f32.gmra.mxu3 %vm275_vm0, %v3246_v5  ;;  %v576_v5 = vadd.f32 %v3664_v28, %v3463_v19  ;;  %v573_v28 = vadd.f32 %v3648_v49, %v3487_v30  ;;  %v673_v49 = vmax.f32 %v538_v35, 0.0  ;;  %v3818_v35 = vld [vmem:[%s4761_s2 + $0x18] sm:$0xff] }
 0x10e   : > { %v712_v14 = vmax.f32 %v664_v39, %v680_v9  ;;  %v713_v60 = vmax.f32 %v665_v8, %v681_v12  ;;  %1422 = vperm.xlu0 %3017, %v1404_v26   ;;  %v659_v8 = vmax.f32 %v614_v27, 0.0  ;;  %1427 = vperm.xlu1 %3018, %v3818_v35  }
 0x10f   : > { %v666_v50 = vmax.f32 %v576_v5, 0.0  ;;  %v2793_v5 = vld [vmem:[%s3076_s19 + $0x3e8] sm:$0xff] }
 0x110   : > { %v728_v36 = vmax.f32 %v696_v61, %v712_v14  ;;  %v729_v40 = vmax.f32 %v697_v13, %v713_v60  ;;  %v581_v41 = vpop.f32.mrf.mxu2  ;;  %v622_v33 = vpop.f32.mrf.mxu3  ;;  %v3795_v13 = vld [vmem:[%s4760_s1] sm:$0xff]  ;;  %v674_v14 = vmax.f32 %v579_v17, 0.0  ;;  %v675_v60 = vmax.f32 %v620_v55, 0.0  ;;  %1691 = vmatpush.msrb.mxu1 %v2793_v5  ;;  %v1407_v17 = vld [vmem:[%s4761_s2 + $0x28] sm:$0xff] }
 0x111   : > { %v582_v19 = vadd.f32 %v581_v41, %v3494_v34  ;;  %v623_v21 = vadd.f32 %v622_v33, %v3494_v34  ;;  %v502_v42 = vpop.f32.mrf.mxu0  ;;  %v543_v43 = vpop.f32.mrf.mxu1  ;;  %v707_v62 = vmax.f32 %v643_v23, %v659_v8 }
 0x112   : > { %v742_v37 = vpack.c.bf16 %v729_v40, %v728_v36  ;;  %v503_v15 = vadd.f32 %v502_v42, %v3547_v31  ;;  %v544_v56 = vadd.f32 %v543_v43, %v3547_v31  ;;  %v2784_v42 = vld [vmem:[%s3076_s19 + $0x3a0] sm:$0xff]  ;;  %v2785_v43 = vld [vmem:[%s3076_s19 + $0x3a8] sm:$0xff]  ;;  %v3946_v23 = vpop.permute.xlu1 %836 }
 0x113   : > { %v682_v0 = vmax.f32 %v582_v19, 0.0  ;;  %v683_v2 = vmax.f32 %v623_v21, 0.0  ;;  %v3832_v21 = vld [vmem:[%s4760_s1 + $0x8] sm:$0xff]  ;;  %1651 = vmatpush.msrb.mxu0 %v2784_v42  ;;  %1692 = vmatpush.msrb.mxu1 %v2785_v43 }
 0x114   : > { %750 = vst [vmem:[%s3556_s28 + $0x10] sm:$0xff] %v742_v37  ;;  %v688_v34 = vmax.f32 %v503_v15, 0.0  ;;  %v689_v46 = vmax.f32 %v544_v56, 0.0  ;;  %2731 = vmatmul.msk.f32.gmra.mxu0 %vm275_vm0, %v3266_v11  ;;  %2739 = vmatmul.msk.f32.gmra.mxu1 %vm275_vm0, %v3266_v11 }
 0x115   : > { %v714_v30 = vmax.f32 %v666_v50, %v682_v0  ;;  %v715_v20 = vmax.f32 %v667_v16, %v683_v2  ;;  %2747 = vmatmul.msk.f32.gmra.mxu2 %vm275_vm0, %v3266_v11  ;;  %2755 = vmatmul.msk.f32.gmra.mxu3 %vm275_vm0, %v3266_v11  ;;  %v658_v11 = vmax.f32 %v573_v28, 0.0  ;;  %v3858_v50 = vld [vmem:[%s4760_s1 + $0x10] sm:$0xff]  ;;  %v2779_v0 = vld [vmem:[%s3076_s19 + $0x378] sm:$0xff]  ;;  %v1403_v2 = vld [vmem:[%s4761_s2 + $0x8] sm:$0xff] }
 0x116   : > { %v720_v47 = vmax.f32 %v672_v1, %v688_v34  ;;  %v721_v48 = vmax.f32 %v673_v49, %v689_v46  ;;  %v2778_v16 = vld [vmem:[%s3076_s19 + $0x370] sm:$0xff]  ;;  %1775 = vmatpush.msrb.mxu3 %v2779_v0  ;;  %1417 = vperm.xlu2 %3019, %v1403_v2  }
 0x117   : > { %v730_v57 = vmax.f32 %v3739_v51, %v714_v30  ;;  %v731_v3 = vmax.f32 %v699_v29, %v715_v20  ;;  %v706_v54 = vmax.f32 %v642_v4, %v658_v11  ;;  %1734 = vmatpush.msrb.mxu2 %v2778_v16  ;;  %v3884_v30 = vld [vmem:[%s4760_s1 + $0x18] sm:$0xff]  ;;  %v2776_v20 = vld [vmem:[%s3076_s19 + $0x360] sm:$0xff]  ;;  %1437 = vperm.xlu0 %3017, %v1407_v17   ;;  %v3944_v4 = vld [vmem:[%s4760_s1 + $0x28] sm:$0xff] }
 0x118   : > { %v736_v63 = vmax.f32 %v704_v38, %v720_v47  ;;  %v737_v6 = vmax.f32 %v705_v10, %v721_v48  ;;  %v584_v7 = vpop.f32.mrf.mxu2  ;;  %v625_v39 = vpop.f32.mrf.mxu3  ;;  %v2777_v10 = vld [vmem:[%s3076_s19 + $0x368] sm:$0xff]  ;;  %1652 = vmatpush.msrb.mxu0 %v2776_v20  ;;  %v3904_v48 = vld [vmem:[%s4761_s2 + $0x30] sm:$0xff]  ;;  %v2771_v11 = vld [vmem:[%s3076_s19 + $0x338] sm:$0xff] }
 0x119   : > { %v743_v18 = vpack.c.bf16 %v731_v3, %v730_v57  ;;  %v585_v45 = vadd.f32 %v584_v7, %v3547_v31  ;;  %v626_v9 = vadd.f32 %v625_v39, %v3547_v31  ;;  %v3788_v12 = vpop.f32.mrf.mxu0  ;;  %v3790_v61 = vpop.f32.mrf.mxu1  ;;  %1693 = vmatpush.msrb.mxu1 %v2777_v10  ;;  %1442 = vperm.xlu1 %3018, %v3904_v48   ;;  %v3914_v57 = vld [vmem:[%s4760_s1 + $0x20] sm:$0xff]  ;;  %v2770_v3 = vld [vmem:[%s3076_s19 + $0x330] sm:$0xff] }
 0x11a   : > { %v746_v51 = vpack.c.bf16 %v737_v6, %v736_v63  ;;  %v3899_v47 = vpop.permute.xlu2 %826  ;;  %v2768_v63 = vld [vmem:[%s3076_s19 + $0x320] sm:$0xff]  ;;  %v2769_v6 = vld [vmem:[%s3076_s19 + $0x328] sm:$0xff]  ;;  %v3924_v7 = vpop.permute.xlu0 %831  ;;  %1735 = vmatpush.msrb.mxu2 %v2770_v3  ;;  %1776 = vmatpush.msrb.mxu3 %v2771_v11  ;;  %v4008_v0 = vld [vmem:[%s4760_s1 + $0x30] sm:$0xff] }
 0x11b   : > { %754 = vst.msk [vmem:[%s3556_s28 + $0x18] sm:$0xff] %vm3782_vm3, %v743_v18  ;;  %v690_v31 = vmax.f32 %v585_v45, 0.0  ;;  %v691_v24 = vmax.f32 %v626_v9, 0.0  ;;  %1653 = vmatpush.msrb.mxu0 %v2768_v63  ;;  %1694 = vmatpush.msrb.mxu1 %v2769_v6 }
 0x11c   : > { %757 = vst [vmem:[%s3556_s28 + $0x30] sm:$0xff] %v746_v51  ;;  %2812 = vmatmul.msk.f32.vlgmr.msra.gmra.mxu0 %vm275_vm0, %v3795_v13  ;;  %2820 = vmatmul.msk.f32.vlgmr.msra.gmra.mxu1 %vm275_vm0, %v3795_v13  ;;  %v906_v51 = vadd.f32 %v3788_v12, %v3899_v47 }
 0x11d   : > { %v722_v59 = vmax.f32 %v674_v14, %v690_v31  ;;  %v723_v29 = vmax.f32 %v675_v60, %v691_v24  ;;  %2828 = vmatmul.msk.f32.vlgmr.msra.gmra.mxu2 %vm275_vm0, %v3795_v13  ;;  %2836 = vmatmul.msk.f32.vlgmr.msra.gmra.mxu3 %vm275_vm0, %v3795_v13  ;;  %v2926_v14 = vld [vmem:[%s3076_s19 + $0x5d0] sm:$0xff]  ;;  %v2927_v60 = vld [vmem:[%s3076_s19 + $0x5d8] sm:$0xff]  ;;  %v2924_v31 = vld [vmem:[%s3076_s19 + $0x5c0] sm:$0xff] }
 0x11e   : > { %v2925_v24 = vld [vmem:[%s3076_s19 + $0x5c8] sm:$0xff]  ;;  %2152 = vmatpush.msra.mxu2 %v2926_v14  ;;  %2193 = vmatpush.msra.mxu3 %v2927_v60  ;;  %v1216_v32 = vmax.f32 %v906_v51, 0.0  ;;  %v4032_v60 = vpop.permute.xlu1 %851 }
 0x11f   : > { %v738_v36 = vmax.f32 %v706_v54, %v722_v59  ;;  %v739_v40 = vmax.f32 %v707_v62, %v723_v29  ;;  %1998 = vperm.xlu0 %3017, %v3736_v22   ;;  %v947_v22 = vadd.f32 %v3790_v61, %v3899_v47  ;;  %v1406_v61 = vld [vmem:[%s4761_s2 + $0x20] sm:$0xff]  ;;  %2070 = vmatpush.msra.mxu0 %v2924_v31 }
 0x120   : > { %v3820_v41 = vpop.f32.mrf.mxu2  ;;  %v3822_v33 = vpop.f32.mrf.mxu3  ;;  %2111 = vmatpush.msra.mxu1 %v2925_v24  ;;  %1432 = vperm.xlu2 %3019, %v1406_v61  }
 0x121   : > { %v747_v38 = vpack.c.bf16 %v739_v40, %v738_v36  ;;  %v3825_v28 = vpop.f32.mrf.mxu0  ;;  %v3827_v19 = vpop.f32.mrf.mxu1  ;;  %2003 = vperm.xlu1 %3018, %v1403_v2   ;;  %v3962_v54 = vadd.f32 %v3820_v41, %v3899_v47  ;;  %v3977_v59 = vadd.f32 %v3822_v33, %v3899_v47  ;;  %v1217_v36 = vmax.f32 %v947_v22, 0.0 }
 0x122   : > { %v3930_v39 = vpop.permute.xlu2 %841  ;;  %v3966_v62 = vpop.permute.xlu0 %846  ;;  %v3985_v25 = vadd.f32 %v3825_v28, %v3924_v7  ;;  %v3991_v40 = vadd.f32 %v3827_v19, %v3924_v7 }
 0x123   : > { %758 = vst.msk [vmem:[%s3556_s28 + $0x38] sm:$0xff] %vm3782_vm3, %v747_v38  ;;  %v1218_v28 = vmax.f32 %v3962_v54, 0.0 }
 0x124   : > { %2813 = vmatmul.msk.f32.gmra.mxu0 %vm275_vm0, %v3832_v21  ;;  %2821 = vmatmul.msk.f32.gmra.mxu1 %vm275_vm0, %v3832_v21  ;;  %v1224_v10 = vmax.f32 %v3985_v25, 0.0  ;;  %v1225_v31 = vmax.f32 %v3991_v40, 0.0 }
 0x125   : > { %2829 = vmatmul.msk.f32.gmra.mxu2 %vm275_vm0, %v3832_v21  ;;  %2837 = vmatmul.msk.f32.gmra.mxu3 %vm275_vm0, %v3832_v21 }
 0x127   : > { %2013 = vperm.xlu0 %3017, %v3818_v35   ;;  %v1219_v35 = vmax.f32 %v3977_v59, 0.0 }
 0x128   : > { %v3847_v27 = vpop.f32.mrf.mxu2  ;;  %v3849_v37 = vpop.f32.mrf.mxu3 }
 0x129   : > { %v3851_v15 = vpop.f32.mrf.mxu0  ;;  %v3853_v56 = vpop.f32.mrf.mxu1  ;;  %2018 = vperm.xlu1 %3018, %v1406_v61  }
 0x12a   : > { %v912_v12 = vadd.f32 %v3851_v15, %v3946_v23  ;;  %v953_v29 = vadd.f32 %v3853_v56, %v3946_v23  ;;  %v3987_v58 = vpop.permute.xlu2 %856 }
 0x12c   : > { %2814 = vmatmul.msk.f32.gmra.mxu0 %vm275_vm0, %v3858_v50  ;;  %2822 = vmatmul.msk.f32.gmra.mxu1 %vm275_vm0, %v3858_v50  ;;  %v1232_v43 = vmax.f32 %v912_v12, 0.0  ;;  %v1233_v2 = vmax.f32 %v953_v29, 0.0  ;;  %v2917_v12 = vld [vmem:[%s3076_s19 + $0x588] sm:$0xff] }
 0x12d   : > { %2830 = vmatmul.msk.f32.gmra.mxu2 %vm275_vm0, %v3858_v50  ;;  %2838 = vmatmul.msk.f32.gmra.mxu3 %vm275_vm0, %v3858_v50 }
 0x12e   : > { %v1281_v22 = vmax.f32 %v1217_v36, %v1233_v2  ;;  %2112 = vmatpush.msra.mxu1 %v2917_v12 }
 0x12f   : > { %2028 = vperm.xlu0 %3017, %v3904_v48  }
 0x130   : > { %v3873_v1 = vpop.f32.mrf.mxu2  ;;  %v3875_v49 = vpop.f32.mrf.mxu3 }
 0x131   : > { %v3877_v34 = vpop.f32.mrf.mxu0  ;;  %v3879_v46 = vpop.f32.mrf.mxu1  ;;  %v994_v5 = vadd.f32 %v3873_v1, %v3946_v23  ;;  %v1035_v19 = vadd.f32 %v3875_v49, %v3946_v23  ;;  %v4015_v49 = vadd.f32 %v3847_v27, %v3924_v7  ;;  %v4030_v27 = vadd.f32 %v3849_v37, %v3924_v7  ;;  %v2916_v37 = vld [vmem:[%s3076_s19 + $0x580] sm:$0xff] }
 0x132   : > { %v915_v15 = vadd.f32 %v3877_v34, %v3930_v39  ;;  %v4020_v17 = vadd.f32 %v3879_v46, %v3930_v39  ;;  %v1280_v46 = vmax.f32 %v1216_v32, %v1232_v43  ;;  %2071 = vmatpush.msra.mxu0 %v2916_v37 }
 0x133   : > { %v1234_v34 = vmax.f32 %v994_v5, 0.0  ;;  %v1235_v51 = vmax.f32 %v1035_v19, 0.0  ;;  %v4046_v5 = vpop.permute.xlu0 %861 }
 0x134   : > { %2815 = vmatmul.msk.f32.gmra.mxu0 %vm275_vm0, %v3884_v30  ;;  %2823 = vmatmul.msk.f32.gmra.mxu1 %vm275_vm0, %v3884_v30  ;;  %v1240_v14 = vmax.f32 %v915_v15, 0.0  ;;  %v1241_v59 = vmax.f32 %v4020_v17, 0.0 }
 0x135   : > { %2831 = vmatmul.msk.f32.gmra.mxu2 %vm275_vm0, %v3884_v30  ;;  %2839 = vmatmul.msk.f32.gmra.mxu3 %vm275_vm0, %v3884_v30  ;;  %v1282_v61 = vmax.f32 %v1218_v28, %v1234_v34 }
 0x136   : > { %v1288_v43 = vmax.f32 %v1224_v10, %v1240_v14  ;;  %v2910_v14 = vld [vmem:[%s3076_s19 + $0x550] sm:$0xff] }
 0x138   : > { %v3906_v52 = vpop.f32.mrf.mxu2  ;;  %v3908_v53 = vpop.f32.mrf.mxu3 }
 0x139   : > { %v917_v26 = vpop.f32.mrf.mxu0  ;;  %v958_v55 = vpop.f32.mrf.mxu1 }
 0x13a   : > { %v918_v38 = vadd.f32 %v917_v26, %v3966_v62  ;;  %v959_v42 = vadd.f32 %v958_v55, %v3966_v62  ;;  %v2918_v26 = vld [vmem:[%s3076_s19 + $0x590] sm:$0xff]  ;;  %v2919_v55 = vld [vmem:[%s3076_s19 + $0x598] sm:$0xff] }
 0x13b   : > { %2153 = vmatpush.msra.mxu2 %v2918_v26  ;;  %2194 = vmatpush.msra.mxu3 %v2919_v55 }
 0x13c   : > { %2816 = vmatmul.msk.f32.gmra.mxu0 %vm275_vm0, %v3914_v57  ;;  %2824 = vmatmul.msk.f32.gmra.mxu1 %vm275_vm0, %v3914_v57  ;;  %v1248_v3 = vmax.f32 %v918_v38, 0.0  ;;  %v1249_v63 = vmax.f32 %v959_v42, 0.0 }
 0x13d   : > { %2832 = vmatmul.msk.f32.gmra.mxu2 %vm275_vm0, %v3914_v57  ;;  %2840 = vmatmul.msk.f32.gmra.mxu3 %vm275_vm0, %v3914_v57 }
 0x13e   : > { %2154 = vmatpush.msra.mxu2 %v2910_v14 }
 0x140   : > { %v3932_v8 = vpop.f32.mrf.mxu2  ;;  %v3934_v18 = vpop.f32.mrf.mxu3 }
 0x141   : > { %v3937_v45 = vpop.f32.mrf.mxu0  ;;  %v3939_v9 = vpop.f32.mrf.mxu1  ;;  %v1000_v29 = vadd.f32 %v3932_v8, %v3966_v62  ;;  %v1041_v32 = vadd.f32 %v3934_v18, %v3966_v62  ;;  %v1283_v8 = vmax.f32 %v1219_v35, %v1235_v51 }
 0x142   : > { %v921_v42 = vadd.f32 %v3937_v45, %v4032_v60  ;;  %v962_v28 = vadd.f32 %v3939_v9, %v4032_v60  ;;  %v997_v45 = vadd.f32 %v3906_v52, %v3930_v39  ;;  %v1038_v52 = vadd.f32 %v3908_v53, %v3930_v39  ;;  %v1409_v53 = vld [vmem:[%s4761_s2 + $0x38] sm:$0xff] }
 0x143   : > { %v1250_v2 = vmax.f32 %v1000_v29, 0.0  ;;  %1447 = vperm.xlu2 %3019, %v1409_v53   ;;  %2033 = vperm.xlu1 %3018, %v1409_v53  }
 0x144   : > { %2817 = vmatmul.msk.f32.gmra.mxu0 %vm275_vm0, %v3944_v4  ;;  %2825 = vmatmul.msk.f32.gmra.mxu1 %vm275_vm0, %v3944_v4  ;;  %v1256_v10 = vmax.f32 %v921_v42, 0.0  ;;  %v1257_v26 = vmax.f32 %v962_v28, 0.0  ;;  %v1242_v12 = vmax.f32 %v997_v45, 0.0  ;;  %v1227_v42 = vmax.f32 %v4030_v27, 0.0  ;;  %v2908_v45 = vld [vmem:[%s3076_s19 + $0x540] sm:$0xff] }
 0x145   : > { %2833 = vmatmul.msk.f32.gmra.mxu2 %vm275_vm0, %v3944_v4  ;;  %2841 = vmatmul.msk.f32.gmra.mxu3 %vm275_vm0, %v3944_v4 }
 0x146   : > { %2072 = vmatpush.msra.mxu0 %v2908_v45 }
 0x148   : > { %v3993_v41 = vpop.f32.mrf.mxu2  ;;  %v3995_v33 = vpop.f32.mrf.mxu3 }
 0x149   : > { %v923_v56 = vpop.f32.mrf.mxu0  ;;  %v964_v16 = vpop.f32.mrf.mxu1 }
 0x14a   : > { %v924_v1 = vadd.f32 %v923_v56, %v3987_v58  ;;  %v965_v20 = vadd.f32 %v964_v16, %v3987_v58  ;;  %v4058_v16 = vld [vmem:[%s4760_s1 + $0x38] sm:$0xff] }
 0x14c   : > { %v1264_v11 = vmax.f32 %v924_v1, 0.0  ;;  %v1265_v6 = vmax.f32 %v965_v20, 0.0  ;;  %2818 = vmatmul.msk.f32.gmra.mxu0 %vm275_vm0, %v4008_v0  ;;  %2826 = vmatmul.msk.f32.gmra.mxu1 %vm275_vm0, %v4008_v0  ;;  %v1251_v1 = vmax.f32 %v1041_v32, 0.0  ;;  %v1243_v32 = vmax.f32 %v1038_v52, 0.0  ;;  %v2901_v52 = vld [vmem:[%s3076_s19 + $0x508] sm:$0xff] }
 0x14d   : > { %2834 = vmatmul.msk.f32.gmra.mxu2 %vm275_vm0, %v4008_v0  ;;  %2842 = vmatmul.msk.f32.gmra.mxu3 %vm275_vm0, %v4008_v0 }
 0x14e   : > { %v1296_v24 = vmax.f32 %v1248_v3, %v1264_v11  ;;  %v1297_v54 = vmax.f32 %v1249_v63, %v1265_v6  ;;  %v1289_v63 = vmax.f32 %v1225_v31, %v1241_v59  ;;  %v1003_v6 = vadd.f32 %v3993_v41, %v4032_v60 }
 0x150   : > { %v1312_v25 = vmax.f32 %v1280_v46, %v1296_v24  ;;  %v1313_v36 = vmax.f32 %v1281_v22, %v1297_v54  ;;  %v1005_v40 = vpop.f32.mrf.mxu2  ;;  %v1046_v38 = vpop.f32.mrf.mxu3  ;;  %v2911_v22 = vld [vmem:[%s3076_s19 + $0x558] sm:$0xff]  ;;  %v1044_v24 = vadd.f32 %v3995_v33, %v4032_v60 }
 0x151   : > { %v1006_v18 = vadd.f32 %v1005_v40, %v3987_v58  ;;  %v1047_v19 = vadd.f32 %v1046_v38, %v3987_v58  ;;  %v926_v15 = vpop.f32.mrf.mxu0  ;;  %v967_v56 = vpop.f32.mrf.mxu1  ;;  %2195 = vmatpush.msra.mxu3 %v2911_v22  ;;  %v1226_v38 = vmax.f32 %v4015_v49, 0.0  ;;  %v1291_v49 = vmax.f32 %v1227_v42, %v1243_v32  ;;  %v2887_v32 = vld [vmem:[%s3076_s19 + $0x498] sm:$0xff] }
 0x152   : > { %v1328_v9 = vpack.c.bf16 %v1313_v36, %v1312_v25  ;;  %v927_v48 = vadd.f32 %v926_v15, %v4046_v5  ;;  %v968_v35 = vadd.f32 %v967_v56, %v4046_v5 }
 0x153   : > { %v1266_v20 = vmax.f32 %v1006_v18, 0.0  ;;  %v1267_v34 = vmax.f32 %v1047_v19, 0.0  ;;  %v1290_v15 = vmax.f32 %v1226_v38, %v1242_v12 }
 0x154   : > { %2756 = vst [vmem:[%s3556_s28 + $0x40] sm:$0xff] %v1328_v9  ;;  %v1272_v17 = vmax.f32 %v927_v48, 0.0  ;;  %v1273_v55 = vmax.f32 %v968_v35, 0.0  ;;  %2819 = vmatmul.msk.f32.gmra.mxu0 %vm275_vm0, %v4058_v16  ;;  %2827 = vmatmul.msk.f32.gmra.mxu1 %vm275_vm0, %v4058_v16  ;;  %v2909_v9 = vld [vmem:[%s3076_s19 + $0x548] sm:$0xff]  ;;  %v2902_v48 = vld [vmem:[%s3076_s19 + $0x510] sm:$0xff]  ;;  %v2903_v35 = vld [vmem:[%s3076_s19 + $0x518] sm:$0xff] }
 0x155   : > { %v1298_v3 = vmax.f32 %v1250_v2, %v1266_v20  ;;  %v1299_v11 = vmax.f32 %v1251_v1, %v1267_v34  ;;  %2835 = vmatmul.msk.f32.gmra.mxu2 %vm275_vm0, %v4058_v16  ;;  %2843 = vmatmul.msk.f32.gmra.mxu3 %vm275_vm0, %v4058_v16 }
 0x156   : > { %v1304_v46 = vmax.f32 %v1256_v10, %v1272_v17  ;;  %v1305_v51 = vmax.f32 %v1257_v26, %v1273_v55  ;;  %2113 = vmatpush.msra.mxu1 %v2909_v9  ;;  %2155 = vmatpush.msra.mxu2 %v2902_v48  ;;  %v2900_v55 = vld [vmem:[%s3076_s19 + $0x500] sm:$0xff] }
 0x157   : > { %v1314_v54 = vmax.f32 %v1282_v61, %v1298_v3  ;;  %v1315_v37 = vmax.f32 %v1283_v8, %v1299_v11  ;;  %v1258_v8 = vmax.f32 %v1003_v6, 0.0  ;;  %2196 = vmatpush.msra.mxu3 %v2903_v35  ;;  %2073 = vmatpush.msra.mxu0 %v2900_v55 }
 0x158   : > { %v1320_v31 = vmax.f32 %v1288_v43, %v1304_v46  ;;  %v1321_v59 = vmax.f32 %v1289_v63, %v1305_v51  ;;  %v1008_v41 = vpop.f32.mrf.mxu2  ;;  %v1049_v29 = vpop.f32.mrf.mxu3  ;;  %v1259_v43 = vmax.f32 %v1044_v24, 0.0  ;;  %2114 = vmatpush.msra.mxu1 %v2901_v52  ;;  %v2894_v46 = vld [vmem:[%s3076_s19 + $0x4d0] sm:$0xff]  ;;  %v2895_v51 = vld [vmem:[%s3076_s19 + $0x4d8] sm:$0xff] }
 0x159   : > { %v1329_v25 = vpack.c.bf16 %v1315_v37, %v1314_v54  ;;  %v1009_v36 = vadd.f32 %v1008_v41, %v4046_v5  ;;  %v1050_v40 = vadd.f32 %v1049_v29, %v4046_v5  ;;  %v4086_v33 = vpop.f32.mrf.mxu0  ;;  %v4088_v61 = vpop.f32.mrf.mxu1  ;;  %2156 = vmatpush.msra.mxu2 %v2894_v46  ;;  %2197 = vmatpush.msra.mxu3 %v2895_v51  ;;  %v2892_v54 = vld [vmem:[%s3076_s19 + $0x4c0] sm:$0xff]  ;;  %v2893_v37 = vld [vmem:[%s3076_s19 + $0x4c8] sm:$0xff]  ;;  %v2886_v29 = vld [vmem:[%s3076_s19 + $0x490] sm:$0xff] }
 0x15a   : > { %v1332_v28 = vpack.c.bf16 %v1321_v59, %v1320_v31  ;;  %2074 = vmatpush.msra.mxu0 %v2892_v54  ;;  %2115 = vmatpush.msra.mxu1 %v2893_v37 }
 0x15b   : > { %2757 = vst [vmem:[%s3556_s28 + $0x48] sm:$0xff] %v1329_v25  ;;  %v1274_v18 = vmax.f32 %v1009_v36, 0.0  ;;  %v1275_v19 = vmax.f32 %v1050_v40, 0.0  ;;  %v2884_v25 = vld [vmem:[%s3076_s19 + $0x480] sm:$0xff]  ;;  %v2885_v36 = vld [vmem:[%s3076_s19 + $0x488] sm:$0xff]  ;;  %2157 = vmatpush.msra.mxu2 %v2886_v29  ;;  %2198 = vmatpush.msra.mxu3 %v2887_v32 }
 0x15c   : > { %2760 = vst [vmem:[%s3556_s28 + $0x60] sm:$0xff] %v1332_v28  ;;  %2844 = vmatmul.msk.f32.vlgmr.msrb.gmra.mxu0 %vm275_vm0, %v3795_v13  ;;  %2852 = vmatmul.msk.f32.vlgmr.msrb.gmra.mxu1 %vm275_vm0, %v3795_v13 }
 0x15d   : > { %v1306_v27 = vmax.f32 %v1258_v8, %v1274_v18  ;;  %v1307_v56 = vmax.f32 %v1259_v43, %v1275_v19  ;;  %2860 = vmatmul.msk.f32.vlgmr.msrb.gmra.mxu2 %vm275_vm0, %v3795_v13  ;;  %2868 = vmatmul.msk.f32.vlgmr.msrb.gmra.mxu3 %vm275_vm0, %v3795_v13  ;;  %v1070_v8 = vadd.f32 %v4086_v33, %v3899_v47  ;;  %v2930_v43 = vld [vmem:[%s3076_s19 + $0x5f0] sm:$0xff]  ;;  %v2931_v18 = vld [vmem:[%s3076_s19 + $0x5f8] sm:$0xff] }
 0x15e   : > { %2075 = vmatpush.msra.mxu0 %v2884_v25  ;;  %2116 = vmatpush.msra.mxu1 %v2885_v36  ;;  %v1111_v19 = vadd.f32 %v4088_v61, %v3899_v47 }
 0x15f   : > { %v1322_v2 = vmax.f32 %v1290_v15, %v1306_v27  ;;  %v1323_v1 = vmax.f32 %v1291_v49, %v1307_v56  ;;  %v2928_v15 = vld [vmem:[%s3076_s19 + $0x5e0] sm:$0xff]  ;;  %v2929_v49 = vld [vmem:[%s3076_s19 + $0x5e8] sm:$0xff]  ;;  %2316 = vmatpush.msrb.mxu2 %v2930_v43  ;;  %2357 = vmatpush.msrb.mxu3 %v2931_v18  ;;  %v1220_v45 = vmax.f32 %v1070_v8, 0.0 }
 0x160   : > { %v4106_v20 = vpop.f32.mrf.mxu2  ;;  %v4108_v34 = vpop.f32.mrf.mxu3  ;;  %2234 = vmatpush.msrb.mxu0 %v2928_v15  ;;  %2275 = vmatpush.msrb.mxu1 %v2929_v49  ;;  %v1221_v35 = vmax.f32 %v1111_v19, 0.0  ;;  %v2920_v49 = vld [vmem:[%s3076_s19 + $0x5a0] sm:$0xff] }
 0x161   : > { %v1333_v10 = vpack.c.bf16 %v1323_v1, %v1322_v2  ;;  %v4110_v17 = vpop.f32.mrf.mxu0  ;;  %v4112_v26 = vpop.f32.mrf.mxu1  ;;  %v1152_v27 = vadd.f32 %v4106_v20, %v3899_v47  ;;  %v4196_v33 = vadd.f32 %v4108_v34, %v3899_v47 }
 0x162   : > { %v1073_v9 = vadd.f32 %v4110_v17, %v3924_v7  ;;  %v4204_v2 = vadd.f32 %v4112_v26, %v3924_v7  ;;  %2235 = vmatpush.msrb.mxu0 %v2920_v49 }
 0x163   : > { %2761 = vst [vmem:[%s3556_s28 + $0x68] sm:$0xff] %v1333_v10  ;;  %v1222_v10 = vmax.f32 %v1152_v27, 0.0  ;;  %v1223_v26 = vmax.f32 %v4196_v33, 0.0  ;;  %v2921_v27 = vld [vmem:[%s3076_s19 + $0x5a8] sm:$0xff] }
 0x164   : > { %2845 = vmatmul.msk.f32.gmra.mxu0 %vm275_vm0, %v3832_v21  ;;  %2853 = vmatmul.msk.f32.gmra.mxu1 %vm275_vm0, %v3832_v21  ;;  %v1228_v54 = vmax.f32 %v1073_v9, 0.0  ;;  %v1229_v43 = vmax.f32 %v4204_v2, 0.0 }
 0x165   : > { %2861 = vmatmul.msk.f32.gmra.mxu2 %vm275_vm0, %v3832_v21  ;;  %2869 = vmatmul.msk.f32.gmra.mxu3 %vm275_vm0, %v3832_v21 }
 0x166   : > { %2276 = vmatpush.msrb.mxu1 %v2921_v27 }
 0x168   : > { %v4125_v3 = vpop.f32.mrf.mxu2  ;;  %v4127_v11 = vpop.f32.mrf.mxu3 }
 0x169   : > { %v1075_v63 = vpop.f32.mrf.mxu0  ;;  %v1116_v6 = vpop.f32.mrf.mxu1  ;;  %v4219_v37 = vadd.f32 %v4125_v3, %v3924_v7  ;;  %v4231_v3 = vadd.f32 %v4127_v11, %v3924_v7 }
 0x16a   : > { %v1076_v56 = vadd.f32 %v1075_v63, %v3946_v23  ;;  %v1117_v61 = vadd.f32 %v1116_v6, %v3946_v23 }
 0x16c   : > { %2846 = vmatmul.msk.f32.gmra.mxu0 %vm275_vm0, %v3858_v50  ;;  %2854 = vmatmul.msk.f32.gmra.mxu1 %vm275_vm0, %v3858_v50  ;;  %v1236_v17 = vmax.f32 %v1076_v56, 0.0  ;;  %v1237_v46 = vmax.f32 %v1117_v61, 0.0 }
 0x16d   : > { %2862 = vmatmul.msk.f32.gmra.mxu2 %vm275_vm0, %v3858_v50  ;;  %2870 = vmatmul.msk.f32.gmra.mxu3 %vm275_vm0, %v3858_v50 }
 0x16e   : > { %v1284_v36 = vmax.f32 %v1220_v45, %v1236_v17  ;;  %v1285_v18 = vmax.f32 %v1221_v35, %v1237_v46 }
 0x170   : > { %v1157_v14 = vpop.f32.mrf.mxu2  ;;  %v1198_v22 = vpop.f32.mrf.mxu3 }
 0x171   : > { %v1078_v53 = vpop.f32.mrf.mxu0  ;;  %v4139_v24 = vpop.f32.mrf.mxu1  ;;  %v1158_v48 = vadd.f32 %v1157_v14, %v3946_v23  ;;  %v1199_v55 = vadd.f32 %v1198_v22, %v3946_v23  ;;  %v2922_v22 = vld [vmem:[%s3076_s19 + $0x5b0] sm:$0xff] }
 0x172   : > { %v1079_v52 = vadd.f32 %v1078_v53, %v3930_v39  ;;  %v1120_v23 = vadd.f32 %v4139_v24, %v3930_v39  ;;  %v2923_v53 = vld [vmem:[%s3076_s19 + $0x5b8] sm:$0xff]  ;;  %2317 = vmatpush.msrb.mxu2 %v2922_v22 }
 0x173   : > { %v1239_v24 = vmax.f32 %v1199_v55, 0.0  ;;  %2358 = vmatpush.msrb.mxu3 %v2923_v53 }
 0x174   : > { %2847 = vmatmul.msk.f32.gmra.mxu0 %vm275_vm0, %v3884_v30  ;;  %2855 = vmatmul.msk.f32.gmra.mxu1 %vm275_vm0, %v3884_v30  ;;  %v1244_v8 = vmax.f32 %v1079_v52, 0.0  ;;  %v1245_v11 = vmax.f32 %v1120_v23, 0.0 }
 0x175   : > { %2863 = vmatmul.msk.f32.gmra.mxu2 %vm275_vm0, %v3884_v30  ;;  %2871 = vmatmul.msk.f32.gmra.mxu3 %vm275_vm0, %v3884_v30 }
 0x176   : > { %v1293_v23 = vmax.f32 %v1229_v43, %v1245_v11 }
 0x178   : > { %v4151_v12 = vpop.f32.mrf.mxu2  ;;  %v4153_v31 = vpop.f32.mrf.mxu3 }
 0x179   : > { %v1081_v59 = vpop.f32.mrf.mxu0  ;;  %v1122_v41 = vpop.f32.mrf.mxu1  ;;  %v1161_v17 = vadd.f32 %v4151_v12, %v3930_v39  ;;  %v1202_v12 = vadd.f32 %v4153_v31, %v3930_v39 }
 0x17a   : > { %v1082_v47 = vadd.f32 %v1081_v59, %v3966_v62  ;;  %v1123_v1 = vadd.f32 %v1122_v41, %v3966_v62  ;;  %v1238_v59 = vmax.f32 %v1158_v48, 0.0 }
 0x17c   : > { %2848 = vmatmul.msk.f32.gmra.mxu0 %vm275_vm0, %v3914_v57  ;;  %2856 = vmatmul.msk.f32.gmra.mxu1 %vm275_vm0, %v3914_v57  ;;  %v1252_v41 = vmax.f32 %v1082_v47, 0.0  ;;  %v1253_v29 = vmax.f32 %v1123_v1, 0.0  ;;  %v1286_v7 = vmax.f32 %v1222_v10, %v1238_v59  ;;  %v1287_v47 = vmax.f32 %v1223_v26, %v1239_v24 }
 0x17d   : > { %2864 = vmatmul.msk.f32.gmra.mxu2 %vm275_vm0, %v3914_v57  ;;  %2872 = vmatmul.msk.f32.gmra.mxu3 %vm275_vm0, %v3914_v57  ;;  %v1292_v1 = vmax.f32 %v1228_v54, %v1244_v8 }
 0x180   : > { %v4167_v40 = vpop.f32.mrf.mxu2  ;;  %v4169_v38 = vpop.f32.mrf.mxu3 }
 0x181   : > { %v4171_v42 = vpop.f32.mrf.mxu0  ;;  %v4173_v28 = vpop.f32.mrf.mxu1  ;;  %v1164_v56 = vadd.f32 %v4167_v40, %v3966_v62  ;;  %v1205_v33 = vadd.f32 %v4169_v38, %v3966_v62 }
 0x182   : > { %v1085_v61 = vadd.f32 %v4171_v42, %v4032_v60  ;;  %v1126_v45 = vadd.f32 %v4173_v28, %v4032_v60 }
 0x183   : > { %v1254_v52 = vmax.f32 %v1164_v56, 0.0 }
 0x184   : > { %2849 = vmatmul.msk.f32.gmra.mxu0 %vm275_vm0, %v3944_v4  ;;  %2857 = vmatmul.msk.f32.gmra.mxu1 %vm275_vm0, %v3944_v4  ;;  %v1260_v46 = vmax.f32 %v1085_v61, 0.0 }
 0x185   : > { %2865 = vmatmul.msk.f32.gmra.mxu2 %vm275_vm0, %v3944_v4  ;;  %2873 = vmatmul.msk.f32.gmra.mxu3 %vm275_vm0, %v3944_v4 }
 0x188   : > { %v4208_v20 = vpop.f32.mrf.mxu2  ;;  %v4210_v34 = vpop.f32.mrf.mxu3 }
 0x189   : > { %v1087_v63 = vpop.f32.mrf.mxu0  ;;  %v1128_v6 = vpop.f32.mrf.mxu1  ;;  %v1167_v22 = vadd.f32 %v4208_v20, %v4032_v60 }
 0x18a   : > { %v1088_v51 = vadd.f32 %v1087_v63, %v3987_v58  ;;  %v1129_v14 = vadd.f32 %v1128_v6, %v3987_v58  ;;  %v1255_v63 = vmax.f32 %v1205_v33, 0.0 }
 0x18b   : > { %v1262_v56 = vmax.f32 %v1167_v22, 0.0 }
 0x18c   : > { %v1268_v32 = vmax.f32 %v1088_v51, 0.0  ;;  %v1269_v25 = vmax.f32 %v1129_v14, 0.0  ;;  %2850 = vmatmul.msk.f32.gmra.mxu0 %vm275_vm0, %v4008_v0  ;;  %2858 = vmatmul.msk.f32.gmra.mxu1 %vm275_vm0, %v4008_v0  ;;  %v1261_v51 = vmax.f32 %v1126_v45, 0.0 }
 0x18d   : > { %2866 = vmatmul.msk.f32.gmra.mxu2 %vm275_vm0, %v4008_v0  ;;  %2874 = vmatmul.msk.f32.gmra.mxu3 %vm275_vm0, %v4008_v0 }
 0x18e   : > { %v1300_v19 = vmax.f32 %v1252_v41, %v1268_v32  ;;  %v1301_v15 = vmax.f32 %v1253_v29, %v1269_v25  ;;  %v2914_v29 = vld [vmem:[%s3076_s19 + $0x570] sm:$0xff]  ;;  %v2915_v32 = vld [vmem:[%s3076_s19 + $0x578] sm:$0xff]  ;;  %v1208_v25 = vadd.f32 %v4210_v34, %v4032_v60  ;;  %v1230_v34 = vmax.f32 %v4219_v37, 0.0 }
 0x18f   : > { %2318 = vmatpush.msrb.mxu2 %v2914_v29  ;;  %2359 = vmatpush.msrb.mxu3 %v2915_v32  ;;  %v2890_v29 = vld [vmem:[%s3076_s19 + $0x4b0] sm:$0xff]  ;;  %v2891_v32 = vld [vmem:[%s3076_s19 + $0x4b8] sm:$0xff] }
 0x190   : > { %v1316_v9 = vmax.f32 %v1284_v36, %v1300_v19  ;;  %v1317_v48 = vmax.f32 %v1285_v18, %v1301_v15  ;;  %v1169_v35 = vpop.f32.mrf.mxu2  ;;  %v1210_v2 = vpop.f32.mrf.mxu3  ;;  %v1246_v36 = vmax.f32 %v1161_v17, 0.0  ;;  %v1247_v19 = vmax.f32 %v1202_v12, 0.0 }
 0x191   : > { %v1170_v40 = vadd.f32 %v1169_v35, %v3987_v58  ;;  %v1211_v10 = vadd.f32 %v1210_v2, %v3987_v58  ;;  %v1090_v62 = vpop.f32.mrf.mxu0  ;;  %v1131_v38 = vpop.f32.mrf.mxu1  ;;  %v1263_v33 = vmax.f32 %v1208_v25, 0.0  ;;  %v2913_v35 = vld [vmem:[%s3076_s19 + $0x568] sm:$0xff]  ;;  %v2906_v2 = vld [vmem:[%s3076_s19 + $0x530] sm:$0xff]  ;;  %v2888_v25 = vld [vmem:[%s3076_s19 + $0x4a0] sm:$0xff] }
 0x192   : > { %v1330_v42 = vpack.c.bf16 %v1317_v48, %v1316_v9  ;;  %v1091_v55 = vadd.f32 %v1090_v62, %v4046_v5  ;;  %v1132_v28 = vadd.f32 %v1131_v38, %v4046_v5  ;;  %v1294_v45 = vmax.f32 %v1230_v34, %v1246_v36  ;;  %v2912_v48 = vld [vmem:[%s3076_s19 + $0x560] sm:$0xff]  ;;  %2277 = vmatpush.msrb.mxu1 %v2913_v35 }
 0x193   : > { %v1270_v6 = vmax.f32 %v1170_v40, 0.0  ;;  %v1271_v26 = vmax.f32 %v1211_v10, 0.0  ;;  %2236 = vmatpush.msrb.mxu0 %v2912_v48  ;;  %2319 = vmatpush.msrb.mxu2 %v2906_v2 }
 0x194   : > { %2758 = vst [vmem:[%s3556_s28 + $0x50] sm:$0xff] %v1330_v42  ;;  %v1276_v58 = vmax.f32 %v1091_v55, 0.0  ;;  %v1277_v14 = vmax.f32 %v1132_v28, 0.0  ;;  %2851 = vmatmul.msk.f32.gmra.mxu0 %vm275_vm0, %v4058_v16  ;;  %2859 = vmatmul.msk.f32.gmra.mxu1 %vm275_vm0, %v4058_v16  ;;  %v2904_v42 = vld [vmem:[%s3076_s19 + $0x520] sm:$0xff]  ;;  %v2905_v55 = vld [vmem:[%s3076_s19 + $0x528] sm:$0xff] }
 0x195   : > { %v1302_v54 = vmax.f32 %v1254_v52, %v1270_v6  ;;  %v1303_v59 = vmax.f32 %v1255_v63, %v1271_v26  ;;  %2867 = vmatmul.msk.f32.gmra.mxu2 %vm275_vm0, %v4058_v16  ;;  %2875 = vmatmul.msk.f32.gmra.mxu3 %vm275_vm0, %v4058_v16  ;;  %v2898_v26 = vld [vmem:[%s3076_s19 + $0x4f0] sm:$0xff] }
 0x196   : > { %v1308_v53 = vmax.f32 %v1260_v46, %v1276_v58  ;;  %v1309_v41 = vmax.f32 %v1261_v51, %v1277_v14  ;;  %2237 = vmatpush.msrb.mxu0 %v2904_v42  ;;  %2278 = vmatpush.msrb.mxu1 %v2905_v55  ;;  %v2899_v46 = vld [vmem:[%s3076_s19 + $0x4f8] sm:$0xff] }
 0x197   : > { %v1318_v39 = vmax.f32 %v1286_v7, %v1302_v54  ;;  %v1319_v31 = vmax.f32 %v1287_v47, %v1303_v59  ;;  %v1231_v7 = vmax.f32 %v4231_v3, 0.0  ;;  %v2907_v47 = vld [vmem:[%s3076_s19 + $0x538] sm:$0xff]  ;;  %2320 = vmatpush.msrb.mxu2 %v2898_v26  ;;  %v2897_v54 = vld [vmem:[%s3076_s19 + $0x4e8] sm:$0xff]  ;;  %v4347_v59 = vpop.permute.xlu1 %1412 }
 0x198   : > { %v1324_v24 = vmax.f32 %v1292_v1, %v1308_v53  ;;  %v1325_v8 = vmax.f32 %v1293_v23, %v1309_v41  ;;  %v1172_v18 = vpop.f32.mrf.mxu2  ;;  %v1213_v43 = vpop.f32.mrf.mxu3  ;;  %2360 = vmatpush.msrb.mxu3 %v2907_v47  ;;  %2279 = vmatpush.msrb.mxu1 %v2897_v54 }
 0x199   : > { %v1331_v20 = vpack.c.bf16 %v1319_v31, %v1318_v39  ;;  %v1173_v15 = vadd.f32 %v1172_v18, %v4046_v5  ;;  %v1214_v49 = vadd.f32 %v1213_v43, %v4046_v5  ;;  %v4273_v27 = vpop.f32.mrf.mxu0  ;;  %v4275_v60 = vpop.f32.mrf.mxu1  ;;  %v1295_v37 = vmax.f32 %v1231_v7, %v1247_v19  ;;  %2321 = vmatpush.msrb.mxu2 %v2890_v29 }
 0x19a   : > { %v1334_v11 = vpack.c.bf16 %v1325_v8, %v1324_v24  ;;  %2361 = vmatpush.msrb.mxu3 %v2899_v46  ;;  %v4361_v39 = vpop.permute.xlu2 %1417  ;;  %v4373_v43 = vpop.permute.xlu0 %1422  ;;  %v1492_v19 = vadd.f32 %v4273_v27, %v4347_v59 }
 0x19b   : > { %2759 = vst.msk [vmem:[%s3556_s28 + $0x58] sm:$0xff] %vm3782_vm3, %v1331_v20  ;;  %v1278_v61 = vmax.f32 %v1173_v15, 0.0  ;;  %v1279_v5 = vmax.f32 %v1214_v49, 0.0 }
 0x19c   : > { %2762 = vst [vmem:[%s3556_s28 + $0x70] sm:$0xff] %v1334_v11  ;;  %2932 = vmatmul.msk.f32.vlgmr.msra.gmra.mxu0 %vm275_vm0, %v3795_v13  ;;  %2940 = vmatmul.msk.f32.vlgmr.msra.gmra.mxu1 %vm275_vm0, %v3795_v13 }
 0x19d   : > { %v1310_v3 = vmax.f32 %v1262_v56, %v1278_v61  ;;  %v1311_v9 = vmax.f32 %v1263_v33, %v1279_v5  ;;  %2948 = vmatmul.msk.f32.vlgmr.msra.gmra.mxu2 %vm275_vm0, %v3795_v13  ;;  %2956 = vmatmul.msk.f32.vlgmr.msra.gmra.mxu3 %vm275_vm0, %v3795_v13  ;;  %v1802_v56 = vmax.f32 %v1492_v19, 0.0 }
 0x19e   : > { %2362 = vmatpush.msrb.mxu3 %v2891_v32 }
 0x19f   : > { %v1326_v1 = vmax.f32 %v1294_v45, %v1310_v3  ;;  %v1327_v40 = vmax.f32 %v1295_v37, %v1311_v9  ;;  %v4367_v31 = vpop.permute.xlu1 %1427 }
 0x1a0   : > { %v4295_v10 = vpop.f32.mrf.mxu2  ;;  %v4297_v62 = vpop.f32.mrf.mxu3 }
 0x1a1   : > { %v1335_v38 = vpack.c.bf16 %v1327_v40, %v1326_v1  ;;  %v4299_v13 = vpop.f32.mrf.mxu0  ;;  %v4301_v17 = vpop.f32.mrf.mxu1  ;;  %v1574_v20 = vadd.f32 %v4295_v10, %v4347_v59  ;;  %v1615_v15 = vadd.f32 %v4297_v62, %v4347_v59 }
 0x1a2   : > { %v4387_v49 = vpop.permute.xlu2 %1432  ;;  %v4397_v34 = vadd.f32 %v4299_v13, %v4361_v39  ;;  %v4401_v7 = vadd.f32 %v4301_v17, %v4361_v39 }
 0x1a3   : > { %2763 = vst.msk [vmem:[%s3556_s28 + $0x78] sm:$0xff] %vm3782_vm3, %v1335_v38  ;;  %v1804_v37 = vmax.f32 %v1574_v20, 0.0  ;;  %v1805_v3 = vmax.f32 %v1615_v15, 0.0 }
 0x1a4   : > { %2933 = vmatmul.msk.f32.gmra.mxu0 %vm275_vm0, %v3832_v21  ;;  %2941 = vmatmul.msk.f32.gmra.mxu1 %vm275_vm0, %v3832_v21  ;;  %v1810_v38 = vmax.f32 %v4397_v34, 0.0  ;;  %v1811_v17 = vmax.f32 %v4401_v7, 0.0 }
 0x1a5   : > { %2949 = vmatmul.msk.f32.gmra.mxu2 %vm275_vm0, %v3832_v21  ;;  %2957 = vmatmul.msk.f32.gmra.mxu3 %vm275_vm0, %v3832_v21  ;;  %v1990_v21 = vld [vmem:[%s4761_s2 + $0x10] sm:$0xff] }
 0x1a6   : > { %2008 = vperm.xlu2 %3019, %v1990_v21  }
 0x1a7   : > { %v4403_v11 = vpop.permute.xlu1 %1442 }
 0x1a8   : > { %v4316_v28 = vpop.f32.mrf.mxu2  ;;  %v4318_v52 = vpop.f32.mrf.mxu3 }
 0x1a9   : > { %v1497_v63 = vpop.f32.mrf.mxu0  ;;  %v1538_v6 = vpop.f32.mrf.mxu1  ;;  %v4427_v26 = vadd.f32 %v4316_v28, %v4361_v39  ;;  %v4431_v46 = vadd.f32 %v4318_v52, %v4361_v39 }
 0x1aa   : > { %v1498_v27 = vadd.f32 %v1497_v63, %v4373_v43  ;;  %v4444_v32 = vpop.permute.xlu2 %1447 }
 0x1ac   : > { %2934 = vmatmul.msk.f32.gmra.mxu0 %vm275_vm0, %v3858_v50  ;;  %2942 = vmatmul.msk.f32.gmra.mxu1 %vm275_vm0, %v3858_v50  ;;  %v1818_v47 = vmax.f32 %v1498_v27, 0.0 }
 0x1ad   : > { %2950 = vmatmul.msk.f32.gmra.mxu2 %vm275_vm0, %v3858_v50  ;;  %2958 = vmatmul.msk.f32.gmra.mxu3 %vm275_vm0, %v3858_v50  ;;  %v2896_v50 = vld [vmem:[%s3076_s19 + $0x4e0] sm:$0xff] }
 0x1ae   : > { %2238 = vmatpush.msrb.mxu0 %v2896_v50  ;;  %v1866_v28 = vmax.f32 %v1802_v56, %v1818_v47 }
 0x1b0   : > { %v1579_v51 = vpop.f32.mrf.mxu2  ;;  %v1620_v58 = vpop.f32.mrf.mxu3  ;;  %2239 = vmatpush.msrb.mxu0 %v2888_v25 }
 0x1b1   : > { %v4333_v14 = vpop.f32.mrf.mxu0  ;;  %v4335_v12 = vpop.f32.mrf.mxu1  ;;  %v1580_v9 = vadd.f32 %v1579_v51, %v4373_v43  ;;  %v1621_v48 = vadd.f32 %v1620_v58, %v4373_v43 }
 0x1b2   : > { %v1501_v62 = vadd.f32 %v4333_v14, %v4367_v31  ;;  %v1542_v13 = vadd.f32 %v4335_v12, %v4367_v31  ;;  %v4433_v58 = vpop.permute.xlu0 %1437  ;;  %v1993_v14 = vld [vmem:[%s4761_s2 + $0x28] sm:$0xff] }
 0x1b3   : > { %v1820_v21 = vmax.f32 %v1580_v9, 0.0  ;;  %v1821_v51 = vmax.f32 %v1621_v48, 0.0  ;;  %2023 = vperm.xlu2 %3019, %v1993_v14  }
 0x1b4   : > { %2935 = vmatmul.msk.f32.gmra.mxu0 %vm275_vm0, %v3884_v30  ;;  %2943 = vmatmul.msk.f32.gmra.mxu1 %vm275_vm0, %v3884_v30  ;;  %v1826_v52 = vmax.f32 %v1501_v62, 0.0 }
 0x1b5   : > { %2951 = vmatmul.msk.f32.gmra.mxu2 %vm275_vm0, %v3884_v30  ;;  %2959 = vmatmul.msk.f32.gmra.mxu3 %vm275_vm0, %v3884_v30  ;;  %v2889_v30 = vld [vmem:[%s3076_s19 + $0x4a8] sm:$0xff]  ;;  %v1868_v15 = vmax.f32 %v1804_v37, %v1820_v21  ;;  %v1869_v27 = vmax.f32 %v1805_v3, %v1821_v51 }
 0x1b6   : > { %2280 = vmatpush.msrb.mxu1 %v2889_v30 }
 0x1b8   : > { %v4349_v23 = vpop.f32.mrf.mxu2  ;;  %v4351_v22 = vpop.f32.mrf.mxu3 }
 0x1b9   : > { %v1503_v53 = vpop.f32.mrf.mxu0  ;;  %v1544_v41 = vpop.f32.mrf.mxu1  ;;  %v1583_v7 = vadd.f32 %v4349_v23, %v4367_v31  ;;  %v1624_v23 = vadd.f32 %v4351_v22, %v4367_v31 }
 0x1ba   : > { %v1545_v45 = vadd.f32 %v1544_v41, %v4387_v49 }
 0x1bc   : > { %2936 = vmatmul.msk.f32.gmra.mxu0 %vm275_vm0, %v3914_v57  ;;  %2944 = vmatmul.msk.f32.gmra.mxu1 %vm275_vm0, %v3914_v57  ;;  %v1835_v63 = vmax.f32 %v1545_v45, 0.0 }
 0x1bd   : > { %2952 = vmatmul.msk.f32.gmra.mxu2 %vm275_vm0, %v3914_v57  ;;  %2960 = vmatmul.msk.f32.gmra.mxu3 %vm275_vm0, %v3914_v57  ;;  %v1533_v57 = vadd.f32 %v4275_v60, %v4347_v59  ;;  %v1539_v60 = vadd.f32 %v1538_v6, %v4373_v43 }
 0x1bf   : > { %v1803_v33 = vmax.f32 %v1533_v57, 0.0  ;;  %v1819_v1 = vmax.f32 %v1539_v60, 0.0 }
 0x1c0   : > { %v1585_v36 = vpop.f32.mrf.mxu2  ;;  %v1626_v24 = vpop.f32.mrf.mxu3 }
 0x1c1   : > { %v4369_v8 = vpop.f32.mrf.mxu0  ;;  %v4371_v18 = vpop.f32.mrf.mxu1  ;;  %v1867_v12 = vmax.f32 %v1803_v33, %v1819_v1  ;;  %v1586_v41 = vadd.f32 %v1585_v36, %v4387_v49  ;;  %v1627_v29 = vadd.f32 %v1626_v24, %v4387_v49  ;;  %v1874_v1 = vmax.f32 %v1810_v38, %v1826_v52 }
 0x1c2   : > { %v1507_v57 = vadd.f32 %v4369_v8, %v4433_v58  ;;  %v1548_v20 = vadd.f32 %v4371_v18, %v4433_v58 }
 0x1c3   : > { %v1837_v45 = vmax.f32 %v1627_v29, 0.0 }
 0x1c4   : > { %2937 = vmatmul.msk.f32.gmra.mxu0 %vm275_vm0, %v3944_v4  ;;  %2945 = vmatmul.msk.f32.gmra.mxu1 %vm275_vm0, %v3944_v4  ;;  %v1842_v37 = vmax.f32 %v1507_v57, 0.0  ;;  %v1843_v48 = vmax.f32 %v1548_v20, 0.0 }
 0x1c5   : > { %2953 = vmatmul.msk.f32.gmra.mxu2 %vm275_vm0, %v3944_v4  ;;  %2961 = vmatmul.msk.f32.gmra.mxu3 %vm275_vm0, %v3944_v4  ;;  %v1504_v4 = vadd.f32 %v1503_v53, %v4387_v49  ;;  %v1827_v53 = vmax.f32 %v1542_v13, 0.0 }
 0x1c7   : > { %v1834_v42 = vmax.f32 %v1504_v4, 0.0  ;;  %v1836_v4 = vmax.f32 %v1586_v41, 0.0 }
 0x1c8   : > { %v4405_v61 = vpop.f32.mrf.mxu2  ;;  %v4407_v5 = vpop.f32.mrf.mxu3 }
 0x1c9   : > { %v1509_v35 = vpop.f32.mrf.mxu0  ;;  %v1550_v2 = vpop.f32.mrf.mxu1  ;;  %v1589_v13 = vadd.f32 %v4405_v61, %v4433_v58 }
 0x1ca   : > { %v1510_v40 = vadd.f32 %v1509_v35, %v4403_v11  ;;  %v1551_v10 = vadd.f32 %v1550_v2, %v4403_v11 }
 0x1cb   : > { %v1844_v52 = vmax.f32 %v1589_v13, 0.0 }
 0x1cc   : > { %v1850_v55 = vmax.f32 %v1510_v40, 0.0  ;;  %v1851_v6 = vmax.f32 %v1551_v10, 0.0  ;;  %2938 = vmatmul.msk.f32.gmra.mxu0 %vm275_vm0, %v4008_v0  ;;  %2946 = vmatmul.msk.f32.gmra.mxu1 %vm275_vm0, %v4008_v0  ;;  %v1875_v40 = vmax.f32 %v1811_v17, %v1827_v53 }
 0x1cd   : > { %2954 = vmatmul.msk.f32.gmra.mxu2 %vm275_vm0, %v4008_v0  ;;  %2962 = vmatmul.msk.f32.gmra.mxu3 %vm275_vm0, %v4008_v0 }
 0x1ce   : > { %v1882_v50 = vmax.f32 %v1834_v42, %v1850_v55  ;;  %v1883_v54 = vmax.f32 %v1835_v63, %v1851_v6  ;;  %v1630_v42 = vadd.f32 %v4407_v5, %v4433_v58  ;;  %v1828_v63 = vmax.f32 %v1583_v7, 0.0 }
 0x1cf   : > { %v1812_v5 = vmax.f32 %v4427_v26, 0.0 }
 0x1d0   : > { %v1898_v25 = vmax.f32 %v1866_v28, %v1882_v50  ;;  %v1899_v30 = vmax.f32 %v1867_v12, %v1883_v54  ;;  %v1591_v0 = vpop.f32.mrf.mxu2  ;;  %v1632_v19 = vpop.f32.mrf.mxu3  ;;  %v1813_v50 = vmax.f32 %v4431_v46, 0.0  ;;  %v1845_v53 = vmax.f32 %v1630_v42, 0.0  ;;  %v3025_v42 = vld [vmem:[%s4760_s1 + $0x28] sm:$0xff] }
 0x1d1   : > { %v1592_v60 = vadd.f32 %v1591_v0, %v4403_v11  ;;  %v1633_v36 = vadd.f32 %v1632_v19, %v4403_v11  ;;  %v1512_v24 = vpop.f32.mrf.mxu0  ;;  %v1553_v34 = vpop.f32.mrf.mxu1 }
 0x1d2   : > { %v1914_v56 = vpack.c.bf16 %v1899_v30, %v1898_v25  ;;  %v1513_v33 = vadd.f32 %v1512_v24, %v4444_v32  ;;  %v1554_v8 = vadd.f32 %v1553_v34, %v4444_v32  ;;  %v1876_v25 = vmax.f32 %v1812_v5, %v1828_v63  ;;  %v3020_v30 = vld [vmem:[%s4760_s1] sm:$0xff]  ;;  %v3021_v24 = vld [vmem:[%s4760_s1 + $0x8] sm:$0xff] }
 0x1d3   : > { %v1852_v9 = vmax.f32 %v1592_v60, 0.0  ;;  %v1853_v18 = vmax.f32 %v1633_v36, 0.0 }
 0x1d4   : > { %2876 = vst [vmem:[%s3556_s28 + $0x80] sm:$0xff] %v1914_v56  ;;  %v1858_v3 = vmax.f32 %v1513_v33, 0.0  ;;  %v1859_v35 = vmax.f32 %v1554_v8, 0.0  ;;  %2939 = vmatmul.msk.f32.gmra.mxu0 %vm275_vm0, %v4058_v16  ;;  %2947 = vmatmul.msk.f32.gmra.mxu1 %vm275_vm0, %v4058_v16  ;;  %v3022_v8 = vld [vmem:[%s4760_s1 + $0x10] sm:$0xff] }
 0x1d5   : > { %v1884_v2 = vmax.f32 %v1836_v4, %v1852_v9  ;;  %v1885_v47 = vmax.f32 %v1837_v45, %v1853_v18  ;;  %2955 = vmatmul.msk.f32.gmra.mxu2 %vm275_vm0, %v4058_v16  ;;  %2963 = vmatmul.msk.f32.gmra.mxu3 %vm275_vm0, %v4058_v16  ;;  %v1829_v16 = vmax.f32 %v1624_v23, 0.0 }
 0x1d6   : > { %v1890_v10 = vmax.f32 %v1842_v37, %v1858_v3  ;;  %v1891_v62 = vmax.f32 %v1843_v48, %v1859_v35  ;;  %v3023_v37 = vld [vmem:[%s4760_s1 + $0x18] sm:$0xff] }
 0x1d7   : > { %v1900_v55 = vmax.f32 %v1868_v15, %v1884_v2  ;;  %v1901_v22 = vmax.f32 %v1869_v27, %v1885_v47  ;;  %v1877_v26 = vmax.f32 %v1813_v50, %v1829_v16  ;;  %v3024_v2 = vld [vmem:[%s4760_s1 + $0x20] sm:$0xff] }
 0x1d8   : > { %v1906_v6 = vmax.f32 %v1874_v1, %v1890_v10  ;;  %v1907_v21 = vmax.f32 %v1875_v40, %v1891_v62  ;;  %v1594_v51 = vpop.f32.mrf.mxu2  ;;  %v1635_v14 = vpop.f32.mrf.mxu3 }
 0x1d9   : > { %v1915_v38 = vpack.c.bf16 %v1901_v22, %v1900_v55  ;;  %v1595_v17 = vadd.f32 %v1594_v51, %v4444_v32  ;;  %v1636_v28 = vadd.f32 %v1635_v14, %v4444_v32  ;;  %v4473_v12 = vpop.f32.mrf.mxu0  ;;  %v4475_v61 = vpop.f32.mrf.mxu1 }
 0x1da   : > { %v1918_v54 = vpack.c.bf16 %v1907_v21, %v1906_v6  ;;  %v1656_v62 = vadd.f32 %v4473_v12, %v4347_v59  ;;  %v1697_v13 = vadd.f32 %v4475_v61, %v4347_v59 }
 0x1db   : > { %2877 = vst [vmem:[%s3556_s28 + $0x88] sm:$0xff] %v1915_v38  ;;  %v1860_v41 = vmax.f32 %v1595_v17, 0.0  ;;  %v1861_v29 = vmax.f32 %v1636_v28, 0.0 }
 0x1dc   : > { %2880 = vst [vmem:[%s3556_s28 + $0xa0] sm:$0xff] %v1918_v54  ;;  %2964 = vmatmul.msk.f32.vlgmr.msrb.gmra.mxu0 %vm275_vm0, %v3020_v30  ;;  %2972 = vmatmul.msk.f32.vlgmr.msrb.gmra.mxu1 %vm275_vm0, %v3020_v30  ;;  %v1806_v14 = vmax.f32 %v1656_v62, 0.0  ;;  %v1807_v16 = vmax.f32 %v1697_v13, 0.0 }
 0x1dd   : > { %v1892_v0 = vmax.f32 %v1844_v52, %v1860_v41  ;;  %v1893_v46 = vmax.f32 %v1845_v53, %v1861_v29  ;;  %2980 = vmatmul.msk.f32.vlgmr.msrb.gmra.mxu2 %vm275_vm0, %v3020_v30  ;;  %2988 = vmatmul.msk.f32.vlgmr.msrb.gmra.mxu3 %vm275_vm0, %v3020_v30 }
 0x1df   : > { %v1908_v19 = vmax.f32 %v1876_v25, %v1892_v0  ;;  %v1909_v57 = vmax.f32 %v1877_v26, %v1893_v46 }
 0x1e0   : > { %v1737_v20 = vpop.f32.mrf.mxu2  ;;  %v1778_v15 = vpop.f32.mrf.mxu3 }
 0x1e1   : > { %v1919_v27 = vpack.c.bf16 %v1909_v57, %v1908_v19  ;;  %v1658_v60 = vpop.f32.mrf.mxu0  ;;  %v1699_v36 = vpop.f32.mrf.mxu1  ;;  %v1738_v55 = vadd.f32 %v1737_v20, %v4347_v59  ;;  %v1779_v22 = vadd.f32 %v1778_v15, %v4347_v59  ;;  %v3026_v15 = vld [vmem:[%s4760_s1 + $0x30] sm:$0xff] }
 0x1e2   : > { %v4541_v21 = vadd.f32 %v1658_v60, %v4361_v39  ;;  %v4544_v51 = vadd.f32 %v1699_v36, %v4361_v39 }
 0x1e3   : > { %2881 = vst [vmem:[%s3556_s28 + $0xa8] sm:$0xff] %v1919_v27  ;;  %v1808_v12 = vmax.f32 %v1738_v55, 0.0  ;;  %v1809_v61 = vmax.f32 %v1779_v22, 0.0 }
 0x1e4   : > { %2965 = vmatmul.msk.f32.gmra.mxu0 %vm275_vm0, %v3021_v24  ;;  %2973 = vmatmul.msk.f32.gmra.mxu1 %vm275_vm0, %v3021_v24  ;;  %v1814_v30 = vmax.f32 %v4541_v21, 0.0  ;;  %v1815_v26 = vmax.f32 %v4544_v51, 0.0 }
 0x1e5   : > { %2981 = vmatmul.msk.f32.gmra.mxu2 %vm275_vm0, %v3021_v24  ;;  %2989 = vmatmul.msk.f32.gmra.mxu3 %vm275_vm0, %v3021_v24 }
 0x1e8   : > { %v4496_v34 = vpop.f32.mrf.mxu2  ;;  %v4498_v7 = vpop.f32.mrf.mxu3 }
 0x1e9   : > { %v1661_v56 = vpop.f32.mrf.mxu0  ;;  %v1702_v33 = vpop.f32.mrf.mxu1  ;;  %v4567_v27 = vadd.f32 %v4496_v34, %v4361_v39  ;;  %v4571_v60 = vadd.f32 %v4498_v7, %v4361_v39 }
 0x1ea   : > { %v1662_v63 = vadd.f32 %v1661_v56, %v4373_v43  ;;  %v1703_v6 = vadd.f32 %v1702_v33, %v4373_v43 }
 0x1ec   : > { %2966 = vmatmul.msk.f32.gmra.mxu0 %vm275_vm0, %v3022_v8  ;;  %2974 = vmatmul.msk.f32.gmra.mxu1 %vm275_vm0, %v3022_v8  ;;  %v1822_v53 = vmax.f32 %v1662_v63, 0.0  ;;  %v1823_v41 = vmax.f32 %v1703_v6, 0.0 }
 0x1ed   : > { %2982 = vmatmul.msk.f32.gmra.mxu2 %vm275_vm0, %v3022_v8  ;;  %2990 = vmatmul.msk.f32.gmra.mxu3 %vm275_vm0, %v3022_v8 }
 0x1ee   : > { %v1870_v56 = vmax.f32 %v1806_v14, %v1822_v53  ;;  %v1871_v33 = vmax.f32 %v1807_v16, %v1823_v41 }
 0x1f0   : > { %v1743_v4 = vpop.f32.mrf.mxu2  ;;  %v1784_v45 = vpop.f32.mrf.mxu3 }
 0x1f1   : > { %v1664_v9 = vpop.f32.mrf.mxu0  ;;  %v1705_v18 = vpop.f32.mrf.mxu1  ;;  %v1744_v5 = vadd.f32 %v1743_v4, %v4373_v43  ;;  %v1785_v50 = vadd.f32 %v1784_v45, %v4373_v43 }
 0x1f2   : > { %v1665_v0 = vadd.f32 %v1664_v9, %v4367_v31  ;;  %v1706_v46 = vadd.f32 %v1705_v18, %v4367_v31 }
 0x1f3   : > { %v1824_v36 = vmax.f32 %v1744_v5, 0.0  ;;  %v1825_v24 = vmax.f32 %v1785_v50, 0.0 }
 0x1f4   : > { %2967 = vmatmul.msk.f32.gmra.mxu0 %vm275_vm0, %v3023_v37  ;;  %2975 = vmatmul.msk.f32.gmra.mxu1 %vm275_vm0, %v3023_v37  ;;  %v1830_v45 = vmax.f32 %v1665_v0, 0.0  ;;  %v1831_v9 = vmax.f32 %v1706_v46, 0.0 }
 0x1f5   : > { %2983 = vmatmul.msk.f32.gmra.mxu2 %vm275_vm0, %v3023_v37  ;;  %2991 = vmatmul.msk.f32.gmra.mxu3 %vm275_vm0, %v3023_v37  ;;  %v1872_v62 = vmax.f32 %v1808_v12, %v1824_v36  ;;  %v1873_v13 = vmax.f32 %v1809_v61, %v1825_v24 }
 0x1f6   : > { %v1878_v5 = vmax.f32 %v1814_v30, %v1830_v45  ;;  %v1879_v50 = vmax.f32 %v1815_v26, %v1831_v9 }
 0x1f8   : > { %v4514_v3 = vpop.f32.mrf.mxu2  ;;  %v4516_v48 = vpop.f32.mrf.mxu3 }
 0x1f9   : > { %v1667_v35 = vpop.f32.mrf.mxu0  ;;  %v1708_v23 = vpop.f32.mrf.mxu1 }
 0x1fa   : > { %v1668_v38 = vadd.f32 %v1667_v35, %v4387_v49  ;;  %v1709_v59 = vadd.f32 %v1708_v23, %v4387_v49 }
 0x1fc   : > { %2968 = vmatmul.msk.f32.gmra.mxu0 %vm275_vm0, %v3024_v2  ;;  %2976 = vmatmul.msk.f32.gmra.mxu1 %vm275_vm0, %v3024_v2  ;;  %v1838_v19 = vmax.f32 %v1668_v38, 0.0  ;;  %v1839_v57 = vmax.f32 %v1709_v59, 0.0 }
 0x1fd   : > { %2984 = vmatmul.msk.f32.gmra.mxu2 %vm275_vm0, %v3024_v2  ;;  %2992 = vmatmul.msk.f32.gmra.mxu3 %vm275_vm0, %v3024_v2 }
 0x200   : > { %v1749_v47 = vpop.f32.mrf.mxu2  ;;  %v1790_v1 = vpop.f32.mrf.mxu3 }
 0x201   : > { %v1670_v40 = vpop.f32.mrf.mxu0  ;;  %v1711_v10 = vpop.f32.mrf.mxu1  ;;  %v1750_v18 = vadd.f32 %v1749_v47, %v4387_v49  ;;  %v1791_v34 = vadd.f32 %v1790_v1, %v4387_v49  ;;  %v1747_v49 = vadd.f32 %v4514_v3, %v4367_v31  ;;  %v1788_v3 = vadd.f32 %v4516_v48, %v4367_v31 }
 0x202   : > { %v1671_v37 = vadd.f32 %v1670_v40, %v4433_v58  ;;  %v1712_v39 = vadd.f32 %v1711_v10, %v4433_v58 }
 0x203   : > { %v1840_v10 = vmax.f32 %v1750_v18, 0.0  ;;  %v1841_v6 = vmax.f32 %v1791_v34, 0.0  ;;  %v1832_v0 = vmax.f32 %v1747_v49, 0.0 }
 0x204   : > { %2969 = vmatmul.msk.f32.gmra.mxu0 %vm275_vm0, %v3025_v42  ;;  %2977 = vmatmul.msk.f32.gmra.mxu1 %vm275_vm0, %v3025_v42  ;;  %v1846_v14 = vmax.f32 %v1671_v37, 0.0  ;;  %v1847_v16 = vmax.f32 %v1712_v39, 0.0 }
 0x205   : > { %2985 = vmatmul.msk.f32.gmra.mxu2 %vm275_vm0, %v3025_v42  ;;  %2993 = vmatmul.msk.f32.gmra.mxu3 %vm275_vm0, %v3025_v42 }
 0x208   : > { %v4548_v17 = vpop.f32.mrf.mxu2  ;;  %v4550_v28 = vpop.f32.mrf.mxu3 }
 0x209   : > { %v1673_v54 = vpop.f32.mrf.mxu0  ;;  %v1714_v52 = vpop.f32.mrf.mxu1  ;;  %v1753_v53 = vadd.f32 %v4548_v17, %v4433_v58  ;;  %v1794_v41 = vadd.f32 %v4550_v28, %v4433_v58  ;;  %v1817_v58 = vmax.f32 %v4571_v60, 0.0 }
 0x20a   : > { %v1674_v29 = vadd.f32 %v1673_v54, %v4403_v11  ;;  %v1715_v25 = vadd.f32 %v1714_v52, %v4403_v11 }
 0x20b   : > { %v1848_v36 = vmax.f32 %v1753_v53, 0.0  ;;  %v1849_v24 = vmax.f32 %v1794_v41, 0.0 }
 0x20c   : > { %v1854_v20 = vmax.f32 %v1674_v29, 0.0  ;;  %v1855_v43 = vmax.f32 %v1715_v25, 0.0  ;;  %2970 = vmatmul.msk.f32.gmra.mxu0 %vm275_vm0, %v3026_v15  ;;  %2978 = vmatmul.msk.f32.gmra.mxu1 %vm275_vm0, %v3026_v15 }
 0x20d   : > { %2986 = vmatmul.msk.f32.gmra.mxu2 %vm275_vm0, %v3026_v15  ;;  %2994 = vmatmul.msk.f32.gmra.mxu3 %vm275_vm0, %v3026_v15  ;;  %v1816_v15 = vmax.f32 %v4567_v27, 0.0 }
 0x20e   : > { %v1886_v8 = vmax.f32 %v1838_v19, %v1854_v20  ;;  %v1887_v4 = vmax.f32 %v1839_v57, %v1855_v43  ;;  %v1833_v57 = vmax.f32 %v1788_v3, 0.0 }
 0x210   : > { %v1902_v7 = vmax.f32 %v1870_v56, %v1886_v8  ;;  %v1903_v35 = vmax.f32 %v1871_v33, %v1887_v4  ;;  %v1755_v23 = vpop.f32.mrf.mxu2  ;;  %v1796_v2 = vpop.f32.mrf.mxu3  ;;  %v1880_v8 = vmax.f32 %v1816_v15, %v1832_v0  ;;  %v1881_v4 = vmax.f32 %v1817_v58, %v1833_v57 }
 0x211   : > { %v1756_v42 = vadd.f32 %v1755_v23, %v4403_v11  ;;  %v1797_v55 = vadd.f32 %v1796_v2, %v4403_v11  ;;  %v1676_v22 = vpop.f32.mrf.mxu0  ;;  %v1717_v63 = vpop.f32.mrf.mxu1  ;;  %v3027_v11 = vld [vmem:[%s4760_s1 + $0x38] sm:$0xff] }
 0x212   : > { %v1916_v47 = vpack.c.bf16 %v1903_v35, %v1902_v7  ;;  %v1677_v1 = vadd.f32 %v1676_v22, %v4444_v32  ;;  %v1718_v40 = vadd.f32 %v1717_v63, %v4444_v32  ;;  %v4610_v22 = vpop.permute.xlu0 %1998 }
 0x213   : > { %v1856_v21 = vmax.f32 %v1756_v42, 0.0  ;;  %v1857_v51 = vmax.f32 %v1797_v55, 0.0 }
 0x214   : > { %2878 = vst [vmem:[%s3556_s28 + $0x90] sm:$0xff] %v1916_v47  ;;  %v1862_v38 = vmax.f32 %v1677_v1, 0.0  ;;  %v1863_v59 = vmax.f32 %v1718_v40, 0.0  ;;  %2971 = vmatmul.msk.f32.gmra.mxu0 %vm275_vm0, %v3027_v11  ;;  %2979 = vmatmul.msk.f32.gmra.mxu1 %vm275_vm0, %v3027_v11  ;;  %v4616_v40 = vpop.permute.xlu1 %2003 }
 0x215   : > { %v1888_v12 = vmax.f32 %v1840_v10, %v1856_v21  ;;  %v1889_v61 = vmax.f32 %v1841_v6, %v1857_v51  ;;  %2987 = vmatmul.msk.f32.gmra.mxu2 %vm275_vm0, %v3027_v11  ;;  %2995 = vmatmul.msk.f32.gmra.mxu3 %vm275_vm0, %v3027_v11 }
 0x216   : > { %v1894_v54 = vmax.f32 %v1846_v14, %v1862_v38  ;;  %v1895_v52 = vmax.f32 %v1847_v16, %v1863_v59  ;;  %v4620_v16 = vpop.permute.xlu2 %2008 }
 0x217   : > { %v1904_v29 = vmax.f32 %v1872_v62, %v1888_v12  ;;  %v1905_v25 = vmax.f32 %v1873_v13, %v1889_v61 }
 0x218   : > { %v1910_v31 = vmax.f32 %v1878_v5, %v1894_v54  ;;  %v1911_v48 = vmax.f32 %v1879_v50, %v1895_v52  ;;  %v1758_v46 = vpop.f32.mrf.mxu2  ;;  %v1799_v19 = vpop.f32.mrf.mxu3 }
 0x219   : > { %v1917_v30 = vpack.c.bf16 %v1905_v25, %v1904_v29  ;;  %v1759_v26 = vadd.f32 %v1758_v46, %v4444_v32  ;;  %v1800_v20 = vadd.f32 %v1799_v19, %v4444_v32  ;;  %v2077_v43 = vpop.f32.mrf.mxu0  ;;  %v2118_v17 = vpop.f32.mrf.mxu1 }
 0x21a   : > { %v1920_v28 = vpack.c.bf16 %v1911_v48, %v1910_v31  ;;  %v4618_v10 = vpop.permute.xlu0 %2013  ;;  %v2078_v38 = vadd.f32 %v2077_v43, %v4610_v22  ;;  %v2119_v3 = vadd.f32 %v2118_v17, %v4610_v22 }
 0x21b   : > { %2879 = vst.msk [vmem:[%s3556_s28 + $0x98] sm:$0xff] %vm3782_vm3, %v1917_v30  ;;  %v1864_v56 = vmax.f32 %v1759_v26, 0.0  ;;  %v1865_v33 = vmax.f32 %v1800_v20, 0.0 }
 0x21c   : > { %2882 = vst [vmem:[%s3556_s28 + $0xb0] sm:$0xff] %v1920_v28  ;;  %v4628_v12 = vpop.permute.xlu1 %2018  ;;  %v2388_v53 = vmax.f32 %v2078_v38, 0.0  ;;  %v2389_v46 = vmax.f32 %v2119_v3, 0.0 }
 0x21d   : > { %v1896_v45 = vmax.f32 %v1848_v36, %v1864_v56  ;;  %v1897_v32 = vmax.f32 %v1849_v24, %v1865_v33 }
 0x21f   : > { %v1912_v9 = vmax.f32 %v1880_v8, %v1896_v45  ;;  %v1913_v18 = vmax.f32 %v1881_v4, %v1897_v32 }
 0x220   : > { %v2159_v34 = vpop.f32.mrf.mxu2  ;;  %v2200_v27 = vpop.f32.mrf.mxu3 }
 0x221   : > { %v1921_v37 = vpack.c.bf16 %v1913_v18, %v1912_v9  ;;  %v2080_v60 = vpop.f32.mrf.mxu0  ;;  %v2121_v39 = vpop.f32.mrf.mxu1  ;;  %v2160_v59 = vadd.f32 %v2159_v34, %v4610_v22  ;;  %v4625_v11 = vadd.f32 %v2200_v27, %v4610_v22 }
 0x222   : > { %v4633_v50 = vadd.f32 %v2080_v60, %v4616_v40  ;;  %v4636_v54 = vadd.f32 %v2121_v39, %v4616_v40  ;;  %v4638_v52 = vpop.permute.xlu0 %2028  ;;  %v4661_v18 = vpop.permute.xlu2 %2023 }
 0x223   : > { %2883 = vst.msk [vmem:[%s3556_s28 + $0xb8] sm:$0xff] %vm3782_vm3, %v1921_v37  ;;  %v2390_v31 = vmax.f32 %v2160_v59, 0.0  ;;  %v2391_v48 = vmax.f32 %v4625_v11, 0.0 }
 0x224   : > { %v2396_v28 = vmax.f32 %v4633_v50, 0.0  ;;  %v2397_v36 = vmax.f32 %v4636_v54, 0.0 }
 0x228   : > { %v2162_v7 = vpop.f32.mrf.mxu2  ;;  %v2203_v35 = vpop.f32.mrf.mxu3 }
 0x229   : > { %v2083_v23 = vpop.f32.mrf.mxu0  ;;  %v2124_v2 = vpop.f32.mrf.mxu1  ;;  %v4655_v4 = vadd.f32 %v2162_v7, %v4616_v40  ;;  %v4658_v45 = vadd.f32 %v2203_v35, %v4616_v40 }
 0x22a   : > { %v2084_v61 = vadd.f32 %v2083_v23, %v4620_v16  ;;  %v2125_v5 = vadd.f32 %v2124_v2, %v4620_v16  ;;  %v4665_v7 = vpop.permute.xlu1 %2033 }
 0x22c   : > { %v2404_v26 = vmax.f32 %v2084_v61, 0.0  ;;  %v2405_v20 = vmax.f32 %v2125_v5, 0.0 }
 0x22e   : > { %v2452_v34 = vmax.f32 %v2388_v53, %v2404_v26  ;;  %v2453_v27 = vmax.f32 %v2389_v46, %v2405_v20 }
 0x230   : > { %v2165_v62 = vpop.f32.mrf.mxu2  ;;  %v2206_v13 = vpop.f32.mrf.mxu3 }
 0x231   : > { %v2086_v42 = vpop.f32.mrf.mxu0  ;;  %v2127_v55 = vpop.f32.mrf.mxu1  ;;  %v2166_v19 = vadd.f32 %v2165_v62, %v4620_v16  ;;  %v2207_v15 = vadd.f32 %v2206_v13, %v4620_v16 }
 0x232   : > { %v2087_v58 = vadd.f32 %v2086_v42, %v4618_v10  ;;  %v2128_v9 = vadd.f32 %v2127_v55, %v4618_v10 }
 0x233   : > { %v2406_v32 = vmax.f32 %v2166_v19, 0.0  ;;  %v2407_v39 = vmax.f32 %v2207_v15, 0.0 }
 0x234   : > { %v2412_v23 = vmax.f32 %v2087_v58, 0.0  ;;  %v2413_v59 = vmax.f32 %v2128_v9, 0.0 }
 0x235   : > { %v2454_v38 = vmax.f32 %v2390_v31, %v2406_v32 }
 0x236   : > { %v2460_v20 = vmax.f32 %v2396_v28, %v2412_v23 }
 0x238   : > { %v4612_v63 = vpop.f32.mrf.mxu2  ;;  %v4614_v49 = vpop.f32.mrf.mxu3 }
 0x239   : > { %v2089_v47 = vpop.f32.mrf.mxu0  ;;  %v2130_v1 = vpop.f32.mrf.mxu1 }
 0x23a   : > { %v2090_v25 = vadd.f32 %v2089_v47, %v4628_v12  ;;  %v2131_v0 = vadd.f32 %v2130_v1, %v4628_v12 }
 0x23c   : > { %v2420_v24 = vmax.f32 %v2090_v25, 0.0  ;;  %v2421_v33 = vmax.f32 %v2131_v0, 0.0 }
 0x240   : > { %v2171_v6 = vpop.f32.mrf.mxu2  ;;  %v2212_v21 = vpop.f32.mrf.mxu3 }
 0x241   : > { %v2092_v51 = vpop.f32.mrf.mxu0  ;;  %v2133_v14 = vpop.f32.mrf.mxu1  ;;  %v2172_v2 = vadd.f32 %v2171_v6, %v4628_v12  ;;  %v2213_v62 = vadd.f32 %v2212_v21, %v4628_v12  ;;  %v2169_v21 = vadd.f32 %v4612_v63, %v4618_v10 }
 0x242   : > { %v2093_v55 = vadd.f32 %v2092_v51, %v4661_v18  ;;  %v2134_v1 = vadd.f32 %v2133_v14, %v4661_v18 }
 0x243   : > { %v2422_v51 = vmax.f32 %v2172_v2, 0.0  ;;  %v2423_v53 = vmax.f32 %v2213_v62, 0.0 }
 0x244   : > { %v2428_v0 = vmax.f32 %v2093_v55, 0.0  ;;  %v2429_v46 = vmax.f32 %v2134_v1, 0.0 }
 0x248   : > { %v4640_v41 = vpop.f32.mrf.mxu2  ;;  %v4642_v29 = vpop.f32.mrf.mxu3 }
 0x249   : > { %v2095_v57 = vpop.f32.mrf.mxu0  ;;  %v2136_v30 = vpop.f32.mrf.mxu1  ;;  %v2175_v58 = vadd.f32 %v4640_v41, %v4661_v18 }
 0x24a   : > { %v2096_v43 = vadd.f32 %v2095_v57, %v4638_v52  ;;  %v2137_v17 = vadd.f32 %v2136_v30, %v4638_v52  ;;  %v2455_v57 = vmax.f32 %v2391_v48, %v2407_v39  ;;  %v2210_v30 = vadd.f32 %v4614_v49, %v4618_v10 }
 0x24b   : > { %v2430_v23 = vmax.f32 %v2175_v58, 0.0 }
 0x24c   : > { %v2436_v56 = vmax.f32 %v2096_v43, 0.0  ;;  %v2437_v8 = vmax.f32 %v2137_v17, 0.0  ;;  %v2461_v43 = vmax.f32 %v2397_v36, %v2413_v59 }
 0x24e   : > { %v2468_v37 = vmax.f32 %v2420_v24, %v2436_v56  ;;  %v2469_v60 = vmax.f32 %v2421_v33, %v2437_v8  ;;  %v2216_v24 = vadd.f32 %v4642_v29, %v4661_v18  ;;  %v2414_v8 = vmax.f32 %v2169_v21, 0.0 }
 0x24f   : > { %v2399_v29 = vmax.f32 %v4658_v45, 0.0 }
 0x250   : > { %v2484_v13 = vmax.f32 %v2452_v34, %v2468_v37  ;;  %v2485_v35 = vmax.f32 %v2453_v27, %v2469_v60  ;;  %v2177_v42 = vpop.f32.mrf.mxu2  ;;  %v2218_v47 = vpop.f32.mrf.mxu3  ;;  %v2415_v34 = vmax.f32 %v2210_v30, 0.0  ;;  %v2398_v60 = vmax.f32 %v4655_v4, 0.0 }
 0x251   : > { %v2178_v11 = vadd.f32 %v2177_v42, %v4638_v52  ;;  %v2219_v3 = vadd.f32 %v2218_v47, %v4638_v52  ;;  %v2098_v6 = vpop.f32.mrf.mxu0  ;;  %v2139_v61 = vpop.f32.mrf.mxu1  ;;  %v2431_v2 = vmax.f32 %v2216_v24, 0.0 }
 0x252   : > { %v2500_v5 = vpack.c.bf16 %v2485_v35, %v2484_v13  ;;  %v2099_v50 = vadd.f32 %v2098_v6, %v4665_v7  ;;  %v2140_v54 = vadd.f32 %v2139_v61, %v4665_v7  ;;  %v2462_v35 = vmax.f32 %v2398_v60, %v2414_v8 }
 0x253   : > { %v2438_v25 = vmax.f32 %v2178_v11, 0.0  ;;  %v2439_v14 = vmax.f32 %v2219_v3, 0.0  ;;  %v2463_v42 = vmax.f32 %v2399_v29, %v2415_v34 }
 0x254   : > { %2996 = vst [vmem:[%s3556_s28 + $0xc0] sm:$0xff] %v2500_v5  ;;  %v2444_v31 = vmax.f32 %v2099_v50, 0.0  ;;  %v2445_v19 = vmax.f32 %v2140_v54, 0.0 }
 0x255   : > { %v2470_v26 = vmax.f32 %v2422_v51, %v2438_v25  ;;  %v2471_v63 = vmax.f32 %v2423_v53, %v2439_v14 }
 0x256   : > { %v2476_v17 = vmax.f32 %v2428_v0, %v2444_v31  ;;  %v2477_v15 = vmax.f32 %v2429_v46, %v2445_v19 }
 0x257   : > { %v2486_v56 = vmax.f32 %v2454_v38, %v2470_v26  ;;  %v2487_v33 = vmax.f32 %v2455_v57, %v2471_v63 }
 0x258   : > { %v2492_v48 = vmax.f32 %v2460_v20, %v2476_v17  ;;  %v2493_v32 = vmax.f32 %v2461_v43, %v2477_v15  ;;  %v2180_v9 = vpop.f32.mrf.mxu2  ;;  %v2221_v49 = vpop.f32.mrf.mxu3 }
 0x259   : > { %v2501_v28 = vpack.c.bf16 %v2487_v33, %v2486_v56  ;;  %v2181_v36 = vadd.f32 %v2180_v9, %v4665_v7  ;;  %v2222_v27 = vadd.f32 %v2221_v49, %v4665_v7  ;;  %v2241_v37 = vpop.f32.mrf.mxu0  ;;  %v2282_v41 = vpop.f32.mrf.mxu1 }
 0x25a   : > { %v2504_v39 = vpack.c.bf16 %v2493_v32, %v2492_v48  ;;  %v2242_v26 = vadd.f32 %v2241_v37, %v4610_v22  ;;  %v2283_v63 = vadd.f32 %v2282_v41, %v4610_v22 }
 0x25b   : > { %2997 = vst [vmem:[%s3556_s28 + $0xc8] sm:$0xff] %v2501_v28  ;;  %v2446_v62 = vmax.f32 %v2181_v36, 0.0  ;;  %v2447_v13 = vmax.f32 %v2222_v27, 0.0 }
 0x25c   : > { %3000 = vst [vmem:[%s3556_s28 + $0xe0] sm:$0xff] %v2504_v39  ;;  %v2392_v56 = vmax.f32 %v2242_v26, 0.0 }
 0x25d   : > { %v2478_v47 = vmax.f32 %v2430_v23, %v2446_v62  ;;  %v2479_v55 = vmax.f32 %v2431_v2, %v2447_v13 }
 0x25f   : > { %v2494_v1 = vmax.f32 %v2462_v35, %v2478_v47  ;;  %v2495_v38 = vmax.f32 %v2463_v42, %v2479_v55 }
 0x260   : > { %v2323_v59 = vpop.f32.mrf.mxu2  ;;  %v2364_v11 = vpop.f32.mrf.mxu3 }
 0x261   : > { %v2505_v3 = vpack.c.bf16 %v2495_v38, %v2494_v1  ;;  %v2244_v4 = vpop.f32.mrf.mxu0  ;;  %v2285_v6 = vpop.f32.mrf.mxu1  ;;  %v2324_v20 = vadd.f32 %v2323_v59, %v4610_v22  ;;  %v4697_v43 = vadd.f32 %v2364_v11, %v4610_v22  ;;  %v2393_v22 = vmax.f32 %v2283_v63, 0.0 }
 0x262   : > { %v4702_v58 = vadd.f32 %v2244_v4, %v4616_v40  ;;  %v4705_v24 = vadd.f32 %v2285_v6, %v4616_v40 }
 0x263   : > { %3001 = vst [vmem:[%s3556_s28 + $0xe8] sm:$0xff] %v2505_v3  ;;  %v2394_v9 = vmax.f32 %v2324_v20, 0.0  ;;  %v2395_v49 = vmax.f32 %v4697_v43, 0.0 }
 0x264   : > { %v2400_v29 = vmax.f32 %v4702_v58, 0.0  ;;  %v2401_v39 = vmax.f32 %v4705_v24, 0.0 }
 0x268   : > { %v2326_v45 = vpop.f32.mrf.mxu2  ;;  %v2367_v61 = vpop.f32.mrf.mxu3 }
 0x269   : > { %v2247_v21 = vpop.f32.mrf.mxu0  ;;  %v2288_v5 = vpop.f32.mrf.mxu1  ;;  %v4722_v47 = vadd.f32 %v2326_v45, %v4616_v40  ;;  %v4725_v55 = vadd.f32 %v2367_v61, %v4616_v40 }
 0x26a   : > { %v2248_v17 = vadd.f32 %v2247_v21, %v4620_v16  ;;  %v2289_v15 = vadd.f32 %v2288_v5, %v4620_v16 }
 0x26c   : > { %v2408_v27 = vmax.f32 %v2248_v17, 0.0  ;;  %v2409_v37 = vmax.f32 %v2289_v15, 0.0 }
 0x26e   : > { %v2456_v59 = vmax.f32 %v2392_v56, %v2408_v27  ;;  %v2457_v11 = vmax.f32 %v2393_v22, %v2409_v37 }
 0x270   : > { %v2329_v50 = vpop.f32.mrf.mxu2  ;;  %v2370_v54 = vpop.f32.mrf.mxu3 }
 0x271   : > { %v2250_v51 = vpop.f32.mrf.mxu0  ;;  %v2291_v53 = vpop.f32.mrf.mxu1  ;;  %v2330_v34 = vadd.f32 %v2329_v50, %v4620_v16  ;;  %v2371_v23 = vadd.f32 %v2370_v54, %v4620_v16 }
 0x272   : > { %v2251_v2 = vadd.f32 %v2250_v51, %v4618_v10  ;;  %v2292_v38 = vadd.f32 %v2291_v53, %v4618_v10 }
 0x273   : > { %v2410_v1 = vmax.f32 %v2330_v34, 0.0  ;;  %v2411_v16 = vmax.f32 %v2371_v23, 0.0 }
 0x274   : > { %v2416_v6 = vmax.f32 %v2251_v2, 0.0  ;;  %v2417_v53 = vmax.f32 %v2292_v38, 0.0 }
 0x276   : > { %v2465_v34 = vmax.f32 %v2401_v39, %v2417_v53 }
 0x278   : > { %v4689_v25 = vpop.f32.mrf.mxu2  ;;  %v4691_v14 = vpop.f32.mrf.mxu3 }
 0x279   : > { %v2253_v0 = vpop.f32.mrf.mxu0  ;;  %v2294_v31 = vpop.f32.mrf.mxu1 }
 0x27a   : > { %v2254_v33 = vadd.f32 %v2253_v0, %v4628_v12  ;;  %v2295_v8 = vadd.f32 %v2294_v31, %v4628_v12  ;;  %v2458_v0 = vmax.f32 %v2394_v9, %v2410_v1  ;;  %v2464_v9 = vmax.f32 %v2400_v29, %v2416_v6 }
 0x27c   : > { %v2424_v62 = vmax.f32 %v2254_v33, 0.0  ;;  %v2425_v13 = vmax.f32 %v2295_v8, 0.0  ;;  %v2374_v8 = vadd.f32 %v4691_v14, %v4618_v10 }
 0x280   : > { %v2335_v46 = vpop.f32.mrf.mxu2  ;;  %v2376_v19 = vpop.f32.mrf.mxu3 }
 0x281   : > { %v2256_v57 = vpop.f32.mrf.mxu0  ;;  %v2297_v30 = vpop.f32.mrf.mxu1  ;;  %v2336_v21 = vadd.f32 %v2335_v46, %v4628_v12  ;;  %v2377_v5 = vadd.f32 %v2376_v19, %v4628_v12  ;;  %v2333_v12 = vadd.f32 %v4689_v25, %v4618_v10 }
 0x282   : > { %v2257_v50 = vadd.f32 %v2256_v57, %v4661_v18  ;;  %v2298_v45 = vadd.f32 %v2297_v30, %v4661_v18 }
 0x283   : > { %v2426_v30 = vmax.f32 %v2336_v21, 0.0  ;;  %v2427_v43 = vmax.f32 %v2377_v5, 0.0  ;;  %v2418_v23 = vmax.f32 %v2333_v12, 0.0 }
 0x284   : > { %v2432_v58 = vmax.f32 %v2257_v50, 0.0  ;;  %v2433_v24 = vmax.f32 %v2298_v45, 0.0 }
 0x288   : > { %v4709_v48 = vpop.f32.mrf.mxu2  ;;  %v4711_v32 = vpop.f32.mrf.mxu3 }
 0x289   : > { %v2259_v28 = vpop.f32.mrf.mxu0  ;;  %v2300_v36 = vpop.f32.mrf.mxu1  ;;  %v2339_v27 = vadd.f32 %v4709_v48, %v4661_v18  ;;  %v2380_v37 = vadd.f32 %v4711_v32, %v4661_v18  ;;  %v2402_v48 = vmax.f32 %v4722_v47, 0.0  ;;  %v2403_v18 = vmax.f32 %v4725_v55, 0.0 }
 0x28a   : > { %v2260_v41 = vadd.f32 %v2259_v28, %v4638_v52  ;;  %v2301_v60 = vadd.f32 %v2300_v36, %v4638_v52 }
 0x28c   : > { %v2440_v35 = vmax.f32 %v2260_v41, 0.0  ;;  %v2441_v42 = vmax.f32 %v2301_v60, 0.0 }
 0x28e   : > { %v2472_v3 = vmax.f32 %v2424_v62, %v2440_v35  ;;  %v2473_v4 = vmax.f32 %v2425_v13, %v2441_v42  ;;  %v2419_v62 = vmax.f32 %v2374_v8, 0.0  ;;  %v2434_v35 = vmax.f32 %v2339_v27, 0.0 }
 0x28f   : > { %v2435_v42 = vmax.f32 %v2380_v37, 0.0 }
 0x290   : > { %v2488_v54 = vmax.f32 %v2456_v59, %v2472_v3  ;;  %v2489_v40 = vmax.f32 %v2457_v11, %v2473_v4  ;;  %v2341_v61 = vpop.f32.mrf.mxu2  ;;  %v2382_v51 = vpop.f32.mrf.mxu3  ;;  %v2466_v59 = vmax.f32 %v2402_v48, %v2418_v23  ;;  %v2467_v11 = vmax.f32 %v2403_v18, %v2419_v62 }
 0x291   : > { %v2342_v31 = vadd.f32 %v2341_v61, %v4638_v52  ;;  %v2383_v26 = vadd.f32 %v2382_v51, %v4638_v52  ;;  %v2262_v63 = vpop.f32.mrf.mxu0  ;;  %v2303_v20 = vpop.f32.mrf.mxu1  ;;  %v2459_v52 = vmax.f32 %v2395_v49, %v2411_v16 }
 0x292   : > { %v2502_v46 = vpack.c.bf16 %v2489_v40, %v2488_v54  ;;  %v2263_v19 = vadd.f32 %v2262_v63, %v4665_v7  ;;  %v2304_v57 = vadd.f32 %v2303_v20, %v4665_v7 }
 0x293   : > { %v2442_v17 = vmax.f32 %v2342_v31, 0.0  ;;  %v2443_v15 = vmax.f32 %v2383_v26, 0.0 }
 0x294   : > { %2998 = vst [vmem:[%s3556_s28 + $0xd0] sm:$0xff] %v2502_v46  ;;  %v2448_v56 = vmax.f32 %v2263_v19, 0.0  ;;  %v2449_v33 = vmax.f32 %v2304_v57, 0.0 }
 0x295   : > { %v2474_v22 = vmax.f32 %v2426_v30, %v2442_v17  ;;  %v2475_v25 = vmax.f32 %v2427_v43, %v2443_v15 }
 0x296   : > { %v2480_v28 = vmax.f32 %v2432_v58, %v2448_v56  ;;  %v2481_v36 = vmax.f32 %v2433_v24, %v2449_v33 }
 0x297   : > { %v2490_v41 = vmax.f32 %v2458_v0, %v2474_v22  ;;  %v2491_v60 = vmax.f32 %v2459_v52, %v2475_v25 }
 0x298   : > { %v2496_v49 = vmax.f32 %v2464_v9, %v2480_v28  ;;  %v2497_v2 = vmax.f32 %v2465_v34, %v2481_v36  ;;  %v2344_v10 = vpop.f32.mrf.mxu2  ;;  %v2385_v14 = vpop.f32.mrf.mxu3 }
 0x299   : > { %v2503_v29 = vpack.c.bf16 %v2491_v60, %v2490_v41  ;;  %v2345_v39 = vadd.f32 %v2344_v10, %v4665_v7  ;;  %v2386_v13 = vadd.f32 %v2385_v14, %v4665_v7 }
 0x29a   : > { %v2506_v32 = vpack.c.bf16 %v2497_v2, %v2496_v49 }
 0x29b   : > { %2999 = vst.msk [vmem:[%s3556_s28 + $0xd8] sm:$0xff] %vm3782_vm3, %v2503_v29  ;;  %v2450_v1 = vmax.f32 %v2345_v39, 0.0  ;;  %v2451_v38 = vmax.f32 %v2386_v13, 0.0 }
 0x29c   : > { %3002 = vst [vmem:[%s3556_s28 + $0xf0] sm:$0xff] %v2506_v32 }
 0x29d   : > { %v2482_v3 = vmax.f32 %v2434_v35, %v2450_v1  ;;  %v2483_v4 = vmax.f32 %v2435_v42, %v2451_v38 }
 0x29f   : > { %v2498_v16 = vmax.f32 %v2466_v59, %v2482_v3  ;;  %v2499_v7 = vmax.f32 %v2467_v11, %v2483_v4 }
 0x2a1   : > { %v2507_v6 = vpack.c.bf16 %v2499_v7, %v2498_v16 }
 0x2a3   : > { %3003 = vst.msk [vmem:[%s3556_s28 + $0xf8] sm:$0xff] %vm3782_vm3, %v2507_v6 }
 0x2a4 PF: > { %s13_s12 = sadd.s32 1, %s3034_s12  }
 0x2a5   : > { %p10_p4 = scmp.ge.s32.totalorder %s13_s12, 4  }
 0x2a7   :  { %12 = sbr.rel (!%p10_p4) target bundleno = 1 (0x1), region = 68 }

// kernel: vgg_forward.3
= control target key start
LH: loop header
LB: loop body
LE: loop exit
PB: predicated region body
PF: predicated region fallthrough
CT: control target
= control target key end

     0   :  { %s29780_s24 = smov 0   ;;  %s32107_s0 = inlined_call_operand.vmem [shape: bf16[8,61952], index: 0, kind: input, shape index: {}]   ;;  %s32108_s1 = inlined_call_operand.vmem [shape: bf16[61952,128], index: 1, kind: input, shape index: {}]   ;;  %s32109_s2 = inlined_call_operand.vmem [shape: f32[1,128], index: 2, kind: input, shape index: {}]   ;;  %s32110_s3 = inlined_call_operand.vmem [shape: f32[128,64], index: 3, kind: input, shape index: {}]   ;;  %s32111_s4 = inlined_call_operand.vmem [shape: f32[1,64], index: 4, kind: input, shape index: {}]   ;;  %s32112_s5 = inlined_call_operand.vmem [shape: f32[64,2], index: 5, kind: input, shape index: {}]   ;;  %s32113_s6 = inlined_call_operand.vmem [shape: f32[1,2], index: 6, kind: input, shape index: {}]   ;;  %s32114_s7 = inlined_call_operand.vmem [shape: f32[8,2], index: 7, kind: output, shape index: {}]  }
   0x1 LB: > { %s29786_s25 = sadd.s32 4294967295, %s29737_s24   ;;  %p20031_p0 = scmp.ge.s32.totalorder %s29737_s24, 1  ;;  %s29737_s24 = sphi %s29780_s24, %s17_s24  }
   0x2   : > { %p244_p1 = scmp.lt.s32.totalorder %s29737_s24, 3 }
   0x4   : > { %p245_p2 = pnand %p20031_p0, %p244_p1 }
   0x5   : > { %s276_s26 = smul.u32 (!%p245_p2), 242, %s29786_s25  ;;  %p20034_p5 = scmp.ne.s32.totalorder (!%p245_p2), %s29786_s25, 0 }
   0x6   : > { %248 = sbr.rel (%p245_p2) target bundleno = 2399 (0x95f), region = 48 }
   0x7   : > { %s282_s27 = smul.u32 (!%p245_p2), 3872, %s29786_s25  ;;  %p277_p3 = scmp.lt.s32.totalorder (!%p245_p2), %s276_s26, 483 }
   0x9   : > { %p283_p4 = scmp.lt.s32.totalorder (!%p245_p2), %s282_s27, 7743 }
   0xb   : > { %s32116_s26 = smov (!%p277_p3, %s276_s26), 483  ;;  %s32118_s27 = smov (!%p283_p4, %s282_s27), 7743 }
   0xc   : > { %s20032_s28 = sshll.u32 %s32116_s26, 2  ;;  %s20033_s9 = sshll.u32 %s32118_s27, 2 }
   0xd   : > { %s29795_s8 = scalar_lea.vmem %s32107_s0, %s20032_s28  ;;  %s29800_s12 = scalar_lea.vmem %s32108_s1, %s20033_s9 }
   0xe   : > { %291 = sbr.rel (%p20034_p5) target bundleno = 21 (0x15), region = 52 }
  0x13   : > { %v29739_v0 = vmov 0.0  }
  0x14   : > { %292 = vst [vmem:[#allocation2] sm:$0xff] %v29739_v0 }
  0x15 PF: > { %v27790_v1 = vld [vmem:[%s29800_s12 + $0x38] sm:$0xff]  ;;  %v27789_v5 = vld [vmem:[%s29800_s12 + $0x30] sm:$0xff]  ;;  %v27788_v9 = vld [vmem:[%s29800_s12 + $0x28] sm:$0xff]  ;;  %p27779_p6 = scmp.ne.s32.totalorder %s29786_s25, 1 }
  0x16   : > { %v27798_v2 = vld [vmem:[%s29800_s12 + $0x78] sm:$0xff]  ;;  %16750 = vmatpush.bf16.msra.mxu0 %v27790_v1  ;;  %v27797_v6 = vld [vmem:[%s29800_s12 + $0x70] sm:$0xff]  ;;  %v27796_v10 = vld [vmem:[%s29800_s12 + $0x68] sm:$0xff] }
  0x17   : > { %v27806_v3 = vld [vmem:[%s29800_s12 + $0xb8] sm:$0xff]  ;;  %16763 = vmatpush.bf16.msra.mxu1 %v27798_v2  ;;  %v27805_v7 = vld [vmem:[%s29800_s12 + $0xb0] sm:$0xff]  ;;  %v27804_v11 = vld [vmem:[%s29800_s12 + $0xa8] sm:$0xff] }
  0x18   : > { %v27814_v4 = vld [vmem:[%s29800_s12 + $0xf8] sm:$0xff]  ;;  %16776 = vmatpush.bf16.msra.mxu2 %v27806_v3  ;;  %v27813_v8 = vld [vmem:[%s29800_s12 + $0xf0] sm:$0xff]  ;;  %v27812_v12 = vld [vmem:[%s29800_s12 + $0xe8] sm:$0xff] }
  0x19   : > { %16789 = vmatpush.bf16.msra.mxu3 %v27814_v4  ;;  %v27787_v13 = vld [vmem:[%s29800_s12 + $0x20] sm:$0xff]  ;;  %v27786_v17 = vld [vmem:[%s29800_s12 + $0x18] sm:$0xff]  ;;  %v27785_v21 = vld [vmem:[%s29800_s12 + $0x10] sm:$0xff] }
  0x1a   : > { %16751 = vmatpush.bf16.msra.mxu0 %v27789_v5  ;;  %v27795_v14 = vld [vmem:[%s29800_s12 + $0x60] sm:$0xff]  ;;  %v27794_v18 = vld [vmem:[%s29800_s12 + $0x58] sm:$0xff]  ;;  %v27793_v22 = vld [vmem:[%s29800_s12 + $0x50] sm:$0xff] }
  0x1b   : > { %16764 = vmatpush.bf16.msra.mxu1 %v27797_v6  ;;  %v27803_v15 = vld [vmem:[%s29800_s12 + $0xa0] sm:$0xff]  ;;  %v27802_v19 = vld [vmem:[%s29800_s12 + $0x98] sm:$0xff]  ;;  %v27801_v23 = vld [vmem:[%s29800_s12 + $0x90] sm:$0xff] }
  0x1c   : > { %16777 = vmatpush.bf16.msra.mxu2 %v27805_v7  ;;  %v27811_v16 = vld [vmem:[%s29800_s12 + $0xe0] sm:$0xff]  ;;  %v27810_v20 = vld [vmem:[%s29800_s12 + $0xd8] sm:$0xff]  ;;  %v27809_v24 = vld [vmem:[%s29800_s12 + $0xd0] sm:$0xff] }
  0x1d   : > { %16790 = vmatpush.bf16.msra.mxu3 %v27813_v8  ;;  %v27784_v25 = vld [vmem:[%s29800_s12 + $0x8] sm:$0xff]  ;;  %v294_v27 = vld [vmem:[%s29795_s8] sm:$0xff]  ;;  %v27822_v36 = vld [vmem:[%s29800_s12 + $0x138] sm:$0xff] }
  0x1e   : > { %16752 = vmatpush.bf16.msra.mxu0 %v27788_v9  ;;  %v27792_v26 = vld [vmem:[%s29800_s12 + $0x48] sm:$0xff]  ;;  %v4408_v31 = vunpack.c.l.b16 %v294_v27  ;;  %v27783_v32 = vld [vmem:[%s29800_s12] sm:$0xff]  ;;  %v4409_v37 = vunpack.c.h.b16 %v294_v27  ;;  %v27830_v38 = vld [vmem:[%s29800_s12 + $0x178] sm:$0xff] }
  0x1f   : > { %16765 = vmatpush.bf16.msra.mxu1 %v27796_v10  ;;  %v27800_v28 = vld [vmem:[%s29800_s12 + $0x88] sm:$0xff]  ;;  %v27791_v33 = vld [vmem:[%s29800_s12 + $0x40] sm:$0xff]  ;;  %v27838_v39 = vld [vmem:[%s29800_s12 + $0x1b8] sm:$0xff] }
  0x20   : > { %16778 = vmatpush.bf16.msra.mxu2 %v27804_v11  ;;  %v27808_v29 = vld [vmem:[%s29800_s12 + $0xc8] sm:$0xff]  ;;  %v27799_v35 = vld [vmem:[%s29800_s12 + $0x80] sm:$0xff]  ;;  %v4650_v41 = vpack.c.b16 %v4408_v31, %v4408_v31  ;;  %v27846_v43 = vld [vmem:[%s29800_s12 + $0x1f8] sm:$0xff]  ;;  %v4651_v46 = vpack.c.b16 %v4409_v37, %v4409_v37 }
  0x21   : > { %16791 = vmatpush.bf16.msra.mxu3 %v27812_v12  ;;  %v295_v30 = vld [vmem:[%s29795_s8 + $0x8] sm:$0xff]  ;;  %v27807_v40 = vld [vmem:[%s29800_s12 + $0xc0] sm:$0xff]  ;;  %v27821_v45 = vld [vmem:[%s29800_s12 + $0x130] sm:$0xff] }
  0x22   : > { %16753 = vmatpush.bf16.msra.mxu0 %v27787_v13  ;;  %v4410_v34 = vunpack.c.l.b16 %v295_v30  ;;  %v4411_v42 = vunpack.c.h.b16 %v295_v30  ;;  %v27829_v47 = vld [vmem:[%s29800_s12 + $0x170] sm:$0xff]  ;;  %v27820_v51 = vld [vmem:[%s29800_s12 + $0x128] sm:$0xff]  ;;  %v27819_v55 = vld [vmem:[%s29800_s12 + $0x120] sm:$0xff] }
  0x23   : > { %16766 = vmatpush.bf16.msra.mxu1 %v27795_v14  ;;  %v27837_v48 = vld [vmem:[%s29800_s12 + $0x1b0] sm:$0xff]  ;;  %v27828_v52 = vld [vmem:[%s29800_s12 + $0x168] sm:$0xff]  ;;  %v27827_v56 = vld [vmem:[%s29800_s12 + $0x160] sm:$0xff] }
  0x24   : > { %16779 = vmatpush.bf16.msra.mxu2 %v27803_v15  ;;  %v4652_v44 = vpack.c.b16 %v4410_v34, %v4410_v34  ;;  %v4653_v49 = vpack.c.b16 %v4411_v42, %v4411_v42  ;;  %v27845_v50 = vld [vmem:[%s29800_s12 + $0x1f0] sm:$0xff]  ;;  %v27836_v53 = vld [vmem:[%s29800_s12 + $0x1a8] sm:$0xff]  ;;  %v27835_v57 = vld [vmem:[%s29800_s12 + $0x1a0] sm:$0xff] }
  0x25   : > { %16792 = vmatpush.bf16.msra.mxu3 %v27811_v16  ;;  %v27844_v54 = vld [vmem:[%s29800_s12 + $0x1e8] sm:$0xff]  ;;  %v27843_v58 = vld [vmem:[%s29800_s12 + $0x1e0] sm:$0xff]  ;;  %v27818_v59 = vld [vmem:[%s29800_s12 + $0x118] sm:$0xff] }
  0x26   : > { %16754 = vmatpush.bf16.msra.mxu0 %v27786_v17  ;;  %v27826_v60 = vld [vmem:[%s29800_s12 + $0x158] sm:$0xff]  ;;  %v27817_v63 = vld [vmem:[%s29800_s12 + $0x110] sm:$0xff]  ;;  %v27816_v3 = vld [vmem:[%s29800_s12 + $0x108] sm:$0xff] }
  0x27   : > { %16767 = vmatpush.bf16.msra.mxu1 %v27794_v18  ;;  %v27834_v61 = vld [vmem:[%s29800_s12 + $0x198] sm:$0xff]  ;;  %v27825_v0 = vld [vmem:[%s29800_s12 + $0x150] sm:$0xff]  ;;  %v27824_v4 = vld [vmem:[%s29800_s12 + $0x148] sm:$0xff] }
  0x28   : > { %16780 = vmatpush.bf16.msra.mxu2 %v27802_v19  ;;  %v27842_v62 = vld [vmem:[%s29800_s12 + $0x1d8] sm:$0xff]  ;;  %v27833_v1 = vld [vmem:[%s29800_s12 + $0x190] sm:$0xff]  ;;  %v27832_v5 = vld [vmem:[%s29800_s12 + $0x188] sm:$0xff] }
  0x29   : > { %16793 = vmatpush.bf16.msra.mxu3 %v27810_v20  ;;  %v27841_v2 = vld [vmem:[%s29800_s12 + $0x1d0] sm:$0xff]  ;;  %v297_v6 = vld [vmem:[%s29795_s8 + $0x18] sm:$0xff]  ;;  %v27840_v8 = vld [vmem:[%s29800_s12 + $0x1c8] sm:$0xff] }
  0x2a   : > { %16755 = vmatpush.bf16.msra.mxu0 %v27785_v21  ;;  %v296_v7 = vld [vmem:[%s29795_s8 + $0x10] sm:$0xff]  ;;  %v27815_v9 = vld [vmem:[%s29800_s12 + $0x100] sm:$0xff]  ;;  %v4414_v10 = vunpack.c.l.b16 %v297_v6  ;;  %v27854_v15 = vld [vmem:[%s29800_s12 + $0x238] sm:$0xff]  ;;  %v4415_v19 = vunpack.c.h.b16 %v297_v6 }
  0x2b   : > { %16768 = vmatpush.bf16.msra.mxu1 %v27793_v22  ;;  %v27823_v11 = vld [vmem:[%s29800_s12 + $0x140] sm:$0xff]  ;;  %v4412_v13 = vunpack.c.l.b16 %v296_v7  ;;  %v4413_v14 = vunpack.c.h.b16 %v296_v7  ;;  %v27862_v16 = vld [vmem:[%s29800_s12 + $0x278] sm:$0xff]  ;;  %v27860_v30 = vld [vmem:[%s29800_s12 + $0x268] sm:$0xff] }
  0x2c   : > { %16781 = vmatpush.bf16.msra.mxu2 %v27801_v23  ;;  %v27831_v12 = vld [vmem:[%s29800_s12 + $0x180] sm:$0xff]  ;;  %v27870_v17 = vld [vmem:[%s29800_s12 + $0x2b8] sm:$0xff]  ;;  %v4656_v21 = vpack.c.b16 %v4414_v10, %v4414_v10  ;;  %v4657_v27 = vpack.c.b16 %v4415_v19, %v4415_v19  ;;  %v27868_v31 = vld [vmem:[%s29800_s12 + $0x2a8] sm:$0xff] }
  0x2d   : > { %16794 = vmatpush.bf16.msra.mxu3 %v27809_v24  ;;  %v27839_v18 = vld [vmem:[%s29800_s12 + $0x1c0] sm:$0xff]  ;;  %v27878_v20 = vld [vmem:[%s29800_s12 + $0x2f8] sm:$0xff]  ;;  %v4654_v22 = vpack.c.b16 %v4412_v13, %v4412_v13  ;;  %v4655_v23 = vpack.c.b16 %v4413_v14, %v4413_v14  ;;  %v27853_v24 = vld [vmem:[%s29800_s12 + $0x230] sm:$0xff] }
  0x2e   : > { %16756 = vmatpush.bf16.msra.mxu0 %v27784_v25  ;;  %v27861_v25 = vld [vmem:[%s29800_s12 + $0x270] sm:$0xff]  ;;  %v27859_v34 = vld [vmem:[%s29800_s12 + $0x260] sm:$0xff]  ;;  %v27850_v37 = vld [vmem:[%s29800_s12 + $0x218] sm:$0xff] }
  0x2f   : > { %16769 = vmatpush.bf16.msra.mxu1 %v27792_v26  ;;  %v27869_v26 = vld [vmem:[%s29800_s12 + $0x2b0] sm:$0xff]  ;;  %v27884_v7 = vld [vmem:[%s29800_s12 + $0x328] sm:$0xff]  ;;  %v27899_v13 = vld [vmem:[%s29800_s12 + $0x3a0] sm:$0xff] }
  0x30   : > { %16782 = vmatpush.bf16.msra.mxu2 %v27800_v28  ;;  %v27877_v28 = vld [vmem:[%s29800_s12 + $0x2f0] sm:$0xff]  ;;  %v27908_v10 = vld [vmem:[%s29800_s12 + $0x3e8] sm:$0xff]  ;;  %v27907_v14 = vld [vmem:[%s29800_s12 + $0x3e0] sm:$0xff] }
  0x31   : > { %16795 = vmatpush.bf16.msra.mxu3 %v27808_v29  ;;  %v27852_v29 = vld [vmem:[%s29800_s12 + $0x228] sm:$0xff]  ;;  %v27857_v42 = vld [vmem:[%s29800_s12 + $0x250] sm:$0xff] }
  0x32   : > { %16757 = vmatpush.bf16.msra.mxu0 %v27783_v32  ;;  %v27876_v32 = vld [vmem:[%s29800_s12 + $0x2e8] sm:$0xff]  ;;  %v27909_v6 = vld [vmem:[%s29800_s12 + $0x3f0] sm:$0xff] }
  0x33   : > { %16770 = vmatpush.bf16.msra.mxu1 %v27791_v33  ;;  %v27851_v33 = vld [vmem:[%s29800_s12 + $0x220] sm:$0xff]  ;;  %v27881_v19 = vld [vmem:[%s29800_s12 + $0x310] sm:$0xff] }
  0x34   : > { %16783 = vmatpush.bf16.msra.mxu2 %v27799_v35  ;;  %v27867_v35 = vld [vmem:[%s29800_s12 + $0x2a0] sm:$0xff] }
  0x35   : > { %16796 = vmatpush.bf16.msra.mxu3 %v27807_v40  ;;  %16758 = vmatmul.bf16.vlgmr.msra.gmra.mxu0 %v4650_v41  ;;  %v27874_v40 = vld [vmem:[%s29800_s12 + $0x2d8] sm:$0xff]  ;;  %v27849_v41 = vld [vmem:[%s29800_s12 + $0x210] sm:$0xff] }
  0x36   : > { %16802 = vmatpush.bf16.msrb.mxu0 %v27822_v36  ;;  %16771 = vmatmul.bf16.vlgmr.msra.gmra.mxu1 %v4651_v46  ;;  %v27875_v36 = vld [vmem:[%s29800_s12 + $0x2e0] sm:$0xff]  ;;  %v27856_v46 = vld [vmem:[%s29800_s12 + $0x248] sm:$0xff] }
  0x37   : > { %16815 = vmatpush.bf16.msrb.mxu1 %v27830_v38  ;;  %16784 = vmatmul.bf16.vlgmr.msra.gmra.mxu2 %v4652_v44  ;;  %v27858_v38 = vld [vmem:[%s29800_s12 + $0x258] sm:$0xff]  ;;  %v27873_v44 = vld [vmem:[%s29800_s12 + $0x2d0] sm:$0xff] }
  0x38   : > { %16828 = vmatpush.bf16.msrb.mxu2 %v27838_v39  ;;  %16797 = vmatmul.bf16.vlgmr.msra.gmra.mxu3 %v4653_v49  ;;  %v27866_v39 = vld [vmem:[%s29800_s12 + $0x298] sm:$0xff]  ;;  %v299_v49 = vld [vmem:[%s29795_s8 + $0x28] sm:$0xff] }
  0x39   : > { %16841 = vmatpush.bf16.msrb.mxu3 %v27846_v43  ;;  %v27865_v43 = vld [vmem:[%s29800_s12 + $0x290] sm:$0xff] }
  0x3a   : > { %16803 = vmatpush.bf16.msrb.mxu0 %v27821_v45  ;;  %v27848_v45 = vld [vmem:[%s29800_s12 + $0x208] sm:$0xff] }
  0x3b   : > { %16816 = vmatpush.bf16.msrb.mxu1 %v27829_v47  ;;  %v298_v47 = vld [vmem:[%s29795_s8 + $0x20] sm:$0xff] }
  0x3c   : > { %16829 = vmatpush.bf16.msrb.mxu2 %v27837_v48  ;;  %v27864_v48 = vld [vmem:[%s29800_s12 + $0x288] sm:$0xff] }
  0x3d   : > { %16842 = vmatpush.bf16.msrb.mxu3 %v27845_v50  ;;  %v27872_v50 = vld [vmem:[%s29800_s12 + $0x2c8] sm:$0xff] }
  0x3e   : > { %16804 = vmatpush.bf16.msrb.mxu0 %v27820_v51  ;;  %v4416_v51 = vunpack.c.l.b16 %v298_v47 }
  0x3f   : > { %16817 = vmatpush.bf16.msrb.mxu1 %v27828_v52  ;;  %v27847_v52 = vld [vmem:[%s29800_s12 + $0x200] sm:$0xff] }
  0x40   : > { %16830 = vmatpush.bf16.msrb.mxu2 %v27836_v53  ;;  %v27855_v53 = vld [vmem:[%s29800_s12 + $0x240] sm:$0xff] }
  0x41   : > { %16843 = vmatpush.bf16.msrb.mxu3 %v27844_v54  ;;  %v4418_v54 = vunpack.c.l.b16 %v299_v49 }
  0x42   : > { %16805 = vmatpush.bf16.msrb.mxu0 %v27819_v55  ;;  %v27863_v55 = vld [vmem:[%s29800_s12 + $0x280] sm:$0xff] }
  0x43   : > { %16818 = vmatpush.bf16.msrb.mxu1 %v27827_v56  ;;  %v27886_v56 = vld [vmem:[%s29800_s12 + $0x338] sm:$0xff] }
  0x44   : > { %16831 = vmatpush.bf16.msrb.mxu2 %v27835_v57  ;;  %v4417_v57 = vunpack.c.h.b16 %v298_v47  ;;  %v27933_v47 = vld [vmem:[%s29800_s12 + $0x4b0] sm:$0xff] }
  0x45   : > { %16844 = vmatpush.bf16.msrb.mxu3 %v27843_v58  ;;  %v27894_v58 = vld [vmem:[%s29800_s12 + $0x378] sm:$0xff] }
  0x46   : > { %16806 = vmatpush.bf16.msrb.mxu0 %v27818_v59  ;;  %v27902_v59 = vld [vmem:[%s29800_s12 + $0x3b8] sm:$0xff] }
  0x47   : > { %16819 = vmatpush.bf16.msrb.mxu1 %v27826_v60  ;;  %v4419_v60 = vunpack.c.h.b16 %v299_v49  ;;  %v27916_v49 = vld [vmem:[%s29800_s12 + $0x428] sm:$0xff] }
  0x48   : > { %16832 = vmatpush.bf16.msrb.mxu2 %v27834_v61  ;;  %v27871_v61 = vld [vmem:[%s29800_s12 + $0x2c0] sm:$0xff] }
  0x49   : > { %16845 = vmatpush.bf16.msrb.mxu3 %v27842_v62  ;;  %v4658_v62 = vpack.c.b16 %v4416_v51, %v4416_v51  ;;  %v27932_v51 = vld [vmem:[%s29800_s12 + $0x4a8] sm:$0xff] }
  0x4a   : > { %16807 = vmatpush.bf16.msrb.mxu0 %v27817_v63  ;;  %v4660_v63 = vpack.c.b16 %v4418_v54, %v4418_v54  ;;  %v27923_v54 = vld [vmem:[%s29800_s12 + $0x460] sm:$0xff] }
  0x4b   : > { %16820 = vmatpush.bf16.msrb.mxu1 %v27825_v0  ;;  %v27910_v0 = vld [vmem:[%s29800_s12 + $0x3f8] sm:$0xff] }
  0x4c   : > { %16833 = vmatpush.bf16.msrb.mxu2 %v27833_v1  ;;  %v4659_v1 = vpack.c.b16 %v4417_v57, %v4417_v57  ;;  %v27914_v57 = vld [vmem:[%s29800_s12 + $0x418] sm:$0xff] }
  0x4d   : > { %16846 = vmatpush.bf16.msrb.mxu3 %v27841_v2  ;;  %v27885_v2 = vld [vmem:[%s29800_s12 + $0x330] sm:$0xff] }
  0x4e   : > { %16808 = vmatpush.bf16.msrb.mxu0 %v27816_v3  ;;  %v4661_v3 = vpack.c.b16 %v4419_v60, %v4419_v60  ;;  %v27938_v60 = vld [vmem:[%s29800_s12 + $0x4d8] sm:$0xff] }
  0x4f   : > { %16821 = vmatpush.bf16.msrb.mxu1 %v27824_v4  ;;  %v27893_v4 = vld [vmem:[%s29800_s12 + $0x370] sm:$0xff] }
  0x50   : > { %16834 = vmatpush.bf16.msrb.mxu2 %v27832_v5  ;;  %v27901_v5 = vld [vmem:[%s29800_s12 + $0x3b0] sm:$0xff] }
  0x51   : > { %16847 = vmatpush.bf16.msrb.mxu3 %v27840_v8  ;;  %v27892_v8 = vld [vmem:[%s29800_s12 + $0x368] sm:$0xff] }
  0x52   : > { %16809 = vmatpush.bf16.msrb.mxu0 %v27815_v9  ;;  %v27900_v9 = vld [vmem:[%s29800_s12 + $0x3a8] sm:$0xff] }
  0x53   : > { %16822 = vmatpush.bf16.msrb.mxu1 %v27823_v11  ;;  %v27883_v11 = vld [vmem:[%s29800_s12 + $0x320] sm:$0xff] }
  0x54   : > { %16835 = vmatpush.bf16.msrb.mxu2 %v27831_v12  ;;  %v27891_v12 = vld [vmem:[%s29800_s12 + $0x360] sm:$0xff] }
  0x55   : > { %16848 = vmatpush.bf16.msrb.mxu3 %v27839_v18  ;;  %16810 = vmatmul.bf16.vlgmr.msrb.gmra.mxu0 %v4654_v22  ;;  %v27906_v18 = vld [vmem:[%s29800_s12 + $0x3d8] sm:$0xff]  ;;  %v27905_v22 = vld [vmem:[%s29800_s12 + $0x3d0] sm:$0xff] }
  0x56   : > { %16854 = vmatpush.bf16.msra.mxu0 %v27854_v15  ;;  %16823 = vmatmul.bf16.vlgmr.msrb.gmra.mxu1 %v4655_v23  ;;  %v27882_v15 = vld [vmem:[%s29800_s12 + $0x318] sm:$0xff]  ;;  %v27880_v23 = vld [vmem:[%s29800_s12 + $0x308] sm:$0xff] }
  0x57   : > { %16867 = vmatpush.bf16.msra.mxu1 %v27862_v16  ;;  %16836 = vmatmul.bf16.vlgmr.msrb.gmra.mxu2 %v4656_v21  ;;  %v27890_v16 = vld [vmem:[%s29800_s12 + $0x358] sm:$0xff]  ;;  %v27897_v21 = vld [vmem:[%s29800_s12 + $0x390] sm:$0xff] }
  0x58   : > { %16880 = vmatpush.bf16.msra.mxu2 %v27870_v17  ;;  %16849 = vmatmul.bf16.vlgmr.msrb.gmra.mxu3 %v4657_v27  ;;  %v27898_v17 = vld [vmem:[%s29800_s12 + $0x398] sm:$0xff] }
  0x59   : > { %16893 = vmatpush.bf16.msra.mxu3 %v27878_v20  ;;  %v27889_v20 = vld [vmem:[%s29800_s12 + $0x350] sm:$0xff]  ;;  %v301_v27 = vld [vmem:[%s29795_s8 + $0x38] sm:$0xff] }
  0x5a   : > { %16855 = vmatpush.bf16.msra.mxu0 %v27853_v24  ;;  %v27888_v24 = vld [vmem:[%s29800_s12 + $0x348] sm:$0xff] }
  0x5b   : > { %16868 = vmatpush.bf16.msra.mxu1 %v27861_v25  ;;  %v300_v25 = vld [vmem:[%s29795_s8 + $0x30] sm:$0xff] }
  0x5c   : > { %16881 = vmatpush.bf16.msra.mxu2 %v27869_v26  ;;  %v27896_v26 = vld [vmem:[%s29800_s12 + $0x388] sm:$0xff] }
  0x5d   : > { %16894 = vmatpush.bf16.msra.mxu3 %v27877_v28  ;;  %v27904_v28 = vld [vmem:[%s29800_s12 + $0x3c8] sm:$0xff] }
  0x5e   : > { %16856 = vmatpush.bf16.msra.mxu0 %v27852_v29  ;;  %v27879_v29 = vld [vmem:[%s29800_s12 + $0x300] sm:$0xff] }
  0x5f   : > { %16869 = vmatpush.bf16.msra.mxu1 %v27860_v30  ;;  %v4420_v30 = vunpack.c.l.b16 %v300_v25 }
  0x60   : > { %16882 = vmatpush.bf16.msra.mxu2 %v27868_v31  ;;  %v27887_v31 = vld [vmem:[%s29800_s12 + $0x340] sm:$0xff] }
  0x61   : > { %16895 = vmatpush.bf16.msra.mxu3 %v27876_v32  ;;  %v27918_v32 = vld [vmem:[%s29800_s12 + $0x438] sm:$0xff] }
  0x62   : > { %16857 = vmatpush.bf16.msra.mxu0 %v27851_v33  ;;  %v4422_v33 = vunpack.c.l.b16 %v301_v27 }
  0x63   : > { %16870 = vmatpush.bf16.msra.mxu1 %v27859_v34  ;;  %v4421_v34 = vunpack.c.h.b16 %v300_v25  ;;  %v27965_v25 = vld [vmem:[%s29800_s12 + $0x5b0] sm:$0xff] }
  0x64   : > { %16883 = vmatpush.bf16.msra.mxu2 %v27867_v35  ;;  %v27895_v35 = vld [vmem:[%s29800_s12 + $0x380] sm:$0xff] }
  0x65   : > { %16896 = vmatpush.bf16.msra.mxu3 %v27875_v36  ;;  %v27926_v36 = vld [vmem:[%s29800_s12 + $0x478] sm:$0xff] }
  0x66   : > { %16858 = vmatpush.bf16.msra.mxu0 %v27850_v37  ;;  %v4423_v37 = vunpack.c.h.b16 %v301_v27  ;;  %v27948_v27 = vld [vmem:[%s29800_s12 + $0x528] sm:$0xff] }
  0x67   : > { %16871 = vmatpush.bf16.msra.mxu1 %v27858_v38  ;;  %v27934_v38 = vld [vmem:[%s29800_s12 + $0x4b8] sm:$0xff] }
  0x68   : > { %16884 = vmatpush.bf16.msra.mxu2 %v27866_v39  ;;  %v27903_v39 = vld [vmem:[%s29800_s12 + $0x3c0] sm:$0xff] }
  0x69   : > { %16897 = vmatpush.bf16.msra.mxu3 %v27874_v40  ;;  %v4662_v40 = vpack.c.b16 %v4420_v30, %v4420_v30  ;;  %v27972_v30 = vld [vmem:[%s29800_s12 + $0x5e8] sm:$0xff] }
  0x6a   : > { %16859 = vmatpush.bf16.msra.mxu0 %v27849_v41  ;;  %v27942_v41 = vld [vmem:[%s29800_s12 + $0x4f8] sm:$0xff] }
  0x6b   : > { %16872 = vmatpush.bf16.msra.mxu1 %v27857_v42  ;;  %v4664_v42 = vpack.c.b16 %v4422_v33, %v4422_v33  ;;  %v27955_v33 = vld [vmem:[%s29800_s12 + $0x560] sm:$0xff] }
  0x6c   : > { %16885 = vmatpush.bf16.msra.mxu2 %v27865_v43  ;;  %v4663_v43 = vpack.c.b16 %v4421_v34, %v4421_v34  ;;  %v27963_v34 = vld [vmem:[%s29800_s12 + $0x5a0] sm:$0xff] }
  0x6d   : > { %16898 = vmatpush.bf16.msra.mxu3 %v27873_v44  ;;  %v4665_v44 = vpack.c.b16 %v4423_v37, %v4423_v37 }
  0x6e   : > { %16860 = vmatpush.bf16.msra.mxu0 %v27848_v45  ;;  %v27917_v45 = vld [vmem:[%s29800_s12 + $0x430] sm:$0xff] }
  0x6f   : > { %16873 = vmatpush.bf16.msra.mxu1 %v27856_v46  ;;  %v27925_v46 = vld [vmem:[%s29800_s12 + $0x470] sm:$0xff] }
  0x70   : > { %16886 = vmatpush.bf16.msra.mxu2 %v27864_v48  ;;  %v27941_v48 = vld [vmem:[%s29800_s12 + $0x4f0] sm:$0xff] }
  0x71   : > { %16899 = vmatpush.bf16.msra.mxu3 %v27872_v50  ;;  %v27924_v50 = vld [vmem:[%s29800_s12 + $0x468] sm:$0xff] }
  0x72   : > { %16861 = vmatpush.bf16.msra.mxu0 %v27847_v52  ;;  %v27940_v52 = vld [vmem:[%s29800_s12 + $0x4e8] sm:$0xff] }
  0x73   : > { %16874 = vmatpush.bf16.msra.mxu1 %v27855_v53  ;;  %v27915_v53 = vld [vmem:[%s29800_s12 + $0x420] sm:$0xff] }
  0x74   : > { %16887 = vmatpush.bf16.msra.mxu2 %v27863_v55  ;;  %v27931_v55 = vld [vmem:[%s29800_s12 + $0x4a0] sm:$0xff] }
  0x75   : > { %16900 = vmatpush.bf16.msra.mxu3 %v27871_v61  ;;  %16862 = vmatmul.bf16.vlgmr.msra.gmra.mxu0 %v4658_v62  ;;  %v27913_v61 = vld [vmem:[%s29800_s12 + $0x410] sm:$0xff] }
  0x76   : > { %16906 = vmatpush.bf16.msrb.mxu0 %v27886_v56  ;;  %16875 = vmatmul.bf16.vlgmr.msra.gmra.mxu1 %v4659_v1  ;;  %v27939_v56 = vld [vmem:[%s29800_s12 + $0x4e0] sm:$0xff]  ;;  %v27921_v62 = vld [vmem:[%s29800_s12 + $0x450] sm:$0xff]  ;;  %v27912_v1 = vld [vmem:[%s29800_s12 + $0x408] sm:$0xff] }
  0x77   : > { %16919 = vmatpush.bf16.msrb.mxu1 %v27894_v58  ;;  %16888 = vmatmul.bf16.vlgmr.msra.gmra.mxu2 %v4660_v63  ;;  %v27922_v58 = vld [vmem:[%s29800_s12 + $0x458] sm:$0xff]  ;;  %v27929_v63 = vld [vmem:[%s29800_s12 + $0x490] sm:$0xff] }
  0x78   : > { %16932 = vmatpush.bf16.msrb.mxu2 %v27902_v59  ;;  %16901 = vmatmul.bf16.vlgmr.msra.gmra.mxu3 %v4661_v3  ;;  %v27930_v59 = vld [vmem:[%s29800_s12 + $0x498] sm:$0xff]  ;;  %v27928_v3 = vld [vmem:[%s29800_s12 + $0x488] sm:$0xff] }
  0x79   : > { %16945 = vmatpush.bf16.msrb.mxu3 %v27910_v0  ;;  %v27937_v0 = vld [vmem:[%s29800_s12 + $0x4d0] sm:$0xff] }
  0x7a   : > { %16907 = vmatpush.bf16.msrb.mxu0 %v27885_v2  ;;  %v27920_v2 = vld [vmem:[%s29800_s12 + $0x448] sm:$0xff] }
  0x7b   : > { %16920 = vmatpush.bf16.msrb.mxu1 %v27893_v4  ;;  %v302_v4 = vld [vmem:[%s29795_s8 + $0x40] sm:$0xff] }
  0x7c   : > { %16933 = vmatpush.bf16.msrb.mxu2 %v27901_v5  ;;  %v303_v5 = vld [vmem:[%s29795_s8 + $0x48] sm:$0xff] }
  0x7d   : > { %16946 = vmatpush.bf16.msrb.mxu3 %v27909_v6  ;;  %v27936_v6 = vld [vmem:[%s29800_s12 + $0x4c8] sm:$0xff] }
  0x7e   : > { %16908 = vmatpush.bf16.msrb.mxu0 %v27884_v7  ;;  %v27911_v7 = vld [vmem:[%s29800_s12 + $0x400] sm:$0xff] }
  0x7f   : > { %16921 = vmatpush.bf16.msrb.mxu1 %v27892_v8  ;;  %v4424_v8 = vunpack.c.l.b16 %v302_v4 }
  0x80   : > { %16934 = vmatpush.bf16.msrb.mxu2 %v27900_v9  ;;  %v4426_v9 = vunpack.c.l.b16 %v303_v5 }
  0x81   : > { %16947 = vmatpush.bf16.msrb.mxu3 %v27908_v10  ;;  %v27919_v10 = vld [vmem:[%s29800_s12 + $0x440] sm:$0xff] }
  0x82   : > { %16909 = vmatpush.bf16.msrb.mxu0 %v27883_v11  ;;  %v27927_v11 = vld [vmem:[%s29800_s12 + $0x480] sm:$0xff] }
  0x83   : > { %16922 = vmatpush.bf16.msrb.mxu1 %v27891_v12  ;;  %v4425_v12 = vunpack.c.h.b16 %v302_v4 }
  0x84   : > { %16935 = vmatpush.bf16.msrb.mxu2 %v27899_v13  ;;  %v27950_v13 = vld [vmem:[%s29800_s12 + $0x538] sm:$0xff] }
  0x85   : > { %16948 = vmatpush.bf16.msrb.mxu3 %v27907_v14  ;;  %v27958_v14 = vld [vmem:[%s29800_s12 + $0x578] sm:$0xff] }
  0x86   : > { %16910 = vmatpush.bf16.msrb.mxu0 %v27882_v15  ;;  %v4427_v15 = vunpack.c.h.b16 %v303_v5  ;;  %v27998_v5 = vld [vmem:[%s29800_s12 + $0x6b8] sm:$0xff] }
  0x87   : > { %16923 = vmatpush.bf16.msrb.mxu1 %v27890_v16  ;;  %v27966_v16 = vld [vmem:[%s29800_s12 + $0x5b8] sm:$0xff] }
  0x88   : > { %16936 = vmatpush.bf16.msrb.mxu2 %v27898_v17  ;;  %v27935_v17 = vld [vmem:[%s29800_s12 + $0x4c0] sm:$0xff] }
  0x89   : > { %16949 = vmatpush.bf16.msrb.mxu3 %v27906_v18  ;;  %v4666_v18 = vpack.c.b16 %v4424_v8, %v4424_v8 }
  0x8a   : > { %16911 = vmatpush.bf16.msrb.mxu0 %v27881_v19  ;;  %v4668_v19 = vpack.c.b16 %v4426_v9, %v4426_v9  ;;  %v28006_v9 = vld [vmem:[%s29800_s12 + $0x6f8] sm:$0xff] }
  0x8b   : > { %16924 = vmatpush.bf16.msrb.mxu1 %v27889_v20  ;;  %v27974_v20 = vld [vmem:[%s29800_s12 + $0x5f8] sm:$0xff] }
  0x8c   : > { %16937 = vmatpush.bf16.msrb.mxu2 %v27897_v21  ;;  %v4667_v21 = vpack.c.b16 %v4425_v12, %v4425_v12  ;;  %v27981_v12 = vld [vmem:[%s29800_s12 + $0x630] sm:$0xff] }
  0x8d   : > { %16950 = vmatpush.bf16.msrb.mxu3 %v27905_v22  ;;  %v4669_v22 = vpack.c.b16 %v4427_v15, %v4427_v15  ;;  %v28005_v15 = vld [vmem:[%s29800_s12 + $0x6f0] sm:$0xff] }
  0x8e   : > { %16912 = vmatpush.bf16.msrb.mxu0 %v27880_v23  ;;  %v27949_v23 = vld [vmem:[%s29800_s12 + $0x530] sm:$0xff] }
  0x8f   : > { %16925 = vmatpush.bf16.msrb.mxu1 %v27888_v24  ;;  %v27957_v24 = vld [vmem:[%s29800_s12 + $0x570] sm:$0xff] }
  0x90   : > { %16938 = vmatpush.bf16.msrb.mxu2 %v27896_v26  ;;  %v27973_v26 = vld [vmem:[%s29800_s12 + $0x5f0] sm:$0xff] }
  0x91   : > { %16951 = vmatpush.bf16.msrb.mxu3 %v27904_v28  ;;  %v27956_v28 = vld [vmem:[%s29800_s12 + $0x568] sm:$0xff] }
  0x92   : > { %16913 = vmatpush.bf16.msrb.mxu0 %v27879_v29  ;;  %v27964_v29 = vld [vmem:[%s29800_s12 + $0x5a8] sm:$0xff] }
  0x93   : > { %16926 = vmatpush.bf16.msrb.mxu1 %v27887_v31  ;;  %v27947_v31 = vld [vmem:[%s29800_s12 + $0x520] sm:$0xff] }
  0x94   : > { %16939 = vmatpush.bf16.msrb.mxu2 %v27895_v35 }
  0x95   : > { %16952 = vmatpush.bf16.msrb.mxu3 %v27903_v39  ;;  %16914 = vmatmul.bf16.vlgmr.msrb.gmra.mxu0 %v4662_v40  ;;  %v27954_v39 = vld [vmem:[%s29800_s12 + $0x558] sm:$0xff] }
  0x96   : > { %16958 = vmatpush.bf16.msra.mxu0 %v27918_v32  ;;  %16927 = vmatmul.bf16.vlgmr.msrb.gmra.mxu1 %v4663_v43  ;;  %v27962_v40 = vld [vmem:[%s29800_s12 + $0x598] sm:$0xff]  ;;  %v27945_v43 = vld [vmem:[%s29800_s12 + $0x510] sm:$0xff] }
  0x97   : > { %16971 = vmatpush.bf16.msra.mxu1 %v27926_v36  ;;  %16940 = vmatmul.bf16.vlgmr.msrb.gmra.mxu2 %v4664_v42  ;;  %v27971_v36 = vld [vmem:[%s29800_s12 + $0x5e0] sm:$0xff] }
  0x98   : > { %16984 = vmatpush.bf16.msra.mxu2 %v27934_v38  ;;  %16953 = vmatmul.bf16.vlgmr.msrb.gmra.mxu3 %v4665_v44  ;;  %v27946_v38 = vld [vmem:[%s29800_s12 + $0x518] sm:$0xff] }
  0x99   : > { %16997 = vmatpush.bf16.msra.mxu3 %v27942_v41  ;;  %v27970_v41 = vld [vmem:[%s29800_s12 + $0x5d8] sm:$0xff] }
  0x9a   : > { %16959 = vmatpush.bf16.msra.mxu0 %v27917_v45 }
  0x9b   : > { %16972 = vmatpush.bf16.msra.mxu1 %v27925_v46  ;;  %v27953_v46 = vld [vmem:[%s29800_s12 + $0x550] sm:$0xff] }
  0x9c   : > { %16985 = vmatpush.bf16.msra.mxu2 %v27933_v47  ;;  %v27961_v47 = vld [vmem:[%s29800_s12 + $0x590] sm:$0xff] }
  0x9d   : > { %16998 = vmatpush.bf16.msra.mxu3 %v27941_v48 }
  0x9e   : > { %16960 = vmatpush.bf16.msra.mxu0 %v27916_v49 }
  0x9f   : > { %16973 = vmatpush.bf16.msra.mxu1 %v27924_v50  ;;  %v27969_v50 = vld [vmem:[%s29800_s12 + $0x5d0] sm:$0xff] }
  0xa0   : > { %16986 = vmatpush.bf16.msra.mxu2 %v27932_v51 }
  0xa1   : > { %16999 = vmatpush.bf16.msra.mxu3 %v27940_v52  ;;  %v27944_v52 = vld [vmem:[%s29800_s12 + $0x508] sm:$0xff] }
  0xa2   : > { %16961 = vmatpush.bf16.msra.mxu0 %v27915_v53  ;;  %v27952_v53 = vld [vmem:[%s29800_s12 + $0x548] sm:$0xff] }
  0xa3   : > { %16974 = vmatpush.bf16.msra.mxu1 %v27923_v54  ;;  %v27960_v54 = vld [vmem:[%s29800_s12 + $0x588] sm:$0xff] }
  0xa4   : > { %16987 = vmatpush.bf16.msra.mxu2 %v27931_v55  ;;  %v304_v55 = vld [vmem:[%s29795_s8 + $0x50] sm:$0xff] }
  0xa5   : > { %17000 = vmatpush.bf16.msra.mxu3 %v27939_v56  ;;  %v305_v56 = vld [vmem:[%s29795_s8 + $0x58] sm:$0xff] }
  0xa6   : > { %16962 = vmatpush.bf16.msra.mxu0 %v27914_v57  ;;  %v27968_v57 = vld [vmem:[%s29800_s12 + $0x5c8] sm:$0xff] }
  0xa7   : > { %16975 = vmatpush.bf16.msra.mxu1 %v27922_v58 }
  0xa8   : > { %16988 = vmatpush.bf16.msra.mxu2 %v27930_v59  ;;  %v27943_v59 = vld [vmem:[%s29800_s12 + $0x500] sm:$0xff] }
  0xa9   : > { %17001 = vmatpush.bf16.msra.mxu3 %v27938_v60  ;;  %v4428_v60 = vunpack.c.l.b16 %v304_v55 }
  0xaa   : > { %16963 = vmatpush.bf16.msra.mxu0 %v27913_v61  ;;  %v4430_v61 = vunpack.c.l.b16 %v305_v56 }
  0xab   : > { %16976 = vmatpush.bf16.msra.mxu1 %v27921_v62  ;;  %v27951_v62 = vld [vmem:[%s29800_s12 + $0x540] sm:$0xff] }
  0xac   : > { %16989 = vmatpush.bf16.msra.mxu2 %v27929_v63  ;;  %v27959_v63 = vld [vmem:[%s29800_s12 + $0x580] sm:$0xff]  ;;  %v4672_v8 = vpack.c.b16 %v4430_v61, %v4430_v61 }
  0xad   : > { %17002 = vmatpush.bf16.msra.mxu3 %v27937_v0  ;;  %v4429_v0 = vunpack.c.h.b16 %v304_v55 }
  0xae   : > { %16964 = vmatpush.bf16.msra.mxu0 %v27912_v1  ;;  %v27982_v1 = vld [vmem:[%s29800_s12 + $0x638] sm:$0xff] }
  0xaf   : > { %16977 = vmatpush.bf16.msra.mxu1 %v27920_v2  ;;  %v27990_v2 = vld [vmem:[%s29800_s12 + $0x678] sm:$0xff] }
  0xb0   : > { %16990 = vmatpush.bf16.msra.mxu2 %v27928_v3  ;;  %v4431_v3 = vunpack.c.h.b16 %v305_v56  ;;  %v28014_v56 = vld [vmem:[%s29800_s12 + $0x738] sm:$0xff] }
  0xb1   : > { %17003 = vmatpush.bf16.msra.mxu3 %v27936_v6  ;;  %v27967_v6 = vld [vmem:[%s29800_s12 + $0x5c0] sm:$0xff] }
  0xb2   : > { %16965 = vmatpush.bf16.msra.mxu0 %v27911_v7  ;;  %v16759_v32 = vpop.f32.mrf.mxu0  ;;  %v4670_v7 = vpack.c.b16 %v4428_v60, %v4428_v60  ;;  %v27999_v60 = vld [vmem:[%s29800_s12 + $0x6c0] sm:$0xff] }
  0xb3   : > { %16978 = vmatpush.bf16.msra.mxu1 %v27919_v10  ;;  %v16772_v35 = vpop.f32.mrf.mxu1  ;;  %v4671_v10 = vpack.c.b16 %v4429_v0, %v4429_v0 }
  0xb4   : > { %16991 = vmatpush.bf16.msra.mxu2 %v27927_v11  ;;  %v16773_v37 = vadd.f32 %v16772_v35, %v16759_v32  ;;  %v4673_v11 = vpack.c.b16 %v4431_v3, %v4431_v3  ;;  %v28002_v32 = vld [vmem:[%s29800_s12 + $0x6d8] sm:$0xff]  ;;  %v27985_v35 = vld [vmem:[%s29800_s12 + $0x650] sm:$0xff] }
  0xb5   : > { %17004 = vmatpush.bf16.msra.mxu3 %v27935_v17  ;;  %16966 = vmatmul.bf16.vlgmr.msra.gmra.mxu0 %v4666_v18  ;;  %v27988_v17 = vld [vmem:[%s29800_s12 + $0x668] sm:$0xff]  ;;  %v28021_v3 = vld [vmem:[%s29800_s12 + $0x770] sm:$0xff] }
  0xb6   : > { %17010 = vmatpush.bf16.msrb.mxu0 %v27950_v13  ;;  %16979 = vmatmul.bf16.vlgmr.msra.gmra.mxu1 %v4667_v21  ;;  %v27989_v13 = vld [vmem:[%s29800_s12 + $0x670] sm:$0xff]  ;;  %v27996_v18 = vld [vmem:[%s29800_s12 + $0x6a8] sm:$0xff]  ;;  %v27987_v21 = vld [vmem:[%s29800_s12 + $0x660] sm:$0xff] }
  0xb7   : > { %17023 = vmatpush.bf16.msrb.mxu1 %v27958_v14  ;;  %16992 = vmatmul.bf16.vlgmr.msra.gmra.mxu2 %v4668_v19  ;;  %v27997_v14 = vld [vmem:[%s29800_s12 + $0x6b0] sm:$0xff]  ;;  %v28004_v19 = vld [vmem:[%s29800_s12 + $0x6e8] sm:$0xff] }
  0xb8   : > { %17036 = vmatpush.bf16.msrb.mxu2 %v27966_v16  ;;  %17005 = vmatmul.bf16.vlgmr.msra.gmra.mxu3 %v4669_v22  ;;  %v27980_v16 = vld [vmem:[%s29800_s12 + $0x628] sm:$0xff]  ;;  %v27995_v22 = vld [vmem:[%s29800_s12 + $0x6a0] sm:$0xff] }
  0xb9   : > { %17049 = vmatpush.bf16.msrb.mxu3 %v27974_v20  ;;  %v27979_v20 = vld [vmem:[%s29800_s12 + $0x620] sm:$0xff] }
  0xba   : > { %17011 = vmatpush.bf16.msrb.mxu0 %v27949_v23  ;;  %v16785_v42 = vpop.f32.mrf.mxu2  ;;  %v16761_v45 = vpop.f32.mrf.mxu0 }
  0xbb   : > { %17024 = vmatpush.bf16.msrb.mxu1 %v27957_v24  ;;  %v16786_v44 = vadd.f32 %v16785_v42, %v16773_v37  ;;  %v16798_v48 = vpop.f32.mrf.mxu3  ;;  %v16774_v49 = vpop.f32.mrf.mxu1  ;;  %v27976_v42 = vld [vmem:[%s29800_s12 + $0x608] sm:$0xff]  ;;  %v306_v45 = vld [vmem:[%s29795_s8 + $0x60] sm:$0xff] }
  0xbc   : > { %17037 = vmatpush.bf16.msrb.mxu2 %v27965_v25  ;;  %v27975_v49 = vld [vmem:[%s29800_s12 + $0x600] sm:$0xff] }
  0xbd   : > { %17050 = vmatpush.bf16.msrb.mxu3 %v27973_v26  ;;  %v29997_v51 = vadd.f32 %v16798_v48, %v16786_v44  ;;  %v28003_v26 = vld [vmem:[%s29800_s12 + $0x6e0] sm:$0xff]  ;;  %v27992_v44 = vld [vmem:[%s29800_s12 + $0x688] sm:$0xff] }
  0xbe   : > { %17012 = vmatpush.bf16.msrb.mxu0 %v27948_v27  ;;  %v27978_v27 = vld [vmem:[%s29800_s12 + $0x618] sm:$0xff]  ;;  %v28000_v48 = vld [vmem:[%s29800_s12 + $0x6c8] sm:$0xff] }
  0xbf   : > { %17025 = vmatpush.bf16.msrb.mxu1 %v27956_v28 }
  0xc0   : > { %17038 = vmatpush.bf16.msrb.mxu2 %v27964_v29  ;;  %v27986_v29 = vld [vmem:[%s29800_s12 + $0x658] sm:$0xff] }
  0xc1   : > { %17051 = vmatpush.bf16.msrb.mxu3 %v27972_v30  ;;  %v27994_v30 = vld [vmem:[%s29800_s12 + $0x698] sm:$0xff] }
  0xc2   : > { %17013 = vmatpush.bf16.msrb.mxu0 %v27947_v31  ;;  %v16787_v58 = vpop.f32.mrf.mxu2 }
  0xc3   : > { %17026 = vmatpush.bf16.msrb.mxu1 %v27955_v33  ;;  %v16800_v4 = vpop.f32.mrf.mxu3 }
  0xc4   : > { %17039 = vmatpush.bf16.msrb.mxu2 %v27963_v34  ;;  %v27977_v34 = vld [vmem:[%s29800_s12 + $0x610] sm:$0xff] }
  0xc5   : > { %17052 = vmatpush.bf16.msrb.mxu3 %v27971_v36  ;;  %v27993_v36 = vld [vmem:[%s29800_s12 + $0x690] sm:$0xff] }
  0xc6   : > { %17014 = vmatpush.bf16.msrb.mxu0 %v27946_v38  ;;  %v28029_v4 = vld [vmem:[%s29800_s12 + $0x7b0] sm:$0xff] }
  0xc7   : > { %17027 = vmatpush.bf16.msrb.mxu1 %v27954_v39 }
  0xc8   : > { %17040 = vmatpush.bf16.msrb.mxu2 %v27962_v40 }
  0xc9   : > { %17053 = vmatpush.bf16.msrb.mxu3 %v27970_v41  ;;  %v28001_v41 = vld [vmem:[%s29800_s12 + $0x6d0] sm:$0xff] }
  0xca   : > { %17015 = vmatpush.bf16.msrb.mxu0 %v27945_v43  ;;  %v27984_v43 = vld [vmem:[%s29800_s12 + $0x648] sm:$0xff] }
  0xcb   : > { %17028 = vmatpush.bf16.msrb.mxu1 %v27953_v46  ;;  %v307_v46 = vld [vmem:[%s29795_s8 + $0x68] sm:$0xff] }
  0xcc   : > { %17041 = vmatpush.bf16.msrb.mxu2 %v27961_v47  ;;  %v4435_v58 = vunpack.c.h.b16 %v307_v46 }
  0xcd   : > { %17054 = vmatpush.bf16.msrb.mxu3 %v27969_v50  ;;  %v4432_v50 = vunpack.c.l.b16 %v306_v45 }
  0xce   : > { %17016 = vmatpush.bf16.msrb.mxu0 %v27944_v52  ;;  %v27983_v52 = vld [vmem:[%s29800_s12 + $0x640] sm:$0xff] }
  0xcf   : > { %17029 = vmatpush.bf16.msrb.mxu1 %v27952_v53  ;;  %v27991_v53 = vld [vmem:[%s29800_s12 + $0x680] sm:$0xff]  ;;  %v4674_v61 = vpack.c.b16 %v4432_v50, %v4432_v50 }
  0xd0   : > { %17042 = vmatpush.bf16.msrb.mxu2 %v27960_v54  ;;  %v4433_v54 = vunpack.c.h.b16 %v306_v45  ;;  %v28031_v50 = vld [vmem:[%s29800_s12 + $0x7c0] sm:$0xff] }
  0xd1   : > { %17055 = vmatpush.bf16.msrb.mxu3 %v27968_v57  ;;  %v28022_v57 = vld [vmem:[%s29800_s12 + $0x778] sm:$0xff] }
  0xd2   : > { %17017 = vmatpush.bf16.msrb.mxu0 %v27943_v59  ;;  %v16811_v23 = vpop.f32.mrf.mxu0  ;;  %v28030_v59 = vld [vmem:[%s29800_s12 + $0x7b8] sm:$0xff]  ;;  %v4675_v0 = vpack.c.b16 %v4433_v54, %v4433_v54 }
  0xd3   : > { %17030 = vmatpush.bf16.msrb.mxu1 %v27951_v62  ;;  %v16824_v24 = vpop.f32.mrf.mxu1  ;;  %v16812_v25 = vadd.f32 %v16811_v23, %v29997_v51  ;;  %v4434_v51 = vunpack.c.l.b16 %v307_v46  ;;  %v28034_v23 = vld [vmem:[%s29800_s12 + $0x7d8] sm:$0xff] }
  0xd4   : > { %17043 = vmatpush.bf16.msrb.mxu2 %v27959_v63  ;;  %v28038_v63 = vld [vmem:[%s29800_s12 + $0x7f8] sm:$0xff] }
  0xd5   : > { %17056 = vmatpush.bf16.msrb.mxu3 %v27967_v6  ;;  %17018 = vmatmul.bf16.vlgmr.msrb.gmra.mxu0 %v4670_v7  ;;  %v16825_v28 = vadd.f32 %v16824_v24, %v16812_v25  ;;  %v4676_v62 = vpack.c.b16 %v4434_v51, %v4434_v51  ;;  %v28012_v6 = vld [vmem:[%s29800_s12 + $0x728] sm:$0xff]  ;;  %v28046_v46 = vld [vmem:[%s29800_s12 + $0x838] sm:$0xff] }
  0xd6   : > { %17062 = vmatpush.bf16.msra.mxu0 %v27982_v1  ;;  %17031 = vmatmul.bf16.vlgmr.msrb.gmra.mxu1 %v4671_v10  ;;  %v4677_v1 = vpack.c.b16 %v4435_v58, %v4435_v58  ;;  %v28020_v7 = vld [vmem:[%s29800_s12 + $0x768] sm:$0xff]  ;;  %v28061_v58 = vld [vmem:[%s29800_s12 + $0x8b0] sm:$0xff] }
  0xd7   : > { %17075 = vmatpush.bf16.msra.mxu1 %v27990_v2  ;;  %17044 = vmatmul.bf16.vlgmr.msrb.gmra.mxu2 %v4672_v8  ;;  %v28013_v2 = vld [vmem:[%s29800_s12 + $0x730] sm:$0xff]  ;;  %v28028_v8 = vld [vmem:[%s29800_s12 + $0x7a8] sm:$0xff] }
  0xd8   : > { %17088 = vmatpush.bf16.msra.mxu2 %v27998_v5  ;;  %17057 = vmatmul.bf16.vlgmr.msrb.gmra.mxu3 %v4673_v11  ;;  %v28037_v5 = vld [vmem:[%s29800_s12 + $0x7f0] sm:$0xff] }
  0xd9   : > { %17101 = vmatpush.bf16.msra.mxu3 %v28006_v9  ;;  %v28036_v9 = vld [vmem:[%s29800_s12 + $0x7e8] sm:$0xff] }
  0xda   : > { %17063 = vmatpush.bf16.msra.mxu0 %v27981_v12  ;;  %v16837_v31 = vpop.f32.mrf.mxu2  ;;  %v16813_v38 = vpop.f32.mrf.mxu0  ;;  %v28011_v12 = vld [vmem:[%s29800_s12 + $0x720] sm:$0xff] }
  0xdb   : > { %17076 = vmatpush.bf16.msra.mxu1 %v27989_v13  ;;  %v16838_v33 = vadd.f32 %v16837_v31, %v16825_v28  ;;  %v16850_v37 = vpop.f32.mrf.mxu3  ;;  %v16826_v40 = vpop.f32.mrf.mxu1  ;;  %v28019_v13 = vld [vmem:[%s29800_s12 + $0x760] sm:$0xff]  ;;  %v28017_v28 = vld [vmem:[%s29800_s12 + $0x750] sm:$0xff]  ;;  %v28032_v38 = vld [vmem:[%s29800_s12 + $0x7c8] sm:$0xff] }
  0xdc   : > { %17089 = vmatpush.bf16.msra.mxu2 %v27997_v14  ;;  %v28027_v14 = vld [vmem:[%s29800_s12 + $0x7a0] sm:$0xff]  ;;  %v28033_v31 = vld [vmem:[%s29800_s12 + $0x7d0] sm:$0xff] }
  0xdd   : > { %17102 = vmatpush.bf16.msra.mxu3 %v28005_v15  ;;  %v16851_v39 = vadd.f32 %v16850_v37, %v16838_v33  ;;  %v28016_v33 = vld [vmem:[%s29800_s12 + $0x748] sm:$0xff] }
  0xde   : > { %17064 = vmatpush.bf16.msra.mxu0 %v27980_v16 }
  0xdf   : > { %17077 = vmatpush.bf16.msra.mxu1 %v27988_v17  ;;  %v28035_v17 = vld [vmem:[%s29800_s12 + $0x7e0] sm:$0xff] }
  0xe0   : > { %17090 = vmatpush.bf16.msra.mxu2 %v27996_v18  ;;  %v28010_v18 = vld [vmem:[%s29800_s12 + $0x718] sm:$0xff] }
  0xe1   : > { %17103 = vmatpush.bf16.msra.mxu3 %v28004_v19  ;;  %v28018_v19 = vld [vmem:[%s29800_s12 + $0x758] sm:$0xff] }
  0xe2   : > { %17065 = vmatpush.bf16.msra.mxu0 %v27979_v20  ;;  %v16839_v47 = vpop.f32.mrf.mxu2  ;;  %v28026_v20 = vld [vmem:[%s29800_s12 + $0x798] sm:$0xff] }
  0xe3   : > { %17078 = vmatpush.bf16.msra.mxu1 %v27987_v21  ;;  %v16852_v55 = vpop.f32.mrf.mxu3  ;;  %v28054_v47 = vld [vmem:[%s29800_s12 + $0x878] sm:$0xff] }
  0xe4   : > { %17091 = vmatpush.bf16.msra.mxu2 %v27995_v22 }
  0xe5   : > { %17104 = vmatpush.bf16.msra.mxu3 %v28003_v26  ;;  %v28009_v26 = vld [vmem:[%s29800_s12 + $0x710] sm:$0xff] }
  0xe6   : > { %17066 = vmatpush.bf16.msra.mxu0 %v27978_v27 }
  0xe7   : > { %17079 = vmatpush.bf16.msra.mxu1 %v27986_v29  ;;  %v28025_v29 = vld [vmem:[%s29800_s12 + $0x790] sm:$0xff] }
  0xe8   : > { %17092 = vmatpush.bf16.msra.mxu2 %v27994_v30 }
  0xe9   : > { %17105 = vmatpush.bf16.msra.mxu3 %v28002_v32  ;;  %v28008_v32 = vld [vmem:[%s29800_s12 + $0x708] sm:$0xff] }
  0xea   : > { %17067 = vmatpush.bf16.msra.mxu0 %v27977_v34  ;;  %v28024_v34 = vld [vmem:[%s29800_s12 + $0x788] sm:$0xff] }
  0xeb   : > { %17080 = vmatpush.bf16.msra.mxu1 %v27985_v35  ;;  %v308_v35 = vld [vmem:[%s29795_s8 + $0x70] sm:$0xff] }
  0xec   : > { %17093 = vmatpush.bf16.msra.mxu2 %v27993_v36  ;;  %v309_v36 = vld [vmem:[%s29795_s8 + $0x78] sm:$0xff]  ;;  %v4436_v40 = vunpack.c.l.b16 %v308_v35  ;;  %v4437_v45 = vunpack.c.h.b16 %v308_v35 }
  0xed   : > { %17106 = vmatpush.bf16.msra.mxu3 %v28001_v41  ;;  %v4438_v41 = vunpack.c.l.b16 %v309_v36 }
  0xee   : > { %17068 = vmatpush.bf16.msra.mxu0 %v27976_v42  ;;  %v4678_v51 = vpack.c.b16 %v4436_v40, %v4436_v40  ;;  %v4679_v54 = vpack.c.b16 %v4437_v45, %v4437_v45  ;;  %v28063_v40 = vld [vmem:[%s29800_s12 + $0x8c0] sm:$0xff] }
  0xef   : > { %17081 = vmatpush.bf16.msra.mxu1 %v27984_v43  ;;  %v28015_v43 = vld [vmem:[%s29800_s12 + $0x740] sm:$0xff] }
  0xf0   : > { %17094 = vmatpush.bf16.msra.mxu2 %v27992_v44  ;;  %v28023_v44 = vld [vmem:[%s29800_s12 + $0x780] sm:$0xff] }
  0xf1   : > { %17107 = vmatpush.bf16.msra.mxu3 %v28000_v48  ;;  %v4439_v48 = vunpack.c.h.b16 %v309_v36  ;;  %v28078_v36 = vld [vmem:[%s29800_s12 + $0x938] sm:$0xff] }
  0xf2   : > { %17069 = vmatpush.bf16.msra.mxu0 %v27975_v49  ;;  %v16863_v10 = vpop.f32.mrf.mxu0  ;;  %v28062_v49 = vld [vmem:[%s29800_s12 + $0x8b8] sm:$0xff] }
  0xf3   : > { %17082 = vmatpush.bf16.msra.mxu1 %v27983_v52  ;;  %v16864_v11 = vadd.f32 %v16863_v10, %v16851_v39  ;;  %v16876_v15 = vpop.f32.mrf.mxu1  ;;  %v28007_v39 = vld [vmem:[%s29800_s12 + $0x700] sm:$0xff]  ;;  %v4680_v52 = vpack.c.b16 %v4438_v41, %v4438_v41  ;;  %v4681_v55 = vpack.c.b16 %v4439_v48, %v4439_v48  ;;  %v28058_v10 = vld [vmem:[%s29800_s12 + $0x898] sm:$0xff]  ;;  %v28093_v48 = vld [vmem:[%s29800_s12 + $0x9b0] sm:$0xff] }
  0xf4   : > { %17095 = vmatpush.bf16.msra.mxu2 %v27991_v53  ;;  %v28070_v53 = vld [vmem:[%s29800_s12 + $0x8f8] sm:$0xff] }
  0xf5   : > { %17108 = vmatpush.bf16.msra.mxu3 %v27999_v60  ;;  %17070 = vmatmul.bf16.vlgmr.msra.gmra.mxu0 %v4674_v61  ;;  %v16877_v16 = vadd.f32 %v16876_v15, %v16864_v11  ;;  %v28044_v60 = vld [vmem:[%s29800_s12 + $0x828] sm:$0xff] }
  0xf6   : > { %17114 = vmatpush.bf16.msrb.mxu0 %v28014_v56  ;;  %17083 = vmatmul.bf16.vlgmr.msra.gmra.mxu1 %v4675_v0  ;;  %v28045_v56 = vld [vmem:[%s29800_s12 + $0x830] sm:$0xff]  ;;  %v28052_v61 = vld [vmem:[%s29800_s12 + $0x868] sm:$0xff] }
  0xf7   : > { %17127 = vmatpush.bf16.msrb.mxu1 %v28022_v57  ;;  %17096 = vmatmul.bf16.vlgmr.msra.gmra.mxu2 %v4676_v62  ;;  %v28053_v57 = vld [vmem:[%s29800_s12 + $0x870] sm:$0xff]  ;;  %v28060_v62 = vld [vmem:[%s29800_s12 + $0x8a8] sm:$0xff] }
  0xf8   : > { %17140 = vmatpush.bf16.msrb.mxu2 %v28030_v59  ;;  %17109 = vmatmul.bf16.vlgmr.msra.gmra.mxu3 %v4677_v1  ;;  %v28069_v59 = vld [vmem:[%s29800_s12 + $0x8f0] sm:$0xff] }
  0xf9   : > { %17153 = vmatpush.bf16.msrb.mxu3 %v28038_v63  ;;  %v28068_v63 = vld [vmem:[%s29800_s12 + $0x8e8] sm:$0xff] }
  0xfa   : > { %17115 = vmatpush.bf16.msrb.mxu0 %v28013_v2  ;;  %v16889_v21 = vpop.f32.mrf.mxu2  ;;  %v16865_v24 = vpop.f32.mrf.mxu0  ;;  %v28043_v2 = vld [vmem:[%s29800_s12 + $0x820] sm:$0xff] }
  0xfb   : > { %17128 = vmatpush.bf16.msrb.mxu1 %v28021_v3  ;;  %v16890_v22 = vadd.f32 %v16889_v21, %v16877_v16  ;;  %v16902_v25 = vpop.f32.mrf.mxu3  ;;  %v16878_v30 = vpop.f32.mrf.mxu1  ;;  %v28041_v16 = vld [vmem:[%s29800_s12 + $0x810] sm:$0xff]  ;;  %v28056_v24 = vld [vmem:[%s29800_s12 + $0x888] sm:$0xff] }
  0xfc   : > { %17141 = vmatpush.bf16.msrb.mxu2 %v28029_v4  ;;  %v28051_v4 = vld [vmem:[%s29800_s12 + $0x860] sm:$0xff]  ;;  %v28065_v21 = vld [vmem:[%s29800_s12 + $0x8d0] sm:$0xff] }
  0xfd   : > { %17154 = vmatpush.bf16.msrb.mxu3 %v28037_v5  ;;  %v30065_v27 = vadd.f32 %v16902_v25, %v16890_v22  ;;  %v28059_v5 = vld [vmem:[%s29800_s12 + $0x8a0] sm:$0xff]  ;;  %v28040_v22 = vld [vmem:[%s29800_s12 + $0x808] sm:$0xff] }
  0xfe   : > { %17116 = vmatpush.bf16.msrb.mxu0 %v28012_v6  ;;  %v310_v25 = vld [vmem:[%s29795_s8 + $0x80] sm:$0xff] }
  0xff   : > { %17129 = vmatpush.bf16.msrb.mxu1 %v28020_v7  ;;  %v28067_v7 = vld [vmem:[%s29800_s12 + $0x8e0] sm:$0xff]  ;;  %v4441_v35 = vunpack.c.h.b16 %v310_v25 }
 0x100   : > { %17142 = vmatpush.bf16.msrb.mxu2 %v28028_v8  ;;  %v28042_v8 = vld [vmem:[%s29800_s12 + $0x818] sm:$0xff]  ;;  %v28039_v30 = vld [vmem:[%s29800_s12 + $0x800] sm:$0xff] }
 0x101   : > { %17155 = vmatpush.bf16.msrb.mxu3 %v28036_v9  ;;  %v28050_v9 = vld [vmem:[%s29800_s12 + $0x858] sm:$0xff] }
 0x102   : > { %17117 = vmatpush.bf16.msrb.mxu0 %v28011_v12  ;;  %v16891_v37 = vpop.f32.mrf.mxu2 }
 0x103   : > { %17130 = vmatpush.bf16.msrb.mxu1 %v28019_v13  ;;  %v16904_v42 = vpop.f32.mrf.mxu3  ;;  %v28066_v13 = vld [vmem:[%s29800_s12 + $0x8d8] sm:$0xff] }
 0x104   : > { %17143 = vmatpush.bf16.msrb.mxu2 %v28027_v14  ;;  %v28086_v37 = vld [vmem:[%s29800_s12 + $0x978] sm:$0xff] }
 0x105   : > { %17156 = vmatpush.bf16.msrb.mxu3 %v28035_v17 }
 0x106   : > { %17118 = vmatpush.bf16.msrb.mxu0 %v28010_v18 }
 0x107   : > { %17131 = vmatpush.bf16.msrb.mxu1 %v28018_v19  ;;  %v28049_v19 = vld [vmem:[%s29800_s12 + $0x850] sm:$0xff] }
 0x108   : > { %17144 = vmatpush.bf16.msrb.mxu2 %v28026_v20  ;;  %v28057_v20 = vld [vmem:[%s29800_s12 + $0x890] sm:$0xff] }
 0x109   : > { %17157 = vmatpush.bf16.msrb.mxu3 %v28034_v23  ;;  %v28048_v23 = vld [vmem:[%s29800_s12 + $0x848] sm:$0xff] }
 0x10a   : > { %17119 = vmatpush.bf16.msrb.mxu0 %v28009_v26  ;;  %v311_v26 = vld [vmem:[%s29795_s8 + $0x88] sm:$0xff] }
 0x10b   : > { %17132 = vmatpush.bf16.msrb.mxu1 %v28017_v28  ;;  %v28064_v28 = vld [vmem:[%s29800_s12 + $0x8c8] sm:$0xff] }
 0x10c   : > { %17145 = vmatpush.bf16.msrb.mxu2 %v28025_v29 }
 0x10d   : > { %17158 = vmatpush.bf16.msrb.mxu3 %v28033_v31  ;;  %v4440_v31 = vunpack.c.l.b16 %v310_v25 }
 0x10e   : > { %17120 = vmatpush.bf16.msrb.mxu0 %v28008_v32  ;;  %v4442_v32 = vunpack.c.l.b16 %v311_v26 }
 0x10f   : > { %17133 = vmatpush.bf16.msrb.mxu1 %v28016_v33  ;;  %v28047_v33 = vld [vmem:[%s29800_s12 + $0x840] sm:$0xff]  ;;  %v4682_v41 = vpack.c.b16 %v4440_v31, %v4440_v31 }
 0x110   : > { %17146 = vmatpush.bf16.msrb.mxu2 %v28024_v34  ;;  %v28055_v34 = vld [vmem:[%s29800_s12 + $0x880] sm:$0xff]  ;;  %v4684_v42 = vpack.c.b16 %v4442_v32, %v4442_v32 }
 0x111   : > { %17159 = vmatpush.bf16.msrb.mxu3 %v28032_v38  ;;  %v4443_v38 = vunpack.c.h.b16 %v311_v26  ;;  %v28110_v26 = vld [vmem:[%s29800_s12 + $0xa38] sm:$0xff] }
 0x112   : > { %17121 = vmatpush.bf16.msrb.mxu0 %v28007_v39  ;;  %v16915_v0 = vpop.f32.mrf.mxu0  ;;  %v28094_v39 = vld [vmem:[%s29800_s12 + $0x9b8] sm:$0xff] }
 0x113   : > { %17134 = vmatpush.bf16.msrb.mxu1 %v28015_v43  ;;  %v16916_v1 = vadd.f32 %v16915_v0, %v30065_v27  ;;  %v16928_v3 = vpop.f32.mrf.mxu1  ;;  %v28102_v43 = vld [vmem:[%s29800_s12 + $0x9f8] sm:$0xff]  ;;  %v4685_v45 = vpack.c.b16 %v4443_v38, %v4443_v38  ;;  %v28125_v38 = vld [vmem:[%s29800_s12 + $0xab0] sm:$0xff] }
 0x114   : > { %17147 = vmatpush.bf16.msrb.mxu2 %v28023_v44  ;;  %v4683_v44 = vpack.c.b16 %v4441_v35, %v4441_v35  ;;  %v28090_v0 = vld [vmem:[%s29800_s12 + $0x998] sm:$0xff] }
 0x115   : > { %17160 = vmatpush.bf16.msrb.mxu3 %v28031_v50  ;;  %17122 = vmatmul.bf16.vlgmr.msrb.gmra.mxu0 %v4678_v51  ;;  %v16929_v6 = vadd.f32 %v16928_v3, %v16916_v1  ;;  %v28076_v50 = vld [vmem:[%s29800_s12 + $0x928] sm:$0xff]  ;;  %v28098_v3 = vld [vmem:[%s29800_s12 + $0x9d8] sm:$0xff] }
 0x116   : > { %17166 = vmatpush.bf16.msra.mxu0 %v28046_v46  ;;  %17135 = vmatmul.bf16.vlgmr.msrb.gmra.mxu1 %v4679_v54  ;;  %v28077_v46 = vld [vmem:[%s29800_s12 + $0x930] sm:$0xff]  ;;  %v28084_v51 = vld [vmem:[%s29800_s12 + $0x968] sm:$0xff] }
 0x117   : > { %17179 = vmatpush.bf16.msra.mxu1 %v28054_v47  ;;  %17148 = vmatmul.bf16.vlgmr.msrb.gmra.mxu2 %v4680_v52  ;;  %v28085_v47 = vld [vmem:[%s29800_s12 + $0x970] sm:$0xff]  ;;  %v28092_v52 = vld [vmem:[%s29800_s12 + $0x9a8] sm:$0xff] }
 0x118   : > { %17192 = vmatpush.bf16.msra.mxu2 %v28062_v49  ;;  %17161 = vmatmul.bf16.vlgmr.msrb.gmra.mxu3 %v4681_v55  ;;  %v28101_v49 = vld [vmem:[%s29800_s12 + $0x9f0] sm:$0xff] }
 0x119   : > { %17205 = vmatpush.bf16.msra.mxu3 %v28070_v53  ;;  %v28100_v53 = vld [vmem:[%s29800_s12 + $0x9e8] sm:$0xff] }
 0x11a   : > { %17167 = vmatpush.bf16.msra.mxu0 %v28045_v56  ;;  %v16941_v11 = vpop.f32.mrf.mxu2  ;;  %v16917_v15 = vpop.f32.mrf.mxu0  ;;  %v28075_v56 = vld [vmem:[%s29800_s12 + $0x920] sm:$0xff] }
 0x11b   : > { %17180 = vmatpush.bf16.msra.mxu1 %v28053_v57  ;;  %v16942_v12 = vadd.f32 %v16941_v11, %v16929_v6  ;;  %v16954_v14 = vpop.f32.mrf.mxu3  ;;  %v16930_v17 = vpop.f32.mrf.mxu1  ;;  %v28097_v11 = vld [vmem:[%s29800_s12 + $0x9d0] sm:$0xff] }
 0x11c   : > { %17193 = vmatpush.bf16.msra.mxu2 %v28061_v58  ;;  %v28083_v58 = vld [vmem:[%s29800_s12 + $0x960] sm:$0xff]  ;;  %v312_v15 = vld [vmem:[%s29795_s8 + $0x90] sm:$0xff] }
 0x11d   : > { %17206 = vmatpush.bf16.msra.mxu3 %v28069_v59  ;;  %v30102_v18 = vadd.f32 %v16954_v14, %v16942_v12  ;;  %v28091_v59 = vld [vmem:[%s29800_s12 + $0x9a0] sm:$0xff]  ;;  %v28072_v12 = vld [vmem:[%s29800_s12 + $0x908] sm:$0xff]  ;;  %v4445_v25 = vunpack.c.h.b16 %v312_v15 }
 0x11e   : > { %17168 = vmatpush.bf16.msra.mxu0 %v28044_v60  ;;  %v28088_v14 = vld [vmem:[%s29800_s12 + $0x988] sm:$0xff] }
 0x11f   : > { %17181 = vmatpush.bf16.msra.mxu1 %v28052_v61  ;;  %v28099_v61 = vld [vmem:[%s29800_s12 + $0x9e0] sm:$0xff] }
 0x120   : > { %17194 = vmatpush.bf16.msra.mxu2 %v28060_v62  ;;  %v28074_v62 = vld [vmem:[%s29800_s12 + $0x918] sm:$0xff] }
 0x121   : > { %17207 = vmatpush.bf16.msra.mxu3 %v28068_v63  ;;  %v28082_v63 = vld [vmem:[%s29800_s12 + $0x958] sm:$0xff] }
 0x122   : > { %17169 = vmatpush.bf16.msra.mxu0 %v28043_v2  ;;  %v16943_v27 = vpop.f32.mrf.mxu2 }
 0x123   : > { %17182 = vmatpush.bf16.msra.mxu1 %v28051_v4  ;;  %v16956_v29 = vpop.f32.mrf.mxu3  ;;  %v28118_v27 = vld [vmem:[%s29800_s12 + $0xa78] sm:$0xff] }
 0x124   : > { %17195 = vmatpush.bf16.msra.mxu2 %v28059_v5  ;;  %v28126_v29 = vld [vmem:[%s29800_s12 + $0xab8] sm:$0xff] }
 0x125   : > { %17208 = vmatpush.bf16.msra.mxu3 %v28067_v7  ;;  %v28073_v7 = vld [vmem:[%s29800_s12 + $0x910] sm:$0xff] }
 0x126   : > { %17170 = vmatpush.bf16.msra.mxu0 %v28042_v8 }
 0x127   : > { %17183 = vmatpush.bf16.msra.mxu1 %v28050_v9  ;;  %v28081_v9 = vld [vmem:[%s29800_s12 + $0x950] sm:$0xff] }
 0x128   : > { %17196 = vmatpush.bf16.msra.mxu2 %v28058_v10  ;;  %v28089_v10 = vld [vmem:[%s29800_s12 + $0x990] sm:$0xff] }
 0x129   : > { %17209 = vmatpush.bf16.msra.mxu3 %v28066_v13  ;;  %v28080_v13 = vld [vmem:[%s29800_s12 + $0x948] sm:$0xff] }
 0x12a   : > { %17171 = vmatpush.bf16.msra.mxu0 %v28041_v16  ;;  %v313_v16 = vld [vmem:[%s29795_s8 + $0x98] sm:$0xff] }
 0x12b   : > { %17184 = vmatpush.bf16.msra.mxu1 %v28049_v19 }
 0x12c   : > { %17197 = vmatpush.bf16.msra.mxu2 %v28057_v20  ;;  %v28071_v20 = vld [vmem:[%s29800_s12 + $0x900] sm:$0xff] }
 0x12d   : > { %17210 = vmatpush.bf16.msra.mxu3 %v28065_v21  ;;  %v4444_v21 = vunpack.c.l.b16 %v312_v15 }
 0x12e   : > { %17172 = vmatpush.bf16.msra.mxu0 %v28040_v22  ;;  %v4446_v22 = vunpack.c.l.b16 %v313_v16 }
 0x12f   : > { %17185 = vmatpush.bf16.msra.mxu1 %v28048_v23  ;;  %v28079_v23 = vld [vmem:[%s29800_s12 + $0x940] sm:$0xff]  ;;  %v4686_v31 = vpack.c.b16 %v4444_v21, %v4444_v21 }
 0x130   : > { %17198 = vmatpush.bf16.msra.mxu2 %v28056_v24  ;;  %v28087_v24 = vld [vmem:[%s29800_s12 + $0x980] sm:$0xff]  ;;  %v4688_v32 = vpack.c.b16 %v4446_v22, %v4446_v22 }
 0x131   : > { %17211 = vmatpush.bf16.msra.mxu3 %v28064_v28  ;;  %v4447_v28 = vunpack.c.h.b16 %v313_v16  ;;  %v28142_v16 = vld [vmem:[%s29800_s12 + $0xb38] sm:$0xff] }
 0x132   : > { %17173 = vmatpush.bf16.msra.mxu0 %v28039_v30  ;;  %v16967_v54 = vpop.f32.mrf.mxu0  ;;  %v28095_v30 = vld [vmem:[%s29800_s12 + $0x9c0] sm:$0xff] }
 0x133   : > { %17186 = vmatpush.bf16.msra.mxu1 %v28047_v33  ;;  %v16968_v55 = vadd.f32 %v16967_v54, %v30102_v18  ;;  %v16980_v57 = vpop.f32.mrf.mxu1  ;;  %v28096_v18 = vld [vmem:[%s29800_s12 + $0x9c8] sm:$0xff]  ;;  %v28134_v33 = vld [vmem:[%s29800_s12 + $0xaf8] sm:$0xff]  ;;  %v4689_v35 = vpack.c.b16 %v4447_v28, %v4447_v28  ;;  %v28157_v28 = vld [vmem:[%s29800_s12 + $0xbb0] sm:$0xff] }
 0x134   : > { %17199 = vmatpush.bf16.msra.mxu2 %v28055_v34  ;;  %v4687_v34 = vpack.c.b16 %v4445_v25, %v4445_v25  ;;  %v28122_v54 = vld [vmem:[%s29800_s12 + $0xa98] sm:$0xff] }
 0x135   : > { %17212 = vmatpush.bf16.msra.mxu3 %v28063_v40  ;;  %17174 = vmatmul.bf16.vlgmr.msra.gmra.mxu0 %v4682_v41  ;;  %v16981_v60 = vadd.f32 %v16980_v57, %v16968_v55  ;;  %v28108_v40 = vld [vmem:[%s29800_s12 + $0xa28] sm:$0xff]  ;;  %v28130_v57 = vld [vmem:[%s29800_s12 + $0xad8] sm:$0xff] }
 0x136   : > { %17218 = vmatpush.bf16.msrb.mxu0 %v28078_v36  ;;  %17187 = vmatmul.bf16.vlgmr.msra.gmra.mxu1 %v4683_v44  ;;  %v28109_v36 = vld [vmem:[%s29800_s12 + $0xa30] sm:$0xff]  ;;  %v28116_v41 = vld [vmem:[%s29800_s12 + $0xa68] sm:$0xff] }
 0x137   : > { %17231 = vmatpush.bf16.msrb.mxu1 %v28086_v37  ;;  %17200 = vmatmul.bf16.vlgmr.msra.gmra.mxu2 %v4684_v42  ;;  %v28117_v37 = vld [vmem:[%s29800_s12 + $0xa70] sm:$0xff]  ;;  %v28124_v42 = vld [vmem:[%s29800_s12 + $0xaa8] sm:$0xff] }
 0x138   : > { %17244 = vmatpush.bf16.msrb.mxu2 %v28094_v39  ;;  %17213 = vmatmul.bf16.vlgmr.msra.gmra.mxu3 %v4685_v45  ;;  %v28133_v39 = vld [vmem:[%s29800_s12 + $0xaf0] sm:$0xff] }
 0x139   : > { %17257 = vmatpush.bf16.msrb.mxu3 %v28102_v43  ;;  %v28132_v43 = vld [vmem:[%s29800_s12 + $0xae8] sm:$0xff] }
 0x13a   : > { %17219 = vmatpush.bf16.msrb.mxu0 %v28077_v46  ;;  %v16993_v1 = vpop.f32.mrf.mxu2  ;;  %v16969_v5 = vpop.f32.mrf.mxu0  ;;  %v28107_v46 = vld [vmem:[%s29800_s12 + $0xa20] sm:$0xff] }
 0x13b   : > { %17232 = vmatpush.bf16.msrb.mxu1 %v28085_v47  ;;  %v16994_v2 = vadd.f32 %v16993_v1, %v16981_v60  ;;  %v17006_v4 = vpop.f32.mrf.mxu3  ;;  %v16982_v8 = vpop.f32.mrf.mxu1  ;;  %v28129_v1 = vld [vmem:[%s29800_s12 + $0xad0] sm:$0xff]  ;;  %v314_v5 = vld [vmem:[%s29795_s8 + $0xa0] sm:$0xff] }
 0x13c   : > { %17245 = vmatpush.bf16.msrb.mxu2 %v28093_v48  ;;  %v28115_v48 = vld [vmem:[%s29800_s12 + $0xa60] sm:$0xff]  ;;  %v28128_v8 = vld [vmem:[%s29800_s12 + $0xac8] sm:$0xff]  ;;  %v4449_v15 = vunpack.c.h.b16 %v314_v5 }
 0x13d   : > { %17258 = vmatpush.bf16.msrb.mxu3 %v28101_v49  ;;  %v30138_v6 = vadd.f32 %v17006_v4, %v16994_v2  ;;  %v28123_v49 = vld [vmem:[%s29800_s12 + $0xaa0] sm:$0xff]  ;;  %v28104_v2 = vld [vmem:[%s29800_s12 + $0xa08] sm:$0xff] }
 0x13e   : > { %17220 = vmatpush.bf16.msrb.mxu0 %v28076_v50  ;;  %v28120_v4 = vld [vmem:[%s29800_s12 + $0xa88] sm:$0xff] }
 0x13f   : > { %17233 = vmatpush.bf16.msrb.mxu1 %v28084_v51  ;;  %v28131_v51 = vld [vmem:[%s29800_s12 + $0xae0] sm:$0xff] }
 0x140   : > { %17246 = vmatpush.bf16.msrb.mxu2 %v28092_v52  ;;  %v28106_v52 = vld [vmem:[%s29800_s12 + $0xa18] sm:$0xff] }
 0x141   : > { %17259 = vmatpush.bf16.msrb.mxu3 %v28100_v53  ;;  %v28114_v53 = vld [vmem:[%s29800_s12 + $0xa58] sm:$0xff] }
 0x142   : > { %17221 = vmatpush.bf16.msrb.mxu0 %v28075_v56  ;;  %v16995_v17 = vpop.f32.mrf.mxu2 }
 0x143   : > { %17234 = vmatpush.bf16.msrb.mxu1 %v28083_v58  ;;  %v17008_v19 = vpop.f32.mrf.mxu3  ;;  %v28150_v17 = vld [vmem:[%s29800_s12 + $0xb78] sm:$0xff] }
 0x144   : > { %17247 = vmatpush.bf16.msrb.mxu2 %v28091_v59  ;;  %v28158_v19 = vld [vmem:[%s29800_s12 + $0xbb8] sm:$0xff] }
 0x145   : > { %17260 = vmatpush.bf16.msrb.mxu3 %v28099_v61  ;;  %v28105_v61 = vld [vmem:[%s29800_s12 + $0xa10] sm:$0xff] }
 0x146   : > { %17222 = vmatpush.bf16.msrb.mxu0 %v28074_v62 }
 0x147   : > { %17235 = vmatpush.bf16.msrb.mxu1 %v28082_v63  ;;  %v28113_v63 = vld [vmem:[%s29800_s12 + $0xa50] sm:$0xff] }
 0x148   : > { %17248 = vmatpush.bf16.msrb.mxu2 %v28090_v0  ;;  %v28121_v0 = vld [vmem:[%s29800_s12 + $0xa90] sm:$0xff] }
 0x149   : > { %17261 = vmatpush.bf16.msrb.mxu3 %v28098_v3  ;;  %v28112_v3 = vld [vmem:[%s29800_s12 + $0xa48] sm:$0xff] }
 0x14a   : > { %17223 = vmatpush.bf16.msrb.mxu0 %v28073_v7 }
 0x14b   : > { %17236 = vmatpush.bf16.msrb.mxu1 %v28081_v9 }
 0x14c   : > { %17249 = vmatpush.bf16.msrb.mxu2 %v28089_v10  ;;  %v28103_v10 = vld [vmem:[%s29800_s12 + $0xa00] sm:$0xff] }
 0x14d   : > { %17262 = vmatpush.bf16.msrb.mxu3 %v28097_v11  ;;  %v4448_v11 = vunpack.c.l.b16 %v314_v5 }
 0x14e   : > { %17224 = vmatpush.bf16.msrb.mxu0 %v28072_v12 }
 0x14f   : > { %17237 = vmatpush.bf16.msrb.mxu1 %v28080_v13  ;;  %v28111_v13 = vld [vmem:[%s29800_s12 + $0xa40] sm:$0xff]  ;;  %v4690_v21 = vpack.c.b16 %v4448_v11, %v4448_v11 }
 0x150   : > { %17250 = vmatpush.bf16.msrb.mxu2 %v28088_v14  ;;  %v28119_v14 = vld [vmem:[%s29800_s12 + $0xa80] sm:$0xff] }
 0x151   : > { %17263 = vmatpush.bf16.msrb.mxu3 %v28096_v18 }
 0x152   : > { %17225 = vmatpush.bf16.msrb.mxu0 %v28071_v20  ;;  %v17019_v44 = vpop.f32.mrf.mxu0  ;;  %v28127_v20 = vld [vmem:[%s29800_s12 + $0xac0] sm:$0xff] }
 0x153   : > { %17238 = vmatpush.bf16.msrb.mxu1 %v28079_v23  ;;  %v17020_v45 = vadd.f32 %v17019_v44, %v30138_v6  ;;  %v17032_v47 = vpop.f32.mrf.mxu1  ;;  %v315_v6 = vld [vmem:[%s29795_s8 + $0xa8] sm:$0xff]  ;;  %v28166_v23 = vld [vmem:[%s29800_s12 + $0xbf8] sm:$0xff] }
 0x154   : > { %17251 = vmatpush.bf16.msrb.mxu2 %v28087_v24  ;;  %v4450_v12 = vunpack.c.l.b16 %v315_v6  ;;  %v4451_v18 = vunpack.c.h.b16 %v315_v6  ;;  %v4691_v24 = vpack.c.b16 %v4449_v15, %v4449_v15  ;;  %v28154_v44 = vld [vmem:[%s29800_s12 + $0xb98] sm:$0xff] }
 0x155   : > { %17264 = vmatpush.bf16.msrb.mxu3 %v28095_v30  ;;  %17226 = vmatmul.bf16.vlgmr.msrb.gmra.mxu0 %v4686_v31  ;;  %v17033_v50 = vadd.f32 %v17032_v47, %v17020_v45  ;;  %v28140_v30 = vld [vmem:[%s29800_s12 + $0xb28] sm:$0xff]  ;;  %v28162_v47 = vld [vmem:[%s29800_s12 + $0xbd8] sm:$0xff] }
 0x156   : > { %17270 = vmatpush.bf16.msra.mxu0 %v28110_v26  ;;  %17239 = vmatmul.bf16.vlgmr.msrb.gmra.mxu1 %v4687_v34  ;;  %v4692_v22 = vpack.c.b16 %v4450_v12, %v4450_v12  ;;  %v4693_v25 = vpack.c.b16 %v4451_v18, %v4451_v18  ;;  %v28141_v26 = vld [vmem:[%s29800_s12 + $0xb30] sm:$0xff]  ;;  %v28148_v31 = vld [vmem:[%s29800_s12 + $0xb68] sm:$0xff]  ;;  %v28174_v6 = vld [vmem:[%s29800_s12 + $0xc38] sm:$0xff] }
 0x157   : > { %17283 = vmatpush.bf16.msra.mxu1 %v28118_v27  ;;  %17252 = vmatmul.bf16.vlgmr.msrb.gmra.mxu2 %v4688_v32  ;;  %v28149_v27 = vld [vmem:[%s29800_s12 + $0xb70] sm:$0xff]  ;;  %v28156_v32 = vld [vmem:[%s29800_s12 + $0xba8] sm:$0xff] }
 0x158   : > { %17296 = vmatpush.bf16.msra.mxu2 %v28126_v29  ;;  %17265 = vmatmul.bf16.vlgmr.msrb.gmra.mxu3 %v4689_v35  ;;  %v28165_v29 = vld [vmem:[%s29800_s12 + $0xbf0] sm:$0xff] }
 0x159   : > { %17309 = vmatpush.bf16.msra.mxu3 %v28134_v33  ;;  %v28164_v33 = vld [vmem:[%s29800_s12 + $0xbe8] sm:$0xff]  ;;  %v28189_v18 = vld [vmem:[%s29800_s12 + $0xcb0] sm:$0xff] }
 0x15a   : > { %17271 = vmatpush.bf16.msra.mxu0 %v28109_v36  ;;  %v17045_v55 = vpop.f32.mrf.mxu2  ;;  %v17021_v59 = vpop.f32.mrf.mxu0  ;;  %v28139_v36 = vld [vmem:[%s29800_s12 + $0xb20] sm:$0xff] }
 0x15b   : > { %17284 = vmatpush.bf16.msra.mxu1 %v28117_v37  ;;  %v17046_v56 = vadd.f32 %v17045_v55, %v17033_v50  ;;  %v17058_v58 = vpop.f32.mrf.mxu3  ;;  %v17034_v62 = vpop.f32.mrf.mxu1  ;;  %v28161_v55 = vld [vmem:[%s29800_s12 + $0xbd0] sm:$0xff] }
 0x15c   : > { %17297 = vmatpush.bf16.msra.mxu2 %v28125_v38  ;;  %v28147_v38 = vld [vmem:[%s29800_s12 + $0xb60] sm:$0xff]  ;;  %v316_v59 = vld [vmem:[%s29795_s8 + $0xb0] sm:$0xff]  ;;  %v28160_v62 = vld [vmem:[%s29800_s12 + $0xbc8] sm:$0xff] }
 0x15d   : > { %17310 = vmatpush.bf16.msra.mxu3 %v28133_v39  ;;  %v30175_v60 = vadd.f32 %v17058_v58, %v17046_v56  ;;  %v28155_v39 = vld [vmem:[%s29800_s12 + $0xba0] sm:$0xff]  ;;  %v28136_v56 = vld [vmem:[%s29800_s12 + $0xb08] sm:$0xff]  ;;  %v4453_v5 = vunpack.c.h.b16 %v316_v59 }
 0x15e   : > { %17272 = vmatpush.bf16.msra.mxu0 %v28108_v40  ;;  %v28152_v58 = vld [vmem:[%s29800_s12 + $0xb88] sm:$0xff] }
 0x15f   : > { %17285 = vmatpush.bf16.msra.mxu1 %v28116_v41  ;;  %v28163_v41 = vld [vmem:[%s29800_s12 + $0xbe0] sm:$0xff] }
 0x160   : > { %17298 = vmatpush.bf16.msra.mxu2 %v28124_v42  ;;  %v28138_v42 = vld [vmem:[%s29800_s12 + $0xb18] sm:$0xff] }
 0x161   : > { %17311 = vmatpush.bf16.msra.mxu3 %v28132_v43  ;;  %v28146_v43 = vld [vmem:[%s29800_s12 + $0xb58] sm:$0xff] }
 0x162   : > { %17273 = vmatpush.bf16.msra.mxu0 %v28107_v46  ;;  %v17047_v7 = vpop.f32.mrf.mxu2 }
 0x163   : > { %17286 = vmatpush.bf16.msra.mxu1 %v28115_v48  ;;  %v17060_v9 = vpop.f32.mrf.mxu3  ;;  %v28182_v7 = vld [vmem:[%s29800_s12 + $0xc78] sm:$0xff] }
 0x164   : > { %17299 = vmatpush.bf16.msra.mxu2 %v28123_v49  ;;  %v28190_v9 = vld [vmem:[%s29800_s12 + $0xcb8] sm:$0xff] }
 0x165   : > { %17312 = vmatpush.bf16.msra.mxu3 %v28131_v51  ;;  %v28137_v51 = vld [vmem:[%s29800_s12 + $0xb10] sm:$0xff] }
 0x166   : > { %17274 = vmatpush.bf16.msra.mxu0 %v28106_v52 }
 0x167   : > { %17287 = vmatpush.bf16.msra.mxu1 %v28114_v53  ;;  %v28145_v53 = vld [vmem:[%s29800_s12 + $0xb50] sm:$0xff] }
 0x168   : > { %17300 = vmatpush.bf16.msra.mxu2 %v28122_v54  ;;  %v28153_v54 = vld [vmem:[%s29800_s12 + $0xb90] sm:$0xff] }
 0x169   : > { %17313 = vmatpush.bf16.msra.mxu3 %v28130_v57  ;;  %v28144_v57 = vld [vmem:[%s29800_s12 + $0xb48] sm:$0xff] }
 0x16a   : > { %17275 = vmatpush.bf16.msra.mxu0 %v28105_v61 }
 0x16b   : > { %17288 = vmatpush.bf16.msra.mxu1 %v28113_v63 }
 0x16c   : > { %17301 = vmatpush.bf16.msra.mxu2 %v28121_v0  ;;  %v28135_v0 = vld [vmem:[%s29800_s12 + $0xb00] sm:$0xff] }
 0x16d   : > { %17314 = vmatpush.bf16.msra.mxu3 %v28129_v1  ;;  %v4452_v1 = vunpack.c.l.b16 %v316_v59 }
 0x16e   : > { %17276 = vmatpush.bf16.msra.mxu0 %v28104_v2 }
 0x16f   : > { %17289 = vmatpush.bf16.msra.mxu1 %v28112_v3  ;;  %v28143_v3 = vld [vmem:[%s29800_s12 + $0xb40] sm:$0xff]  ;;  %v4694_v11 = vpack.c.b16 %v4452_v1, %v4452_v1 }
 0x170   : > { %17302 = vmatpush.bf16.msra.mxu2 %v28120_v4  ;;  %v28151_v4 = vld [vmem:[%s29800_s12 + $0xb80] sm:$0xff] }
 0x171   : > { %17315 = vmatpush.bf16.msra.mxu3 %v28128_v8 }
 0x172   : > { %17277 = vmatpush.bf16.msra.mxu0 %v28103_v10  ;;  %v17071_v34 = vpop.f32.mrf.mxu0  ;;  %v28159_v10 = vld [vmem:[%s29800_s12 + $0xbc0] sm:$0xff] }
 0x173   : > { %17290 = vmatpush.bf16.msra.mxu1 %v28111_v13  ;;  %v17072_v35 = vadd.f32 %v17071_v34, %v30175_v60  ;;  %v17084_v37 = vpop.f32.mrf.mxu1  ;;  %v317_v60 = vld [vmem:[%s29795_s8 + $0xb8] sm:$0xff] }
 0x174   : > { %17303 = vmatpush.bf16.msra.mxu2 %v28119_v14  ;;  %v4454_v2 = vunpack.c.l.b16 %v317_v60  ;;  %v4455_v8 = vunpack.c.h.b16 %v317_v60  ;;  %v28198_v13 = vld [vmem:[%s29800_s12 + $0xcf8] sm:$0xff]  ;;  %v4695_v14 = vpack.c.b16 %v4453_v5, %v4453_v5 }
 0x175   : > { %17316 = vmatpush.bf16.msra.mxu3 %v28127_v20  ;;  %17278 = vmatmul.bf16.vlgmr.msra.gmra.mxu0 %v4690_v21  ;;  %v17085_v40 = vadd.f32 %v17084_v37, %v17072_v35  ;;  %v28172_v20 = vld [vmem:[%s29800_s12 + $0xc28] sm:$0xff]  ;;  %v28186_v34 = vld [vmem:[%s29800_s12 + $0xc98] sm:$0xff] }
 0x176   : > { %17322 = vmatpush.bf16.msrb.mxu0 %v28142_v16  ;;  %17291 = vmatmul.bf16.vlgmr.msra.gmra.mxu1 %v4691_v24  ;;  %v4696_v12 = vpack.c.b16 %v4454_v2, %v4454_v2  ;;  %v4697_v15 = vpack.c.b16 %v4455_v8, %v4455_v8  ;;  %v28173_v16 = vld [vmem:[%s29800_s12 + $0xc30] sm:$0xff]  ;;  %v28180_v21 = vld [vmem:[%s29800_s12 + $0xc68] sm:$0xff]  ;;  %v28194_v37 = vld [vmem:[%s29800_s12 + $0xcd8] sm:$0xff] }
 0x177   : > { %17335 = vmatpush.bf16.msrb.mxu1 %v28150_v17  ;;  %17304 = vmatmul.bf16.vlgmr.msra.gmra.mxu2 %v4692_v22  ;;  %v28181_v17 = vld [vmem:[%s29800_s12 + $0xc70] sm:$0xff]  ;;  %v28188_v22 = vld [vmem:[%s29800_s12 + $0xca8] sm:$0xff]  ;;  %v28206_v60 = vld [vmem:[%s29800_s12 + $0xd38] sm:$0xff] }
 0x178   : > { %17348 = vmatpush.bf16.msrb.mxu2 %v28158_v19  ;;  %17317 = vmatmul.bf16.vlgmr.msra.gmra.mxu3 %v4693_v25  ;;  %v28197_v19 = vld [vmem:[%s29800_s12 + $0xcf0] sm:$0xff] }
 0x179   : > { %17361 = vmatpush.bf16.msrb.mxu3 %v28166_v23  ;;  %v28196_v23 = vld [vmem:[%s29800_s12 + $0xce8] sm:$0xff]  ;;  %v28221_v8 = vld [vmem:[%s29800_s12 + $0xdb0] sm:$0xff] }
 0x17a   : > { %17323 = vmatpush.bf16.msrb.mxu0 %v28141_v26  ;;  %v17097_v45 = vpop.f32.mrf.mxu2  ;;  %v17073_v49 = vpop.f32.mrf.mxu0  ;;  %v28171_v26 = vld [vmem:[%s29800_s12 + $0xc20] sm:$0xff] }
 0x17b   : > { %17336 = vmatpush.bf16.msrb.mxu1 %v28149_v27  ;;  %v17098_v46 = vadd.f32 %v17097_v45, %v17085_v40  ;;  %v17110_v48 = vpop.f32.mrf.mxu3  ;;  %v17086_v52 = vpop.f32.mrf.mxu1  ;;  %v28193_v45 = vld [vmem:[%s29800_s12 + $0xcd0] sm:$0xff]  ;;  %v318_v49 = vld [vmem:[%s29795_s8 + $0xc0] sm:$0xff] }
 0x17c   : > { %17349 = vmatpush.bf16.msrb.mxu2 %v28157_v28  ;;  %v28179_v28 = vld [vmem:[%s29800_s12 + $0xc60] sm:$0xff]  ;;  %v28192_v52 = vld [vmem:[%s29800_s12 + $0xcc8] sm:$0xff]  ;;  %v4457_v59 = vunpack.c.h.b16 %v318_v49 }
 0x17d   : > { %17362 = vmatpush.bf16.msrb.mxu3 %v28165_v29  ;;  %v30212_v50 = vadd.f32 %v17110_v48, %v17098_v46  ;;  %v28187_v29 = vld [vmem:[%s29800_s12 + $0xca0] sm:$0xff]  ;;  %v28168_v46 = vld [vmem:[%s29800_s12 + $0xc08] sm:$0xff] }
 0x17e   : > { %17324 = vmatpush.bf16.msrb.mxu0 %v28140_v30  ;;  %v28184_v48 = vld [vmem:[%s29800_s12 + $0xc88] sm:$0xff] }
 0x17f   : > { %17337 = vmatpush.bf16.msrb.mxu1 %v28148_v31  ;;  %v28195_v31 = vld [vmem:[%s29800_s12 + $0xce0] sm:$0xff] }
 0x180   : > { %17350 = vmatpush.bf16.msrb.mxu2 %v28156_v32  ;;  %v28170_v32 = vld [vmem:[%s29800_s12 + $0xc18] sm:$0xff] }
 0x181   : > { %17363 = vmatpush.bf16.msrb.mxu3 %v28164_v33  ;;  %v28178_v33 = vld [vmem:[%s29800_s12 + $0xc58] sm:$0xff] }
 0x182   : > { %17325 = vmatpush.bf16.msrb.mxu0 %v28139_v36  ;;  %v17099_v61 = vpop.f32.mrf.mxu2 }
 0x183   : > { %17338 = vmatpush.bf16.msrb.mxu1 %v28147_v38  ;;  %v17112_v63 = vpop.f32.mrf.mxu3  ;;  %v28214_v61 = vld [vmem:[%s29800_s12 + $0xd78] sm:$0xff] }
 0x184   : > { %17351 = vmatpush.bf16.msrb.mxu2 %v28155_v39  ;;  %v28222_v63 = vld [vmem:[%s29800_s12 + $0xdb8] sm:$0xff] }
 0x185   : > { %17364 = vmatpush.bf16.msrb.mxu3 %v28163_v41  ;;  %v28169_v41 = vld [vmem:[%s29800_s12 + $0xc10] sm:$0xff] }
 0x186   : > { %17326 = vmatpush.bf16.msrb.mxu0 %v28138_v42 }
 0x187   : > { %17339 = vmatpush.bf16.msrb.mxu1 %v28146_v43  ;;  %v28177_v43 = vld [vmem:[%s29800_s12 + $0xc50] sm:$0xff] }
 0x188   : > { %17352 = vmatpush.bf16.msrb.mxu2 %v28154_v44  ;;  %v28185_v44 = vld [vmem:[%s29800_s12 + $0xc90] sm:$0xff] }
 0x189   : > { %17365 = vmatpush.bf16.msrb.mxu3 %v28162_v47  ;;  %v28176_v47 = vld [vmem:[%s29800_s12 + $0xc48] sm:$0xff] }
 0x18a   : > { %17327 = vmatpush.bf16.msrb.mxu0 %v28137_v51 }
 0x18b   : > { %17340 = vmatpush.bf16.msrb.mxu1 %v28145_v53 }
 0x18c   : > { %17353 = vmatpush.bf16.msrb.mxu2 %v28153_v54  ;;  %v28167_v54 = vld [vmem:[%s29800_s12 + $0xc00] sm:$0xff] }
 0x18d   : > { %17366 = vmatpush.bf16.msrb.mxu3 %v28161_v55  ;;  %v4456_v55 = vunpack.c.l.b16 %v318_v49 }
 0x18e   : > { %17328 = vmatpush.bf16.msrb.mxu0 %v28136_v56 }
 0x18f   : > { %17341 = vmatpush.bf16.msrb.mxu1 %v28144_v57  ;;  %v28175_v57 = vld [vmem:[%s29800_s12 + $0xc40] sm:$0xff]  ;;  %v4698_v1 = vpack.c.b16 %v4456_v55, %v4456_v55 }
 0x190   : > { %17354 = vmatpush.bf16.msrb.mxu2 %v28152_v58  ;;  %v28183_v58 = vld [vmem:[%s29800_s12 + $0xc80] sm:$0xff] }
 0x191   : > { %17367 = vmatpush.bf16.msrb.mxu3 %v28160_v62 }
 0x192   : > { %17329 = vmatpush.bf16.msrb.mxu0 %v28135_v0  ;;  %v17123_v24 = vpop.f32.mrf.mxu0  ;;  %v28191_v0 = vld [vmem:[%s29800_s12 + $0xcc0] sm:$0xff] }
 0x193   : > { %17342 = vmatpush.bf16.msrb.mxu1 %v28143_v3  ;;  %v17124_v25 = vadd.f32 %v17123_v24, %v30212_v50  ;;  %v17136_v27 = vpop.f32.mrf.mxu1  ;;  %v319_v50 = vld [vmem:[%s29795_s8 + $0xc8] sm:$0xff]  ;;  %v28230_v3 = vld [vmem:[%s29800_s12 + $0xdf8] sm:$0xff] }
 0x194   : > { %17355 = vmatpush.bf16.msrb.mxu2 %v28151_v4  ;;  %v4458_v56 = vunpack.c.l.b16 %v319_v50  ;;  %v4459_v62 = vunpack.c.h.b16 %v319_v50  ;;  %v4699_v4 = vpack.c.b16 %v4457_v59, %v4457_v59  ;;  %v28218_v24 = vld [vmem:[%s29800_s12 + $0xd98] sm:$0xff] }
 0x195   : > { %17368 = vmatpush.bf16.msrb.mxu3 %v28159_v10  ;;  %17330 = vmatmul.bf16.vlgmr.msrb.gmra.mxu0 %v4694_v11  ;;  %v17137_v30 = vadd.f32 %v17136_v27, %v17124_v25  ;;  %v28204_v10 = vld [vmem:[%s29800_s12 + $0xd28] sm:$0xff]  ;;  %v28226_v27 = vld [vmem:[%s29800_s12 + $0xdd8] sm:$0xff] }
 0x196   : > { %17374 = vmatpush.bf16.msra.mxu0 %v28174_v6  ;;  %17343 = vmatmul.bf16.vlgmr.msrb.gmra.mxu1 %v4695_v14  ;;  %v4700_v2 = vpack.c.b16 %v4458_v56, %v4458_v56  ;;  %v4701_v5 = vpack.c.b16 %v4459_v62, %v4459_v62  ;;  %v28205_v6 = vld [vmem:[%s29800_s12 + $0xd30] sm:$0xff]  ;;  %v28212_v11 = vld [vmem:[%s29800_s12 + $0xd68] sm:$0xff]  ;;  %v28238_v50 = vld [vmem:[%s29800_s12 + $0xe38] sm:$0xff] }
 0x197   : > { %17387 = vmatpush.bf16.msra.mxu1 %v28182_v7  ;;  %17356 = vmatmul.bf16.vlgmr.msrb.gmra.mxu2 %v4696_v12  ;;  %v28213_v7 = vld [vmem:[%s29800_s12 + $0xd70] sm:$0xff]  ;;  %v28220_v12 = vld [vmem:[%s29800_s12 + $0xda8] sm:$0xff] }
 0x198   : > { %17400 = vmatpush.bf16.msra.mxu2 %v28190_v9  ;;  %17369 = vmatmul.bf16.vlgmr.msrb.gmra.mxu3 %v4697_v15  ;;  %v28229_v9 = vld [vmem:[%s29800_s12 + $0xdf0] sm:$0xff] }
 0x199   : > { %17413 = vmatpush.bf16.msra.mxu3 %v28198_v13  ;;  %v28228_v13 = vld [vmem:[%s29800_s12 + $0xde8] sm:$0xff]  ;;  %v28253_v62 = vld [vmem:[%s29800_s12 + $0xeb0] sm:$0xff] }
 0x19a   : > { %17375 = vmatpush.bf16.msra.mxu0 %v28173_v16  ;;  %v17149_v35 = vpop.f32.mrf.mxu2  ;;  %v17125_v39 = vpop.f32.mrf.mxu0  ;;  %v28203_v16 = vld [vmem:[%s29800_s12 + $0xd20] sm:$0xff] }
 0x19b   : > { %17388 = vmatpush.bf16.msra.mxu1 %v28181_v17  ;;  %v17150_v36 = vadd.f32 %v17149_v35, %v17137_v30  ;;  %v17162_v38 = vpop.f32.mrf.mxu3  ;;  %v17138_v42 = vpop.f32.mrf.mxu1  ;;  %v28225_v35 = vld [vmem:[%s29800_s12 + $0xdd0] sm:$0xff] }
 0x19c   : > { %17401 = vmatpush.bf16.msra.mxu2 %v28189_v18  ;;  %v28211_v18 = vld [vmem:[%s29800_s12 + $0xd60] sm:$0xff]  ;;  %v320_v39 = vld [vmem:[%s29795_s8 + $0xd0] sm:$0xff]  ;;  %v28224_v42 = vld [vmem:[%s29800_s12 + $0xdc8] sm:$0xff] }
 0x19d   : > { %17414 = vmatpush.bf16.msra.mxu3 %v28197_v19  ;;  %v30249_v40 = vadd.f32 %v17162_v38, %v17150_v36  ;;  %v28219_v19 = vld [vmem:[%s29800_s12 + $0xda0] sm:$0xff]  ;;  %v28200_v36 = vld [vmem:[%s29800_s12 + $0xd08] sm:$0xff]  ;;  %v4461_v49 = vunpack.c.h.b16 %v320_v39 }
 0x19e   : > { %17376 = vmatpush.bf16.msra.mxu0 %v28172_v20  ;;  %v28216_v38 = vld [vmem:[%s29800_s12 + $0xd88] sm:$0xff] }
 0x19f   : > { %17389 = vmatpush.bf16.msra.mxu1 %v28180_v21  ;;  %v28227_v21 = vld [vmem:[%s29800_s12 + $0xde0] sm:$0xff] }
 0x1a0   : > { %17402 = vmatpush.bf16.msra.mxu2 %v28188_v22  ;;  %v28202_v22 = vld [vmem:[%s29800_s12 + $0xd18] sm:$0xff] }
 0x1a1   : > { %17415 = vmatpush.bf16.msra.mxu3 %v28196_v23  ;;  %v28210_v23 = vld [vmem:[%s29800_s12 + $0xd58] sm:$0xff] }
 0x1a2   : > { %17377 = vmatpush.bf16.msra.mxu0 %v28171_v26  ;;  %v17151_v51 = vpop.f32.mrf.mxu2 }
 0x1a3   : > { %17390 = vmatpush.bf16.msra.mxu1 %v28179_v28  ;;  %v17164_v53 = vpop.f32.mrf.mxu3  ;;  %v28246_v51 = vld [vmem:[%s29800_s12 + $0xe78] sm:$0xff] }
 0x1a4   : > { %17403 = vmatpush.bf16.msra.mxu2 %v28187_v29  ;;  %v28254_v53 = vld [vmem:[%s29800_s12 + $0xeb8] sm:$0xff] }
 0x1a5   : > { %17416 = vmatpush.bf16.msra.mxu3 %v28195_v31  ;;  %v28201_v31 = vld [vmem:[%s29800_s12 + $0xd10] sm:$0xff] }
 0x1a6   : > { %17378 = vmatpush.bf16.msra.mxu0 %v28170_v32 }
 0x1a7   : > { %17391 = vmatpush.bf16.msra.mxu1 %v28178_v33  ;;  %v28209_v33 = vld [vmem:[%s29800_s12 + $0xd50] sm:$0xff] }
 0x1a8   : > { %17404 = vmatpush.bf16.msra.mxu2 %v28186_v34  ;;  %v28217_v34 = vld [vmem:[%s29800_s12 + $0xd90] sm:$0xff] }
 0x1a9   : > { %17417 = vmatpush.bf16.msra.mxu3 %v28194_v37  ;;  %v28208_v37 = vld [vmem:[%s29800_s12 + $0xd48] sm:$0xff] }
 0x1aa   : > { %17379 = vmatpush.bf16.msra.mxu0 %v28169_v41 }
 0x1ab   : > { %17392 = vmatpush.bf16.msra.mxu1 %v28177_v43 }
 0x1ac   : > { %17405 = vmatpush.bf16.msra.mxu2 %v28185_v44  ;;  %v28199_v44 = vld [vmem:[%s29800_s12 + $0xd00] sm:$0xff] }
 0x1ad   : > { %17418 = vmatpush.bf16.msra.mxu3 %v28193_v45  ;;  %v4460_v45 = vunpack.c.l.b16 %v320_v39 }
 0x1ae   : > { %17380 = vmatpush.bf16.msra.mxu0 %v28168_v46 }
 0x1af   : > { %17393 = vmatpush.bf16.msra.mxu1 %v28176_v47  ;;  %v28207_v47 = vld [vmem:[%s29800_s12 + $0xd40] sm:$0xff]  ;;  %v4702_v55 = vpack.c.b16 %v4460_v45, %v4460_v45 }
 0x1b0   : > { %17406 = vmatpush.bf16.msra.mxu2 %v28184_v48  ;;  %v28215_v48 = vld [vmem:[%s29800_s12 + $0xd80] sm:$0xff] }
 0x1b1   : > { %17419 = vmatpush.bf16.msra.mxu3 %v28192_v52 }
 0x1b2   : > { %17381 = vmatpush.bf16.msra.mxu0 %v28167_v54  ;;  %v17175_v14 = vpop.f32.mrf.mxu0  ;;  %v28223_v54 = vld [vmem:[%s29800_s12 + $0xdc0] sm:$0xff] }
 0x1b3   : > { %17394 = vmatpush.bf16.msra.mxu1 %v28175_v57  ;;  %v17176_v15 = vadd.f32 %v17175_v14, %v30249_v40  ;;  %v17188_v17 = vpop.f32.mrf.mxu1  ;;  %v321_v40 = vld [vmem:[%s29795_s8 + $0xd8] sm:$0xff] }
 0x1b4   : > { %17407 = vmatpush.bf16.msra.mxu2 %v28183_v58  ;;  %v4462_v46 = vunpack.c.l.b16 %v321_v40  ;;  %v4463_v52 = vunpack.c.h.b16 %v321_v40  ;;  %v28262_v57 = vld [vmem:[%s29800_s12 + $0xef8] sm:$0xff]  ;;  %v4703_v58 = vpack.c.b16 %v4461_v49, %v4461_v49 }
 0x1b5   : > { %17420 = vmatpush.bf16.msra.mxu3 %v28191_v0  ;;  %17382 = vmatmul.bf16.vlgmr.msra.gmra.mxu0 %v4698_v1  ;;  %v17189_v20 = vadd.f32 %v17188_v17, %v17176_v15  ;;  %v28236_v0 = vld [vmem:[%s29800_s12 + $0xe28] sm:$0xff]  ;;  %v28250_v14 = vld [vmem:[%s29800_s12 + $0xe98] sm:$0xff] }
 0x1b6   : > { %17426 = vmatpush.bf16.msrb.mxu0 %v28206_v60  ;;  %17395 = vmatmul.bf16.vlgmr.msra.gmra.mxu1 %v4699_v4  ;;  %v4704_v56 = vpack.c.b16 %v4462_v46, %v4462_v46  ;;  %v4705_v59 = vpack.c.b16 %v4463_v52, %v4463_v52  ;;  %v28237_v60 = vld [vmem:[%s29800_s12 + $0xe30] sm:$0xff]  ;;  %v28244_v1 = vld [vmem:[%s29800_s12 + $0xe68] sm:$0xff]  ;;  %v28258_v17 = vld [vmem:[%s29800_s12 + $0xed8] sm:$0xff] }
 0x1b7   : > { %17439 = vmatpush.bf16.msrb.mxu1 %v28214_v61  ;;  %17408 = vmatmul.bf16.vlgmr.msra.gmra.mxu2 %v4700_v2  ;;  %v28245_v61 = vld [vmem:[%s29800_s12 + $0xe70] sm:$0xff]  ;;  %v28252_v2 = vld [vmem:[%s29800_s12 + $0xea8] sm:$0xff]  ;;  %v28270_v40 = vld [vmem:[%s29800_s12 + $0xf38] sm:$0xff] }
 0x1b8   : > { %17452 = vmatpush.bf16.msrb.mxu2 %v28222_v63  ;;  %17421 = vmatmul.bf16.vlgmr.msra.gmra.mxu3 %v4701_v5  ;;  %v28261_v63 = vld [vmem:[%s29800_s12 + $0xef0] sm:$0xff] }
 0x1b9   : > { %17465 = vmatpush.bf16.msrb.mxu3 %v28230_v3  ;;  %v28260_v3 = vld [vmem:[%s29800_s12 + $0xee8] sm:$0xff]  ;;  %v28285_v52 = vld [vmem:[%s29800_s12 + $0xfb0] sm:$0xff] }
 0x1ba   : > { %17427 = vmatpush.bf16.msrb.mxu0 %v28205_v6  ;;  %v17201_v25 = vpop.f32.mrf.mxu2  ;;  %v17177_v29 = vpop.f32.mrf.mxu0  ;;  %v28235_v6 = vld [vmem:[%s29800_s12 + $0xe20] sm:$0xff] }
 0x1bb   : > { %17440 = vmatpush.bf16.msrb.mxu1 %v28213_v7  ;;  %v17202_v26 = vadd.f32 %v17201_v25, %v17189_v20  ;;  %v17214_v28 = vpop.f32.mrf.mxu3  ;;  %v17190_v32 = vpop.f32.mrf.mxu1  ;;  %v28257_v25 = vld [vmem:[%s29800_s12 + $0xed0] sm:$0xff]  ;;  %v322_v29 = vld [vmem:[%s29795_s8 + $0xe0] sm:$0xff] }
 0x1bc   : > { %17453 = vmatpush.bf16.msrb.mxu2 %v28221_v8  ;;  %v28243_v8 = vld [vmem:[%s29800_s12 + $0xe60] sm:$0xff]  ;;  %v28256_v32 = vld [vmem:[%s29800_s12 + $0xec8] sm:$0xff]  ;;  %v4465_v39 = vunpack.c.h.b16 %v322_v29 }
 0x1bd   : > { %17466 = vmatpush.bf16.msrb.mxu3 %v28229_v9  ;;  %v30286_v30 = vadd.f32 %v17214_v28, %v17202_v26  ;;  %v28251_v9 = vld [vmem:[%s29800_s12 + $0xea0] sm:$0xff]  ;;  %v28232_v26 = vld [vmem:[%s29800_s12 + $0xe08] sm:$0xff] }
 0x1be   : > { %17428 = vmatpush.bf16.msrb.mxu0 %v28204_v10  ;;  %v28248_v28 = vld [vmem:[%s29800_s12 + $0xe88] sm:$0xff] }
 0x1bf   : > { %17441 = vmatpush.bf16.msrb.mxu1 %v28212_v11  ;;  %v28259_v11 = vld [vmem:[%s29800_s12 + $0xee0] sm:$0xff] }
 0x1c0   : > { %17454 = vmatpush.bf16.msrb.mxu2 %v28220_v12  ;;  %v28234_v12 = vld [vmem:[%s29800_s12 + $0xe18] sm:$0xff] }
 0x1c1   : > { %17467 = vmatpush.bf16.msrb.mxu3 %v28228_v13  ;;  %v28242_v13 = vld [vmem:[%s29800_s12 + $0xe58] sm:$0xff] }
 0x1c2   : > { %17429 = vmatpush.bf16.msrb.mxu0 %v28203_v16  ;;  %v17203_v41 = vpop.f32.mrf.mxu2 }
 0x1c3   : > { %17442 = vmatpush.bf16.msrb.mxu1 %v28211_v18  ;;  %v17216_v43 = vpop.f32.mrf.mxu3  ;;  %v28278_v41 = vld [vmem:[%s29800_s12 + $0xf78] sm:$0xff] }
 0x1c4   : > { %17455 = vmatpush.bf16.msrb.mxu2 %v28219_v19  ;;  %v28286_v43 = vld [vmem:[%s29800_s12 + $0xfb8] sm:$0xff] }
 0x1c5   : > { %17468 = vmatpush.bf16.msrb.mxu3 %v28227_v21  ;;  %v28233_v21 = vld [vmem:[%s29800_s12 + $0xe10] sm:$0xff] }
 0x1c6   : > { %17430 = vmatpush.bf16.msrb.mxu0 %v28202_v22 }
 0x1c7   : > { %17443 = vmatpush.bf16.msrb.mxu1 %v28210_v23  ;;  %v28241_v23 = vld [vmem:[%s29800_s12 + $0xe50] sm:$0xff] }
 0x1c8   : > { %17456 = vmatpush.bf16.msrb.mxu2 %v28218_v24  ;;  %v28249_v24 = vld [vmem:[%s29800_s12 + $0xe90] sm:$0xff] }
 0x1c9   : > { %17469 = vmatpush.bf16.msrb.mxu3 %v28226_v27  ;;  %v28240_v27 = vld [vmem:[%s29800_s12 + $0xe48] sm:$0xff] }
 0x1ca   : > { %17431 = vmatpush.bf16.msrb.mxu0 %v28201_v31 }
 0x1cb   : > { %17444 = vmatpush.bf16.msrb.mxu1 %v28209_v33 }
 0x1cc   : > { %17457 = vmatpush.bf16.msrb.mxu2 %v28217_v34  ;;  %v28231_v34 = vld [vmem:[%s29800_s12 + $0xe00] sm:$0xff] }
 0x1cd   : > { %17470 = vmatpush.bf16.msrb.mxu3 %v28225_v35  ;;  %v4464_v35 = vunpack.c.l.b16 %v322_v29 }
 0x1ce   : > { %17432 = vmatpush.bf16.msrb.mxu0 %v28200_v36 }
 0x1cf   : > { %17445 = vmatpush.bf16.msrb.mxu1 %v28208_v37  ;;  %v28239_v37 = vld [vmem:[%s29800_s12 + $0xe40] sm:$0xff]  ;;  %v4706_v45 = vpack.c.b16 %v4464_v35, %v4464_v35 }
 0x1d0   : > { %17458 = vmatpush.bf16.msrb.mxu2 %v28216_v38  ;;  %v28247_v38 = vld [vmem:[%s29800_s12 + $0xe80] sm:$0xff] }
 0x1d1   : > { %17471 = vmatpush.bf16.msrb.mxu3 %v28224_v42 }
 0x1d2   : > { %17433 = vmatpush.bf16.msrb.mxu0 %v28199_v44  ;;  %v17227_v4 = vpop.f32.mrf.mxu0  ;;  %v28255_v44 = vld [vmem:[%s29800_s12 + $0xec0] sm:$0xff] }
 0x1d3   : > { %17446 = vmatpush.bf16.msrb.mxu1 %v28207_v47  ;;  %v17228_v5 = vadd.f32 %v17227_v4, %v30286_v30  ;;  %v17240_v7 = vpop.f32.mrf.mxu1  ;;  %v323_v30 = vld [vmem:[%s29795_s8 + $0xe8] sm:$0xff]  ;;  %v28294_v47 = vld [vmem:[%s29800_s12 + $0xff8] sm:$0xff] }
 0x1d4   : > { %17459 = vmatpush.bf16.msrb.mxu2 %v28215_v48  ;;  %v4466_v36 = vunpack.c.l.b16 %v323_v30  ;;  %v4467_v42 = vunpack.c.h.b16 %v323_v30  ;;  %v4707_v48 = vpack.c.b16 %v4465_v39, %v4465_v39  ;;  %v28282_v4 = vld [vmem:[%s29800_s12 + $0xf98] sm:$0xff] }
 0x1d5   : > { %17472 = vmatpush.bf16.msrb.mxu3 %v28223_v54  ;;  %17434 = vmatmul.bf16.vlgmr.msrb.gmra.mxu0 %v4702_v55  ;;  %v17241_v10 = vadd.f32 %v17240_v7, %v17228_v5  ;;  %v28268_v54 = vld [vmem:[%s29800_s12 + $0xf28] sm:$0xff]  ;;  %v28290_v7 = vld [vmem:[%s29800_s12 + $0xfd8] sm:$0xff] }
 0x1d6   : > { %17478 = vmatpush.bf16.msra.mxu0 %v28238_v50  ;;  %17447 = vmatmul.bf16.vlgmr.msrb.gmra.mxu1 %v4703_v58  ;;  %v4708_v46 = vpack.c.b16 %v4466_v36, %v4466_v36  ;;  %v4709_v49 = vpack.c.b16 %v4467_v42, %v4467_v42  ;;  %v28269_v50 = vld [vmem:[%s29800_s12 + $0xf30] sm:$0xff]  ;;  %v28276_v55 = vld [vmem:[%s29800_s12 + $0xf68] sm:$0xff]  ;;  %v28302_v30 = vld [vmem:[%s29800_s12 + $0x1038] sm:$0xff] }
 0x1d7   : > { %17491 = vmatpush.bf16.msra.mxu1 %v28246_v51  ;;  %17460 = vmatmul.bf16.vlgmr.msrb.gmra.mxu2 %v4704_v56  ;;  %v28277_v51 = vld [vmem:[%s29800_s12 + $0xf70] sm:$0xff]  ;;  %v28284_v56 = vld [vmem:[%s29800_s12 + $0xfa8] sm:$0xff] }
 0x1d8   : > { %17504 = vmatpush.bf16.msra.mxu2 %v28254_v53  ;;  %17473 = vmatmul.bf16.vlgmr.msrb.gmra.mxu3 %v4705_v59  ;;  %v28293_v53 = vld [vmem:[%s29800_s12 + $0xff0] sm:$0xff] }
 0x1d9   : > { %17517 = vmatpush.bf16.msra.mxu3 %v28262_v57  ;;  %v28292_v57 = vld [vmem:[%s29800_s12 + $0xfe8] sm:$0xff]  ;;  %v28317_v42 = vld [vmem:[%s29800_s12 + $0x10b0] sm:$0xff] }
 0x1da   : > { %17479 = vmatpush.bf16.msra.mxu0 %v28237_v60  ;;  %v17253_v15 = vpop.f32.mrf.mxu2  ;;  %v17229_v19 = vpop.f32.mrf.mxu0  ;;  %v28267_v60 = vld [vmem:[%s29800_s12 + $0xf20] sm:$0xff] }
 0x1db   : > { %17492 = vmatpush.bf16.msra.mxu1 %v28245_v61  ;;  %v17254_v16 = vadd.f32 %v17253_v15, %v17241_v10  ;;  %v17266_v18 = vpop.f32.mrf.mxu3  ;;  %v17242_v22 = vpop.f32.mrf.mxu1  ;;  %v28289_v15 = vld [vmem:[%s29800_s12 + $0xfd0] sm:$0xff] }
 0x1dc   : > { %17505 = vmatpush.bf16.msra.mxu2 %v28253_v62  ;;  %v28275_v62 = vld [vmem:[%s29800_s12 + $0xf60] sm:$0xff]  ;;  %v324_v19 = vld [vmem:[%s29795_s8 + $0xf0] sm:$0xff]  ;;  %v28288_v22 = vld [vmem:[%s29800_s12 + $0xfc8] sm:$0xff] }
 0x1dd   : > { %17518 = vmatpush.bf16.msra.mxu3 %v28261_v63  ;;  %v30323_v20 = vadd.f32 %v17266_v18, %v17254_v16  ;;  %v28283_v63 = vld [vmem:[%s29800_s12 + $0xfa0] sm:$0xff]  ;;  %v28264_v16 = vld [vmem:[%s29800_s12 + $0xf08] sm:$0xff]  ;;  %v4469_v29 = vunpack.c.h.b16 %v324_v19 }
 0x1de   : > { %17480 = vmatpush.bf16.msra.mxu0 %v28236_v0  ;;  %v28280_v18 = vld [vmem:[%s29800_s12 + $0xf88] sm:$0xff] }
 0x1df   : > { %17493 = vmatpush.bf16.msra.mxu1 %v28244_v1  ;;  %v28291_v1 = vld [vmem:[%s29800_s12 + $0xfe0] sm:$0xff] }
 0x1e0   : > { %17506 = vmatpush.bf16.msra.mxu2 %v28252_v2  ;;  %v28266_v2 = vld [vmem:[%s29800_s12 + $0xf18] sm:$0xff] }
 0x1e1   : > { %17519 = vmatpush.bf16.msra.mxu3 %v28260_v3  ;;  %v28274_v3 = vld [vmem:[%s29800_s12 + $0xf58] sm:$0xff] }
 0x1e2   : > { %17481 = vmatpush.bf16.msra.mxu0 %v28235_v6  ;;  %v17255_v31 = vpop.f32.mrf.mxu2 }
 0x1e3   : > { %17494 = vmatpush.bf16.msra.mxu1 %v28243_v8  ;;  %v17268_v33 = vpop.f32.mrf.mxu3  ;;  %v28310_v31 = vld [vmem:[%s29800_s12 + $0x1078] sm:$0xff] }
 0x1e4   : > { %17507 = vmatpush.bf16.msra.mxu2 %v28251_v9  ;;  %v28318_v33 = vld [vmem:[%s29800_s12 + $0x10b8] sm:$0xff] }
 0x1e5   : > { %17520 = vmatpush.bf16.msra.mxu3 %v28259_v11  ;;  %v28265_v11 = vld [vmem:[%s29800_s12 + $0xf10] sm:$0xff] }
 0x1e6   : > { %17482 = vmatpush.bf16.msra.mxu0 %v28234_v12 }
 0x1e7   : > { %17495 = vmatpush.bf16.msra.mxu1 %v28242_v13  ;;  %v28273_v13 = vld [vmem:[%s29800_s12 + $0xf50] sm:$0xff] }
 0x1e8   : > { %17508 = vmatpush.bf16.msra.mxu2 %v28250_v14  ;;  %v28281_v14 = vld [vmem:[%s29800_s12 + $0xf90] sm:$0xff] }
 0x1e9   : > { %17521 = vmatpush.bf16.msra.mxu3 %v28258_v17  ;;  %v28272_v17 = vld [vmem:[%s29800_s12 + $0xf48] sm:$0xff] }
 0x1ea   : > { %17483 = vmatpush.bf16.msra.mxu0 %v28233_v21 }
 0x1eb   : > { %17496 = vmatpush.bf16.msra.mxu1 %v28241_v23 }
 0x1ec   : > { %17509 = vmatpush.bf16.msra.mxu2 %v28249_v24  ;;  %v28263_v24 = vld [vmem:[%s29800_s12 + $0xf00] sm:$0xff] }
 0x1ed   : > { %17522 = vmatpush.bf16.msra.mxu3 %v28257_v25  ;;  %v4468_v25 = vunpack.c.l.b16 %v324_v19 }
 0x1ee   : > { %17484 = vmatpush.bf16.msra.mxu0 %v28232_v26 }
 0x1ef   : > { %17497 = vmatpush.bf16.msra.mxu1 %v28240_v27  ;;  %v28271_v27 = vld [vmem:[%s29800_s12 + $0xf40] sm:$0xff]  ;;  %v4710_v35 = vpack.c.b16 %v4468_v25, %v4468_v25 }
 0x1f0   : > { %17510 = vmatpush.bf16.msra.mxu2 %v28248_v28  ;;  %v28279_v28 = vld [vmem:[%s29800_s12 + $0xf80] sm:$0xff] }
 0x1f1   : > { %17523 = vmatpush.bf16.msra.mxu3 %v28256_v32 }
 0x1f2   : > { %17485 = vmatpush.bf16.msra.mxu0 %v28231_v34  ;;  %v17279_v58 = vpop.f32.mrf.mxu0  ;;  %v28287_v34 = vld [vmem:[%s29800_s12 + $0xfc0] sm:$0xff] }
 0x1f3   : > { %17498 = vmatpush.bf16.msra.mxu1 %v28239_v37  ;;  %v17280_v59 = vadd.f32 %v17279_v58, %v30323_v20  ;;  %v17292_v61 = vpop.f32.mrf.mxu1  ;;  %v325_v20 = vld [vmem:[%s29795_s8 + $0xf8] sm:$0xff] }
 0x1f4   : > { %17511 = vmatpush.bf16.msra.mxu2 %v28247_v38  ;;  %v4470_v26 = vunpack.c.l.b16 %v325_v20  ;;  %v4471_v32 = vunpack.c.h.b16 %v325_v20  ;;  %v28326_v37 = vld [vmem:[%s29800_s12 + $0x10f8] sm:$0xff]  ;;  %v4711_v38 = vpack.c.b16 %v4469_v29, %v4469_v29 }
 0x1f5   : > { %17524 = vmatpush.bf16.msra.mxu3 %v28255_v44  ;;  %17486 = vmatmul.bf16.vlgmr.msra.gmra.mxu0 %v4706_v45  ;;  %v17293_v0 = vadd.f32 %v17292_v61, %v17280_v59  ;;  %v28300_v44 = vld [vmem:[%s29800_s12 + $0x1028] sm:$0xff]  ;;  %v28314_v58 = vld [vmem:[%s29800_s12 + $0x1098] sm:$0xff] }
 0x1f6   : > { %17530 = vmatpush.bf16.msrb.mxu0 %v28270_v40  ;;  %17499 = vmatmul.bf16.vlgmr.msra.gmra.mxu1 %v4707_v48  ;;  %v4712_v36 = vpack.c.b16 %v4470_v26, %v4470_v26  ;;  %v4713_v39 = vpack.c.b16 %v4471_v32, %v4471_v32  ;;  %v28301_v40 = vld [vmem:[%s29800_s12 + $0x1030] sm:$0xff]  ;;  %v28308_v45 = vld [vmem:[%s29800_s12 + $0x1068] sm:$0xff]  ;;  %v28322_v61 = vld [vmem:[%s29800_s12 + $0x10d8] sm:$0xff] }
 0x1f7   : > { %17543 = vmatpush.bf16.msrb.mxu1 %v28278_v41  ;;  %17512 = vmatmul.bf16.vlgmr.msra.gmra.mxu2 %v4708_v46  ;;  %v28309_v41 = vld [vmem:[%s29800_s12 + $0x1070] sm:$0xff]  ;;  %v28316_v46 = vld [vmem:[%s29800_s12 + $0x10a8] sm:$0xff]  ;;  %v28334_v20 = vld [vmem:[%s29800_s12 + $0x1138] sm:$0xff] }
 0x1f8   : > { %17556 = vmatpush.bf16.msrb.mxu2 %v28286_v43  ;;  %17525 = vmatmul.bf16.vlgmr.msra.gmra.mxu3 %v4709_v49  ;;  %v28325_v43 = vld [vmem:[%s29800_s12 + $0x10f0] sm:$0xff] }
 0x1f9   : > { %17569 = vmatpush.bf16.msrb.mxu3 %v28294_v47  ;;  %v28324_v47 = vld [vmem:[%s29800_s12 + $0x10e8] sm:$0xff]  ;;  %v28349_v32 = vld [vmem:[%s29800_s12 + $0x11b0] sm:$0xff] }
 0x1fa   : > { %17531 = vmatpush.bf16.msrb.mxu0 %v28269_v50  ;;  %v17305_v5 = vpop.f32.mrf.mxu2  ;;  %v17281_v9 = vpop.f32.mrf.mxu0  ;;  %v28299_v50 = vld [vmem:[%s29800_s12 + $0x1020] sm:$0xff] }
 0x1fb   : > { %17544 = vmatpush.bf16.msrb.mxu1 %v28277_v51  ;;  %v17306_v6 = vadd.f32 %v17305_v5, %v17293_v0  ;;  %v17318_v8 = vpop.f32.mrf.mxu3  ;;  %v17294_v12 = vpop.f32.mrf.mxu1  ;;  %v28321_v5 = vld [vmem:[%s29800_s12 + $0x10d0] sm:$0xff]  ;;  %v326_v9 = vld [vmem:[%s29795_s8 + $0x100] sm:$0xff] }
 0x1fc   : > { %17557 = vmatpush.bf16.msrb.mxu2 %v28285_v52  ;;  %v28307_v52 = vld [vmem:[%s29800_s12 + $0x1060] sm:$0xff]  ;;  %v28320_v12 = vld [vmem:[%s29800_s12 + $0x10c8] sm:$0xff]  ;;  %v4473_v19 = vunpack.c.h.b16 %v326_v9 }
 0x1fd   : > { %17570 = vmatpush.bf16.msrb.mxu3 %v28293_v53  ;;  %v30360_v10 = vadd.f32 %v17318_v8, %v17306_v6  ;;  %v28315_v53 = vld [vmem:[%s29800_s12 + $0x10a0] sm:$0xff]  ;;  %v28296_v6 = vld [vmem:[%s29800_s12 + $0x1008] sm:$0xff] }
 0x1fe   : > { %17532 = vmatpush.bf16.msrb.mxu0 %v28268_v54  ;;  %v28312_v8 = vld [vmem:[%s29800_s12 + $0x1088] sm:$0xff] }
 0x1ff   : > { %17545 = vmatpush.bf16.msrb.mxu1 %v28276_v55  ;;  %v28323_v55 = vld [vmem:[%s29800_s12 + $0x10e0] sm:$0xff] }
 0x200   : > { %17558 = vmatpush.bf16.msrb.mxu2 %v28284_v56  ;;  %v28298_v56 = vld [vmem:[%s29800_s12 + $0x1018] sm:$0xff] }
 0x201   : > { %17571 = vmatpush.bf16.msrb.mxu3 %v28292_v57  ;;  %v28306_v57 = vld [vmem:[%s29800_s12 + $0x1058] sm:$0xff] }
 0x202   : > { %17533 = vmatpush.bf16.msrb.mxu0 %v28267_v60  ;;  %v17307_v21 = vpop.f32.mrf.mxu2 }
 0x203   : > { %17546 = vmatpush.bf16.msrb.mxu1 %v28275_v62  ;;  %v17320_v23 = vpop.f32.mrf.mxu3  ;;  %v28342_v21 = vld [vmem:[%s29800_s12 + $0x1178] sm:$0xff] }
 0x204   : > { %17559 = vmatpush.bf16.msrb.mxu2 %v28283_v63  ;;  %v28350_v23 = vld [vmem:[%s29800_s12 + $0x11b8] sm:$0xff] }
 0x205   : > { %17572 = vmatpush.bf16.msrb.mxu3 %v28291_v1  ;;  %v28297_v1 = vld [vmem:[%s29800_s12 + $0x1010] sm:$0xff] }
 0x206   : > { %17534 = vmatpush.bf16.msrb.mxu0 %v28266_v2 }
 0x207   : > { %17547 = vmatpush.bf16.msrb.mxu1 %v28274_v3  ;;  %v28305_v3 = vld [vmem:[%s29800_s12 + $0x1050] sm:$0xff] }
 0x208   : > { %17560 = vmatpush.bf16.msrb.mxu2 %v28282_v4  ;;  %v28313_v4 = vld [vmem:[%s29800_s12 + $0x1090] sm:$0xff] }
 0x209   : > { %17573 = vmatpush.bf16.msrb.mxu3 %v28290_v7  ;;  %v28304_v7 = vld [vmem:[%s29800_s12 + $0x1048] sm:$0xff] }
 0x20a   : > { %17535 = vmatpush.bf16.msrb.mxu0 %v28265_v11 }
 0x20b   : > { %17548 = vmatpush.bf16.msrb.mxu1 %v28273_v13 }
 0x20c   : > { %17561 = vmatpush.bf16.msrb.mxu2 %v28281_v14  ;;  %v28295_v14 = vld [vmem:[%s29800_s12 + $0x1000] sm:$0xff] }
 0x20d   : > { %17574 = vmatpush.bf16.msrb.mxu3 %v28289_v15  ;;  %v4472_v15 = vunpack.c.l.b16 %v326_v9 }
 0x20e   : > { %17536 = vmatpush.bf16.msrb.mxu0 %v28264_v16 }
 0x20f   : > { %17549 = vmatpush.bf16.msrb.mxu1 %v28272_v17  ;;  %v28303_v17 = vld [vmem:[%s29800_s12 + $0x1040] sm:$0xff]  ;;  %v4714_v25 = vpack.c.b16 %v4472_v15, %v4472_v15 }
 0x210   : > { %17562 = vmatpush.bf16.msrb.mxu2 %v28280_v18  ;;  %v28311_v18 = vld [vmem:[%s29800_s12 + $0x1080] sm:$0xff] }
 0x211   : > { %17575 = vmatpush.bf16.msrb.mxu3 %v28288_v22 }
 0x212   : > { %17537 = vmatpush.bf16.msrb.mxu0 %v28263_v24  ;;  %v17331_v48 = vpop.f32.mrf.mxu0  ;;  %v28319_v24 = vld [vmem:[%s29800_s12 + $0x10c0] sm:$0xff] }
 0x213   : > { %17550 = vmatpush.bf16.msrb.mxu1 %v28271_v27  ;;  %v17332_v49 = vadd.f32 %v17331_v48, %v30360_v10  ;;  %v17344_v51 = vpop.f32.mrf.mxu1  ;;  %v327_v10 = vld [vmem:[%s29795_s8 + $0x108] sm:$0xff]  ;;  %v28358_v27 = vld [vmem:[%s29800_s12 + $0x11f8] sm:$0xff] }
 0x214   : > { %17563 = vmatpush.bf16.msrb.mxu2 %v28279_v28  ;;  %v4474_v16 = vunpack.c.l.b16 %v327_v10  ;;  %v4475_v22 = vunpack.c.h.b16 %v327_v10  ;;  %v4715_v28 = vpack.c.b16 %v4473_v19, %v4473_v19  ;;  %v28346_v48 = vld [vmem:[%s29800_s12 + $0x1198] sm:$0xff] }
 0x215   : > { %17576 = vmatpush.bf16.msrb.mxu3 %v28287_v34  ;;  %17538 = vmatmul.bf16.vlgmr.msrb.gmra.mxu0 %v4710_v35  ;;  %v17345_v54 = vadd.f32 %v17344_v51, %v17332_v49  ;;  %v28332_v34 = vld [vmem:[%s29800_s12 + $0x1128] sm:$0xff]  ;;  %v28354_v51 = vld [vmem:[%s29800_s12 + $0x11d8] sm:$0xff] }
 0x216   : > { %17582 = vmatpush.bf16.msra.mxu0 %v28302_v30  ;;  %17551 = vmatmul.bf16.vlgmr.msrb.gmra.mxu1 %v4711_v38  ;;  %v4716_v26 = vpack.c.b16 %v4474_v16, %v4474_v16  ;;  %v4717_v29 = vpack.c.b16 %v4475_v22, %v4475_v22  ;;  %v28333_v30 = vld [vmem:[%s29800_s12 + $0x1130] sm:$0xff]  ;;  %v28340_v35 = vld [vmem:[%s29800_s12 + $0x1168] sm:$0xff]  ;;  %v28366_v10 = vld [vmem:[%s29800_s12 + $0x1238] sm:$0xff] }
 0x217   : > { %17595 = vmatpush.bf16.msra.mxu1 %v28310_v31  ;;  %17564 = vmatmul.bf16.vlgmr.msrb.gmra.mxu2 %v4712_v36  ;;  %v28341_v31 = vld [vmem:[%s29800_s12 + $0x1170] sm:$0xff]  ;;  %v28348_v36 = vld [vmem:[%s29800_s12 + $0x11a8] sm:$0xff] }
 0x218   : > { %17608 = vmatpush.bf16.msra.mxu2 %v28318_v33  ;;  %17577 = vmatmul.bf16.vlgmr.msrb.gmra.mxu3 %v4713_v39  ;;  %v28357_v33 = vld [vmem:[%s29800_s12 + $0x11f0] sm:$0xff] }
 0x219   : > { %17621 = vmatpush.bf16.msra.mxu3 %v28326_v37  ;;  %v28356_v37 = vld [vmem:[%s29800_s12 + $0x11e8] sm:$0xff]  ;;  %v28381_v22 = vld [vmem:[%s29800_s12 + $0x12b0] sm:$0xff] }
 0x21a   : > { %17583 = vmatpush.bf16.msra.mxu0 %v28301_v40  ;;  %v17357_v59 = vpop.f32.mrf.mxu2  ;;  %v17333_v63 = vpop.f32.mrf.mxu0  ;;  %v28331_v40 = vld [vmem:[%s29800_s12 + $0x1120] sm:$0xff] }
 0x21b   : > { %17596 = vmatpush.bf16.msra.mxu1 %v28309_v41  ;;  %v17358_v60 = vadd.f32 %v17357_v59, %v17345_v54  ;;  %v17370_v62 = vpop.f32.mrf.mxu3  ;;  %v17346_v2 = vpop.f32.mrf.mxu1  ;;  %v28353_v59 = vld [vmem:[%s29800_s12 + $0x11d0] sm:$0xff] }
 0x21c   : > { %17609 = vmatpush.bf16.msra.mxu2 %v28317_v42  ;;  %v28339_v42 = vld [vmem:[%s29800_s12 + $0x1160] sm:$0xff]  ;;  %v328_v63 = vld [vmem:[%s29795_s8 + $0x110] sm:$0xff]  ;;  %v28352_v2 = vld [vmem:[%s29800_s12 + $0x11c8] sm:$0xff] }
 0x21d   : > { %17622 = vmatpush.bf16.msra.mxu3 %v28325_v43  ;;  %v30397_v0 = vadd.f32 %v17370_v62, %v17358_v60  ;;  %v28347_v43 = vld [vmem:[%s29800_s12 + $0x11a0] sm:$0xff]  ;;  %v28328_v60 = vld [vmem:[%s29800_s12 + $0x1108] sm:$0xff]  ;;  %v4477_v9 = vunpack.c.h.b16 %v328_v63 }
 0x21e   : > { %17584 = vmatpush.bf16.msra.mxu0 %v28300_v44  ;;  %v28344_v62 = vld [vmem:[%s29800_s12 + $0x1188] sm:$0xff] }
 0x21f   : > { %17597 = vmatpush.bf16.msra.mxu1 %v28308_v45  ;;  %v28355_v45 = vld [vmem:[%s29800_s12 + $0x11e0] sm:$0xff] }
 0x220   : > { %17610 = vmatpush.bf16.msra.mxu2 %v28316_v46  ;;  %v28330_v46 = vld [vmem:[%s29800_s12 + $0x1118] sm:$0xff] }
 0x221   : > { %17623 = vmatpush.bf16.msra.mxu3 %v28324_v47  ;;  %v28338_v47 = vld [vmem:[%s29800_s12 + $0x1158] sm:$0xff] }
 0x222   : > { %17585 = vmatpush.bf16.msra.mxu0 %v28299_v50  ;;  %v17359_v11 = vpop.f32.mrf.mxu2 }
 0x223   : > { %17598 = vmatpush.bf16.msra.mxu1 %v28307_v52  ;;  %v17372_v13 = vpop.f32.mrf.mxu3  ;;  %v28374_v11 = vld [vmem:[%s29800_s12 + $0x1278] sm:$0xff] }
 0x224   : > { %17611 = vmatpush.bf16.msra.mxu2 %v28315_v53  ;;  %v28382_v13 = vld [vmem:[%s29800_s12 + $0x12b8] sm:$0xff] }
 0x225   : > { %17624 = vmatpush.bf16.msra.mxu3 %v28323_v55  ;;  %v28329_v55 = vld [vmem:[%s29800_s12 + $0x1110] sm:$0xff] }
 0x226   : > { %17586 = vmatpush.bf16.msra.mxu0 %v28298_v56 }
 0x227   : > { %17599 = vmatpush.bf16.msra.mxu1 %v28306_v57  ;;  %v28337_v57 = vld [vmem:[%s29800_s12 + $0x1150] sm:$0xff] }
 0x228   : > { %17612 = vmatpush.bf16.msra.mxu2 %v28314_v58  ;;  %v28345_v58 = vld [vmem:[%s29800_s12 + $0x1190] sm:$0xff] }
 0x229   : > { %17625 = vmatpush.bf16.msra.mxu3 %v28322_v61  ;;  %v28336_v61 = vld [vmem:[%s29800_s12 + $0x1148] sm:$0xff] }
 0x22a   : > { %17587 = vmatpush.bf16.msra.mxu0 %v28297_v1 }
 0x22b   : > { %17600 = vmatpush.bf16.msra.mxu1 %v28305_v3 }
 0x22c   : > { %17613 = vmatpush.bf16.msra.mxu2 %v28313_v4  ;;  %v28327_v4 = vld [vmem:[%s29800_s12 + $0x1100] sm:$0xff] }
 0x22d   : > { %17626 = vmatpush.bf16.msra.mxu3 %v28321_v5  ;;  %v4476_v5 = vunpack.c.l.b16 %v328_v63 }
 0x22e   : > { %17588 = vmatpush.bf16.msra.mxu0 %v28296_v6 }
 0x22f   : > { %17601 = vmatpush.bf16.msra.mxu1 %v28304_v7  ;;  %v28335_v7 = vld [vmem:[%s29800_s12 + $0x1140] sm:$0xff]  ;;  %v4718_v15 = vpack.c.b16 %v4476_v5, %v4476_v5 }
 0x230   : > { %17614 = vmatpush.bf16.msra.mxu2 %v28312_v8  ;;  %v28343_v8 = vld [vmem:[%s29800_s12 + $0x1180] sm:$0xff] }
 0x231   : > { %17627 = vmatpush.bf16.msra.mxu3 %v28320_v12 }
 0x232   : > { %17589 = vmatpush.bf16.msra.mxu0 %v28295_v14  ;;  %v17383_v38 = vpop.f32.mrf.mxu0  ;;  %v28351_v14 = vld [vmem:[%s29800_s12 + $0x11c0] sm:$0xff] }
 0x233   : > { %17602 = vmatpush.bf16.msra.mxu1 %v28303_v17  ;;  %v17384_v39 = vadd.f32 %v17383_v38, %v30397_v0  ;;  %v17396_v41 = vpop.f32.mrf.mxu1  ;;  %v329_v0 = vld [vmem:[%s29795_s8 + $0x118] sm:$0xff] }
 0x234   : > { %17615 = vmatpush.bf16.msra.mxu2 %v28311_v18  ;;  %v4478_v6 = vunpack.c.l.b16 %v329_v0  ;;  %v4479_v12 = vunpack.c.h.b16 %v329_v0  ;;  %v28390_v17 = vld [vmem:[%s29800_s12 + $0x12f8] sm:$0xff]  ;;  %v4719_v18 = vpack.c.b16 %v4477_v9, %v4477_v9 }
 0x235   : > { %17628 = vmatpush.bf16.msra.mxu3 %v28319_v24  ;;  %17590 = vmatmul.bf16.vlgmr.msra.gmra.mxu0 %v4714_v25  ;;  %v17397_v44 = vadd.f32 %v17396_v41, %v17384_v39  ;;  %v28364_v24 = vld [vmem:[%s29800_s12 + $0x1228] sm:$0xff]  ;;  %v28378_v38 = vld [vmem:[%s29800_s12 + $0x1298] sm:$0xff] }
 0x236   : > { %17634 = vmatpush.bf16.msrb.mxu0 %v28334_v20  ;;  %17603 = vmatmul.bf16.vlgmr.msra.gmra.mxu1 %v4715_v28  ;;  %v4720_v16 = vpack.c.b16 %v4478_v6, %v4478_v6  ;;  %v4721_v19 = vpack.c.b16 %v4479_v12, %v4479_v12  ;;  %v28365_v20 = vld [vmem:[%s29800_s12 + $0x1230] sm:$0xff]  ;;  %v28372_v25 = vld [vmem:[%s29800_s12 + $0x1268] sm:$0xff]  ;;  %v28386_v41 = vld [vmem:[%s29800_s12 + $0x12d8] sm:$0xff] }
 0x237   : > { %17647 = vmatpush.bf16.msrb.mxu1 %v28342_v21  ;;  %17616 = vmatmul.bf16.vlgmr.msra.gmra.mxu2 %v4716_v26  ;;  %v28373_v21 = vld [vmem:[%s29800_s12 + $0x1270] sm:$0xff]  ;;  %v28380_v26 = vld [vmem:[%s29800_s12 + $0x12a8] sm:$0xff]  ;;  %v28398_v0 = vld [vmem:[%s29800_s12 + $0x1338] sm:$0xff] }
 0x238   : > { %17660 = vmatpush.bf16.msrb.mxu2 %v28350_v23  ;;  %17629 = vmatmul.bf16.vlgmr.msra.gmra.mxu3 %v4717_v29  ;;  %v28389_v23 = vld [vmem:[%s29800_s12 + $0x12f0] sm:$0xff] }
 0x239   : > { %17673 = vmatpush.bf16.msrb.mxu3 %v28358_v27  ;;  %v28388_v27 = vld [vmem:[%s29800_s12 + $0x12e8] sm:$0xff]  ;;  %v28413_v12 = vld [vmem:[%s29800_s12 + $0x13b0] sm:$0xff] }
 0x23a   : > { %17635 = vmatpush.bf16.msrb.mxu0 %v28333_v30  ;;  %v17409_v49 = vpop.f32.mrf.mxu2  ;;  %v17385_v53 = vpop.f32.mrf.mxu0  ;;  %v28363_v30 = vld [vmem:[%s29800_s12 + $0x1220] sm:$0xff] }
 0x23b   : > { %17648 = vmatpush.bf16.msrb.mxu1 %v28341_v31  ;;  %v17410_v50 = vadd.f32 %v17409_v49, %v17397_v44  ;;  %v17422_v52 = vpop.f32.mrf.mxu3  ;;  %v17398_v56 = vpop.f32.mrf.mxu1  ;;  %v28385_v49 = vld [vmem:[%s29800_s12 + $0x12d0] sm:$0xff]  ;;  %v330_v53 = vld [vmem:[%s29795_s8 + $0x120] sm:$0xff] }
 0x23c   : > { %17661 = vmatpush.bf16.msrb.mxu2 %v28349_v32  ;;  %v28371_v32 = vld [vmem:[%s29800_s12 + $0x1260] sm:$0xff]  ;;  %v28384_v56 = vld [vmem:[%s29800_s12 + $0x12c8] sm:$0xff]  ;;  %v4481_v63 = vunpack.c.h.b16 %v330_v53 }
 0x23d   : > { %17674 = vmatpush.bf16.msrb.mxu3 %v28357_v33  ;;  %v30434_v54 = vadd.f32 %v17422_v52, %v17410_v50  ;;  %v28379_v33 = vld [vmem:[%s29800_s12 + $0x12a0] sm:$0xff]  ;;  %v28360_v50 = vld [vmem:[%s29800_s12 + $0x1208] sm:$0xff] }
 0x23e   : > { %17636 = vmatpush.bf16.msrb.mxu0 %v28332_v34  ;;  %v28376_v52 = vld [vmem:[%s29800_s12 + $0x1288] sm:$0xff] }
 0x23f   : > { %17649 = vmatpush.bf16.msrb.mxu1 %v28340_v35  ;;  %v28387_v35 = vld [vmem:[%s29800_s12 + $0x12e0] sm:$0xff] }
 0x240   : > { %17662 = vmatpush.bf16.msrb.mxu2 %v28348_v36  ;;  %v28362_v36 = vld [vmem:[%s29800_s12 + $0x1218] sm:$0xff] }
 0x241   : > { %17675 = vmatpush.bf16.msrb.mxu3 %v28356_v37  ;;  %v28370_v37 = vld [vmem:[%s29800_s12 + $0x1258] sm:$0xff] }
 0x242   : > { %17637 = vmatpush.bf16.msrb.mxu0 %v28331_v40  ;;  %v17411_v1 = vpop.f32.mrf.mxu2 }
 0x243   : > { %17650 = vmatpush.bf16.msrb.mxu1 %v28339_v42  ;;  %v17424_v3 = vpop.f32.mrf.mxu3  ;;  %v28406_v1 = vld [vmem:[%s29800_s12 + $0x1378] sm:$0xff] }
 0x244   : > { %17663 = vmatpush.bf16.msrb.mxu2 %v28347_v43  ;;  %v28414_v3 = vld [vmem:[%s29800_s12 + $0x13b8] sm:$0xff] }
 0x245   : > { %17676 = vmatpush.bf16.msrb.mxu3 %v28355_v45  ;;  %v28361_v45 = vld [vmem:[%s29800_s12 + $0x1210] sm:$0xff] }
 0x246   : > { %17638 = vmatpush.bf16.msrb.mxu0 %v28330_v46 }
 0x247   : > { %17651 = vmatpush.bf16.msrb.mxu1 %v28338_v47  ;;  %v28369_v47 = vld [vmem:[%s29800_s12 + $0x1250] sm:$0xff] }
 0x248   : > { %17664 = vmatpush.bf16.msrb.mxu2 %v28346_v48  ;;  %v28377_v48 = vld [vmem:[%s29800_s12 + $0x1290] sm:$0xff] }
 0x249   : > { %17677 = vmatpush.bf16.msrb.mxu3 %v28354_v51  ;;  %v28368_v51 = vld [vmem:[%s29800_s12 + $0x1248] sm:$0xff] }
 0x24a   : > { %17639 = vmatpush.bf16.msrb.mxu0 %v28329_v55 }
 0x24b   : > { %17652 = vmatpush.bf16.msrb.mxu1 %v28337_v57 }
 0x24c   : > { %17665 = vmatpush.bf16.msrb.mxu2 %v28345_v58  ;;  %v28359_v58 = vld [vmem:[%s29800_s12 + $0x1200] sm:$0xff] }
 0x24d   : > { %17678 = vmatpush.bf16.msrb.mxu3 %v28353_v59  ;;  %v4480_v59 = vunpack.c.l.b16 %v330_v53 }
 0x24e   : > { %17640 = vmatpush.bf16.msrb.mxu0 %v28328_v60 }
 0x24f   : > { %17653 = vmatpush.bf16.msrb.mxu1 %v28336_v61  ;;  %v28367_v61 = vld [vmem:[%s29800_s12 + $0x1240] sm:$0xff]  ;;  %v4722_v5 = vpack.c.b16 %v4480_v59, %v4480_v59 }
 0x250   : > { %17666 = vmatpush.bf16.msrb.mxu2 %v28344_v62  ;;  %v28375_v62 = vld [vmem:[%s29800_s12 + $0x1280] sm:$0xff] }
 0x251   : > { %17679 = vmatpush.bf16.msrb.mxu3 %v28352_v2 }
 0x252   : > { %17641 = vmatpush.bf16.msrb.mxu0 %v28327_v4  ;;  %v17435_v28 = vpop.f32.mrf.mxu0  ;;  %v28383_v4 = vld [vmem:[%s29800_s12 + $0x12c0] sm:$0xff] }
 0x253   : > { %17654 = vmatpush.bf16.msrb.mxu1 %v28335_v7  ;;  %v17436_v29 = vadd.f32 %v17435_v28, %v30434_v54  ;;  %v17448_v31 = vpop.f32.mrf.mxu1  ;;  %v331_v54 = vld [vmem:[%s29795_s8 + $0x128] sm:$0xff]  ;;  %v28422_v7 = vld [vmem:[%s29800_s12 + $0x13f8] sm:$0xff] }
 0x254   : > { %17667 = vmatpush.bf16.msrb.mxu2 %v28343_v8  ;;  %v4482_v60 = vunpack.c.l.b16 %v331_v54  ;;  %v4483_v2 = vunpack.c.h.b16 %v331_v54  ;;  %v4723_v8 = vpack.c.b16 %v4481_v63, %v4481_v63  ;;  %v28410_v28 = vld [vmem:[%s29800_s12 + $0x1398] sm:$0xff] }
 0x255   : > { %17680 = vmatpush.bf16.msrb.mxu3 %v28351_v14  ;;  %17642 = vmatmul.bf16.vlgmr.msrb.gmra.mxu0 %v4718_v15  ;;  %v17449_v34 = vadd.f32 %v17448_v31, %v17436_v29  ;;  %v28396_v14 = vld [vmem:[%s29800_s12 + $0x1328] sm:$0xff]  ;;  %v28418_v31 = vld [vmem:[%s29800_s12 + $0x13d8] sm:$0xff] }
 0x256   : > { %17686 = vmatpush.bf16.msra.mxu0 %v28366_v10  ;;  %17655 = vmatmul.bf16.vlgmr.msrb.gmra.mxu1 %v4719_v18  ;;  %v4724_v6 = vpack.c.b16 %v4482_v60, %v4482_v60  ;;  %v4725_v9 = vpack.c.b16 %v4483_v2, %v4483_v2  ;;  %v28397_v10 = vld [vmem:[%s29800_s12 + $0x1330] sm:$0xff]  ;;  %v28404_v15 = vld [vmem:[%s29800_s12 + $0x1368] sm:$0xff]  ;;  %v28430_v54 = vld [vmem:[%s29800_s12 + $0x1438] sm:$0xff] }
 0x257   : > { %17699 = vmatpush.bf16.msra.mxu1 %v28374_v11  ;;  %17668 = vmatmul.bf16.vlgmr.msrb.gmra.mxu2 %v4720_v16  ;;  %v28405_v11 = vld [vmem:[%s29800_s12 + $0x1370] sm:$0xff]  ;;  %v28412_v16 = vld [vmem:[%s29800_s12 + $0x13a8] sm:$0xff] }
 0x258   : > { %17712 = vmatpush.bf16.msra.mxu2 %v28382_v13  ;;  %17681 = vmatmul.bf16.vlgmr.msrb.gmra.mxu3 %v4721_v19  ;;  %v28421_v13 = vld [vmem:[%s29800_s12 + $0x13f0] sm:$0xff] }
 0x259   : > { %17725 = vmatpush.bf16.msra.mxu3 %v28390_v17  ;;  %v28420_v17 = vld [vmem:[%s29800_s12 + $0x13e8] sm:$0xff]  ;;  %v28445_v2 = vld [vmem:[%s29800_s12 + $0x14b0] sm:$0xff] }
 0x25a   : > { %17687 = vmatpush.bf16.msra.mxu0 %v28365_v20  ;;  %v17461_v39 = vpop.f32.mrf.mxu2  ;;  %v17437_v43 = vpop.f32.mrf.mxu0  ;;  %v28395_v20 = vld [vmem:[%s29800_s12 + $0x1320] sm:$0xff] }
 0x25b   : > { %17700 = vmatpush.bf16.msra.mxu1 %v28373_v21  ;;  %v17462_v40 = vadd.f32 %v17461_v39, %v17449_v34  ;;  %v17474_v42 = vpop.f32.mrf.mxu3  ;;  %v17450_v46 = vpop.f32.mrf.mxu1  ;;  %v28417_v39 = vld [vmem:[%s29800_s12 + $0x13d0] sm:$0xff] }
 0x25c   : > { %17713 = vmatpush.bf16.msra.mxu2 %v28381_v22  ;;  %v28403_v22 = vld [vmem:[%s29800_s12 + $0x1360] sm:$0xff]  ;;  %v332_v43 = vld [vmem:[%s29795_s8 + $0x130] sm:$0xff]  ;;  %v28416_v46 = vld [vmem:[%s29800_s12 + $0x13c8] sm:$0xff] }
 0x25d   : > { %17726 = vmatpush.bf16.msra.mxu3 %v28389_v23  ;;  %v30471_v44 = vadd.f32 %v17474_v42, %v17462_v40  ;;  %v28411_v23 = vld [vmem:[%s29800_s12 + $0x13a0] sm:$0xff]  ;;  %v28392_v40 = vld [vmem:[%s29800_s12 + $0x1308] sm:$0xff]  ;;  %v4485_v53 = vunpack.c.h.b16 %v332_v43 }
 0x25e   : > { %17688 = vmatpush.bf16.msra.mxu0 %v28364_v24  ;;  %v28408_v42 = vld [vmem:[%s29800_s12 + $0x1388] sm:$0xff] }
 0x25f   : > { %17701 = vmatpush.bf16.msra.mxu1 %v28372_v25  ;;  %v28419_v25 = vld [vmem:[%s29800_s12 + $0x13e0] sm:$0xff] }
 0x260   : > { %17714 = vmatpush.bf16.msra.mxu2 %v28380_v26  ;;  %v28394_v26 = vld [vmem:[%s29800_s12 + $0x1318] sm:$0xff] }
 0x261   : > { %17727 = vmatpush.bf16.msra.mxu3 %v28388_v27  ;;  %v28402_v27 = vld [vmem:[%s29800_s12 + $0x1358] sm:$0xff] }
 0x262   : > { %17689 = vmatpush.bf16.msra.mxu0 %v28363_v30  ;;  %v17463_v55 = vpop.f32.mrf.mxu2 }
 0x263   : > { %17702 = vmatpush.bf16.msra.mxu1 %v28371_v32  ;;  %v17476_v57 = vpop.f32.mrf.mxu3  ;;  %v28438_v55 = vld [vmem:[%s29800_s12 + $0x1478] sm:$0xff] }
 0x264   : > { %17715 = vmatpush.bf16.msra.mxu2 %v28379_v33  ;;  %v28446_v57 = vld [vmem:[%s29800_s12 + $0x14b8] sm:$0xff] }
 0x265   : > { %17728 = vmatpush.bf16.msra.mxu3 %v28387_v35  ;;  %v28393_v35 = vld [vmem:[%s29800_s12 + $0x1310] sm:$0xff] }
 0x266   : > { %17690 = vmatpush.bf16.msra.mxu0 %v28362_v36 }
 0x267   : > { %17703 = vmatpush.bf16.msra.mxu1 %v28370_v37  ;;  %v28401_v37 = vld [vmem:[%s29800_s12 + $0x1350] sm:$0xff] }
 0x268   : > { %17716 = vmatpush.bf16.msra.mxu2 %v28378_v38  ;;  %v28409_v38 = vld [vmem:[%s29800_s12 + $0x1390] sm:$0xff] }
 0x269   : > { %17729 = vmatpush.bf16.msra.mxu3 %v28386_v41  ;;  %v28400_v41 = vld [vmem:[%s29800_s12 + $0x1348] sm:$0xff] }
 0x26a   : > { %17691 = vmatpush.bf16.msra.mxu0 %v28361_v45 }
 0x26b   : > { %17704 = vmatpush.bf16.msra.mxu1 %v28369_v47 }
 0x26c   : > { %17717 = vmatpush.bf16.msra.mxu2 %v28377_v48  ;;  %v28391_v48 = vld [vmem:[%s29800_s12 + $0x1300] sm:$0xff] }
 0x26d   : > { %17730 = vmatpush.bf16.msra.mxu3 %v28385_v49  ;;  %v4484_v49 = vunpack.c.l.b16 %v332_v43 }
 0x26e   : > { %17692 = vmatpush.bf16.msra.mxu0 %v28360_v50 }
 0x26f   : > { %17705 = vmatpush.bf16.msra.mxu1 %v28368_v51  ;;  %v28399_v51 = vld [vmem:[%s29800_s12 + $0x1340] sm:$0xff]  ;;  %v4726_v59 = vpack.c.b16 %v4484_v49, %v4484_v49 }
 0x270   : > { %17718 = vmatpush.bf16.msra.mxu2 %v28376_v52  ;;  %v28407_v52 = vld [vmem:[%s29800_s12 + $0x1380] sm:$0xff] }
 0x271   : > { %17731 = vmatpush.bf16.msra.mxu3 %v28384_v56 }
 0x272   : > { %17693 = vmatpush.bf16.msra.mxu0 %v28359_v58  ;;  %v17487_v18 = vpop.f32.mrf.mxu0  ;;  %v28415_v58 = vld [vmem:[%s29800_s12 + $0x13c0] sm:$0xff] }
 0x273   : > { %17706 = vmatpush.bf16.msra.mxu1 %v28367_v61  ;;  %v17488_v19 = vadd.f32 %v17487_v18, %v30471_v44  ;;  %v17500_v21 = vpop.f32.mrf.mxu1  ;;  %v333_v44 = vld [vmem:[%s29795_s8 + $0x138] sm:$0xff] }
 0x274   : > { %17719 = vmatpush.bf16.msra.mxu2 %v28375_v62  ;;  %v4486_v50 = vunpack.c.l.b16 %v333_v44  ;;  %v4487_v56 = vunpack.c.h.b16 %v333_v44  ;;  %v28454_v61 = vld [vmem:[%s29800_s12 + $0x14f8] sm:$0xff]  ;;  %v4727_v62 = vpack.c.b16 %v4485_v53, %v4485_v53 }
 0x275   : > { %17732 = vmatpush.bf16.msra.mxu3 %v28383_v4  ;;  %17694 = vmatmul.bf16.vlgmr.msra.gmra.mxu0 %v4722_v5  ;;  %v17501_v24 = vadd.f32 %v17500_v21, %v17488_v19  ;;  %v28428_v4 = vld [vmem:[%s29800_s12 + $0x1428] sm:$0xff]  ;;  %v28442_v18 = vld [vmem:[%s29800_s12 + $0x1498] sm:$0xff] }
 0x276   : > { %17738 = vmatpush.bf16.msrb.mxu0 %v28398_v0  ;;  %17707 = vmatmul.bf16.vlgmr.msra.gmra.mxu1 %v4723_v8  ;;  %v4728_v60 = vpack.c.b16 %v4486_v50, %v4486_v50  ;;  %v4729_v63 = vpack.c.b16 %v4487_v56, %v4487_v56  ;;  %v28429_v0 = vld [vmem:[%s29800_s12 + $0x1430] sm:$0xff]  ;;  %v28436_v5 = vld [vmem:[%s29800_s12 + $0x1468] sm:$0xff]  ;;  %v28450_v21 = vld [vmem:[%s29800_s12 + $0x14d8] sm:$0xff] }
 0x277   : > { %17751 = vmatpush.bf16.msrb.mxu1 %v28406_v1  ;;  %17720 = vmatmul.bf16.vlgmr.msra.gmra.mxu2 %v4724_v6  ;;  %v28437_v1 = vld [vmem:[%s29800_s12 + $0x1470] sm:$0xff]  ;;  %v28444_v6 = vld [vmem:[%s29800_s12 + $0x14a8] sm:$0xff]  ;;  %v28462_v44 = vld [vmem:[%s29800_s12 + $0x1538] sm:$0xff] }
 0x278   : > { %17764 = vmatpush.bf16.msrb.mxu2 %v28414_v3  ;;  %17733 = vmatmul.bf16.vlgmr.msra.gmra.mxu3 %v4725_v9  ;;  %v28453_v3 = vld [vmem:[%s29800_s12 + $0x14f0] sm:$0xff] }
 0x279   : > { %17777 = vmatpush.bf16.msrb.mxu3 %v28422_v7  ;;  %v28452_v7 = vld [vmem:[%s29800_s12 + $0x14e8] sm:$0xff]  ;;  %v28477_v56 = vld [vmem:[%s29800_s12 + $0x15b0] sm:$0xff] }
 0x27a   : > { %17739 = vmatpush.bf16.msrb.mxu0 %v28397_v10  ;;  %v17513_v29 = vpop.f32.mrf.mxu2  ;;  %v17489_v33 = vpop.f32.mrf.mxu0  ;;  %v28427_v10 = vld [vmem:[%s29800_s12 + $0x1420] sm:$0xff] }
 0x27b   : > { %17752 = vmatpush.bf16.msrb.mxu1 %v28405_v11  ;;  %v17514_v30 = vadd.f32 %v17513_v29, %v17501_v24  ;;  %v17526_v32 = vpop.f32.mrf.mxu3  ;;  %v17502_v36 = vpop.f32.mrf.mxu1  ;;  %v28449_v29 = vld [vmem:[%s29800_s12 + $0x14d0] sm:$0xff]  ;;  %v334_v33 = vld [vmem:[%s29795_s8 + $0x140] sm:$0xff] }
 0x27c   : > { %17765 = vmatpush.bf16.msrb.mxu2 %v28413_v12  ;;  %v28435_v12 = vld [vmem:[%s29800_s12 + $0x1460] sm:$0xff]  ;;  %v28448_v36 = vld [vmem:[%s29800_s12 + $0x14c8] sm:$0xff]  ;;  %v4489_v43 = vunpack.c.h.b16 %v334_v33 }
 0x27d   : > { %17778 = vmatpush.bf16.msrb.mxu3 %v28421_v13  ;;  %v30508_v34 = vadd.f32 %v17526_v32, %v17514_v30  ;;  %v28443_v13 = vld [vmem:[%s29800_s12 + $0x14a0] sm:$0xff]  ;;  %v28424_v30 = vld [vmem:[%s29800_s12 + $0x1408] sm:$0xff] }
 0x27e   : > { %17740 = vmatpush.bf16.msrb.mxu0 %v28396_v14  ;;  %v28440_v32 = vld [vmem:[%s29800_s12 + $0x1488] sm:$0xff] }
 0x27f   : > { %17753 = vmatpush.bf16.msrb.mxu1 %v28404_v15  ;;  %v28451_v15 = vld [vmem:[%s29800_s12 + $0x14e0] sm:$0xff] }
 0x280   : > { %17766 = vmatpush.bf16.msrb.mxu2 %v28412_v16  ;;  %v28426_v16 = vld [vmem:[%s29800_s12 + $0x1418] sm:$0xff] }
 0x281   : > { %17779 = vmatpush.bf16.msrb.mxu3 %v28420_v17  ;;  %v28434_v17 = vld [vmem:[%s29800_s12 + $0x1458] sm:$0xff] }
 0x282   : > { %17741 = vmatpush.bf16.msrb.mxu0 %v28395_v20  ;;  %v17515_v45 = vpop.f32.mrf.mxu2 }
 0x283   : > { %17754 = vmatpush.bf16.msrb.mxu1 %v28403_v22  ;;  %v17528_v47 = vpop.f32.mrf.mxu3  ;;  %v28470_v45 = vld [vmem:[%s29800_s12 + $0x1578] sm:$0xff] }
 0x284   : > { %17767 = vmatpush.bf16.msrb.mxu2 %v28411_v23  ;;  %v28478_v47 = vld [vmem:[%s29800_s12 + $0x15b8] sm:$0xff] }
 0x285   : > { %17780 = vmatpush.bf16.msrb.mxu3 %v28419_v25  ;;  %v28425_v25 = vld [vmem:[%s29800_s12 + $0x1410] sm:$0xff] }
 0x286   : > { %17742 = vmatpush.bf16.msrb.mxu0 %v28394_v26 }
 0x287   : > { %17755 = vmatpush.bf16.msrb.mxu1 %v28402_v27  ;;  %v28433_v27 = vld [vmem:[%s29800_s12 + $0x1450] sm:$0xff] }
 0x288   : > { %17768 = vmatpush.bf16.msrb.mxu2 %v28410_v28  ;;  %v28441_v28 = vld [vmem:[%s29800_s12 + $0x1490] sm:$0xff] }
 0x289   : > { %17781 = vmatpush.bf16.msrb.mxu3 %v28418_v31  ;;  %v28432_v31 = vld [vmem:[%s29800_s12 + $0x1448] sm:$0xff] }
 0x28a   : > { %17743 = vmatpush.bf16.msrb.mxu0 %v28393_v35 }
 0x28b   : > { %17756 = vmatpush.bf16.msrb.mxu1 %v28401_v37 }
 0x28c   : > { %17769 = vmatpush.bf16.msrb.mxu2 %v28409_v38  ;;  %v28423_v38 = vld [vmem:[%s29800_s12 + $0x1400] sm:$0xff] }
 0x28d   : > { %17782 = vmatpush.bf16.msrb.mxu3 %v28417_v39  ;;  %v4488_v39 = vunpack.c.l.b16 %v334_v33 }
 0x28e   : > { %17744 = vmatpush.bf16.msrb.mxu0 %v28392_v40 }
 0x28f   : > { %17757 = vmatpush.bf16.msrb.mxu1 %v28400_v41  ;;  %v28431_v41 = vld [vmem:[%s29800_s12 + $0x1440] sm:$0xff]  ;;  %v4730_v49 = vpack.c.b16 %v4488_v39, %v4488_v39 }
 0x290   : > { %17770 = vmatpush.bf16.msrb.mxu2 %v28408_v42  ;;  %v28439_v42 = vld [vmem:[%s29800_s12 + $0x1480] sm:$0xff] }
 0x291   : > { %17783 = vmatpush.bf16.msrb.mxu3 %v28416_v46 }
 0x292   : > { %17745 = vmatpush.bf16.msrb.mxu0 %v28391_v48  ;;  %v17539_v8 = vpop.f32.mrf.mxu0  ;;  %v28447_v48 = vld [vmem:[%s29800_s12 + $0x14c0] sm:$0xff] }
 0x293   : > { %17758 = vmatpush.bf16.msrb.mxu1 %v28399_v51  ;;  %v17540_v9 = vadd.f32 %v17539_v8, %v30508_v34  ;;  %v17552_v11 = vpop.f32.mrf.mxu1  ;;  %v335_v34 = vld [vmem:[%s29795_s8 + $0x148] sm:$0xff]  ;;  %v28486_v51 = vld [vmem:[%s29800_s12 + $0x15f8] sm:$0xff] }
 0x294   : > { %17771 = vmatpush.bf16.msrb.mxu2 %v28407_v52  ;;  %v4490_v40 = vunpack.c.l.b16 %v335_v34  ;;  %v4491_v46 = vunpack.c.h.b16 %v335_v34  ;;  %v4731_v52 = vpack.c.b16 %v4489_v43, %v4489_v43  ;;  %v28474_v8 = vld [vmem:[%s29800_s12 + $0x1598] sm:$0xff] }
 0x295   : > { %17784 = vmatpush.bf16.msrb.mxu3 %v28415_v58  ;;  %17746 = vmatmul.bf16.vlgmr.msrb.gmra.mxu0 %v4726_v59  ;;  %v17553_v14 = vadd.f32 %v17552_v11, %v17540_v9  ;;  %v28460_v58 = vld [vmem:[%s29800_s12 + $0x1528] sm:$0xff]  ;;  %v28482_v11 = vld [vmem:[%s29800_s12 + $0x15d8] sm:$0xff] }
 0x296   : > { %17790 = vmatpush.bf16.msra.mxu0 %v28430_v54  ;;  %17759 = vmatmul.bf16.vlgmr.msrb.gmra.mxu1 %v4727_v62  ;;  %v4732_v50 = vpack.c.b16 %v4490_v40, %v4490_v40  ;;  %v4733_v53 = vpack.c.b16 %v4491_v46, %v4491_v46  ;;  %v28461_v54 = vld [vmem:[%s29800_s12 + $0x1530] sm:$0xff]  ;;  %v28468_v59 = vld [vmem:[%s29800_s12 + $0x1568] sm:$0xff]  ;;  %v28494_v34 = vld [vmem:[%s29800_s12 + $0x1638] sm:$0xff] }
 0x297   : > { %17803 = vmatpush.bf16.msra.mxu1 %v28438_v55  ;;  %17772 = vmatmul.bf16.vlgmr.msrb.gmra.mxu2 %v4728_v60  ;;  %v28469_v55 = vld [vmem:[%s29800_s12 + $0x1570] sm:$0xff]  ;;  %v28476_v60 = vld [vmem:[%s29800_s12 + $0x15a8] sm:$0xff] }
 0x298   : > { %17816 = vmatpush.bf16.msra.mxu2 %v28446_v57  ;;  %17785 = vmatmul.bf16.vlgmr.msrb.gmra.mxu3 %v4729_v63  ;;  %v28485_v57 = vld [vmem:[%s29800_s12 + $0x15f0] sm:$0xff] }
 0x299   : > { %17829 = vmatpush.bf16.msra.mxu3 %v28454_v61  ;;  %v28484_v61 = vld [vmem:[%s29800_s12 + $0x15e8] sm:$0xff]  ;;  %v28509_v46 = vld [vmem:[%s29800_s12 + $0x16b0] sm:$0xff] }
 0x29a   : > { %17791 = vmatpush.bf16.msra.mxu0 %v28429_v0  ;;  %v17565_v19 = vpop.f32.mrf.mxu2  ;;  %v17541_v23 = vpop.f32.mrf.mxu0  ;;  %v28459_v0 = vld [vmem:[%s29800_s12 + $0x1520] sm:$0xff] }
 0x29b   : > { %17804 = vmatpush.bf16.msra.mxu1 %v28437_v1  ;;  %v17566_v20 = vadd.f32 %v17565_v19, %v17553_v14  ;;  %v17578_v22 = vpop.f32.mrf.mxu3  ;;  %v17554_v26 = vpop.f32.mrf.mxu1  ;;  %v28481_v19 = vld [vmem:[%s29800_s12 + $0x15d0] sm:$0xff] }
 0x29c   : > { %17817 = vmatpush.bf16.msra.mxu2 %v28445_v2  ;;  %v28467_v2 = vld [vmem:[%s29800_s12 + $0x1560] sm:$0xff]  ;;  %v336_v23 = vld [vmem:[%s29795_s8 + $0x150] sm:$0xff]  ;;  %v28480_v26 = vld [vmem:[%s29800_s12 + $0x15c8] sm:$0xff] }
 0x29d   : > { %17830 = vmatpush.bf16.msra.mxu3 %v28453_v3  ;;  %v30545_v24 = vadd.f32 %v17578_v22, %v17566_v20  ;;  %v28475_v3 = vld [vmem:[%s29800_s12 + $0x15a0] sm:$0xff]  ;;  %v28456_v20 = vld [vmem:[%s29800_s12 + $0x1508] sm:$0xff]  ;;  %v4493_v33 = vunpack.c.h.b16 %v336_v23 }
 0x29e   : > { %17792 = vmatpush.bf16.msra.mxu0 %v28428_v4  ;;  %v28472_v22 = vld [vmem:[%s29800_s12 + $0x1588] sm:$0xff] }
 0x29f   : > { %17805 = vmatpush.bf16.msra.mxu1 %v28436_v5  ;;  %v28483_v5 = vld [vmem:[%s29800_s12 + $0x15e0] sm:$0xff] }
 0x2a0   : > { %17818 = vmatpush.bf16.msra.mxu2 %v28444_v6  ;;  %v28458_v6 = vld [vmem:[%s29800_s12 + $0x1518] sm:$0xff] }
 0x2a1   : > { %17831 = vmatpush.bf16.msra.mxu3 %v28452_v7  ;;  %v28466_v7 = vld [vmem:[%s29800_s12 + $0x1558] sm:$0xff] }
 0x2a2   : > { %17793 = vmatpush.bf16.msra.mxu0 %v28427_v10  ;;  %v17567_v35 = vpop.f32.mrf.mxu2 }
 0x2a3   : > { %17806 = vmatpush.bf16.msra.mxu1 %v28435_v12  ;;  %v17580_v37 = vpop.f32.mrf.mxu3  ;;  %v28502_v35 = vld [vmem:[%s29800_s12 + $0x1678] sm:$0xff] }
 0x2a4   : > { %17819 = vmatpush.bf16.msra.mxu2 %v28443_v13  ;;  %v28510_v37 = vld [vmem:[%s29800_s12 + $0x16b8] sm:$0xff] }
 0x2a5   : > { %17832 = vmatpush.bf16.msra.mxu3 %v28451_v15  ;;  %v28457_v15 = vld [vmem:[%s29800_s12 + $0x1510] sm:$0xff] }
 0x2a6   : > { %17794 = vmatpush.bf16.msra.mxu0 %v28426_v16 }
 0x2a7   : > { %17807 = vmatpush.bf16.msra.mxu1 %v28434_v17  ;;  %v28465_v17 = vld [vmem:[%s29800_s12 + $0x1550] sm:$0xff] }
 0x2a8   : > { %17820 = vmatpush.bf16.msra.mxu2 %v28442_v18  ;;  %v28473_v18 = vld [vmem:[%s29800_s12 + $0x1590] sm:$0xff] }
 0x2a9   : > { %17833 = vmatpush.bf16.msra.mxu3 %v28450_v21  ;;  %v28464_v21 = vld [vmem:[%s29800_s12 + $0x1548] sm:$0xff] }
 0x2aa   : > { %17795 = vmatpush.bf16.msra.mxu0 %v28425_v25 }
 0x2ab   : > { %17808 = vmatpush.bf16.msra.mxu1 %v28433_v27 }
 0x2ac   : > { %17821 = vmatpush.bf16.msra.mxu2 %v28441_v28  ;;  %v28455_v28 = vld [vmem:[%s29800_s12 + $0x1500] sm:$0xff] }
 0x2ad   : > { %17834 = vmatpush.bf16.msra.mxu3 %v28449_v29  ;;  %v4492_v29 = vunpack.c.l.b16 %v336_v23 }
 0x2ae   : > { %17796 = vmatpush.bf16.msra.mxu0 %v28424_v30 }
 0x2af   : > { %17809 = vmatpush.bf16.msra.mxu1 %v28432_v31  ;;  %v28463_v31 = vld [vmem:[%s29800_s12 + $0x1540] sm:$0xff]  ;;  %v4734_v39 = vpack.c.b16 %v4492_v29, %v4492_v29 }
 0x2b0   : > { %17822 = vmatpush.bf16.msra.mxu2 %v28440_v32  ;;  %v28471_v32 = vld [vmem:[%s29800_s12 + $0x1580] sm:$0xff] }
 0x2b1   : > { %17835 = vmatpush.bf16.msra.mxu3 %v28448_v36 }
 0x2b2   : > { %17797 = vmatpush.bf16.msra.mxu0 %v28423_v38  ;;  %v17591_v62 = vpop.f32.mrf.mxu0  ;;  %v28479_v38 = vld [vmem:[%s29800_s12 + $0x15c0] sm:$0xff] }
 0x2b3   : > { %17810 = vmatpush.bf16.msra.mxu1 %v28431_v41  ;;  %v17592_v63 = vadd.f32 %v17591_v62, %v30545_v24  ;;  %v17604_v1 = vpop.f32.mrf.mxu1  ;;  %v337_v24 = vld [vmem:[%s29795_s8 + $0x158] sm:$0xff] }
 0x2b4   : > { %17823 = vmatpush.bf16.msra.mxu2 %v28439_v42  ;;  %v4494_v30 = vunpack.c.l.b16 %v337_v24  ;;  %v4495_v36 = vunpack.c.h.b16 %v337_v24  ;;  %v28518_v41 = vld [vmem:[%s29800_s12 + $0x16f8] sm:$0xff]  ;;  %v4735_v42 = vpack.c.b16 %v4493_v33, %v4493_v33 }
 0x2b5   : > { %17836 = vmatpush.bf16.msra.mxu3 %v28447_v48  ;;  %17798 = vmatmul.bf16.vlgmr.msra.gmra.mxu0 %v4730_v49  ;;  %v17605_v4 = vadd.f32 %v17604_v1, %v17592_v63  ;;  %v28492_v48 = vld [vmem:[%s29800_s12 + $0x1628] sm:$0xff]  ;;  %v28506_v62 = vld [vmem:[%s29800_s12 + $0x1698] sm:$0xff] }
 0x2b6   : > { %17842 = vmatpush.bf16.msrb.mxu0 %v28462_v44  ;;  %17811 = vmatmul.bf16.vlgmr.msra.gmra.mxu1 %v4731_v52  ;;  %v4736_v40 = vpack.c.b16 %v4494_v30, %v4494_v30  ;;  %v4737_v43 = vpack.c.b16 %v4495_v36, %v4495_v36  ;;  %v28493_v44 = vld [vmem:[%s29800_s12 + $0x1630] sm:$0xff]  ;;  %v28500_v49 = vld [vmem:[%s29800_s12 + $0x1668] sm:$0xff]  ;;  %v28514_v1 = vld [vmem:[%s29800_s12 + $0x16d8] sm:$0xff] }
 0x2b7   : > { %17855 = vmatpush.bf16.msrb.mxu1 %v28470_v45  ;;  %17824 = vmatmul.bf16.vlgmr.msra.gmra.mxu2 %v4732_v50  ;;  %v28501_v45 = vld [vmem:[%s29800_s12 + $0x1670] sm:$0xff]  ;;  %v28508_v50 = vld [vmem:[%s29800_s12 + $0x16a8] sm:$0xff]  ;;  %v28526_v24 = vld [vmem:[%s29800_s12 + $0x1738] sm:$0xff] }
 0x2b8   : > { %17868 = vmatpush.bf16.msrb.mxu2 %v28478_v47  ;;  %17837 = vmatmul.bf16.vlgmr.msra.gmra.mxu3 %v4733_v53  ;;  %v28517_v47 = vld [vmem:[%s29800_s12 + $0x16f0] sm:$0xff] }
 0x2b9   : > { %17881 = vmatpush.bf16.msrb.mxu3 %v28486_v51  ;;  %v28516_v51 = vld [vmem:[%s29800_s12 + $0x16e8] sm:$0xff]  ;;  %v28541_v36 = vld [vmem:[%s29800_s12 + $0x17b0] sm:$0xff] }
 0x2ba   : > { %17843 = vmatpush.bf16.msrb.mxu0 %v28461_v54  ;;  %v17617_v9 = vpop.f32.mrf.mxu2  ;;  %v17593_v13 = vpop.f32.mrf.mxu0  ;;  %v28491_v54 = vld [vmem:[%s29800_s12 + $0x1620] sm:$0xff] }
 0x2bb   : > { %17856 = vmatpush.bf16.msrb.mxu1 %v28469_v55  ;;  %v17618_v10 = vadd.f32 %v17617_v9, %v17605_v4  ;;  %v17630_v12 = vpop.f32.mrf.mxu3  ;;  %v17606_v16 = vpop.f32.mrf.mxu1  ;;  %v28513_v9 = vld [vmem:[%s29800_s12 + $0x16d0] sm:$0xff]  ;;  %v338_v13 = vld [vmem:[%s29795_s8 + $0x160] sm:$0xff] }
 0x2bc   : > { %17869 = vmatpush.bf16.msrb.mxu2 %v28477_v56  ;;  %v28499_v56 = vld [vmem:[%s29800_s12 + $0x1660] sm:$0xff]  ;;  %v28512_v16 = vld [vmem:[%s29800_s12 + $0x16c8] sm:$0xff]  ;;  %v4497_v23 = vunpack.c.h.b16 %v338_v13 }
 0x2bd   : > { %17882 = vmatpush.bf16.msrb.mxu3 %v28485_v57  ;;  %v30582_v14 = vadd.f32 %v17630_v12, %v17618_v10  ;;  %v28507_v57 = vld [vmem:[%s29800_s12 + $0x16a0] sm:$0xff]  ;;  %v28488_v10 = vld [vmem:[%s29800_s12 + $0x1608] sm:$0xff] }
 0x2be   : > { %17844 = vmatpush.bf16.msrb.mxu0 %v28460_v58  ;;  %v28504_v12 = vld [vmem:[%s29800_s12 + $0x1688] sm:$0xff] }
 0x2bf   : > { %17857 = vmatpush.bf16.msrb.mxu1 %v28468_v59  ;;  %v28515_v59 = vld [vmem:[%s29800_s12 + $0x16e0] sm:$0xff] }
 0x2c0   : > { %17870 = vmatpush.bf16.msrb.mxu2 %v28476_v60  ;;  %v28490_v60 = vld [vmem:[%s29800_s12 + $0x1618] sm:$0xff] }
 0x2c1   : > { %17883 = vmatpush.bf16.msrb.mxu3 %v28484_v61  ;;  %v28498_v61 = vld [vmem:[%s29800_s12 + $0x1658] sm:$0xff] }
 0x2c2   : > { %17845 = vmatpush.bf16.msrb.mxu0 %v28459_v0  ;;  %v17619_v25 = vpop.f32.mrf.mxu2 }
 0x2c3   : > { %17858 = vmatpush.bf16.msrb.mxu1 %v28467_v2  ;;  %v17632_v27 = vpop.f32.mrf.mxu3  ;;  %v28534_v25 = vld [vmem:[%s29800_s12 + $0x1778] sm:$0xff] }
 0x2c4   : > { %17871 = vmatpush.bf16.msrb.mxu2 %v28475_v3  ;;  %v28542_v27 = vld [vmem:[%s29800_s12 + $0x17b8] sm:$0xff] }
 0x2c5   : > { %17884 = vmatpush.bf16.msrb.mxu3 %v28483_v5  ;;  %v28489_v5 = vld [vmem:[%s29800_s12 + $0x1610] sm:$0xff] }
 0x2c6   : > { %17846 = vmatpush.bf16.msrb.mxu0 %v28458_v6 }
 0x2c7   : > { %17859 = vmatpush.bf16.msrb.mxu1 %v28466_v7  ;;  %v28497_v7 = vld [vmem:[%s29800_s12 + $0x1650] sm:$0xff] }
 0x2c8   : > { %17872 = vmatpush.bf16.msrb.mxu2 %v28474_v8  ;;  %v28505_v8 = vld [vmem:[%s29800_s12 + $0x1690] sm:$0xff] }
 0x2c9   : > { %17885 = vmatpush.bf16.msrb.mxu3 %v28482_v11  ;;  %v28496_v11 = vld [vmem:[%s29800_s12 + $0x1648] sm:$0xff] }
 0x2ca   : > { %17847 = vmatpush.bf16.msrb.mxu0 %v28457_v15 }
 0x2cb   : > { %17860 = vmatpush.bf16.msrb.mxu1 %v28465_v17 }
 0x2cc   : > { %17873 = vmatpush.bf16.msrb.mxu2 %v28473_v18  ;;  %v28487_v18 = vld [vmem:[%s29800_s12 + $0x1600] sm:$0xff] }
 0x2cd   : > { %17886 = vmatpush.bf16.msrb.mxu3 %v28481_v19  ;;  %v4496_v19 = vunpack.c.l.b16 %v338_v13 }
 0x2ce   : > { %17848 = vmatpush.bf16.msrb.mxu0 %v28456_v20 }
 0x2cf   : > { %17861 = vmatpush.bf16.msrb.mxu1 %v28464_v21  ;;  %v28495_v21 = vld [vmem:[%s29800_s12 + $0x1640] sm:$0xff]  ;;  %v4738_v29 = vpack.c.b16 %v4496_v19, %v4496_v19 }
 0x2d0   : > { %17874 = vmatpush.bf16.msrb.mxu2 %v28472_v22  ;;  %v28503_v22 = vld [vmem:[%s29800_s12 + $0x1680] sm:$0xff] }
 0x2d1   : > { %17887 = vmatpush.bf16.msrb.mxu3 %v28480_v26 }
 0x2d2   : > { %17849 = vmatpush.bf16.msrb.mxu0 %v28455_v28  ;;  %v17643_v52 = vpop.f32.mrf.mxu0  ;;  %v28511_v28 = vld [vmem:[%s29800_s12 + $0x16c0] sm:$0xff] }
 0x2d3   : > { %17862 = vmatpush.bf16.msrb.mxu1 %v28463_v31  ;;  %v17644_v53 = vadd.f32 %v17643_v52, %v30582_v14  ;;  %v17656_v55 = vpop.f32.mrf.mxu1  ;;  %v339_v14 = vld [vmem:[%s29795_s8 + $0x168] sm:$0xff]  ;;  %v28550_v31 = vld [vmem:[%s29800_s12 + $0x17f8] sm:$0xff] }
 0x2d4   : > { %17875 = vmatpush.bf16.msrb.mxu2 %v28471_v32  ;;  %v4498_v20 = vunpack.c.l.b16 %v339_v14  ;;  %v4499_v26 = vunpack.c.h.b16 %v339_v14  ;;  %v4739_v32 = vpack.c.b16 %v4497_v23, %v4497_v23  ;;  %v28538_v52 = vld [vmem:[%s29800_s12 + $0x1798] sm:$0xff] }
 0x2d5   : > { %17888 = vmatpush.bf16.msrb.mxu3 %v28479_v38  ;;  %17850 = vmatmul.bf16.vlgmr.msrb.gmra.mxu0 %v4734_v39  ;;  %v17657_v58 = vadd.f32 %v17656_v55, %v17644_v53  ;;  %v28524_v38 = vld [vmem:[%s29800_s12 + $0x1728] sm:$0xff]  ;;  %v28546_v55 = vld [vmem:[%s29800_s12 + $0x17d8] sm:$0xff] }
 0x2d6   : > { %17894 = vmatpush.bf16.msra.mxu0 %v28494_v34  ;;  %17863 = vmatmul.bf16.vlgmr.msrb.gmra.mxu1 %v4735_v42  ;;  %v4740_v30 = vpack.c.b16 %v4498_v20, %v4498_v20  ;;  %v4741_v33 = vpack.c.b16 %v4499_v26, %v4499_v26  ;;  %v28525_v34 = vld [vmem:[%s29800_s12 + $0x1730] sm:$0xff]  ;;  %v28532_v39 = vld [vmem:[%s29800_s12 + $0x1768] sm:$0xff]  ;;  %v28558_v14 = vld [vmem:[%s29800_s12 + $0x1838] sm:$0xff] }
 0x2d7   : > { %17907 = vmatpush.bf16.msra.mxu1 %v28502_v35  ;;  %17876 = vmatmul.bf16.vlgmr.msrb.gmra.mxu2 %v4736_v40  ;;  %v28533_v35 = vld [vmem:[%s29800_s12 + $0x1770] sm:$0xff]  ;;  %v28540_v40 = vld [vmem:[%s29800_s12 + $0x17a8] sm:$0xff] }
 0x2d8   : > { %17920 = vmatpush.bf16.msra.mxu2 %v28510_v37  ;;  %17889 = vmatmul.bf16.vlgmr.msrb.gmra.mxu3 %v4737_v43  ;;  %v28549_v37 = vld [vmem:[%s29800_s12 + $0x17f0] sm:$0xff] }
 0x2d9   : > { %17933 = vmatpush.bf16.msra.mxu3 %v28518_v41  ;;  %v28548_v41 = vld [vmem:[%s29800_s12 + $0x17e8] sm:$0xff]  ;;  %v28573_v26 = vld [vmem:[%s29800_s12 + $0x18b0] sm:$0xff] }
 0x2da   : > { %17895 = vmatpush.bf16.msra.mxu0 %v28493_v44  ;;  %v17669_v63 = vpop.f32.mrf.mxu2  ;;  %v17645_v3 = vpop.f32.mrf.mxu0  ;;  %v28523_v44 = vld [vmem:[%s29800_s12 + $0x1720] sm:$0xff] }
 0x2db   : > { %17908 = vmatpush.bf16.msra.mxu1 %v28501_v45  ;;  %v17670_v0 = vadd.f32 %v17669_v63, %v17657_v58  ;;  %v17682_v2 = vpop.f32.mrf.mxu3  ;;  %v17658_v6 = vpop.f32.mrf.mxu1  ;;  %v28545_v63 = vld [vmem:[%s29800_s12 + $0x17d0] sm:$0xff] }
 0x2dc   : > { %17921 = vmatpush.bf16.msra.mxu2 %v28509_v46  ;;  %v28531_v46 = vld [vmem:[%s29800_s12 + $0x1760] sm:$0xff]  ;;  %v340_v3 = vld [vmem:[%s29795_s8 + $0x170] sm:$0xff]  ;;  %v28544_v6 = vld [vmem:[%s29800_s12 + $0x17c8] sm:$0xff] }
 0x2dd   : > { %17934 = vmatpush.bf16.msra.mxu3 %v28517_v47  ;;  %v30619_v4 = vadd.f32 %v17682_v2, %v17670_v0  ;;  %v28539_v47 = vld [vmem:[%s29800_s12 + $0x17a0] sm:$0xff]  ;;  %v28520_v0 = vld [vmem:[%s29800_s12 + $0x1708] sm:$0xff]  ;;  %v4501_v13 = vunpack.c.h.b16 %v340_v3 }
 0x2de   : > { %17896 = vmatpush.bf16.msra.mxu0 %v28492_v48  ;;  %v28536_v2 = vld [vmem:[%s29800_s12 + $0x1788] sm:$0xff] }
 0x2df   : > { %17909 = vmatpush.bf16.msra.mxu1 %v28500_v49  ;;  %v28547_v49 = vld [vmem:[%s29800_s12 + $0x17e0] sm:$0xff] }
 0x2e0   : > { %17922 = vmatpush.bf16.msra.mxu2 %v28508_v50  ;;  %v28522_v50 = vld [vmem:[%s29800_s12 + $0x1718] sm:$0xff] }
 0x2e1   : > { %17935 = vmatpush.bf16.msra.mxu3 %v28516_v51  ;;  %v28530_v51 = vld [vmem:[%s29800_s12 + $0x1758] sm:$0xff] }
 0x2e2   : > { %17897 = vmatpush.bf16.msra.mxu0 %v28491_v54  ;;  %v17671_v15 = vpop.f32.mrf.mxu2 }
 0x2e3   : > { %17910 = vmatpush.bf16.msra.mxu1 %v28499_v56  ;;  %v17684_v17 = vpop.f32.mrf.mxu3  ;;  %v28566_v15 = vld [vmem:[%s29800_s12 + $0x1878] sm:$0xff] }
 0x2e4   : > { %17923 = vmatpush.bf16.msra.mxu2 %v28507_v57  ;;  %v28574_v17 = vld [vmem:[%s29800_s12 + $0x18b8] sm:$0xff] }
 0x2e5   : > { %17936 = vmatpush.bf16.msra.mxu3 %v28515_v59  ;;  %v28521_v59 = vld [vmem:[%s29800_s12 + $0x1710] sm:$0xff] }
 0x2e6   : > { %17898 = vmatpush.bf16.msra.mxu0 %v28490_v60 }
 0x2e7   : > { %17911 = vmatpush.bf16.msra.mxu1 %v28498_v61  ;;  %v28529_v61 = vld [vmem:[%s29800_s12 + $0x1750] sm:$0xff] }
 0x2e8   : > { %17924 = vmatpush.bf16.msra.mxu2 %v28506_v62  ;;  %v28537_v62 = vld [vmem:[%s29800_s12 + $0x1790] sm:$0xff] }
 0x2e9   : > { %17937 = vmatpush.bf16.msra.mxu3 %v28514_v1  ;;  %v28528_v1 = vld [vmem:[%s29800_s12 + $0x1748] sm:$0xff] }
 0x2ea   : > { %17899 = vmatpush.bf16.msra.mxu0 %v28489_v5 }
 0x2eb   : > { %17912 = vmatpush.bf16.msra.mxu1 %v28497_v7 }
 0x2ec   : > { %17925 = vmatpush.bf16.msra.mxu2 %v28505_v8  ;;  %v28519_v8 = vld [vmem:[%s29800_s12 + $0x1700] sm:$0xff] }
 0x2ed   : > { %17938 = vmatpush.bf16.msra.mxu3 %v28513_v9  ;;  %v4500_v9 = vunpack.c.l.b16 %v340_v3 }
 0x2ee   : > { %17900 = vmatpush.bf16.msra.mxu0 %v28488_v10 }
 0x2ef   : > { %17913 = vmatpush.bf16.msra.mxu1 %v28496_v11  ;;  %v28527_v11 = vld [vmem:[%s29800_s12 + $0x1740] sm:$0xff]  ;;  %v4742_v19 = vpack.c.b16 %v4500_v9, %v4500_v9 }
 0x2f0   : > { %17926 = vmatpush.bf16.msra.mxu2 %v28504_v12  ;;  %v28535_v12 = vld [vmem:[%s29800_s12 + $0x1780] sm:$0xff] }
 0x2f1   : > { %17939 = vmatpush.bf16.msra.mxu3 %v28512_v16 }
 0x2f2   : > { %17901 = vmatpush.bf16.msra.mxu0 %v28487_v18  ;;  %v17695_v42 = vpop.f32.mrf.mxu0  ;;  %v28543_v18 = vld [vmem:[%s29800_s12 + $0x17c0] sm:$0xff] }
 0x2f3   : > { %17914 = vmatpush.bf16.msra.mxu1 %v28495_v21  ;;  %v17696_v43 = vadd.f32 %v17695_v42, %v30619_v4  ;;  %v17708_v45 = vpop.f32.mrf.mxu1  ;;  %v341_v4 = vld [vmem:[%s29795_s8 + $0x178] sm:$0xff] }
 0x2f4   : > { %17927 = vmatpush.bf16.msra.mxu2 %v28503_v22  ;;  %v4502_v10 = vunpack.c.l.b16 %v341_v4  ;;  %v4503_v16 = vunpack.c.h.b16 %v341_v4  ;;  %v28582_v21 = vld [vmem:[%s29800_s12 + $0x18f8] sm:$0xff]  ;;  %v4743_v22 = vpack.c.b16 %v4501_v13, %v4501_v13 }
 0x2f5   : > { %17940 = vmatpush.bf16.msra.mxu3 %v28511_v28  ;;  %17902 = vmatmul.bf16.vlgmr.msra.gmra.mxu0 %v4738_v29  ;;  %v17709_v48 = vadd.f32 %v17708_v45, %v17696_v43  ;;  %v28556_v28 = vld [vmem:[%s29800_s12 + $0x1828] sm:$0xff]  ;;  %v28570_v42 = vld [vmem:[%s29800_s12 + $0x1898] sm:$0xff] }
 0x2f6   : > { %17946 = vmatpush.bf16.msrb.mxu0 %v28526_v24  ;;  %17915 = vmatmul.bf16.vlgmr.msra.gmra.mxu1 %v4739_v32  ;;  %v4744_v20 = vpack.c.b16 %v4502_v10, %v4502_v10  ;;  %v4745_v23 = vpack.c.b16 %v4503_v16, %v4503_v16  ;;  %v28557_v24 = vld [vmem:[%s29800_s12 + $0x1830] sm:$0xff]  ;;  %v28564_v29 = vld [vmem:[%s29800_s12 + $0x1868] sm:$0xff]  ;;  %v28578_v45 = vld [vmem:[%s29800_s12 + $0x18d8] sm:$0xff] }
 0x2f7   : > { %17959 = vmatpush.bf16.msrb.mxu1 %v28534_v25  ;;  %17928 = vmatmul.bf16.vlgmr.msra.gmra.mxu2 %v4740_v30  ;;  %v28565_v25 = vld [vmem:[%s29800_s12 + $0x1870] sm:$0xff]  ;;  %v28572_v30 = vld [vmem:[%s29800_s12 + $0x18a8] sm:$0xff]  ;;  %v28590_v4 = vld [vmem:[%s29800_s12 + $0x1938] sm:$0xff] }
 0x2f8   : > { %17972 = vmatpush.bf16.msrb.mxu2 %v28542_v27  ;;  %17941 = vmatmul.bf16.vlgmr.msra.gmra.mxu3 %v4741_v33  ;;  %v28581_v27 = vld [vmem:[%s29800_s12 + $0x18f0] sm:$0xff] }
 0x2f9   : > { %17985 = vmatpush.bf16.msrb.mxu3 %v28550_v31  ;;  %v28580_v31 = vld [vmem:[%s29800_s12 + $0x18e8] sm:$0xff]  ;;  %v28605_v16 = vld [vmem:[%s29800_s12 + $0x19b0] sm:$0xff] }
 0x2fa   : > { %17947 = vmatpush.bf16.msrb.mxu0 %v28525_v34  ;;  %v17721_v53 = vpop.f32.mrf.mxu2  ;;  %v17697_v57 = vpop.f32.mrf.mxu0  ;;  %v28555_v34 = vld [vmem:[%s29800_s12 + $0x1820] sm:$0xff] }
 0x2fb   : > { %17960 = vmatpush.bf16.msrb.mxu1 %v28533_v35  ;;  %v17722_v54 = vadd.f32 %v17721_v53, %v17709_v48  ;;  %v17734_v56 = vpop.f32.mrf.mxu3  ;;  %v17710_v60 = vpop.f32.mrf.mxu1  ;;  %v28577_v53 = vld [vmem:[%s29800_s12 + $0x18d0] sm:$0xff]  ;;  %v342_v57 = vld [vmem:[%s29795_s8 + $0x180] sm:$0xff] }
 0x2fc   : > { %17973 = vmatpush.bf16.msrb.mxu2 %v28541_v36  ;;  %v28563_v36 = vld [vmem:[%s29800_s12 + $0x1860] sm:$0xff]  ;;  %v28576_v60 = vld [vmem:[%s29800_s12 + $0x18c8] sm:$0xff]  ;;  %v4505_v3 = vunpack.c.h.b16 %v342_v57 }
 0x2fd   : > { %17986 = vmatpush.bf16.msrb.mxu3 %v28549_v37  ;;  %v30656_v58 = vadd.f32 %v17734_v56, %v17722_v54  ;;  %v28571_v37 = vld [vmem:[%s29800_s12 + $0x18a0] sm:$0xff]  ;;  %v28552_v54 = vld [vmem:[%s29800_s12 + $0x1808] sm:$0xff] }
 0x2fe   : > { %17948 = vmatpush.bf16.msrb.mxu0 %v28524_v38  ;;  %v28568_v56 = vld [vmem:[%s29800_s12 + $0x1888] sm:$0xff] }
 0x2ff   : > { %17961 = vmatpush.bf16.msrb.mxu1 %v28532_v39  ;;  %v28579_v39 = vld [vmem:[%s29800_s12 + $0x18e0] sm:$0xff] }
 0x300   : > { %17974 = vmatpush.bf16.msrb.mxu2 %v28540_v40  ;;  %v28554_v40 = vld [vmem:[%s29800_s12 + $0x1818] sm:$0xff] }
 0x301   : > { %17987 = vmatpush.bf16.msrb.mxu3 %v28548_v41  ;;  %v28562_v41 = vld [vmem:[%s29800_s12 + $0x1858] sm:$0xff] }
 0x302   : > { %17949 = vmatpush.bf16.msrb.mxu0 %v28523_v44  ;;  %v17723_v5 = vpop.f32.mrf.mxu2 }
 0x303   : > { %17962 = vmatpush.bf16.msrb.mxu1 %v28531_v46  ;;  %v17736_v7 = vpop.f32.mrf.mxu3  ;;  %v28598_v5 = vld [vmem:[%s29800_s12 + $0x1978] sm:$0xff] }
 0x304   : > { %17975 = vmatpush.bf16.msrb.mxu2 %v28539_v47  ;;  %v28606_v7 = vld [vmem:[%s29800_s12 + $0x19b8] sm:$0xff] }
 0x305   : > { %17988 = vmatpush.bf16.msrb.mxu3 %v28547_v49  ;;  %v28553_v49 = vld [vmem:[%s29800_s12 + $0x1810] sm:$0xff] }
 0x306   : > { %17950 = vmatpush.bf16.msrb.mxu0 %v28522_v50 }
 0x307   : > { %17963 = vmatpush.bf16.msrb.mxu1 %v28530_v51  ;;  %v28561_v51 = vld [vmem:[%s29800_s12 + $0x1850] sm:$0xff] }
 0x308   : > { %17976 = vmatpush.bf16.msrb.mxu2 %v28538_v52  ;;  %v28569_v52 = vld [vmem:[%s29800_s12 + $0x1890] sm:$0xff] }
 0x309   : > { %17989 = vmatpush.bf16.msrb.mxu3 %v28546_v55  ;;  %v28560_v55 = vld [vmem:[%s29800_s12 + $0x1848] sm:$0xff] }
 0x30a   : > { %17951 = vmatpush.bf16.msrb.mxu0 %v28521_v59 }
 0x30b   : > { %17964 = vmatpush.bf16.msrb.mxu1 %v28529_v61 }
 0x30c   : > { %17977 = vmatpush.bf16.msrb.mxu2 %v28537_v62  ;;  %v28551_v62 = vld [vmem:[%s29800_s12 + $0x1800] sm:$0xff] }
 0x30d   : > { %17990 = vmatpush.bf16.msrb.mxu3 %v28545_v63  ;;  %v4504_v63 = vunpack.c.l.b16 %v342_v57 }
 0x30e   : > { %17952 = vmatpush.bf16.msrb.mxu0 %v28520_v0 }
 0x30f   : > { %17965 = vmatpush.bf16.msrb.mxu1 %v28528_v1  ;;  %v28559_v1 = vld [vmem:[%s29800_s12 + $0x1840] sm:$0xff]  ;;  %v4746_v9 = vpack.c.b16 %v4504_v63, %v4504_v63 }
 0x310   : > { %17978 = vmatpush.bf16.msrb.mxu2 %v28536_v2  ;;  %v28567_v2 = vld [vmem:[%s29800_s12 + $0x1880] sm:$0xff] }
 0x311   : > { %17991 = vmatpush.bf16.msrb.mxu3 %v28544_v6 }
 0x312   : > { %17953 = vmatpush.bf16.msrb.mxu0 %v28519_v8  ;;  %v17747_v32 = vpop.f32.mrf.mxu0  ;;  %v28575_v8 = vld [vmem:[%s29800_s12 + $0x18c0] sm:$0xff] }
 0x313   : > { %17966 = vmatpush.bf16.msrb.mxu1 %v28527_v11  ;;  %v17748_v33 = vadd.f32 %v17747_v32, %v30656_v58  ;;  %v17760_v35 = vpop.f32.mrf.mxu1  ;;  %v343_v58 = vld [vmem:[%s29795_s8 + $0x188] sm:$0xff]  ;;  %v28614_v11 = vld [vmem:[%s29800_s12 + $0x19f8] sm:$0xff] }
 0x314   : > { %17979 = vmatpush.bf16.msrb.mxu2 %v28535_v12  ;;  %v4506_v0 = vunpack.c.l.b16 %v343_v58  ;;  %v4507_v6 = vunpack.c.h.b16 %v343_v58  ;;  %v4747_v12 = vpack.c.b16 %v4505_v3, %v4505_v3  ;;  %v28602_v32 = vld [vmem:[%s29800_s12 + $0x1998] sm:$0xff] }
 0x315   : > { %17992 = vmatpush.bf16.msrb.mxu3 %v28543_v18  ;;  %17954 = vmatmul.bf16.vlgmr.msrb.gmra.mxu0 %v4742_v19  ;;  %v17761_v38 = vadd.f32 %v17760_v35, %v17748_v33  ;;  %v28588_v18 = vld [vmem:[%s29800_s12 + $0x1928] sm:$0xff]  ;;  %v28610_v35 = vld [vmem:[%s29800_s12 + $0x19d8] sm:$0xff] }
 0x316   : > { %17998 = vmatpush.bf16.msra.mxu0 %v28558_v14  ;;  %17967 = vmatmul.bf16.vlgmr.msrb.gmra.mxu1 %v4743_v22  ;;  %v4748_v10 = vpack.c.b16 %v4506_v0, %v4506_v0  ;;  %v4749_v13 = vpack.c.b16 %v4507_v6, %v4507_v6  ;;  %v28589_v14 = vld [vmem:[%s29800_s12 + $0x1930] sm:$0xff]  ;;  %v28596_v19 = vld [vmem:[%s29800_s12 + $0x1968] sm:$0xff]  ;;  %v28622_v58 = vld [vmem:[%s29800_s12 + $0x1a38] sm:$0xff] }
 0x317   : > { %18011 = vmatpush.bf16.msra.mxu1 %v28566_v15  ;;  %17980 = vmatmul.bf16.vlgmr.msrb.gmra.mxu2 %v4744_v20  ;;  %v28597_v15 = vld [vmem:[%s29800_s12 + $0x1970] sm:$0xff]  ;;  %v28604_v20 = vld [vmem:[%s29800_s12 + $0x19a8] sm:$0xff] }
 0x318   : > { %18024 = vmatpush.bf16.msra.mxu2 %v28574_v17  ;;  %17993 = vmatmul.bf16.vlgmr.msrb.gmra.mxu3 %v4745_v23  ;;  %v28613_v17 = vld [vmem:[%s29800_s12 + $0x19f0] sm:$0xff] }
 0x319   : > { %18037 = vmatpush.bf16.msra.mxu3 %v28582_v21  ;;  %v28612_v21 = vld [vmem:[%s29800_s12 + $0x19e8] sm:$0xff]  ;;  %v28637_v6 = vld [vmem:[%s29800_s12 + $0x1ab0] sm:$0xff] }
 0x31a   : > { %17999 = vmatpush.bf16.msra.mxu0 %v28557_v24  ;;  %v17773_v43 = vpop.f32.mrf.mxu2  ;;  %v17749_v47 = vpop.f32.mrf.mxu0  ;;  %v28587_v24 = vld [vmem:[%s29800_s12 + $0x1920] sm:$0xff] }
 0x31b   : > { %18012 = vmatpush.bf16.msra.mxu1 %v28565_v25  ;;  %v17774_v44 = vadd.f32 %v17773_v43, %v17761_v38  ;;  %v17786_v46 = vpop.f32.mrf.mxu3  ;;  %v17762_v50 = vpop.f32.mrf.mxu1  ;;  %v28609_v43 = vld [vmem:[%s29800_s12 + $0x19d0] sm:$0xff] }
 0x31c   : > { %18025 = vmatpush.bf16.msra.mxu2 %v28573_v26  ;;  %v28595_v26 = vld [vmem:[%s29800_s12 + $0x1960] sm:$0xff]  ;;  %v344_v47 = vld [vmem:[%s29795_s8 + $0x190] sm:$0xff]  ;;  %v28608_v50 = vld [vmem:[%s29800_s12 + $0x19c8] sm:$0xff] }
 0x31d   : > { %18038 = vmatpush.bf16.msra.mxu3 %v28581_v27  ;;  %v30693_v48 = vadd.f32 %v17786_v46, %v17774_v44  ;;  %v28603_v27 = vld [vmem:[%s29800_s12 + $0x19a0] sm:$0xff]  ;;  %v28584_v44 = vld [vmem:[%s29800_s12 + $0x1908] sm:$0xff]  ;;  %v4509_v57 = vunpack.c.h.b16 %v344_v47 }
 0x31e   : > { %18000 = vmatpush.bf16.msra.mxu0 %v28556_v28  ;;  %v28600_v46 = vld [vmem:[%s29800_s12 + $0x1988] sm:$0xff] }
 0x31f   : > { %18013 = vmatpush.bf16.msra.mxu1 %v28564_v29  ;;  %v28611_v29 = vld [vmem:[%s29800_s12 + $0x19e0] sm:$0xff] }
 0x320   : > { %18026 = vmatpush.bf16.msra.mxu2 %v28572_v30  ;;  %v28586_v30 = vld [vmem:[%s29800_s12 + $0x1918] sm:$0xff] }
 0x321   : > { %18039 = vmatpush.bf16.msra.mxu3 %v28580_v31  ;;  %v28594_v31 = vld [vmem:[%s29800_s12 + $0x1958] sm:$0xff] }
 0x322   : > { %18001 = vmatpush.bf16.msra.mxu0 %v28555_v34  ;;  %v17775_v59 = vpop.f32.mrf.mxu2 }
 0x323   : > { %18014 = vmatpush.bf16.msra.mxu1 %v28563_v36  ;;  %v17788_v61 = vpop.f32.mrf.mxu3  ;;  %v28630_v59 = vld [vmem:[%s29800_s12 + $0x1a78] sm:$0xff] }
 0x324   : > { %18027 = vmatpush.bf16.msra.mxu2 %v28571_v37  ;;  %v28638_v61 = vld [vmem:[%s29800_s12 + $0x1ab8] sm:$0xff] }
 0x325   : > { %18040 = vmatpush.bf16.msra.mxu3 %v28579_v39  ;;  %v28585_v39 = vld [vmem:[%s29800_s12 + $0x1910] sm:$0xff] }
 0x326   : > { %18002 = vmatpush.bf16.msra.mxu0 %v28554_v40 }
 0x327   : > { %18015 = vmatpush.bf16.msra.mxu1 %v28562_v41  ;;  %v28593_v41 = vld [vmem:[%s29800_s12 + $0x1950] sm:$0xff] }
 0x328   : > { %18028 = vmatpush.bf16.msra.mxu2 %v28570_v42  ;;  %v28601_v42 = vld [vmem:[%s29800_s12 + $0x1990] sm:$0xff] }
 0x329   : > { %18041 = vmatpush.bf16.msra.mxu3 %v28578_v45  ;;  %v28592_v45 = vld [vmem:[%s29800_s12 + $0x1948] sm:$0xff] }
 0x32a   : > { %18003 = vmatpush.bf16.msra.mxu0 %v28553_v49 }
 0x32b   : > { %18016 = vmatpush.bf16.msra.mxu1 %v28561_v51 }
 0x32c   : > { %18029 = vmatpush.bf16.msra.mxu2 %v28569_v52  ;;  %v28583_v52 = vld [vmem:[%s29800_s12 + $0x1900] sm:$0xff] }
 0x32d   : > { %18042 = vmatpush.bf16.msra.mxu3 %v28577_v53  ;;  %v4508_v53 = vunpack.c.l.b16 %v344_v47 }
 0x32e   : > { %18004 = vmatpush.bf16.msra.mxu0 %v28552_v54 }
 0x32f   : > { %18017 = vmatpush.bf16.msra.mxu1 %v28560_v55  ;;  %v28591_v55 = vld [vmem:[%s29800_s12 + $0x1940] sm:$0xff]  ;;  %v4750_v63 = vpack.c.b16 %v4508_v53, %v4508_v53 }
 0x330   : > { %18030 = vmatpush.bf16.msra.mxu2 %v28568_v56  ;;  %v28599_v56 = vld [vmem:[%s29800_s12 + $0x1980] sm:$0xff] }
 0x331   : > { %18043 = vmatpush.bf16.msra.mxu3 %v28576_v60 }
 0x332   : > { %18005 = vmatpush.bf16.msra.mxu0 %v28551_v62  ;;  %v17799_v22 = vpop.f32.mrf.mxu0  ;;  %v28607_v62 = vld [vmem:[%s29800_s12 + $0x19c0] sm:$0xff] }
 0x333   : > { %18018 = vmatpush.bf16.msra.mxu1 %v28559_v1  ;;  %v17800_v23 = vadd.f32 %v17799_v22, %v30693_v48  ;;  %v17812_v25 = vpop.f32.mrf.mxu1  ;;  %v345_v48 = vld [vmem:[%s29795_s8 + $0x198] sm:$0xff] }
 0x334   : > { %18031 = vmatpush.bf16.msra.mxu2 %v28567_v2  ;;  %v4510_v54 = vunpack.c.l.b16 %v345_v48  ;;  %v4511_v60 = vunpack.c.h.b16 %v345_v48  ;;  %v28646_v1 = vld [vmem:[%s29800_s12 + $0x1af8] sm:$0xff]  ;;  %v4751_v2 = vpack.c.b16 %v4509_v57, %v4509_v57 }
 0x335   : > { %18044 = vmatpush.bf16.msra.mxu3 %v28575_v8  ;;  %18006 = vmatmul.bf16.vlgmr.msra.gmra.mxu0 %v4746_v9  ;;  %v17813_v28 = vadd.f32 %v17812_v25, %v17800_v23  ;;  %v28620_v8 = vld [vmem:[%s29800_s12 + $0x1a28] sm:$0xff]  ;;  %v28634_v22 = vld [vmem:[%s29800_s12 + $0x1a98] sm:$0xff] }
 0x336   : > { %18050 = vmatpush.bf16.msrb.mxu0 %v28590_v4  ;;  %18019 = vmatmul.bf16.vlgmr.msra.gmra.mxu1 %v4747_v12  ;;  %v4752_v0 = vpack.c.b16 %v4510_v54, %v4510_v54  ;;  %v4753_v3 = vpack.c.b16 %v4511_v60, %v4511_v60  ;;  %v28621_v4 = vld [vmem:[%s29800_s12 + $0x1a30] sm:$0xff]  ;;  %v28628_v9 = vld [vmem:[%s29800_s12 + $0x1a68] sm:$0xff]  ;;  %v28642_v25 = vld [vmem:[%s29800_s12 + $0x1ad8] sm:$0xff] }
 0x337   : > { %18063 = vmatpush.bf16.msrb.mxu1 %v28598_v5  ;;  %18032 = vmatmul.bf16.vlgmr.msra.gmra.mxu2 %v4748_v10  ;;  %v28629_v5 = vld [vmem:[%s29800_s12 + $0x1a70] sm:$0xff]  ;;  %v28636_v10 = vld [vmem:[%s29800_s12 + $0x1aa8] sm:$0xff]  ;;  %v28654_v48 = vld [vmem:[%s29800_s12 + $0x1b38] sm:$0xff] }
 0x338   : > { %18076 = vmatpush.bf16.msrb.mxu2 %v28606_v7  ;;  %18045 = vmatmul.bf16.vlgmr.msra.gmra.mxu3 %v4749_v13  ;;  %v28645_v7 = vld [vmem:[%s29800_s12 + $0x1af0] sm:$0xff] }
 0x339   : > { %18089 = vmatpush.bf16.msrb.mxu3 %v28614_v11  ;;  %v28644_v11 = vld [vmem:[%s29800_s12 + $0x1ae8] sm:$0xff]  ;;  %v28669_v60 = vld [vmem:[%s29800_s12 + $0x1bb0] sm:$0xff] }
 0x33a   : > { %18051 = vmatpush.bf16.msrb.mxu0 %v28589_v14  ;;  %v17825_v33 = vpop.f32.mrf.mxu2  ;;  %v17801_v37 = vpop.f32.mrf.mxu0  ;;  %v28619_v14 = vld [vmem:[%s29800_s12 + $0x1a20] sm:$0xff] }
 0x33b   : > { %18064 = vmatpush.bf16.msrb.mxu1 %v28597_v15  ;;  %v17826_v34 = vadd.f32 %v17825_v33, %v17813_v28  ;;  %v17838_v36 = vpop.f32.mrf.mxu3  ;;  %v17814_v40 = vpop.f32.mrf.mxu1  ;;  %v28641_v33 = vld [vmem:[%s29800_s12 + $0x1ad0] sm:$0xff]  ;;  %v346_v37 = vld [vmem:[%s29795_s8 + $0x1a0] sm:$0xff] }
 0x33c   : > { %18077 = vmatpush.bf16.msrb.mxu2 %v28605_v16  ;;  %v28627_v16 = vld [vmem:[%s29800_s12 + $0x1a60] sm:$0xff]  ;;  %v28640_v40 = vld [vmem:[%s29800_s12 + $0x1ac8] sm:$0xff]  ;;  %v4513_v47 = vunpack.c.h.b16 %v346_v37 }
 0x33d   : > { %18090 = vmatpush.bf16.msrb.mxu3 %v28613_v17  ;;  %v30730_v38 = vadd.f32 %v17838_v36, %v17826_v34  ;;  %v28635_v17 = vld [vmem:[%s29800_s12 + $0x1aa0] sm:$0xff]  ;;  %v28616_v34 = vld [vmem:[%s29800_s12 + $0x1a08] sm:$0xff] }
 0x33e   : > { %18052 = vmatpush.bf16.msrb.mxu0 %v28588_v18  ;;  %v28632_v36 = vld [vmem:[%s29800_s12 + $0x1a88] sm:$0xff] }
 0x33f   : > { %18065 = vmatpush.bf16.msrb.mxu1 %v28596_v19  ;;  %v28643_v19 = vld [vmem:[%s29800_s12 + $0x1ae0] sm:$0xff] }
 0x340   : > { %18078 = vmatpush.bf16.msrb.mxu2 %v28604_v20  ;;  %v28618_v20 = vld [vmem:[%s29800_s12 + $0x1a18] sm:$0xff] }
 0x341   : > { %18091 = vmatpush.bf16.msrb.mxu3 %v28612_v21  ;;  %v28626_v21 = vld [vmem:[%s29800_s12 + $0x1a58] sm:$0xff] }
 0x342   : > { %18053 = vmatpush.bf16.msrb.mxu0 %v28587_v24  ;;  %v17827_v49 = vpop.f32.mrf.mxu2 }
 0x343   : > { %18066 = vmatpush.bf16.msrb.mxu1 %v28595_v26  ;;  %v17840_v51 = vpop.f32.mrf.mxu3  ;;  %v28662_v49 = vld [vmem:[%s29800_s12 + $0x1b78] sm:$0xff] }
 0x344   : > { %18079 = vmatpush.bf16.msrb.mxu2 %v28603_v27  ;;  %v28670_v51 = vld [vmem:[%s29800_s12 + $0x1bb8] sm:$0xff] }
 0x345   : > { %18092 = vmatpush.bf16.msrb.mxu3 %v28611_v29  ;;  %v28617_v29 = vld [vmem:[%s29800_s12 + $0x1a10] sm:$0xff] }
 0x346   : > { %18054 = vmatpush.bf16.msrb.mxu0 %v28586_v30 }
 0x347   : > { %18067 = vmatpush.bf16.msrb.mxu1 %v28594_v31  ;;  %v28625_v31 = vld [vmem:[%s29800_s12 + $0x1a50] sm:$0xff] }
 0x348   : > { %18080 = vmatpush.bf16.msrb.mxu2 %v28602_v32  ;;  %v28633_v32 = vld [vmem:[%s29800_s12 + $0x1a90] sm:$0xff] }
 0x349   : > { %18093 = vmatpush.bf16.msrb.mxu3 %v28610_v35  ;;  %v28624_v35 = vld [vmem:[%s29800_s12 + $0x1a48] sm:$0xff] }
 0x34a   : > { %18055 = vmatpush.bf16.msrb.mxu0 %v28585_v39 }
 0x34b   : > { %18068 = vmatpush.bf16.msrb.mxu1 %v28593_v41 }
 0x34c   : > { %18081 = vmatpush.bf16.msrb.mxu2 %v28601_v42  ;;  %v28615_v42 = vld [vmem:[%s29800_s12 + $0x1a00] sm:$0xff] }
 0x34d   : > { %18094 = vmatpush.bf16.msrb.mxu3 %v28609_v43  ;;  %v4512_v43 = vunpack.c.l.b16 %v346_v37 }
 0x34e   : > { %18056 = vmatpush.bf16.msrb.mxu0 %v28584_v44 }
 0x34f   : > { %18069 = vmatpush.bf16.msrb.mxu1 %v28592_v45  ;;  %v28623_v45 = vld [vmem:[%s29800_s12 + $0x1a40] sm:$0xff]  ;;  %v4754_v53 = vpack.c.b16 %v4512_v43, %v4512_v43 }
 0x350   : > { %18082 = vmatpush.bf16.msrb.mxu2 %v28600_v46  ;;  %v28631_v46 = vld [vmem:[%s29800_s12 + $0x1a80] sm:$0xff] }
 0x351   : > { %18095 = vmatpush.bf16.msrb.mxu3 %v28608_v50 }
 0x352   : > { %18057 = vmatpush.bf16.msrb.mxu0 %v28583_v52  ;;  %v17851_v12 = vpop.f32.mrf.mxu0  ;;  %v28639_v52 = vld [vmem:[%s29800_s12 + $0x1ac0] sm:$0xff] }
 0x353   : > { %18070 = vmatpush.bf16.msrb.mxu1 %v28591_v55  ;;  %v17852_v13 = vadd.f32 %v17851_v12, %v30730_v38  ;;  %v17864_v15 = vpop.f32.mrf.mxu1  ;;  %v347_v38 = vld [vmem:[%s29795_s8 + $0x1a8] sm:$0xff]  ;;  %v28678_v55 = vld [vmem:[%s29800_s12 + $0x1bf8] sm:$0xff] }
 0x354   : > { %18083 = vmatpush.bf16.msrb.mxu2 %v28599_v56  ;;  %v4514_v44 = vunpack.c.l.b16 %v347_v38  ;;  %v4515_v50 = vunpack.c.h.b16 %v347_v38  ;;  %v4755_v56 = vpack.c.b16 %v4513_v47, %v4513_v47  ;;  %v28666_v12 = vld [vmem:[%s29800_s12 + $0x1b98] sm:$0xff] }
 0x355   : > { %18096 = vmatpush.bf16.msrb.mxu3 %v28607_v62  ;;  %18058 = vmatmul.bf16.vlgmr.msrb.gmra.mxu0 %v4750_v63  ;;  %v17865_v18 = vadd.f32 %v17864_v15, %v17852_v13  ;;  %v28652_v62 = vld [vmem:[%s29800_s12 + $0x1b28] sm:$0xff]  ;;  %v28674_v15 = vld [vmem:[%s29800_s12 + $0x1bd8] sm:$0xff] }
 0x356   : > { %18102 = vmatpush.bf16.msra.mxu0 %v28622_v58  ;;  %18071 = vmatmul.bf16.vlgmr.msrb.gmra.mxu1 %v4751_v2  ;;  %v4756_v54 = vpack.c.b16 %v4514_v44, %v4514_v44  ;;  %v4757_v57 = vpack.c.b16 %v4515_v50, %v4515_v50  ;;  %v28653_v58 = vld [vmem:[%s29800_s12 + $0x1b30] sm:$0xff]  ;;  %v28660_v63 = vld [vmem:[%s29800_s12 + $0x1b68] sm:$0xff]  ;;  %v28686_v38 = vld [vmem:[%s29800_s12 + $0x1c38] sm:$0xff] }
 0x357   : > { %18115 = vmatpush.bf16.msra.mxu1 %v28630_v59  ;;  %18084 = vmatmul.bf16.vlgmr.msrb.gmra.mxu2 %v4752_v0  ;;  %v28661_v59 = vld [vmem:[%s29800_s12 + $0x1b70] sm:$0xff]  ;;  %v28668_v0 = vld [vmem:[%s29800_s12 + $0x1ba8] sm:$0xff] }
 0x358   : > { %18128 = vmatpush.bf16.msra.mxu2 %v28638_v61  ;;  %18097 = vmatmul.bf16.vlgmr.msrb.gmra.mxu3 %v4753_v3  ;;  %v28677_v61 = vld [vmem:[%s29800_s12 + $0x1bf0] sm:$0xff] }
 0x359   : > { %18141 = vmatpush.bf16.msra.mxu3 %v28646_v1  ;;  %v28676_v1 = vld [vmem:[%s29800_s12 + $0x1be8] sm:$0xff]  ;;  %v28701_v50 = vld [vmem:[%s29800_s12 + $0x1cb0] sm:$0xff] }
 0x35a   : > { %18103 = vmatpush.bf16.msra.mxu0 %v28621_v4  ;;  %v17877_v23 = vpop.f32.mrf.mxu2  ;;  %v17853_v27 = vpop.f32.mrf.mxu0  ;;  %v28651_v4 = vld [vmem:[%s29800_s12 + $0x1b20] sm:$0xff] }
 0x35b   : > { %18116 = vmatpush.bf16.msra.mxu1 %v28629_v5  ;;  %v17878_v24 = vadd.f32 %v17877_v23, %v17865_v18  ;;  %v17890_v26 = vpop.f32.mrf.mxu3  ;;  %v17866_v30 = vpop.f32.mrf.mxu1  ;;  %v28673_v23 = vld [vmem:[%s29800_s12 + $0x1bd0] sm:$0xff] }
 0x35c   : > { %18129 = vmatpush.bf16.msra.mxu2 %v28637_v6  ;;  %v28659_v6 = vld [vmem:[%s29800_s12 + $0x1b60] sm:$0xff]  ;;  %v348_v27 = vld [vmem:[%s29795_s8 + $0x1b0] sm:$0xff]  ;;  %v28672_v30 = vld [vmem:[%s29800_s12 + $0x1bc8] sm:$0xff] }
 0x35d   : > { %18142 = vmatpush.bf16.msra.mxu3 %v28645_v7  ;;  %v30767_v28 = vadd.f32 %v17890_v26, %v17878_v24  ;;  %v28667_v7 = vld [vmem:[%s29800_s12 + $0x1ba0] sm:$0xff]  ;;  %v28648_v24 = vld [vmem:[%s29800_s12 + $0x1b08] sm:$0xff]  ;;  %v4517_v37 = vunpack.c.h.b16 %v348_v27 }
 0x35e   : > { %18104 = vmatpush.bf16.msra.mxu0 %v28620_v8  ;;  %v28664_v26 = vld [vmem:[%s29800_s12 + $0x1b88] sm:$0xff] }
 0x35f   : > { %18117 = vmatpush.bf16.msra.mxu1 %v28628_v9  ;;  %v28675_v9 = vld [vmem:[%s29800_s12 + $0x1be0] sm:$0xff] }
 0x360   : > { %18130 = vmatpush.bf16.msra.mxu2 %v28636_v10  ;;  %v28650_v10 = vld [vmem:[%s29800_s12 + $0x1b18] sm:$0xff] }
 0x361   : > { %18143 = vmatpush.bf16.msra.mxu3 %v28644_v11  ;;  %v28658_v11 = vld [vmem:[%s29800_s12 + $0x1b58] sm:$0xff] }
 0x362   : > { %18105 = vmatpush.bf16.msra.mxu0 %v28619_v14  ;;  %v17879_v39 = vpop.f32.mrf.mxu2 }
 0x363   : > { %18118 = vmatpush.bf16.msra.mxu1 %v28627_v16  ;;  %v17892_v41 = vpop.f32.mrf.mxu3  ;;  %v28694_v39 = vld [vmem:[%s29800_s12 + $0x1c78] sm:$0xff] }
 0x364   : > { %18131 = vmatpush.bf16.msra.mxu2 %v28635_v17  ;;  %v28702_v41 = vld [vmem:[%s29800_s12 + $0x1cb8] sm:$0xff] }
 0x365   : > { %18144 = vmatpush.bf16.msra.mxu3 %v28643_v19  ;;  %v28649_v19 = vld [vmem:[%s29800_s12 + $0x1b10] sm:$0xff] }
 0x366   : > { %18106 = vmatpush.bf16.msra.mxu0 %v28618_v20 }
 0x367   : > { %18119 = vmatpush.bf16.msra.mxu1 %v28626_v21  ;;  %v28657_v21 = vld [vmem:[%s29800_s12 + $0x1b50] sm:$0xff] }
 0x368   : > { %18132 = vmatpush.bf16.msra.mxu2 %v28634_v22  ;;  %v28665_v22 = vld [vmem:[%s29800_s12 + $0x1b90] sm:$0xff] }
 0x369   : > { %18145 = vmatpush.bf16.msra.mxu3 %v28642_v25  ;;  %v28656_v25 = vld [vmem:[%s29800_s12 + $0x1b48] sm:$0xff] }
 0x36a   : > { %18107 = vmatpush.bf16.msra.mxu0 %v28617_v29 }
 0x36b   : > { %18120 = vmatpush.bf16.msra.mxu1 %v28625_v31 }
 0x36c   : > { %18133 = vmatpush.bf16.msra.mxu2 %v28633_v32  ;;  %v28647_v32 = vld [vmem:[%s29800_s12 + $0x1b00] sm:$0xff] }
 0x36d   : > { %18146 = vmatpush.bf16.msra.mxu3 %v28641_v33  ;;  %v4516_v33 = vunpack.c.l.b16 %v348_v27 }
 0x36e   : > { %18108 = vmatpush.bf16.msra.mxu0 %v28616_v34 }
 0x36f   : > { %18121 = vmatpush.bf16.msra.mxu1 %v28624_v35  ;;  %v28655_v35 = vld [vmem:[%s29800_s12 + $0x1b40] sm:$0xff]  ;;  %v4758_v43 = vpack.c.b16 %v4516_v33, %v4516_v33 }
 0x370   : > { %18134 = vmatpush.bf16.msra.mxu2 %v28632_v36  ;;  %v28663_v36 = vld [vmem:[%s29800_s12 + $0x1b80] sm:$0xff] }
 0x371   : > { %18147 = vmatpush.bf16.msra.mxu3 %v28640_v40 }
 0x372   : > { %18109 = vmatpush.bf16.msra.mxu0 %v28615_v42  ;;  %v17903_v2 = vpop.f32.mrf.mxu0  ;;  %v28671_v42 = vld [vmem:[%s29800_s12 + $0x1bc0] sm:$0xff] }
 0x373   : > { %18122 = vmatpush.bf16.msra.mxu1 %v28623_v45  ;;  %v17904_v3 = vadd.f32 %v17903_v2, %v30767_v28  ;;  %v17916_v5 = vpop.f32.mrf.mxu1  ;;  %v349_v28 = vld [vmem:[%s29795_s8 + $0x1b8] sm:$0xff] }
 0x374   : > { %18135 = vmatpush.bf16.msra.mxu2 %v28631_v46  ;;  %v4518_v34 = vunpack.c.l.b16 %v349_v28  ;;  %v4519_v40 = vunpack.c.h.b16 %v349_v28  ;;  %v28710_v45 = vld [vmem:[%s29800_s12 + $0x1cf8] sm:$0xff]  ;;  %v4759_v46 = vpack.c.b16 %v4517_v37, %v4517_v37 }
 0x375   : > { %18148 = vmatpush.bf16.msra.mxu3 %v28639_v52  ;;  %18110 = vmatmul.bf16.vlgmr.msra.gmra.mxu0 %v4754_v53  ;;  %v17917_v8 = vadd.f32 %v17916_v5, %v17904_v3  ;;  %v28684_v52 = vld [vmem:[%s29800_s12 + $0x1c28] sm:$0xff]  ;;  %v28698_v2 = vld [vmem:[%s29800_s12 + $0x1c98] sm:$0xff] }
 0x376   : > { %18154 = vmatpush.bf16.msrb.mxu0 %v28654_v48  ;;  %18123 = vmatmul.bf16.vlgmr.msra.gmra.mxu1 %v4755_v56  ;;  %v4760_v44 = vpack.c.b16 %v4518_v34, %v4518_v34  ;;  %v4761_v47 = vpack.c.b16 %v4519_v40, %v4519_v40  ;;  %v28685_v48 = vld [vmem:[%s29800_s12 + $0x1c30] sm:$0xff]  ;;  %v28692_v53 = vld [vmem:[%s29800_s12 + $0x1c68] sm:$0xff]  ;;  %v28706_v5 = vld [vmem:[%s29800_s12 + $0x1cd8] sm:$0xff] }
 0x377   : > { %18167 = vmatpush.bf16.msrb.mxu1 %v28662_v49  ;;  %18136 = vmatmul.bf16.vlgmr.msra.gmra.mxu2 %v4756_v54  ;;  %v28693_v49 = vld [vmem:[%s29800_s12 + $0x1c70] sm:$0xff]  ;;  %v28700_v54 = vld [vmem:[%s29800_s12 + $0x1ca8] sm:$0xff]  ;;  %v28718_v28 = vld [vmem:[%s29800_s12 + $0x1d38] sm:$0xff] }
 0x378   : > { %18180 = vmatpush.bf16.msrb.mxu2 %v28670_v51  ;;  %18149 = vmatmul.bf16.vlgmr.msra.gmra.mxu3 %v4757_v57  ;;  %v28709_v51 = vld [vmem:[%s29800_s12 + $0x1cf0] sm:$0xff] }
 0x379   : > { %18193 = vmatpush.bf16.msrb.mxu3 %v28678_v55  ;;  %v28708_v55 = vld [vmem:[%s29800_s12 + $0x1ce8] sm:$0xff]  ;;  %v28733_v40 = vld [vmem:[%s29800_s12 + $0x1db0] sm:$0xff] }
 0x37a   : > { %18155 = vmatpush.bf16.msrb.mxu0 %v28653_v58  ;;  %v17929_v13 = vpop.f32.mrf.mxu2  ;;  %v17905_v17 = vpop.f32.mrf.mxu0  ;;  %v28683_v58 = vld [vmem:[%s29800_s12 + $0x1c20] sm:$0xff] }
 0x37b   : > { %18168 = vmatpush.bf16.msrb.mxu1 %v28661_v59  ;;  %v17930_v14 = vadd.f32 %v17929_v13, %v17917_v8  ;;  %v17942_v16 = vpop.f32.mrf.mxu3  ;;  %v17918_v20 = vpop.f32.mrf.mxu1  ;;  %v28705_v13 = vld [vmem:[%s29800_s12 + $0x1cd0] sm:$0xff]  ;;  %v350_v17 = vld [vmem:[%s29795_s8 + $0x1c0] sm:$0xff] }
 0x37c   : > { %18181 = vmatpush.bf16.msrb.mxu2 %v28669_v60  ;;  %v28691_v60 = vld [vmem:[%s29800_s12 + $0x1c60] sm:$0xff]  ;;  %v28704_v20 = vld [vmem:[%s29800_s12 + $0x1cc8] sm:$0xff]  ;;  %v4521_v27 = vunpack.c.h.b16 %v350_v17 }
 0x37d   : > { %18194 = vmatpush.bf16.msrb.mxu3 %v28677_v61  ;;  %v30804_v18 = vadd.f32 %v17942_v16, %v17930_v14  ;;  %v28699_v61 = vld [vmem:[%s29800_s12 + $0x1ca0] sm:$0xff]  ;;  %v28680_v14 = vld [vmem:[%s29800_s12 + $0x1c08] sm:$0xff] }
 0x37e   : > { %18156 = vmatpush.bf16.msrb.mxu0 %v28652_v62  ;;  %v28696_v16 = vld [vmem:[%s29800_s12 + $0x1c88] sm:$0xff] }
 0x37f   : > { %18169 = vmatpush.bf16.msrb.mxu1 %v28660_v63  ;;  %v28707_v63 = vld [vmem:[%s29800_s12 + $0x1ce0] sm:$0xff] }
 0x380   : > { %18182 = vmatpush.bf16.msrb.mxu2 %v28668_v0  ;;  %v28682_v0 = vld [vmem:[%s29800_s12 + $0x1c18] sm:$0xff] }
 0x381   : > { %18195 = vmatpush.bf16.msrb.mxu3 %v28676_v1  ;;  %v28690_v1 = vld [vmem:[%s29800_s12 + $0x1c58] sm:$0xff] }
 0x382   : > { %18157 = vmatpush.bf16.msrb.mxu0 %v28651_v4  ;;  %v17931_v29 = vpop.f32.mrf.mxu2 }
 0x383   : > { %18170 = vmatpush.bf16.msrb.mxu1 %v28659_v6  ;;  %v17944_v31 = vpop.f32.mrf.mxu3  ;;  %v28726_v29 = vld [vmem:[%s29800_s12 + $0x1d78] sm:$0xff] }
 0x384   : > { %18183 = vmatpush.bf16.msrb.mxu2 %v28667_v7  ;;  %v28734_v31 = vld [vmem:[%s29800_s12 + $0x1db8] sm:$0xff] }
 0x385   : > { %18196 = vmatpush.bf16.msrb.mxu3 %v28675_v9  ;;  %v28681_v9 = vld [vmem:[%s29800_s12 + $0x1c10] sm:$0xff] }
 0x386   : > { %18158 = vmatpush.bf16.msrb.mxu0 %v28650_v10 }
 0x387   : > { %18171 = vmatpush.bf16.msrb.mxu1 %v28658_v11  ;;  %v28689_v11 = vld [vmem:[%s29800_s12 + $0x1c50] sm:$0xff] }
 0x388   : > { %18184 = vmatpush.bf16.msrb.mxu2 %v28666_v12  ;;  %v28697_v12 = vld [vmem:[%s29800_s12 + $0x1c90] sm:$0xff] }
 0x389   : > { %18197 = vmatpush.bf16.msrb.mxu3 %v28674_v15  ;;  %v28688_v15 = vld [vmem:[%s29800_s12 + $0x1c48] sm:$0xff] }
 0x38a   : > { %18159 = vmatpush.bf16.msrb.mxu0 %v28649_v19 }
 0x38b   : > { %18172 = vmatpush.bf16.msrb.mxu1 %v28657_v21 }
 0x38c   : > { %18185 = vmatpush.bf16.msrb.mxu2 %v28665_v22  ;;  %v28679_v22 = vld [vmem:[%s29800_s12 + $0x1c00] sm:$0xff] }
 0x38d   : > { %18198 = vmatpush.bf16.msrb.mxu3 %v28673_v23  ;;  %v4520_v23 = vunpack.c.l.b16 %v350_v17 }
 0x38e   : > { %18160 = vmatpush.bf16.msrb.mxu0 %v28648_v24 }
 0x38f   : > { %18173 = vmatpush.bf16.msrb.mxu1 %v28656_v25  ;;  %v28687_v25 = vld [vmem:[%s29800_s12 + $0x1c40] sm:$0xff]  ;;  %v4762_v33 = vpack.c.b16 %v4520_v23, %v4520_v23 }
 0x390   : > { %18186 = vmatpush.bf16.msrb.mxu2 %v28664_v26  ;;  %v28695_v26 = vld [vmem:[%s29800_s12 + $0x1c80] sm:$0xff] }
 0x391   : > { %18199 = vmatpush.bf16.msrb.mxu3 %v28672_v30 }
 0x392   : > { %18161 = vmatpush.bf16.msrb.mxu0 %v28647_v32  ;;  %v17955_v56 = vpop.f32.mrf.mxu0  ;;  %v28703_v32 = vld [vmem:[%s29800_s12 + $0x1cc0] sm:$0xff] }
 0x393   : > { %18174 = vmatpush.bf16.msrb.mxu1 %v28655_v35  ;;  %v17956_v57 = vadd.f32 %v17955_v56, %v30804_v18  ;;  %v17968_v59 = vpop.f32.mrf.mxu1  ;;  %v351_v18 = vld [vmem:[%s29795_s8 + $0x1c8] sm:$0xff]  ;;  %v28742_v35 = vld [vmem:[%s29800_s12 + $0x1df8] sm:$0xff] }
 0x394   : > { %18187 = vmatpush.bf16.msrb.mxu2 %v28663_v36  ;;  %v4522_v24 = vunpack.c.l.b16 %v351_v18  ;;  %v4523_v30 = vunpack.c.h.b16 %v351_v18  ;;  %v4763_v36 = vpack.c.b16 %v4521_v27, %v4521_v27  ;;  %v28730_v56 = vld [vmem:[%s29800_s12 + $0x1d98] sm:$0xff] }
 0x395   : > { %18200 = vmatpush.bf16.msrb.mxu3 %v28671_v42  ;;  %18162 = vmatmul.bf16.vlgmr.msrb.gmra.mxu0 %v4758_v43  ;;  %v17969_v62 = vadd.f32 %v17968_v59, %v17956_v57  ;;  %v28716_v42 = vld [vmem:[%s29800_s12 + $0x1d28] sm:$0xff]  ;;  %v28738_v59 = vld [vmem:[%s29800_s12 + $0x1dd8] sm:$0xff] }
 0x396   : > { %18206 = vmatpush.bf16.msra.mxu0 %v28686_v38  ;;  %18175 = vmatmul.bf16.vlgmr.msrb.gmra.mxu1 %v4759_v46  ;;  %v4764_v34 = vpack.c.b16 %v4522_v24, %v4522_v24  ;;  %v4765_v37 = vpack.c.b16 %v4523_v30, %v4523_v30  ;;  %v28717_v38 = vld [vmem:[%s29800_s12 + $0x1d30] sm:$0xff]  ;;  %v28724_v43 = vld [vmem:[%s29800_s12 + $0x1d68] sm:$0xff]  ;;  %v28750_v18 = vld [vmem:[%s29800_s12 + $0x1e38] sm:$0xff] }
 0x397   : > { %18219 = vmatpush.bf16.msra.mxu1 %v28694_v39  ;;  %18188 = vmatmul.bf16.vlgmr.msrb.gmra.mxu2 %v4760_v44  ;;  %v28725_v39 = vld [vmem:[%s29800_s12 + $0x1d70] sm:$0xff]  ;;  %v28732_v44 = vld [vmem:[%s29800_s12 + $0x1da8] sm:$0xff] }
 0x398   : > { %18232 = vmatpush.bf16.msra.mxu2 %v28702_v41  ;;  %18201 = vmatmul.bf16.vlgmr.msrb.gmra.mxu3 %v4761_v47  ;;  %v28741_v41 = vld [vmem:[%s29800_s12 + $0x1df0] sm:$0xff] }
 0x399   : > { %18245 = vmatpush.bf16.msra.mxu3 %v28710_v45  ;;  %v28740_v45 = vld [vmem:[%s29800_s12 + $0x1de8] sm:$0xff]  ;;  %v28765_v30 = vld [vmem:[%s29800_s12 + $0x1eb0] sm:$0xff] }
 0x39a   : > { %18207 = vmatpush.bf16.msra.mxu0 %v28685_v48  ;;  %v17981_v3 = vpop.f32.mrf.mxu2  ;;  %v17957_v7 = vpop.f32.mrf.mxu0  ;;  %v28715_v48 = vld [vmem:[%s29800_s12 + $0x1d20] sm:$0xff] }
 0x39b   : > { %18220 = vmatpush.bf16.msra.mxu1 %v28693_v49  ;;  %v17982_v4 = vadd.f32 %v17981_v3, %v17969_v62  ;;  %v17994_v6 = vpop.f32.mrf.mxu3  ;;  %v17970_v10 = vpop.f32.mrf.mxu1  ;;  %v28737_v3 = vld [vmem:[%s29800_s12 + $0x1dd0] sm:$0xff] }
 0x39c   : > { %18233 = vmatpush.bf16.msra.mxu2 %v28701_v50  ;;  %v28723_v50 = vld [vmem:[%s29800_s12 + $0x1d60] sm:$0xff]  ;;  %v352_v7 = vld [vmem:[%s29795_s8 + $0x1d0] sm:$0xff]  ;;  %v28736_v10 = vld [vmem:[%s29800_s12 + $0x1dc8] sm:$0xff] }
 0x39d   : > { %18246 = vmatpush.bf16.msra.mxu3 %v28709_v51  ;;  %v30841_v8 = vadd.f32 %v17994_v6, %v17982_v4  ;;  %v28731_v51 = vld [vmem:[%s29800_s12 + $0x1da0] sm:$0xff]  ;;  %v28712_v4 = vld [vmem:[%s29800_s12 + $0x1d08] sm:$0xff]  ;;  %v4525_v17 = vunpack.c.h.b16 %v352_v7 }
 0x39e   : > { %18208 = vmatpush.bf16.msra.mxu0 %v28684_v52  ;;  %v28728_v6 = vld [vmem:[%s29800_s12 + $0x1d88] sm:$0xff] }
 0x39f   : > { %18221 = vmatpush.bf16.msra.mxu1 %v28692_v53  ;;  %v28739_v53 = vld [vmem:[%s29800_s12 + $0x1de0] sm:$0xff] }
 0x3a0   : > { %18234 = vmatpush.bf16.msra.mxu2 %v28700_v54  ;;  %v28714_v54 = vld [vmem:[%s29800_s12 + $0x1d18] sm:$0xff] }
 0x3a1   : > { %18247 = vmatpush.bf16.msra.mxu3 %v28708_v55  ;;  %v28722_v55 = vld [vmem:[%s29800_s12 + $0x1d58] sm:$0xff] }
 0x3a2   : > { %18209 = vmatpush.bf16.msra.mxu0 %v28683_v58  ;;  %v17983_v19 = vpop.f32.mrf.mxu2 }
 0x3a3   : > { %18222 = vmatpush.bf16.msra.mxu1 %v28691_v60  ;;  %v17996_v21 = vpop.f32.mrf.mxu3  ;;  %v28758_v19 = vld [vmem:[%s29800_s12 + $0x1e78] sm:$0xff] }
 0x3a4   : > { %18235 = vmatpush.bf16.msra.mxu2 %v28699_v61  ;;  %v28766_v21 = vld [vmem:[%s29800_s12 + $0x1eb8] sm:$0xff] }
 0x3a5   : > { %18248 = vmatpush.bf16.msra.mxu3 %v28707_v63  ;;  %v28713_v63 = vld [vmem:[%s29800_s12 + $0x1d10] sm:$0xff] }
 0x3a6   : > { %18210 = vmatpush.bf16.msra.mxu0 %v28682_v0 }
 0x3a7   : > { %18223 = vmatpush.bf16.msra.mxu1 %v28690_v1  ;;  %v28721_v1 = vld [vmem:[%s29800_s12 + $0x1d50] sm:$0xff] }
 0x3a8   : > { %18236 = vmatpush.bf16.msra.mxu2 %v28698_v2  ;;  %v28729_v2 = vld [vmem:[%s29800_s12 + $0x1d90] sm:$0xff] }
 0x3a9   : > { %18249 = vmatpush.bf16.msra.mxu3 %v28706_v5  ;;  %v28720_v5 = vld [vmem:[%s29800_s12 + $0x1d48] sm:$0xff] }
 0x3aa   : > { %18211 = vmatpush.bf16.msra.mxu0 %v28681_v9 }
 0x3ab   : > { %18224 = vmatpush.bf16.msra.mxu1 %v28689_v11 }
 0x3ac   : > { %18237 = vmatpush.bf16.msra.mxu2 %v28697_v12  ;;  %v28711_v12 = vld [vmem:[%s29800_s12 + $0x1d00] sm:$0xff] }
 0x3ad   : > { %18250 = vmatpush.bf16.msra.mxu3 %v28705_v13  ;;  %v4524_v13 = vunpack.c.l.b16 %v352_v7 }
 0x3ae   : > { %18212 = vmatpush.bf16.msra.mxu0 %v28680_v14 }
 0x3af   : > { %18225 = vmatpush.bf16.msra.mxu1 %v28688_v15  ;;  %v28719_v15 = vld [vmem:[%s29800_s12 + $0x1d40] sm:$0xff]  ;;  %v4766_v23 = vpack.c.b16 %v4524_v13, %v4524_v13 }
 0x3b0   : > { %18238 = vmatpush.bf16.msra.mxu2 %v28696_v16  ;;  %v28727_v16 = vld [vmem:[%s29800_s12 + $0x1d80] sm:$0xff] }
 0x3b1   : > { %18251 = vmatpush.bf16.msra.mxu3 %v28704_v20 }
 0x3b2   : > { %18213 = vmatpush.bf16.msra.mxu0 %v28679_v22  ;;  %v18007_v46 = vpop.f32.mrf.mxu0  ;;  %v28735_v22 = vld [vmem:[%s29800_s12 + $0x1dc0] sm:$0xff] }
 0x3b3   : > { %18226 = vmatpush.bf16.msra.mxu1 %v28687_v25  ;;  %v18008_v47 = vadd.f32 %v18007_v46, %v30841_v8  ;;  %v18020_v49 = vpop.f32.mrf.mxu1  ;;  %v353_v8 = vld [vmem:[%s29795_s8 + $0x1d8] sm:$0xff] }
 0x3b4   : > { %18239 = vmatpush.bf16.msra.mxu2 %v28695_v26  ;;  %v4526_v14 = vunpack.c.l.b16 %v353_v8  ;;  %v4527_v20 = vunpack.c.h.b16 %v353_v8  ;;  %v28774_v25 = vld [vmem:[%s29800_s12 + $0x1ef8] sm:$0xff]  ;;  %v4767_v26 = vpack.c.b16 %v4525_v17, %v4525_v17 }
 0x3b5   : > { %18252 = vmatpush.bf16.msra.mxu3 %v28703_v32  ;;  %18214 = vmatmul.bf16.vlgmr.msra.gmra.mxu0 %v4762_v33  ;;  %v18021_v52 = vadd.f32 %v18020_v49, %v18008_v47  ;;  %v28748_v32 = vld [vmem:[%s29800_s12 + $0x1e28] sm:$0xff]  ;;  %v28762_v46 = vld [vmem:[%s29800_s12 + $0x1e98] sm:$0xff] }
 0x3b6   : > { %18258 = vmatpush.bf16.msrb.mxu0 %v28718_v28  ;;  %18227 = vmatmul.bf16.vlgmr.msra.gmra.mxu1 %v4763_v36  ;;  %v4768_v24 = vpack.c.b16 %v4526_v14, %v4526_v14  ;;  %v4769_v27 = vpack.c.b16 %v4527_v20, %v4527_v20  ;;  %v28749_v28 = vld [vmem:[%s29800_s12 + $0x1e30] sm:$0xff]  ;;  %v28756_v33 = vld [vmem:[%s29800_s12 + $0x1e68] sm:$0xff]  ;;  %v28770_v49 = vld [vmem:[%s29800_s12 + $0x1ed8] sm:$0xff] }
 0x3b7   : > { %18271 = vmatpush.bf16.msrb.mxu1 %v28726_v29  ;;  %18240 = vmatmul.bf16.vlgmr.msra.gmra.mxu2 %v4764_v34  ;;  %v28757_v29 = vld [vmem:[%s29800_s12 + $0x1e70] sm:$0xff]  ;;  %v28764_v34 = vld [vmem:[%s29800_s12 + $0x1ea8] sm:$0xff]  ;;  %v28782_v8 = vld [vmem:[%s29800_s12 + $0x1f38] sm:$0xff] }
 0x3b8   : > { %18284 = vmatpush.bf16.msrb.mxu2 %v28734_v31  ;;  %18253 = vmatmul.bf16.vlgmr.msra.gmra.mxu3 %v4765_v37  ;;  %v28773_v31 = vld [vmem:[%s29800_s12 + $0x1ef0] sm:$0xff] }
 0x3b9   : > { %18297 = vmatpush.bf16.msrb.mxu3 %v28742_v35  ;;  %v28772_v35 = vld [vmem:[%s29800_s12 + $0x1ee8] sm:$0xff]  ;;  %v28797_v20 = vld [vmem:[%s29800_s12 + $0x1fb0] sm:$0xff] }
 0x3ba   : > { %18259 = vmatpush.bf16.msrb.mxu0 %v28717_v38  ;;  %v18033_v57 = vpop.f32.mrf.mxu2  ;;  %v18009_v61 = vpop.f32.mrf.mxu0  ;;  %v28747_v38 = vld [vmem:[%s29800_s12 + $0x1e20] sm:$0xff] }
 0x3bb   : > { %18272 = vmatpush.bf16.msrb.mxu1 %v28725_v39  ;;  %v18034_v58 = vadd.f32 %v18033_v57, %v18021_v52  ;;  %v18046_v60 = vpop.f32.mrf.mxu3  ;;  %v18022_v0 = vpop.f32.mrf.mxu1  ;;  %v28769_v57 = vld [vmem:[%s29800_s12 + $0x1ed0] sm:$0xff]  ;;  %v354_v61 = vld [vmem:[%s29795_s8 + $0x1e0] sm:$0xff] }
 0x3bc   : > { %18285 = vmatpush.bf16.msrb.mxu2 %v28733_v40  ;;  %v28755_v40 = vld [vmem:[%s29800_s12 + $0x1e60] sm:$0xff]  ;;  %v28768_v0 = vld [vmem:[%s29800_s12 + $0x1ec8] sm:$0xff]  ;;  %v4529_v7 = vunpack.c.h.b16 %v354_v61 }
 0x3bd   : > { %18298 = vmatpush.bf16.msrb.mxu3 %v28741_v41  ;;  %v30878_v62 = vadd.f32 %v18046_v60, %v18034_v58  ;;  %v28763_v41 = vld [vmem:[%s29800_s12 + $0x1ea0] sm:$0xff]  ;;  %v28744_v58 = vld [vmem:[%s29800_s12 + $0x1e08] sm:$0xff] }
 0x3be   : > { %18260 = vmatpush.bf16.msrb.mxu0 %v28716_v42  ;;  %v28760_v60 = vld [vmem:[%s29800_s12 + $0x1e88] sm:$0xff] }
 0x3bf   : > { %18273 = vmatpush.bf16.msrb.mxu1 %v28724_v43  ;;  %v28771_v43 = vld [vmem:[%s29800_s12 + $0x1ee0] sm:$0xff] }
 0x3c0   : > { %18286 = vmatpush.bf16.msrb.mxu2 %v28732_v44  ;;  %v28746_v44 = vld [vmem:[%s29800_s12 + $0x1e18] sm:$0xff] }
 0x3c1   : > { %18299 = vmatpush.bf16.msrb.mxu3 %v28740_v45  ;;  %v28754_v45 = vld [vmem:[%s29800_s12 + $0x1e58] sm:$0xff] }
 0x3c2   : > { %18261 = vmatpush.bf16.msrb.mxu0 %v28715_v48  ;;  %v18035_v9 = vpop.f32.mrf.mxu2 }
 0x3c3   : > { %18274 = vmatpush.bf16.msrb.mxu1 %v28723_v50  ;;  %v18048_v11 = vpop.f32.mrf.mxu3  ;;  %v28790_v9 = vld [vmem:[%s29800_s12 + $0x1f78] sm:$0xff] }
 0x3c4   : > { %18287 = vmatpush.bf16.msrb.mxu2 %v28731_v51  ;;  %v28798_v11 = vld [vmem:[%s29800_s12 + $0x1fb8] sm:$0xff] }
 0x3c5   : > { %18300 = vmatpush.bf16.msrb.mxu3 %v28739_v53  ;;  %v28745_v53 = vld [vmem:[%s29800_s12 + $0x1e10] sm:$0xff] }
 0x3c6   : > { %18262 = vmatpush.bf16.msrb.mxu0 %v28714_v54 }
 0x3c7   : > { %18275 = vmatpush.bf16.msrb.mxu1 %v28722_v55  ;;  %v28753_v55 = vld [vmem:[%s29800_s12 + $0x1e50] sm:$0xff] }
 0x3c8   : > { %18288 = vmatpush.bf16.msrb.mxu2 %v28730_v56  ;;  %v28761_v56 = vld [vmem:[%s29800_s12 + $0x1e90] sm:$0xff] }
 0x3c9   : > { %18301 = vmatpush.bf16.msrb.mxu3 %v28738_v59  ;;  %v28752_v59 = vld [vmem:[%s29800_s12 + $0x1e48] sm:$0xff] }
 0x3ca   : > { %18263 = vmatpush.bf16.msrb.mxu0 %v28713_v63 }
 0x3cb   : > { %18276 = vmatpush.bf16.msrb.mxu1 %v28721_v1 }
 0x3cc   : > { %18289 = vmatpush.bf16.msrb.mxu2 %v28729_v2  ;;  %v28743_v2 = vld [vmem:[%s29800_s12 + $0x1e00] sm:$0xff] }
 0x3cd   : > { %18302 = vmatpush.bf16.msrb.mxu3 %v28737_v3  ;;  %v4528_v3 = vunpack.c.l.b16 %v354_v61 }
 0x3ce   : > { %18264 = vmatpush.bf16.msrb.mxu0 %v28712_v4 }
 0x3cf   : > { %18277 = vmatpush.bf16.msrb.mxu1 %v28720_v5  ;;  %v28751_v5 = vld [vmem:[%s29800_s12 + $0x1e40] sm:$0xff]  ;;  %v4770_v13 = vpack.c.b16 %v4528_v3, %v4528_v3 }
 0x3d0   : > { %18290 = vmatpush.bf16.msrb.mxu2 %v28728_v6  ;;  %v28759_v6 = vld [vmem:[%s29800_s12 + $0x1e80] sm:$0xff] }
 0x3d1   : > { %18303 = vmatpush.bf16.msrb.mxu3 %v28736_v10 }
 0x3d2   : > { %18265 = vmatpush.bf16.msrb.mxu0 %v28711_v12  ;;  %v18059_v36 = vpop.f32.mrf.mxu0  ;;  %v28767_v12 = vld [vmem:[%s29800_s12 + $0x1ec0] sm:$0xff] }
 0x3d3   : > { %18278 = vmatpush.bf16.msrb.mxu1 %v28719_v15  ;;  %v18060_v37 = vadd.f32 %v18059_v36, %v30878_v62  ;;  %v18072_v39 = vpop.f32.mrf.mxu1  ;;  %v355_v62 = vld [vmem:[%s29795_s8 + $0x1e8] sm:$0xff]  ;;  %v28806_v15 = vld [vmem:[%s29800_s12 + $0x1ff8] sm:$0xff] }
 0x3d4   : > { %18291 = vmatpush.bf16.msrb.mxu2 %v28727_v16  ;;  %v4530_v4 = vunpack.c.l.b16 %v355_v62  ;;  %v4531_v10 = vunpack.c.h.b16 %v355_v62  ;;  %v4771_v16 = vpack.c.b16 %v4529_v7, %v4529_v7  ;;  %v28794_v36 = vld [vmem:[%s29800_s12 + $0x1f98] sm:$0xff] }
 0x3d5   : > { %18304 = vmatpush.bf16.msrb.mxu3 %v28735_v22  ;;  %18266 = vmatmul.bf16.vlgmr.msrb.gmra.mxu0 %v4766_v23  ;;  %v18073_v42 = vadd.f32 %v18072_v39, %v18060_v37  ;;  %v28780_v22 = vld [vmem:[%s29800_s12 + $0x1f28] sm:$0xff]  ;;  %v28802_v39 = vld [vmem:[%s29800_s12 + $0x1fd8] sm:$0xff] }
 0x3d6   : > { %18310 = vmatpush.bf16.msra.mxu0 %v28750_v18  ;;  %18279 = vmatmul.bf16.vlgmr.msrb.gmra.mxu1 %v4767_v26  ;;  %v4772_v14 = vpack.c.b16 %v4530_v4, %v4530_v4  ;;  %v4773_v17 = vpack.c.b16 %v4531_v10, %v4531_v10  ;;  %v28781_v18 = vld [vmem:[%s29800_s12 + $0x1f30] sm:$0xff]  ;;  %v28788_v23 = vld [vmem:[%s29800_s12 + $0x1f68] sm:$0xff]  ;;  %v28814_v62 = vld [vmem:[%s29800_s12 + $0x2038] sm:$0xff] }
 0x3d7   : > { %18323 = vmatpush.bf16.msra.mxu1 %v28758_v19  ;;  %18292 = vmatmul.bf16.vlgmr.msrb.gmra.mxu2 %v4768_v24  ;;  %v28789_v19 = vld [vmem:[%s29800_s12 + $0x1f70] sm:$0xff]  ;;  %v28796_v24 = vld [vmem:[%s29800_s12 + $0x1fa8] sm:$0xff] }
 0x3d8   : > { %18336 = vmatpush.bf16.msra.mxu2 %v28766_v21  ;;  %18305 = vmatmul.bf16.vlgmr.msrb.gmra.mxu3 %v4769_v27  ;;  %v28805_v21 = vld [vmem:[%s29800_s12 + $0x1ff0] sm:$0xff] }
 0x3d9   : > { %18349 = vmatpush.bf16.msra.mxu3 %v28774_v25  ;;  %v28804_v25 = vld [vmem:[%s29800_s12 + $0x1fe8] sm:$0xff]  ;;  %v28829_v10 = vld [vmem:[%s29800_s12 + $0x20b0] sm:$0xff] }
 0x3da   : > { %18311 = vmatpush.bf16.msra.mxu0 %v28749_v28  ;;  %v18085_v47 = vpop.f32.mrf.mxu2  ;;  %v18061_v51 = vpop.f32.mrf.mxu0  ;;  %v28779_v28 = vld [vmem:[%s29800_s12 + $0x1f20] sm:$0xff] }
 0x3db   : > { %18324 = vmatpush.bf16.msra.mxu1 %v28757_v29  ;;  %v18086_v48 = vadd.f32 %v18085_v47, %v18073_v42  ;;  %v18098_v50 = vpop.f32.mrf.mxu3  ;;  %v18074_v54 = vpop.f32.mrf.mxu1  ;;  %v28801_v47 = vld [vmem:[%s29800_s12 + $0x1fd0] sm:$0xff] }
 0x3dc   : > { %18337 = vmatpush.bf16.msra.mxu2 %v28765_v30  ;;  %v28787_v30 = vld [vmem:[%s29800_s12 + $0x1f60] sm:$0xff]  ;;  %v356_v51 = vld [vmem:[%s29795_s8 + $0x1f0] sm:$0xff]  ;;  %v28800_v54 = vld [vmem:[%s29800_s12 + $0x1fc8] sm:$0xff] }
 0x3dd   : > { %18350 = vmatpush.bf16.msra.mxu3 %v28773_v31  ;;  %v30915_v52 = vadd.f32 %v18098_v50, %v18086_v48  ;;  %v28795_v31 = vld [vmem:[%s29800_s12 + $0x1fa0] sm:$0xff]  ;;  %v28776_v48 = vld [vmem:[%s29800_s12 + $0x1f08] sm:$0xff]  ;;  %v4533_v61 = vunpack.c.h.b16 %v356_v51 }
 0x3de   : > { %18312 = vmatpush.bf16.msra.mxu0 %v28748_v32  ;;  %v28792_v50 = vld [vmem:[%s29800_s12 + $0x1f88] sm:$0xff] }
 0x3df   : > { %18325 = vmatpush.bf16.msra.mxu1 %v28756_v33  ;;  %v28803_v33 = vld [vmem:[%s29800_s12 + $0x1fe0] sm:$0xff] }
 0x3e0   : > { %18338 = vmatpush.bf16.msra.mxu2 %v28764_v34  ;;  %v28778_v34 = vld [vmem:[%s29800_s12 + $0x1f18] sm:$0xff] }
 0x3e1   : > { %18351 = vmatpush.bf16.msra.mxu3 %v28772_v35  ;;  %v28786_v35 = vld [vmem:[%s29800_s12 + $0x1f58] sm:$0xff] }
 0x3e2   : > { %18313 = vmatpush.bf16.msra.mxu0 %v28747_v38  ;;  %v18087_v63 = vpop.f32.mrf.mxu2 }
 0x3e3   : > { %18326 = vmatpush.bf16.msra.mxu1 %v28755_v40  ;;  %v18100_v1 = vpop.f32.mrf.mxu3  ;;  %v28822_v63 = vld [vmem:[%s29800_s12 + $0x2078] sm:$0xff] }
 0x3e4   : > { %18339 = vmatpush.bf16.msra.mxu2 %v28763_v41  ;;  %v28830_v1 = vld [vmem:[%s29800_s12 + $0x20b8] sm:$0xff] }
 0x3e5   : > { %18352 = vmatpush.bf16.msra.mxu3 %v28771_v43  ;;  %v28777_v43 = vld [vmem:[%s29800_s12 + $0x1f10] sm:$0xff] }
 0x3e6   : > { %18314 = vmatpush.bf16.msra.mxu0 %v28746_v44 }
 0x3e7   : > { %18327 = vmatpush.bf16.msra.mxu1 %v28754_v45  ;;  %v28785_v45 = vld [vmem:[%s29800_s12 + $0x1f50] sm:$0xff] }
 0x3e8   : > { %18340 = vmatpush.bf16.msra.mxu2 %v28762_v46  ;;  %v28793_v46 = vld [vmem:[%s29800_s12 + $0x1f90] sm:$0xff] }
 0x3e9   : > { %18353 = vmatpush.bf16.msra.mxu3 %v28770_v49  ;;  %v28784_v49 = vld [vmem:[%s29800_s12 + $0x1f48] sm:$0xff] }
 0x3ea   : > { %18315 = vmatpush.bf16.msra.mxu0 %v28745_v53 }
 0x3eb   : > { %18328 = vmatpush.bf16.msra.mxu1 %v28753_v55 }
 0x3ec   : > { %18341 = vmatpush.bf16.msra.mxu2 %v28761_v56  ;;  %v28775_v56 = vld [vmem:[%s29800_s12 + $0x1f00] sm:$0xff] }
 0x3ed   : > { %18354 = vmatpush.bf16.msra.mxu3 %v28769_v57  ;;  %v4532_v57 = vunpack.c.l.b16 %v356_v51 }
 0x3ee   : > { %18316 = vmatpush.bf16.msra.mxu0 %v28744_v58 }
 0x3ef   : > { %18329 = vmatpush.bf16.msra.mxu1 %v28752_v59  ;;  %v28783_v59 = vld [vmem:[%s29800_s12 + $0x1f40] sm:$0xff]  ;;  %v4774_v3 = vpack.c.b16 %v4532_v57, %v4532_v57 }
 0x3f0   : > { %18342 = vmatpush.bf16.msra.mxu2 %v28760_v60  ;;  %v28791_v60 = vld [vmem:[%s29800_s12 + $0x1f80] sm:$0xff] }
 0x3f1   : > { %18355 = vmatpush.bf16.msra.mxu3 %v28768_v0 }
 0x3f2   : > { %18317 = vmatpush.bf16.msra.mxu0 %v28743_v2  ;;  %v18111_v26 = vpop.f32.mrf.mxu0  ;;  %v28799_v2 = vld [vmem:[%s29800_s12 + $0x1fc0] sm:$0xff] }
 0x3f3   : > { %18330 = vmatpush.bf16.msra.mxu1 %v28751_v5  ;;  %v18112_v27 = vadd.f32 %v18111_v26, %v30915_v52  ;;  %v18124_v29 = vpop.f32.mrf.mxu1  ;;  %v357_v52 = vld [vmem:[%s29795_s8 + $0x1f8] sm:$0xff] }
 0x3f4   : > { %18343 = vmatpush.bf16.msra.mxu2 %v28759_v6  ;;  %v4534_v58 = vunpack.c.l.b16 %v357_v52  ;;  %v4535_v0 = vunpack.c.h.b16 %v357_v52  ;;  %v28838_v5 = vld [vmem:[%s29800_s12 + $0x20f8] sm:$0xff]  ;;  %v4775_v6 = vpack.c.b16 %v4533_v61, %v4533_v61 }
 0x3f5   : > { %18356 = vmatpush.bf16.msra.mxu3 %v28767_v12  ;;  %18318 = vmatmul.bf16.vlgmr.msra.gmra.mxu0 %v4770_v13  ;;  %v18125_v32 = vadd.f32 %v18124_v29, %v18112_v27  ;;  %v28812_v12 = vld [vmem:[%s29800_s12 + $0x2028] sm:$0xff]  ;;  %v28826_v26 = vld [vmem:[%s29800_s12 + $0x2098] sm:$0xff] }
 0x3f6   : > { %18362 = vmatpush.bf16.msrb.mxu0 %v28782_v8  ;;  %18331 = vmatmul.bf16.vlgmr.msra.gmra.mxu1 %v4771_v16  ;;  %v4776_v4 = vpack.c.b16 %v4534_v58, %v4534_v58  ;;  %v4777_v7 = vpack.c.b16 %v4535_v0, %v4535_v0  ;;  %v28813_v8 = vld [vmem:[%s29800_s12 + $0x2030] sm:$0xff]  ;;  %v28820_v13 = vld [vmem:[%s29800_s12 + $0x2068] sm:$0xff]  ;;  %v28834_v29 = vld [vmem:[%s29800_s12 + $0x20d8] sm:$0xff] }
 0x3f7   : > { %18375 = vmatpush.bf16.msrb.mxu1 %v28790_v9  ;;  %18344 = vmatmul.bf16.vlgmr.msra.gmra.mxu2 %v4772_v14  ;;  %v28821_v9 = vld [vmem:[%s29800_s12 + $0x2070] sm:$0xff]  ;;  %v28828_v14 = vld [vmem:[%s29800_s12 + $0x20a8] sm:$0xff]  ;;  %v28846_v52 = vld [vmem:[%s29800_s12 + $0x2138] sm:$0xff] }
 0x3f8   : > { %18388 = vmatpush.bf16.msrb.mxu2 %v28798_v11  ;;  %18357 = vmatmul.bf16.vlgmr.msra.gmra.mxu3 %v4773_v17  ;;  %v28837_v11 = vld [vmem:[%s29800_s12 + $0x20f0] sm:$0xff] }
 0x3f9   : > { %18401 = vmatpush.bf16.msrb.mxu3 %v28806_v15  ;;  %v28836_v15 = vld [vmem:[%s29800_s12 + $0x20e8] sm:$0xff]  ;;  %v28861_v0 = vld [vmem:[%s29800_s12 + $0x21b0] sm:$0xff] }
 0x3fa   : > { %18363 = vmatpush.bf16.msrb.mxu0 %v28781_v18  ;;  %v18137_v37 = vpop.f32.mrf.mxu2  ;;  %v18113_v41 = vpop.f32.mrf.mxu0  ;;  %v28811_v18 = vld [vmem:[%s29800_s12 + $0x2020] sm:$0xff] }
 0x3fb   : > { %18376 = vmatpush.bf16.msrb.mxu1 %v28789_v19  ;;  %v18138_v38 = vadd.f32 %v18137_v37, %v18125_v32  ;;  %v18150_v40 = vpop.f32.mrf.mxu3  ;;  %v18126_v44 = vpop.f32.mrf.mxu1  ;;  %v28833_v37 = vld [vmem:[%s29800_s12 + $0x20d0] sm:$0xff]  ;;  %v358_v41 = vld [vmem:[%s29795_s8 + $0x200] sm:$0xff] }
 0x3fc   : > { %18389 = vmatpush.bf16.msrb.mxu2 %v28797_v20  ;;  %v28819_v20 = vld [vmem:[%s29800_s12 + $0x2060] sm:$0xff]  ;;  %v28832_v44 = vld [vmem:[%s29800_s12 + $0x20c8] sm:$0xff]  ;;  %v4537_v51 = vunpack.c.h.b16 %v358_v41 }
 0x3fd   : > { %18402 = vmatpush.bf16.msrb.mxu3 %v28805_v21  ;;  %v30952_v42 = vadd.f32 %v18150_v40, %v18138_v38  ;;  %v28827_v21 = vld [vmem:[%s29800_s12 + $0x20a0] sm:$0xff]  ;;  %v28808_v38 = vld [vmem:[%s29800_s12 + $0x2008] sm:$0xff] }
 0x3fe   : > { %18364 = vmatpush.bf16.msrb.mxu0 %v28780_v22  ;;  %v28824_v40 = vld [vmem:[%s29800_s12 + $0x2088] sm:$0xff] }
 0x3ff   : > { %18377 = vmatpush.bf16.msrb.mxu1 %v28788_v23  ;;  %v28835_v23 = vld [vmem:[%s29800_s12 + $0x20e0] sm:$0xff] }
 0x400   : > { %18390 = vmatpush.bf16.msrb.mxu2 %v28796_v24  ;;  %v28810_v24 = vld [vmem:[%s29800_s12 + $0x2018] sm:$0xff] }
 0x401   : > { %18403 = vmatpush.bf16.msrb.mxu3 %v28804_v25  ;;  %v28818_v25 = vld [vmem:[%s29800_s12 + $0x2058] sm:$0xff] }
 0x402   : > { %18365 = vmatpush.bf16.msrb.mxu0 %v28779_v28  ;;  %v18139_v53 = vpop.f32.mrf.mxu2 }
 0x403   : > { %18378 = vmatpush.bf16.msrb.mxu1 %v28787_v30  ;;  %v18152_v55 = vpop.f32.mrf.mxu3  ;;  %v28854_v53 = vld [vmem:[%s29800_s12 + $0x2178] sm:$0xff] }
 0x404   : > { %18391 = vmatpush.bf16.msrb.mxu2 %v28795_v31  ;;  %v28862_v55 = vld [vmem:[%s29800_s12 + $0x21b8] sm:$0xff] }
 0x405   : > { %18404 = vmatpush.bf16.msrb.mxu3 %v28803_v33  ;;  %v28809_v33 = vld [vmem:[%s29800_s12 + $0x2010] sm:$0xff] }
 0x406   : > { %18366 = vmatpush.bf16.msrb.mxu0 %v28778_v34 }
 0x407   : > { %18379 = vmatpush.bf16.msrb.mxu1 %v28786_v35  ;;  %v28817_v35 = vld [vmem:[%s29800_s12 + $0x2050] sm:$0xff] }
 0x408   : > { %18392 = vmatpush.bf16.msrb.mxu2 %v28794_v36  ;;  %v28825_v36 = vld [vmem:[%s29800_s12 + $0x2090] sm:$0xff] }
 0x409   : > { %18405 = vmatpush.bf16.msrb.mxu3 %v28802_v39  ;;  %v28816_v39 = vld [vmem:[%s29800_s12 + $0x2048] sm:$0xff] }
 0x40a   : > { %18367 = vmatpush.bf16.msrb.mxu0 %v28777_v43 }
 0x40b   : > { %18380 = vmatpush.bf16.msrb.mxu1 %v28785_v45 }
 0x40c   : > { %18393 = vmatpush.bf16.msrb.mxu2 %v28793_v46  ;;  %v28807_v46 = vld [vmem:[%s29800_s12 + $0x2000] sm:$0xff] }
 0x40d   : > { %18406 = vmatpush.bf16.msrb.mxu3 %v28801_v47  ;;  %v4536_v47 = vunpack.c.l.b16 %v358_v41 }
 0x40e   : > { %18368 = vmatpush.bf16.msrb.mxu0 %v28776_v48 }
 0x40f   : > { %18381 = vmatpush.bf16.msrb.mxu1 %v28784_v49  ;;  %v28815_v49 = vld [vmem:[%s29800_s12 + $0x2040] sm:$0xff]  ;;  %v4778_v57 = vpack.c.b16 %v4536_v47, %v4536_v47 }
 0x410   : > { %18394 = vmatpush.bf16.msrb.mxu2 %v28792_v50  ;;  %v28823_v50 = vld [vmem:[%s29800_s12 + $0x2080] sm:$0xff] }
 0x411   : > { %18407 = vmatpush.bf16.msrb.mxu3 %v28800_v54 }
 0x412   : > { %18369 = vmatpush.bf16.msrb.mxu0 %v28775_v56  ;;  %v18163_v16 = vpop.f32.mrf.mxu0  ;;  %v28831_v56 = vld [vmem:[%s29800_s12 + $0x20c0] sm:$0xff] }
 0x413   : > { %18382 = vmatpush.bf16.msrb.mxu1 %v28783_v59  ;;  %v18164_v17 = vadd.f32 %v18163_v16, %v30952_v42  ;;  %v18176_v19 = vpop.f32.mrf.mxu1  ;;  %v359_v42 = vld [vmem:[%s29795_s8 + $0x208] sm:$0xff]  ;;  %v28870_v59 = vld [vmem:[%s29800_s12 + $0x21f8] sm:$0xff] }
 0x414   : > { %18395 = vmatpush.bf16.msrb.mxu2 %v28791_v60  ;;  %v4538_v48 = vunpack.c.l.b16 %v359_v42  ;;  %v4539_v54 = vunpack.c.h.b16 %v359_v42  ;;  %v4779_v60 = vpack.c.b16 %v4537_v51, %v4537_v51  ;;  %v28858_v16 = vld [vmem:[%s29800_s12 + $0x2198] sm:$0xff] }
 0x415   : > { %18408 = vmatpush.bf16.msrb.mxu3 %v28799_v2  ;;  %18370 = vmatmul.bf16.vlgmr.msrb.gmra.mxu0 %v4774_v3  ;;  %v18177_v22 = vadd.f32 %v18176_v19, %v18164_v17  ;;  %v28844_v2 = vld [vmem:[%s29800_s12 + $0x2128] sm:$0xff]  ;;  %v28866_v19 = vld [vmem:[%s29800_s12 + $0x21d8] sm:$0xff] }
 0x416   : > { %18414 = vmatpush.bf16.msra.mxu0 %v28814_v62  ;;  %18383 = vmatmul.bf16.vlgmr.msrb.gmra.mxu1 %v4775_v6  ;;  %v4780_v58 = vpack.c.b16 %v4538_v48, %v4538_v48  ;;  %v4781_v61 = vpack.c.b16 %v4539_v54, %v4539_v54  ;;  %v28845_v62 = vld [vmem:[%s29800_s12 + $0x2130] sm:$0xff]  ;;  %v28852_v3 = vld [vmem:[%s29800_s12 + $0x2168] sm:$0xff]  ;;  %v28878_v42 = vld [vmem:[%s29800_s12 + $0x2238] sm:$0xff] }
 0x417   : > { %18427 = vmatpush.bf16.msra.mxu1 %v28822_v63  ;;  %18396 = vmatmul.bf16.vlgmr.msrb.gmra.mxu2 %v4776_v4  ;;  %v28853_v63 = vld [vmem:[%s29800_s12 + $0x2170] sm:$0xff]  ;;  %v28860_v4 = vld [vmem:[%s29800_s12 + $0x21a8] sm:$0xff] }
 0x418   : > { %18440 = vmatpush.bf16.msra.mxu2 %v28830_v1  ;;  %18409 = vmatmul.bf16.vlgmr.msrb.gmra.mxu3 %v4777_v7  ;;  %v28869_v1 = vld [vmem:[%s29800_s12 + $0x21f0] sm:$0xff] }
 0x419   : > { %18453 = vmatpush.bf16.msra.mxu3 %v28838_v5  ;;  %v28868_v5 = vld [vmem:[%s29800_s12 + $0x21e8] sm:$0xff]  ;;  %v28893_v54 = vld [vmem:[%s29800_s12 + $0x22b0] sm:$0xff] }
 0x41a   : > { %18415 = vmatpush.bf16.msra.mxu0 %v28813_v8  ;;  %v18189_v27 = vpop.f32.mrf.mxu2  ;;  %v18165_v31 = vpop.f32.mrf.mxu0  ;;  %v28843_v8 = vld [vmem:[%s29800_s12 + $0x2120] sm:$0xff] }
 0x41b   : > { %18428 = vmatpush.bf16.msra.mxu1 %v28821_v9  ;;  %v18190_v28 = vadd.f32 %v18189_v27, %v18177_v22  ;;  %v18202_v30 = vpop.f32.mrf.mxu3  ;;  %v18178_v34 = vpop.f32.mrf.mxu1  ;;  %v28865_v27 = vld [vmem:[%s29800_s12 + $0x21d0] sm:$0xff] }
 0x41c   : > { %18441 = vmatpush.bf16.msra.mxu2 %v28829_v10  ;;  %v28851_v10 = vld [vmem:[%s29800_s12 + $0x2160] sm:$0xff]  ;;  %v360_v31 = vld [vmem:[%s29795_s8 + $0x210] sm:$0xff]  ;;  %v28864_v34 = vld [vmem:[%s29800_s12 + $0x21c8] sm:$0xff] }
 0x41d   : > { %18454 = vmatpush.bf16.msra.mxu3 %v28837_v11  ;;  %v30989_v32 = vadd.f32 %v18202_v30, %v18190_v28  ;;  %v28859_v11 = vld [vmem:[%s29800_s12 + $0x21a0] sm:$0xff]  ;;  %v28840_v28 = vld [vmem:[%s29800_s12 + $0x2108] sm:$0xff]  ;;  %v4541_v41 = vunpack.c.h.b16 %v360_v31 }
 0x41e   : > { %18416 = vmatpush.bf16.msra.mxu0 %v28812_v12  ;;  %v28856_v30 = vld [vmem:[%s29800_s12 + $0x2188] sm:$0xff] }
 0x41f   : > { %18429 = vmatpush.bf16.msra.mxu1 %v28820_v13  ;;  %v28867_v13 = vld [vmem:[%s29800_s12 + $0x21e0] sm:$0xff] }
 0x420   : > { %18442 = vmatpush.bf16.msra.mxu2 %v28828_v14  ;;  %v28842_v14 = vld [vmem:[%s29800_s12 + $0x2118] sm:$0xff] }
 0x421   : > { %18455 = vmatpush.bf16.msra.mxu3 %v28836_v15  ;;  %v28850_v15 = vld [vmem:[%s29800_s12 + $0x2158] sm:$0xff] }
 0x422   : > { %18417 = vmatpush.bf16.msra.mxu0 %v28811_v18  ;;  %v18191_v43 = vpop.f32.mrf.mxu2 }
 0x423   : > { %18430 = vmatpush.bf16.msra.mxu1 %v28819_v20  ;;  %v18204_v45 = vpop.f32.mrf.mxu3  ;;  %v28886_v43 = vld [vmem:[%s29800_s12 + $0x2278] sm:$0xff] }
 0x424   : > { %18443 = vmatpush.bf16.msra.mxu2 %v28827_v21  ;;  %v28894_v45 = vld [vmem:[%s29800_s12 + $0x22b8] sm:$0xff] }
 0x425   : > { %18456 = vmatpush.bf16.msra.mxu3 %v28835_v23  ;;  %v28841_v23 = vld [vmem:[%s29800_s12 + $0x2110] sm:$0xff] }
 0x426   : > { %18418 = vmatpush.bf16.msra.mxu0 %v28810_v24 }
 0x427   : > { %18431 = vmatpush.bf16.msra.mxu1 %v28818_v25  ;;  %v28849_v25 = vld [vmem:[%s29800_s12 + $0x2150] sm:$0xff] }
 0x428   : > { %18444 = vmatpush.bf16.msra.mxu2 %v28826_v26  ;;  %v28857_v26 = vld [vmem:[%s29800_s12 + $0x2190] sm:$0xff] }
 0x429   : > { %18457 = vmatpush.bf16.msra.mxu3 %v28834_v29  ;;  %v28848_v29 = vld [vmem:[%s29800_s12 + $0x2148] sm:$0xff] }
 0x42a   : > { %18419 = vmatpush.bf16.msra.mxu0 %v28809_v33 }
 0x42b   : > { %18432 = vmatpush.bf16.msra.mxu1 %v28817_v35 }
 0x42c   : > { %18445 = vmatpush.bf16.msra.mxu2 %v28825_v36  ;;  %v28839_v36 = vld [vmem:[%s29800_s12 + $0x2100] sm:$0xff] }
 0x42d   : > { %18458 = vmatpush.bf16.msra.mxu3 %v28833_v37  ;;  %v4540_v37 = vunpack.c.l.b16 %v360_v31 }
 0x42e   : > { %18420 = vmatpush.bf16.msra.mxu0 %v28808_v38 }
 0x42f   : > { %18433 = vmatpush.bf16.msra.mxu1 %v28816_v39  ;;  %v28847_v39 = vld [vmem:[%s29800_s12 + $0x2140] sm:$0xff]  ;;  %v4782_v47 = vpack.c.b16 %v4540_v37, %v4540_v37 }
 0x430   : > { %18446 = vmatpush.bf16.msra.mxu2 %v28824_v40  ;;  %v28855_v40 = vld [vmem:[%s29800_s12 + $0x2180] sm:$0xff] }
 0x431   : > { %18459 = vmatpush.bf16.msra.mxu3 %v28832_v44 }
 0x432   : > { %18421 = vmatpush.bf16.msra.mxu0 %v28807_v46  ;;  %v18215_v6 = vpop.f32.mrf.mxu0  ;;  %v28863_v46 = vld [vmem:[%s29800_s12 + $0x21c0] sm:$0xff] }
 0x433   : > { %18434 = vmatpush.bf16.msra.mxu1 %v28815_v49  ;;  %v18216_v7 = vadd.f32 %v18215_v6, %v30989_v32  ;;  %v18228_v9 = vpop.f32.mrf.mxu1  ;;  %v361_v32 = vld [vmem:[%s29795_s8 + $0x218] sm:$0xff] }
 0x434   : > { %18447 = vmatpush.bf16.msra.mxu2 %v28823_v50  ;;  %v4542_v38 = vunpack.c.l.b16 %v361_v32  ;;  %v4543_v44 = vunpack.c.h.b16 %v361_v32  ;;  %v28902_v49 = vld [vmem:[%s29800_s12 + $0x22f8] sm:$0xff]  ;;  %v4783_v50 = vpack.c.b16 %v4541_v41, %v4541_v41 }
 0x435   : > { %18460 = vmatpush.bf16.msra.mxu3 %v28831_v56  ;;  %18422 = vmatmul.bf16.vlgmr.msra.gmra.mxu0 %v4778_v57  ;;  %v18229_v12 = vadd.f32 %v18228_v9, %v18216_v7  ;;  %v28876_v56 = vld [vmem:[%s29800_s12 + $0x2228] sm:$0xff]  ;;  %v28890_v6 = vld [vmem:[%s29800_s12 + $0x2298] sm:$0xff] }
 0x436   : > { %18466 = vmatpush.bf16.msrb.mxu0 %v28846_v52  ;;  %18435 = vmatmul.bf16.vlgmr.msra.gmra.mxu1 %v4779_v60  ;;  %v4784_v48 = vpack.c.b16 %v4542_v38, %v4542_v38  ;;  %v4785_v51 = vpack.c.b16 %v4543_v44, %v4543_v44  ;;  %v28877_v52 = vld [vmem:[%s29800_s12 + $0x2230] sm:$0xff]  ;;  %v28884_v57 = vld [vmem:[%s29800_s12 + $0x2268] sm:$0xff]  ;;  %v28898_v9 = vld [vmem:[%s29800_s12 + $0x22d8] sm:$0xff] }
 0x437   : > { %18479 = vmatpush.bf16.msrb.mxu1 %v28854_v53  ;;  %18448 = vmatmul.bf16.vlgmr.msra.gmra.mxu2 %v4780_v58  ;;  %v28885_v53 = vld [vmem:[%s29800_s12 + $0x2270] sm:$0xff]  ;;  %v28892_v58 = vld [vmem:[%s29800_s12 + $0x22a8] sm:$0xff]  ;;  %v28910_v32 = vld [vmem:[%s29800_s12 + $0x2338] sm:$0xff] }
 0x438   : > { %18492 = vmatpush.bf16.msrb.mxu2 %v28862_v55  ;;  %18461 = vmatmul.bf16.vlgmr.msra.gmra.mxu3 %v4781_v61  ;;  %v28901_v55 = vld [vmem:[%s29800_s12 + $0x22f0] sm:$0xff] }
 0x439   : > { %18505 = vmatpush.bf16.msrb.mxu3 %v28870_v59  ;;  %v28900_v59 = vld [vmem:[%s29800_s12 + $0x22e8] sm:$0xff]  ;;  %v28925_v44 = vld [vmem:[%s29800_s12 + $0x23b0] sm:$0xff] }
 0x43a   : > { %18467 = vmatpush.bf16.msrb.mxu0 %v28845_v62  ;;  %v18241_v17 = vpop.f32.mrf.mxu2  ;;  %v18217_v21 = vpop.f32.mrf.mxu0  ;;  %v28875_v62 = vld [vmem:[%s29800_s12 + $0x2220] sm:$0xff] }
 0x43b   : > { %18480 = vmatpush.bf16.msrb.mxu1 %v28853_v63  ;;  %v18242_v18 = vadd.f32 %v18241_v17, %v18229_v12  ;;  %v18254_v20 = vpop.f32.mrf.mxu3  ;;  %v18230_v24 = vpop.f32.mrf.mxu1  ;;  %v28897_v17 = vld [vmem:[%s29800_s12 + $0x22d0] sm:$0xff]  ;;  %v362_v21 = vld [vmem:[%s29795_s8 + $0x220] sm:$0xff] }
 0x43c   : > { %18493 = vmatpush.bf16.msrb.mxu2 %v28861_v0  ;;  %v28883_v0 = vld [vmem:[%s29800_s12 + $0x2260] sm:$0xff]  ;;  %v28896_v24 = vld [vmem:[%s29800_s12 + $0x22c8] sm:$0xff]  ;;  %v4545_v31 = vunpack.c.h.b16 %v362_v21 }
 0x43d   : > { %18506 = vmatpush.bf16.msrb.mxu3 %v28869_v1  ;;  %v31026_v22 = vadd.f32 %v18254_v20, %v18242_v18  ;;  %v28891_v1 = vld [vmem:[%s29800_s12 + $0x22a0] sm:$0xff]  ;;  %v28872_v18 = vld [vmem:[%s29800_s12 + $0x2208] sm:$0xff] }
 0x43e   : > { %18468 = vmatpush.bf16.msrb.mxu0 %v28844_v2  ;;  %v28888_v20 = vld [vmem:[%s29800_s12 + $0x2288] sm:$0xff] }
 0x43f   : > { %18481 = vmatpush.bf16.msrb.mxu1 %v28852_v3  ;;  %v28899_v3 = vld [vmem:[%s29800_s12 + $0x22e0] sm:$0xff] }
 0x440   : > { %18494 = vmatpush.bf16.msrb.mxu2 %v28860_v4  ;;  %v28874_v4 = vld [vmem:[%s29800_s12 + $0x2218] sm:$0xff] }
 0x441   : > { %18507 = vmatpush.bf16.msrb.mxu3 %v28868_v5  ;;  %v28882_v5 = vld [vmem:[%s29800_s12 + $0x2258] sm:$0xff] }
 0x442   : > { %18469 = vmatpush.bf16.msrb.mxu0 %v28843_v8  ;;  %v18243_v33 = vpop.f32.mrf.mxu2 }
 0x443   : > { %18482 = vmatpush.bf16.msrb.mxu1 %v28851_v10  ;;  %v18256_v35 = vpop.f32.mrf.mxu3  ;;  %v28918_v33 = vld [vmem:[%s29800_s12 + $0x2378] sm:$0xff] }
 0x444   : > { %18495 = vmatpush.bf16.msrb.mxu2 %v28859_v11  ;;  %v28926_v35 = vld [vmem:[%s29800_s12 + $0x23b8] sm:$0xff] }
 0x445   : > { %18508 = vmatpush.bf16.msrb.mxu3 %v28867_v13  ;;  %v28873_v13 = vld [vmem:[%s29800_s12 + $0x2210] sm:$0xff] }
 0x446   : > { %18470 = vmatpush.bf16.msrb.mxu0 %v28842_v14 }
 0x447   : > { %18483 = vmatpush.bf16.msrb.mxu1 %v28850_v15  ;;  %v28881_v15 = vld [vmem:[%s29800_s12 + $0x2250] sm:$0xff] }
 0x448   : > { %18496 = vmatpush.bf16.msrb.mxu2 %v28858_v16  ;;  %v28889_v16 = vld [vmem:[%s29800_s12 + $0x2290] sm:$0xff] }
 0x449   : > { %18509 = vmatpush.bf16.msrb.mxu3 %v28866_v19  ;;  %v28880_v19 = vld [vmem:[%s29800_s12 + $0x2248] sm:$0xff] }
 0x44a   : > { %18471 = vmatpush.bf16.msrb.mxu0 %v28841_v23 }
 0x44b   : > { %18484 = vmatpush.bf16.msrb.mxu1 %v28849_v25 }
 0x44c   : > { %18497 = vmatpush.bf16.msrb.mxu2 %v28857_v26  ;;  %v28871_v26 = vld [vmem:[%s29800_s12 + $0x2200] sm:$0xff] }
 0x44d   : > { %18510 = vmatpush.bf16.msrb.mxu3 %v28865_v27  ;;  %v4544_v27 = vunpack.c.l.b16 %v362_v21 }
 0x44e   : > { %18472 = vmatpush.bf16.msrb.mxu0 %v28840_v28 }
 0x44f   : > { %18485 = vmatpush.bf16.msrb.mxu1 %v28848_v29  ;;  %v28879_v29 = vld [vmem:[%s29800_s12 + $0x2240] sm:$0xff]  ;;  %v4786_v37 = vpack.c.b16 %v4544_v27, %v4544_v27 }
 0x450   : > { %18498 = vmatpush.bf16.msrb.mxu2 %v28856_v30  ;;  %v28887_v30 = vld [vmem:[%s29800_s12 + $0x2280] sm:$0xff] }
 0x451   : > { %18511 = vmatpush.bf16.msrb.mxu3 %v28864_v34 }
 0x452   : > { %18473 = vmatpush.bf16.msrb.mxu0 %v28839_v36  ;;  %v18267_v60 = vpop.f32.mrf.mxu0  ;;  %v28895_v36 = vld [vmem:[%s29800_s12 + $0x22c0] sm:$0xff] }
 0x453   : > { %18486 = vmatpush.bf16.msrb.mxu1 %v28847_v39  ;;  %v18268_v61 = vadd.f32 %v18267_v60, %v31026_v22  ;;  %v18280_v63 = vpop.f32.mrf.mxu1  ;;  %v363_v22 = vld [vmem:[%s29795_s8 + $0x228] sm:$0xff]  ;;  %v28934_v39 = vld [vmem:[%s29800_s12 + $0x23f8] sm:$0xff] }
 0x454   : > { %18499 = vmatpush.bf16.msrb.mxu2 %v28855_v40  ;;  %v4546_v28 = vunpack.c.l.b16 %v363_v22  ;;  %v4547_v34 = vunpack.c.h.b16 %v363_v22  ;;  %v4787_v40 = vpack.c.b16 %v4545_v31, %v4545_v31  ;;  %v28922_v60 = vld [vmem:[%s29800_s12 + $0x2398] sm:$0xff] }
 0x455   : > { %18512 = vmatpush.bf16.msrb.mxu3 %v28863_v46  ;;  %18474 = vmatmul.bf16.vlgmr.msrb.gmra.mxu0 %v4782_v47  ;;  %v18281_v2 = vadd.f32 %v18280_v63, %v18268_v61  ;;  %v28908_v46 = vld [vmem:[%s29800_s12 + $0x2328] sm:$0xff]  ;;  %v28930_v63 = vld [vmem:[%s29800_s12 + $0x23d8] sm:$0xff] }
 0x456   : > { %18518 = vmatpush.bf16.msra.mxu0 %v28878_v42  ;;  %18487 = vmatmul.bf16.vlgmr.msrb.gmra.mxu1 %v4783_v50  ;;  %v4788_v38 = vpack.c.b16 %v4546_v28, %v4546_v28  ;;  %v4789_v41 = vpack.c.b16 %v4547_v34, %v4547_v34  ;;  %v28909_v42 = vld [vmem:[%s29800_s12 + $0x2330] sm:$0xff]  ;;  %v28916_v47 = vld [vmem:[%s29800_s12 + $0x2368] sm:$0xff]  ;;  %v28942_v22 = vld [vmem:[%s29800_s12 + $0x2438] sm:$0xff] }
 0x457   : > { %18531 = vmatpush.bf16.msra.mxu1 %v28886_v43  ;;  %18500 = vmatmul.bf16.vlgmr.msrb.gmra.mxu2 %v4784_v48  ;;  %v28917_v43 = vld [vmem:[%s29800_s12 + $0x2370] sm:$0xff]  ;;  %v28924_v48 = vld [vmem:[%s29800_s12 + $0x23a8] sm:$0xff] }
 0x458   : > { %18544 = vmatpush.bf16.msra.mxu2 %v28894_v45  ;;  %18513 = vmatmul.bf16.vlgmr.msrb.gmra.mxu3 %v4785_v51  ;;  %v28933_v45 = vld [vmem:[%s29800_s12 + $0x23f0] sm:$0xff] }
 0x459   : > { %18557 = vmatpush.bf16.msra.mxu3 %v28902_v49  ;;  %v28932_v49 = vld [vmem:[%s29800_s12 + $0x23e8] sm:$0xff]  ;;  %v28957_v34 = vld [vmem:[%s29800_s12 + $0x24b0] sm:$0xff] }
 0x45a   : > { %18519 = vmatpush.bf16.msra.mxu0 %v28877_v52  ;;  %v18293_v7 = vpop.f32.mrf.mxu2  ;;  %v18269_v11 = vpop.f32.mrf.mxu0  ;;  %v28907_v52 = vld [vmem:[%s29800_s12 + $0x2320] sm:$0xff] }
 0x45b   : > { %18532 = vmatpush.bf16.msra.mxu1 %v28885_v53  ;;  %v18294_v8 = vadd.f32 %v18293_v7, %v18281_v2  ;;  %v18306_v10 = vpop.f32.mrf.mxu3  ;;  %v18282_v14 = vpop.f32.mrf.mxu1  ;;  %v28929_v7 = vld [vmem:[%s29800_s12 + $0x23d0] sm:$0xff] }
 0x45c   : > { %18545 = vmatpush.bf16.msra.mxu2 %v28893_v54  ;;  %v28915_v54 = vld [vmem:[%s29800_s12 + $0x2360] sm:$0xff]  ;;  %v364_v11 = vld [vmem:[%s29795_s8 + $0x230] sm:$0xff]  ;;  %v28928_v14 = vld [vmem:[%s29800_s12 + $0x23c8] sm:$0xff] }
 0x45d   : > { %18558 = vmatpush.bf16.msra.mxu3 %v28901_v55  ;;  %v31063_v12 = vadd.f32 %v18306_v10, %v18294_v8  ;;  %v28923_v55 = vld [vmem:[%s29800_s12 + $0x23a0] sm:$0xff]  ;;  %v28904_v8 = vld [vmem:[%s29800_s12 + $0x2308] sm:$0xff]  ;;  %v4549_v21 = vunpack.c.h.b16 %v364_v11 }
 0x45e   : > { %18520 = vmatpush.bf16.msra.mxu0 %v28876_v56  ;;  %v28920_v10 = vld [vmem:[%s29800_s12 + $0x2388] sm:$0xff] }
 0x45f   : > { %18533 = vmatpush.bf16.msra.mxu1 %v28884_v57  ;;  %v28931_v57 = vld [vmem:[%s29800_s12 + $0x23e0] sm:$0xff] }
 0x460   : > { %18546 = vmatpush.bf16.msra.mxu2 %v28892_v58  ;;  %v28906_v58 = vld [vmem:[%s29800_s12 + $0x2318] sm:$0xff] }
 0x461   : > { %18559 = vmatpush.bf16.msra.mxu3 %v28900_v59  ;;  %v28914_v59 = vld [vmem:[%s29800_s12 + $0x2358] sm:$0xff] }
 0x462   : > { %18521 = vmatpush.bf16.msra.mxu0 %v28875_v62  ;;  %v18295_v23 = vpop.f32.mrf.mxu2 }
 0x463   : > { %18534 = vmatpush.bf16.msra.mxu1 %v28883_v0  ;;  %v18308_v25 = vpop.f32.mrf.mxu3  ;;  %v28950_v23 = vld [vmem:[%s29800_s12 + $0x2478] sm:$0xff] }
 0x464   : > { %18547 = vmatpush.bf16.msra.mxu2 %v28891_v1  ;;  %v28958_v25 = vld [vmem:[%s29800_s12 + $0x24b8] sm:$0xff] }
 0x465   : > { %18560 = vmatpush.bf16.msra.mxu3 %v28899_v3  ;;  %v28905_v3 = vld [vmem:[%s29800_s12 + $0x2310] sm:$0xff] }
 0x466   : > { %18522 = vmatpush.bf16.msra.mxu0 %v28874_v4 }
 0x467   : > { %18535 = vmatpush.bf16.msra.mxu1 %v28882_v5  ;;  %v28913_v5 = vld [vmem:[%s29800_s12 + $0x2350] sm:$0xff] }
 0x468   : > { %18548 = vmatpush.bf16.msra.mxu2 %v28890_v6  ;;  %v28921_v6 = vld [vmem:[%s29800_s12 + $0x2390] sm:$0xff] }
 0x469   : > { %18561 = vmatpush.bf16.msra.mxu3 %v28898_v9  ;;  %v28912_v9 = vld [vmem:[%s29800_s12 + $0x2348] sm:$0xff] }
 0x46a   : > { %18523 = vmatpush.bf16.msra.mxu0 %v28873_v13 }
 0x46b   : > { %18536 = vmatpush.bf16.msra.mxu1 %v28881_v15 }
 0x46c   : > { %18549 = vmatpush.bf16.msra.mxu2 %v28889_v16  ;;  %v28903_v16 = vld [vmem:[%s29800_s12 + $0x2300] sm:$0xff] }
 0x46d   : > { %18562 = vmatpush.bf16.msra.mxu3 %v28897_v17  ;;  %v4548_v17 = vunpack.c.l.b16 %v364_v11 }
 0x46e   : > { %18524 = vmatpush.bf16.msra.mxu0 %v28872_v18 }
 0x46f   : > { %18537 = vmatpush.bf16.msra.mxu1 %v28880_v19  ;;  %v28911_v19 = vld [vmem:[%s29800_s12 + $0x2340] sm:$0xff]  ;;  %v4790_v27 = vpack.c.b16 %v4548_v17, %v4548_v17 }
 0x470   : > { %18550 = vmatpush.bf16.msra.mxu2 %v28888_v20  ;;  %v28919_v20 = vld [vmem:[%s29800_s12 + $0x2380] sm:$0xff] }
 0x471   : > { %18563 = vmatpush.bf16.msra.mxu3 %v28896_v24 }
 0x472   : > { %18525 = vmatpush.bf16.msra.mxu0 %v28871_v26  ;;  %v18319_v50 = vpop.f32.mrf.mxu0  ;;  %v28927_v26 = vld [vmem:[%s29800_s12 + $0x23c0] sm:$0xff] }
 0x473   : > { %18538 = vmatpush.bf16.msra.mxu1 %v28879_v29  ;;  %v18320_v51 = vadd.f32 %v18319_v50, %v31063_v12  ;;  %v18332_v53 = vpop.f32.mrf.mxu1  ;;  %v365_v12 = vld [vmem:[%s29795_s8 + $0x238] sm:$0xff] }
 0x474   : > { %18551 = vmatpush.bf16.msra.mxu2 %v28887_v30  ;;  %v4550_v18 = vunpack.c.l.b16 %v365_v12  ;;  %v4551_v24 = vunpack.c.h.b16 %v365_v12  ;;  %v28966_v29 = vld [vmem:[%s29800_s12 + $0x24f8] sm:$0xff]  ;;  %v4791_v30 = vpack.c.b16 %v4549_v21, %v4549_v21 }
 0x475   : > { %18564 = vmatpush.bf16.msra.mxu3 %v28895_v36  ;;  %18526 = vmatmul.bf16.vlgmr.msra.gmra.mxu0 %v4786_v37  ;;  %v18333_v56 = vadd.f32 %v18332_v53, %v18320_v51  ;;  %v28940_v36 = vld [vmem:[%s29800_s12 + $0x2428] sm:$0xff]  ;;  %v28954_v50 = vld [vmem:[%s29800_s12 + $0x2498] sm:$0xff] }
 0x476   : > { %18570 = vmatpush.bf16.msrb.mxu0 %v28910_v32  ;;  %18539 = vmatmul.bf16.vlgmr.msra.gmra.mxu1 %v4787_v40  ;;  %v4792_v28 = vpack.c.b16 %v4550_v18, %v4550_v18  ;;  %v4793_v31 = vpack.c.b16 %v4551_v24, %v4551_v24  ;;  %v28941_v32 = vld [vmem:[%s29800_s12 + $0x2430] sm:$0xff]  ;;  %v28948_v37 = vld [vmem:[%s29800_s12 + $0x2468] sm:$0xff]  ;;  %v28962_v53 = vld [vmem:[%s29800_s12 + $0x24d8] sm:$0xff] }
 0x477   : > { %18583 = vmatpush.bf16.msrb.mxu1 %v28918_v33  ;;  %18552 = vmatmul.bf16.vlgmr.msra.gmra.mxu2 %v4788_v38  ;;  %v28949_v33 = vld [vmem:[%s29800_s12 + $0x2470] sm:$0xff]  ;;  %v28956_v38 = vld [vmem:[%s29800_s12 + $0x24a8] sm:$0xff]  ;;  %v28974_v12 = vld [vmem:[%s29800_s12 + $0x2538] sm:$0xff] }
 0x478   : > { %18596 = vmatpush.bf16.msrb.mxu2 %v28926_v35  ;;  %18565 = vmatmul.bf16.vlgmr.msra.gmra.mxu3 %v4789_v41  ;;  %v28965_v35 = vld [vmem:[%s29800_s12 + $0x24f0] sm:$0xff] }
 0x479   : > { %18609 = vmatpush.bf16.msrb.mxu3 %v28934_v39  ;;  %v28964_v39 = vld [vmem:[%s29800_s12 + $0x24e8] sm:$0xff]  ;;  %v28989_v24 = vld [vmem:[%s29800_s12 + $0x25b0] sm:$0xff] }
 0x47a   : > { %18571 = vmatpush.bf16.msrb.mxu0 %v28909_v42  ;;  %v18345_v61 = vpop.f32.mrf.mxu2  ;;  %v18321_v1 = vpop.f32.mrf.mxu0  ;;  %v28939_v42 = vld [vmem:[%s29800_s12 + $0x2420] sm:$0xff] }
 0x47b   : > { %18584 = vmatpush.bf16.msrb.mxu1 %v28917_v43  ;;  %v18346_v62 = vadd.f32 %v18345_v61, %v18333_v56  ;;  %v18358_v0 = vpop.f32.mrf.mxu3  ;;  %v18334_v4 = vpop.f32.mrf.mxu1  ;;  %v28961_v61 = vld [vmem:[%s29800_s12 + $0x24d0] sm:$0xff]  ;;  %v366_v1 = vld [vmem:[%s29795_s8 + $0x240] sm:$0xff] }
 0x47c   : > { %18597 = vmatpush.bf16.msrb.mxu2 %v28925_v44  ;;  %v28947_v44 = vld [vmem:[%s29800_s12 + $0x2460] sm:$0xff]  ;;  %v28960_v4 = vld [vmem:[%s29800_s12 + $0x24c8] sm:$0xff]  ;;  %v4553_v11 = vunpack.c.h.b16 %v366_v1 }
 0x47d   : > { %18610 = vmatpush.bf16.msrb.mxu3 %v28933_v45  ;;  %v31100_v2 = vadd.f32 %v18358_v0, %v18346_v62  ;;  %v28955_v45 = vld [vmem:[%s29800_s12 + $0x24a0] sm:$0xff]  ;;  %v28936_v62 = vld [vmem:[%s29800_s12 + $0x2408] sm:$0xff] }
 0x47e   : > { %18572 = vmatpush.bf16.msrb.mxu0 %v28908_v46  ;;  %v28952_v0 = vld [vmem:[%s29800_s12 + $0x2488] sm:$0xff] }
 0x47f   : > { %18585 = vmatpush.bf16.msrb.mxu1 %v28916_v47  ;;  %v28963_v47 = vld [vmem:[%s29800_s12 + $0x24e0] sm:$0xff] }
 0x480   : > { %18598 = vmatpush.bf16.msrb.mxu2 %v28924_v48  ;;  %v28938_v48 = vld [vmem:[%s29800_s12 + $0x2418] sm:$0xff] }
 0x481   : > { %18611 = vmatpush.bf16.msrb.mxu3 %v28932_v49  ;;  %v28946_v49 = vld [vmem:[%s29800_s12 + $0x2458] sm:$0xff] }
 0x482   : > { %18573 = vmatpush.bf16.msrb.mxu0 %v28907_v52  ;;  %v18347_v13 = vpop.f32.mrf.mxu2 }
 0x483   : > { %18586 = vmatpush.bf16.msrb.mxu1 %v28915_v54  ;;  %v18360_v15 = vpop.f32.mrf.mxu3  ;;  %v28982_v13 = vld [vmem:[%s29800_s12 + $0x2578] sm:$0xff] }
 0x484   : > { %18599 = vmatpush.bf16.msrb.mxu2 %v28923_v55  ;;  %v28990_v15 = vld [vmem:[%s29800_s12 + $0x25b8] sm:$0xff] }
 0x485   : > { %18612 = vmatpush.bf16.msrb.mxu3 %v28931_v57  ;;  %v28937_v57 = vld [vmem:[%s29800_s12 + $0x2410] sm:$0xff] }
 0x486   : > { %18574 = vmatpush.bf16.msrb.mxu0 %v28906_v58 }
 0x487   : > { %18587 = vmatpush.bf16.msrb.mxu1 %v28914_v59  ;;  %v28945_v59 = vld [vmem:[%s29800_s12 + $0x2450] sm:$0xff] }
 0x488   : > { %18600 = vmatpush.bf16.msrb.mxu2 %v28922_v60  ;;  %v28953_v60 = vld [vmem:[%s29800_s12 + $0x2490] sm:$0xff] }
 0x489   : > { %18613 = vmatpush.bf16.msrb.mxu3 %v28930_v63  ;;  %v28944_v63 = vld [vmem:[%s29800_s12 + $0x2448] sm:$0xff] }
 0x48a   : > { %18575 = vmatpush.bf16.msrb.mxu0 %v28905_v3 }
 0x48b   : > { %18588 = vmatpush.bf16.msrb.mxu1 %v28913_v5 }
 0x48c   : > { %18601 = vmatpush.bf16.msrb.mxu2 %v28921_v6  ;;  %v28935_v6 = vld [vmem:[%s29800_s12 + $0x2400] sm:$0xff] }
 0x48d   : > { %18614 = vmatpush.bf16.msrb.mxu3 %v28929_v7  ;;  %v4552_v7 = vunpack.c.l.b16 %v366_v1 }
 0x48e   : > { %18576 = vmatpush.bf16.msrb.mxu0 %v28904_v8 }
 0x48f   : > { %18589 = vmatpush.bf16.msrb.mxu1 %v28912_v9  ;;  %v28943_v9 = vld [vmem:[%s29800_s12 + $0x2440] sm:$0xff]  ;;  %v4794_v17 = vpack.c.b16 %v4552_v7, %v4552_v7 }
 0x490   : > { %18602 = vmatpush.bf16.msrb.mxu2 %v28920_v10  ;;  %v28951_v10 = vld [vmem:[%s29800_s12 + $0x2480] sm:$0xff] }
 0x491   : > { %18615 = vmatpush.bf16.msrb.mxu3 %v28928_v14 }
 0x492   : > { %18577 = vmatpush.bf16.msrb.mxu0 %v28903_v16  ;;  %v18371_v40 = vpop.f32.mrf.mxu0  ;;  %v28959_v16 = vld [vmem:[%s29800_s12 + $0x24c0] sm:$0xff] }
 0x493   : > { %18590 = vmatpush.bf16.msrb.mxu1 %v28911_v19  ;;  %v18372_v41 = vadd.f32 %v18371_v40, %v31100_v2  ;;  %v18384_v43 = vpop.f32.mrf.mxu1  ;;  %v367_v2 = vld [vmem:[%s29795_s8 + $0x248] sm:$0xff]  ;;  %v28998_v19 = vld [vmem:[%s29800_s12 + $0x25f8] sm:$0xff] }
 0x494   : > { %18603 = vmatpush.bf16.msrb.mxu2 %v28919_v20  ;;  %v4554_v8 = vunpack.c.l.b16 %v367_v2  ;;  %v4555_v14 = vunpack.c.h.b16 %v367_v2  ;;  %v4795_v20 = vpack.c.b16 %v4553_v11, %v4553_v11  ;;  %v28986_v40 = vld [vmem:[%s29800_s12 + $0x2598] sm:$0xff] }
 0x495   : > { %18616 = vmatpush.bf16.msrb.mxu3 %v28927_v26  ;;  %18578 = vmatmul.bf16.vlgmr.msrb.gmra.mxu0 %v4790_v27  ;;  %v18385_v46 = vadd.f32 %v18384_v43, %v18372_v41  ;;  %v28972_v26 = vld [vmem:[%s29800_s12 + $0x2528] sm:$0xff]  ;;  %v28994_v43 = vld [vmem:[%s29800_s12 + $0x25d8] sm:$0xff] }
 0x496   : > { %18622 = vmatpush.bf16.msra.mxu0 %v28942_v22  ;;  %18591 = vmatmul.bf16.vlgmr.msrb.gmra.mxu1 %v4791_v30  ;;  %v4796_v18 = vpack.c.b16 %v4554_v8, %v4554_v8  ;;  %v4797_v21 = vpack.c.b16 %v4555_v14, %v4555_v14  ;;  %v28973_v22 = vld [vmem:[%s29800_s12 + $0x2530] sm:$0xff]  ;;  %v28980_v27 = vld [vmem:[%s29800_s12 + $0x2568] sm:$0xff]  ;;  %v29006_v2 = vld [vmem:[%s29800_s12 + $0x2638] sm:$0xff] }
 0x497   : > { %18635 = vmatpush.bf16.msra.mxu1 %v28950_v23  ;;  %18604 = vmatmul.bf16.vlgmr.msrb.gmra.mxu2 %v4792_v28  ;;  %v28981_v23 = vld [vmem:[%s29800_s12 + $0x2570] sm:$0xff]  ;;  %v28988_v28 = vld [vmem:[%s29800_s12 + $0x25a8] sm:$0xff] }
 0x498   : > { %18648 = vmatpush.bf16.msra.mxu2 %v28958_v25  ;;  %18617 = vmatmul.bf16.vlgmr.msrb.gmra.mxu3 %v4793_v31  ;;  %v28997_v25 = vld [vmem:[%s29800_s12 + $0x25f0] sm:$0xff] }
 0x499   : > { %18661 = vmatpush.bf16.msra.mxu3 %v28966_v29  ;;  %v28996_v29 = vld [vmem:[%s29800_s12 + $0x25e8] sm:$0xff]  ;;  %v29021_v14 = vld [vmem:[%s29800_s12 + $0x26b0] sm:$0xff] }
 0x49a   : > { %18623 = vmatpush.bf16.msra.mxu0 %v28941_v32  ;;  %v18397_v51 = vpop.f32.mrf.mxu2  ;;  %v18373_v55 = vpop.f32.mrf.mxu0  ;;  %v28971_v32 = vld [vmem:[%s29800_s12 + $0x2520] sm:$0xff] }
 0x49b   : > { %18636 = vmatpush.bf16.msra.mxu1 %v28949_v33  ;;  %v18398_v52 = vadd.f32 %v18397_v51, %v18385_v46  ;;  %v18410_v54 = vpop.f32.mrf.mxu3  ;;  %v18386_v58 = vpop.f32.mrf.mxu1  ;;  %v28993_v51 = vld [vmem:[%s29800_s12 + $0x25d0] sm:$0xff] }
 0x49c   : > { %18649 = vmatpush.bf16.msra.mxu2 %v28957_v34  ;;  %v28979_v34 = vld [vmem:[%s29800_s12 + $0x2560] sm:$0xff]  ;;  %v368_v55 = vld [vmem:[%s29795_s8 + $0x250] sm:$0xff]  ;;  %v28992_v58 = vld [vmem:[%s29800_s12 + $0x25c8] sm:$0xff] }
 0x49d   : > { %18662 = vmatpush.bf16.msra.mxu3 %v28965_v35  ;;  %v31137_v56 = vadd.f32 %v18410_v54, %v18398_v52  ;;  %v28987_v35 = vld [vmem:[%s29800_s12 + $0x25a0] sm:$0xff]  ;;  %v28968_v52 = vld [vmem:[%s29800_s12 + $0x2508] sm:$0xff]  ;;  %v4557_v1 = vunpack.c.h.b16 %v368_v55 }
 0x49e   : > { %18624 = vmatpush.bf16.msra.mxu0 %v28940_v36  ;;  %v28984_v54 = vld [vmem:[%s29800_s12 + $0x2588] sm:$0xff] }
 0x49f   : > { %18637 = vmatpush.bf16.msra.mxu1 %v28948_v37  ;;  %v28995_v37 = vld [vmem:[%s29800_s12 + $0x25e0] sm:$0xff] }
 0x4a0   : > { %18650 = vmatpush.bf16.msra.mxu2 %v28956_v38  ;;  %v28970_v38 = vld [vmem:[%s29800_s12 + $0x2518] sm:$0xff] }
 0x4a1   : > { %18663 = vmatpush.bf16.msra.mxu3 %v28964_v39  ;;  %v28978_v39 = vld [vmem:[%s29800_s12 + $0x2558] sm:$0xff] }
 0x4a2   : > { %18625 = vmatpush.bf16.msra.mxu0 %v28939_v42  ;;  %v18399_v3 = vpop.f32.mrf.mxu2 }
 0x4a3   : > { %18638 = vmatpush.bf16.msra.mxu1 %v28947_v44  ;;  %v18412_v5 = vpop.f32.mrf.mxu3  ;;  %v29014_v3 = vld [vmem:[%s29800_s12 + $0x2678] sm:$0xff] }
 0x4a4   : > { %18651 = vmatpush.bf16.msra.mxu2 %v28955_v45  ;;  %v29022_v5 = vld [vmem:[%s29800_s12 + $0x26b8] sm:$0xff] }
 0x4a5   : > { %18664 = vmatpush.bf16.msra.mxu3 %v28963_v47  ;;  %v28969_v47 = vld [vmem:[%s29800_s12 + $0x2510] sm:$0xff] }
 0x4a6   : > { %18626 = vmatpush.bf16.msra.mxu0 %v28938_v48 }
 0x4a7   : > { %18639 = vmatpush.bf16.msra.mxu1 %v28946_v49  ;;  %v28977_v49 = vld [vmem:[%s29800_s12 + $0x2550] sm:$0xff] }
 0x4a8   : > { %18652 = vmatpush.bf16.msra.mxu2 %v28954_v50  ;;  %v28985_v50 = vld [vmem:[%s29800_s12 + $0x2590] sm:$0xff] }
 0x4a9   : > { %18665 = vmatpush.bf16.msra.mxu3 %v28962_v53  ;;  %v28976_v53 = vld [vmem:[%s29800_s12 + $0x2548] sm:$0xff] }
 0x4aa   : > { %18627 = vmatpush.bf16.msra.mxu0 %v28937_v57 }
 0x4ab   : > { %18640 = vmatpush.bf16.msra.mxu1 %v28945_v59 }
 0x4ac   : > { %18653 = vmatpush.bf16.msra.mxu2 %v28953_v60  ;;  %v28967_v60 = vld [vmem:[%s29800_s12 + $0x2500] sm:$0xff] }
 0x4ad   : > { %18666 = vmatpush.bf16.msra.mxu3 %v28961_v61  ;;  %v4556_v61 = vunpack.c.l.b16 %v368_v55 }
 0x4ae   : > { %18628 = vmatpush.bf16.msra.mxu0 %v28936_v62 }
 0x4af   : > { %18641 = vmatpush.bf16.msra.mxu1 %v28944_v63  ;;  %v28975_v63 = vld [vmem:[%s29800_s12 + $0x2540] sm:$0xff]  ;;  %v4798_v7 = vpack.c.b16 %v4556_v61, %v4556_v61 }
 0x4b0   : > { %18654 = vmatpush.bf16.msra.mxu2 %v28952_v0  ;;  %v28983_v0 = vld [vmem:[%s29800_s12 + $0x2580] sm:$0xff] }
 0x4b1   : > { %18667 = vmatpush.bf16.msra.mxu3 %v28960_v4 }
 0x4b2   : > { %18629 = vmatpush.bf16.msra.mxu0 %v28935_v6  ;;  %v18423_v30 = vpop.f32.mrf.mxu0  ;;  %v28991_v6 = vld [vmem:[%s29800_s12 + $0x25c0] sm:$0xff] }
 0x4b3   : > { %18642 = vmatpush.bf16.msra.mxu1 %v28943_v9  ;;  %v18424_v31 = vadd.f32 %v18423_v30, %v31137_v56  ;;  %v18436_v33 = vpop.f32.mrf.mxu1  ;;  %v369_v56 = vld [vmem:[%s29795_s8 + $0x258] sm:$0xff] }
 0x4b4   : > { %18655 = vmatpush.bf16.msra.mxu2 %v28951_v10  ;;  %v4558_v62 = vunpack.c.l.b16 %v369_v56  ;;  %v4559_v4 = vunpack.c.h.b16 %v369_v56  ;;  %v29030_v9 = vld [vmem:[%s29800_s12 + $0x26f8] sm:$0xff]  ;;  %v4799_v10 = vpack.c.b16 %v4557_v1, %v4557_v1 }
 0x4b5   : > { %18668 = vmatpush.bf16.msra.mxu3 %v28959_v16  ;;  %18630 = vmatmul.bf16.vlgmr.msra.gmra.mxu0 %v4794_v17  ;;  %v18437_v36 = vadd.f32 %v18436_v33, %v18424_v31  ;;  %v29004_v16 = vld [vmem:[%s29800_s12 + $0x2628] sm:$0xff]  ;;  %v29018_v30 = vld [vmem:[%s29800_s12 + $0x2698] sm:$0xff] }
 0x4b6   : > { %18674 = vmatpush.bf16.msrb.mxu0 %v28974_v12  ;;  %18643 = vmatmul.bf16.vlgmr.msra.gmra.mxu1 %v4795_v20  ;;  %v4800_v8 = vpack.c.b16 %v4558_v62, %v4558_v62  ;;  %v4801_v11 = vpack.c.b16 %v4559_v4, %v4559_v4  ;;  %v29005_v12 = vld [vmem:[%s29800_s12 + $0x2630] sm:$0xff]  ;;  %v29012_v17 = vld [vmem:[%s29800_s12 + $0x2668] sm:$0xff]  ;;  %v29026_v33 = vld [vmem:[%s29800_s12 + $0x26d8] sm:$0xff] }
 0x4b7   : > { %18687 = vmatpush.bf16.msrb.mxu1 %v28982_v13  ;;  %18656 = vmatmul.bf16.vlgmr.msra.gmra.mxu2 %v4796_v18  ;;  %v29013_v13 = vld [vmem:[%s29800_s12 + $0x2670] sm:$0xff]  ;;  %v29020_v18 = vld [vmem:[%s29800_s12 + $0x26a8] sm:$0xff]  ;;  %v29038_v56 = vld [vmem:[%s29800_s12 + $0x2738] sm:$0xff] }
 0x4b8   : > { %18700 = vmatpush.bf16.msrb.mxu2 %v28990_v15  ;;  %18669 = vmatmul.bf16.vlgmr.msra.gmra.mxu3 %v4797_v21  ;;  %v29029_v15 = vld [vmem:[%s29800_s12 + $0x26f0] sm:$0xff] }
 0x4b9   : > { %18713 = vmatpush.bf16.msrb.mxu3 %v28998_v19  ;;  %v29028_v19 = vld [vmem:[%s29800_s12 + $0x26e8] sm:$0xff]  ;;  %v29053_v4 = vld [vmem:[%s29800_s12 + $0x27b0] sm:$0xff] }
 0x4ba   : > { %18675 = vmatpush.bf16.msrb.mxu0 %v28973_v22  ;;  %v18449_v41 = vpop.f32.mrf.mxu2  ;;  %v18425_v45 = vpop.f32.mrf.mxu0  ;;  %v29003_v22 = vld [vmem:[%s29800_s12 + $0x2620] sm:$0xff] }
 0x4bb   : > { %18688 = vmatpush.bf16.msrb.mxu1 %v28981_v23  ;;  %v18450_v42 = vadd.f32 %v18449_v41, %v18437_v36  ;;  %v18462_v44 = vpop.f32.mrf.mxu3  ;;  %v18438_v48 = vpop.f32.mrf.mxu1  ;;  %v29025_v41 = vld [vmem:[%s29800_s12 + $0x26d0] sm:$0xff]  ;;  %v370_v45 = vld [vmem:[%s29795_s8 + $0x260] sm:$0xff] }
 0x4bc   : > { %18701 = vmatpush.bf16.msrb.mxu2 %v28989_v24  ;;  %v29011_v24 = vld [vmem:[%s29800_s12 + $0x2660] sm:$0xff]  ;;  %v29024_v48 = vld [vmem:[%s29800_s12 + $0x26c8] sm:$0xff]  ;;  %v4561_v55 = vunpack.c.h.b16 %v370_v45 }
 0x4bd   : > { %18714 = vmatpush.bf16.msrb.mxu3 %v28997_v25  ;;  %v31174_v46 = vadd.f32 %v18462_v44, %v18450_v42  ;;  %v29019_v25 = vld [vmem:[%s29800_s12 + $0x26a0] sm:$0xff]  ;;  %v29000_v42 = vld [vmem:[%s29800_s12 + $0x2608] sm:$0xff] }
 0x4be   : > { %18676 = vmatpush.bf16.msrb.mxu0 %v28972_v26  ;;  %v29016_v44 = vld [vmem:[%s29800_s12 + $0x2688] sm:$0xff] }
 0x4bf   : > { %18689 = vmatpush.bf16.msrb.mxu1 %v28980_v27  ;;  %v29027_v27 = vld [vmem:[%s29800_s12 + $0x26e0] sm:$0xff] }
 0x4c0   : > { %18702 = vmatpush.bf16.msrb.mxu2 %v28988_v28  ;;  %v29002_v28 = vld [vmem:[%s29800_s12 + $0x2618] sm:$0xff] }
 0x4c1   : > { %18715 = vmatpush.bf16.msrb.mxu3 %v28996_v29  ;;  %v29010_v29 = vld [vmem:[%s29800_s12 + $0x2658] sm:$0xff] }
 0x4c2   : > { %18677 = vmatpush.bf16.msrb.mxu0 %v28971_v32  ;;  %v18451_v57 = vpop.f32.mrf.mxu2 }
 0x4c3   : > { %18690 = vmatpush.bf16.msrb.mxu1 %v28979_v34  ;;  %v18464_v59 = vpop.f32.mrf.mxu3  ;;  %v29046_v57 = vld [vmem:[%s29800_s12 + $0x2778] sm:$0xff] }
 0x4c4   : > { %18703 = vmatpush.bf16.msrb.mxu2 %v28987_v35  ;;  %v29054_v59 = vld [vmem:[%s29800_s12 + $0x27b8] sm:$0xff] }
 0x4c5   : > { %18716 = vmatpush.bf16.msrb.mxu3 %v28995_v37  ;;  %v29001_v37 = vld [vmem:[%s29800_s12 + $0x2610] sm:$0xff] }
 0x4c6   : > { %18678 = vmatpush.bf16.msrb.mxu0 %v28970_v38 }
 0x4c7   : > { %18691 = vmatpush.bf16.msrb.mxu1 %v28978_v39  ;;  %v29009_v39 = vld [vmem:[%s29800_s12 + $0x2650] sm:$0xff] }
 0x4c8   : > { %18704 = vmatpush.bf16.msrb.mxu2 %v28986_v40  ;;  %v29017_v40 = vld [vmem:[%s29800_s12 + $0x2690] sm:$0xff] }
 0x4c9   : > { %18717 = vmatpush.bf16.msrb.mxu3 %v28994_v43  ;;  %v29008_v43 = vld [vmem:[%s29800_s12 + $0x2648] sm:$0xff] }
 0x4ca   : > { %18679 = vmatpush.bf16.msrb.mxu0 %v28969_v47 }
 0x4cb   : > { %18692 = vmatpush.bf16.msrb.mxu1 %v28977_v49 }
 0x4cc   : > { %18705 = vmatpush.bf16.msrb.mxu2 %v28985_v50  ;;  %v28999_v50 = vld [vmem:[%s29800_s12 + $0x2600] sm:$0xff] }
 0x4cd   : > { %18718 = vmatpush.bf16.msrb.mxu3 %v28993_v51  ;;  %v4560_v51 = vunpack.c.l.b16 %v370_v45 }
 0x4ce   : > { %18680 = vmatpush.bf16.msrb.mxu0 %v28968_v52 }
 0x4cf   : > { %18693 = vmatpush.bf16.msrb.mxu1 %v28976_v53  ;;  %v29007_v53 = vld [vmem:[%s29800_s12 + $0x2640] sm:$0xff]  ;;  %v4802_v61 = vpack.c.b16 %v4560_v51, %v4560_v51 }
 0x4d0   : > { %18706 = vmatpush.bf16.msrb.mxu2 %v28984_v54  ;;  %v29015_v54 = vld [vmem:[%s29800_s12 + $0x2680] sm:$0xff] }
 0x4d1   : > { %18719 = vmatpush.bf16.msrb.mxu3 %v28992_v58 }
 0x4d2   : > { %18681 = vmatpush.bf16.msrb.mxu0 %v28967_v60  ;;  %v18475_v20 = vpop.f32.mrf.mxu0  ;;  %v29023_v60 = vld [vmem:[%s29800_s12 + $0x26c0] sm:$0xff] }
 0x4d3   : > { %18694 = vmatpush.bf16.msrb.mxu1 %v28975_v63  ;;  %v18476_v21 = vadd.f32 %v18475_v20, %v31174_v46  ;;  %v18488_v23 = vpop.f32.mrf.mxu1  ;;  %v371_v46 = vld [vmem:[%s29795_s8 + $0x268] sm:$0xff]  ;;  %v29062_v63 = vld [vmem:[%s29800_s12 + $0x27f8] sm:$0xff] }
 0x4d4   : > { %18707 = vmatpush.bf16.msrb.mxu2 %v28983_v0  ;;  %v4562_v52 = vunpack.c.l.b16 %v371_v46  ;;  %v4563_v58 = vunpack.c.h.b16 %v371_v46  ;;  %v4803_v0 = vpack.c.b16 %v4561_v55, %v4561_v55  ;;  %v29050_v20 = vld [vmem:[%s29800_s12 + $0x2798] sm:$0xff] }
 0x4d5   : > { %18720 = vmatpush.bf16.msrb.mxu3 %v28991_v6  ;;  %18682 = vmatmul.bf16.vlgmr.msrb.gmra.mxu0 %v4798_v7  ;;  %v18489_v26 = vadd.f32 %v18488_v23, %v18476_v21  ;;  %v29036_v6 = vld [vmem:[%s29800_s12 + $0x2728] sm:$0xff]  ;;  %v29058_v23 = vld [vmem:[%s29800_s12 + $0x27d8] sm:$0xff] }
 0x4d6   : > { %18726 = vmatpush.bf16.msra.mxu0 %v29006_v2  ;;  %18695 = vmatmul.bf16.vlgmr.msrb.gmra.mxu1 %v4799_v10  ;;  %v4804_v62 = vpack.c.b16 %v4562_v52, %v4562_v52  ;;  %v4805_v1 = vpack.c.b16 %v4563_v58, %v4563_v58  ;;  %v29037_v2 = vld [vmem:[%s29800_s12 + $0x2730] sm:$0xff]  ;;  %v29044_v7 = vld [vmem:[%s29800_s12 + $0x2768] sm:$0xff]  ;;  %v29070_v46 = vld [vmem:[%s29800_s12 + $0x2838] sm:$0xff] }
 0x4d7   : > { %18739 = vmatpush.bf16.msra.mxu1 %v29014_v3  ;;  %18708 = vmatmul.bf16.vlgmr.msrb.gmra.mxu2 %v4800_v8  ;;  %v29045_v3 = vld [vmem:[%s29800_s12 + $0x2770] sm:$0xff]  ;;  %v29052_v8 = vld [vmem:[%s29800_s12 + $0x27a8] sm:$0xff] }
 0x4d8   : > { %18752 = vmatpush.bf16.msra.mxu2 %v29022_v5  ;;  %18721 = vmatmul.bf16.vlgmr.msrb.gmra.mxu3 %v4801_v11  ;;  %v29061_v5 = vld [vmem:[%s29800_s12 + $0x27f0] sm:$0xff] }
 0x4d9   : > { %18765 = vmatpush.bf16.msra.mxu3 %v29030_v9  ;;  %v29060_v9 = vld [vmem:[%s29800_s12 + $0x27e8] sm:$0xff]  ;;  %v29085_v58 = vld [vmem:[%s29800_s12 + $0x28b0] sm:$0xff] }
 0x4da   : > { %18727 = vmatpush.bf16.msra.mxu0 %v29005_v12  ;;  %v18501_v31 = vpop.f32.mrf.mxu2  ;;  %v18477_v35 = vpop.f32.mrf.mxu0  ;;  %v29035_v12 = vld [vmem:[%s29800_s12 + $0x2720] sm:$0xff] }
 0x4db   : > { %18740 = vmatpush.bf16.msra.mxu1 %v29013_v13  ;;  %v18502_v32 = vadd.f32 %v18501_v31, %v18489_v26  ;;  %v18514_v34 = vpop.f32.mrf.mxu3  ;;  %v18490_v38 = vpop.f32.mrf.mxu1  ;;  %v29057_v31 = vld [vmem:[%s29800_s12 + $0x27d0] sm:$0xff] }
 0x4dc   : > { %18753 = vmatpush.bf16.msra.mxu2 %v29021_v14  ;;  %v29043_v14 = vld [vmem:[%s29800_s12 + $0x2760] sm:$0xff]  ;;  %v372_v35 = vld [vmem:[%s29795_s8 + $0x270] sm:$0xff]  ;;  %v29056_v38 = vld [vmem:[%s29800_s12 + $0x27c8] sm:$0xff] }
 0x4dd   : > { %18766 = vmatpush.bf16.msra.mxu3 %v29029_v15  ;;  %v31211_v36 = vadd.f32 %v18514_v34, %v18502_v32  ;;  %v29051_v15 = vld [vmem:[%s29800_s12 + $0x27a0] sm:$0xff]  ;;  %v29032_v32 = vld [vmem:[%s29800_s12 + $0x2708] sm:$0xff]  ;;  %v4565_v45 = vunpack.c.h.b16 %v372_v35 }
 0x4de   : > { %18728 = vmatpush.bf16.msra.mxu0 %v29004_v16  ;;  %v29048_v34 = vld [vmem:[%s29800_s12 + $0x2788] sm:$0xff] }
 0x4df   : > { %18741 = vmatpush.bf16.msra.mxu1 %v29012_v17  ;;  %v29059_v17 = vld [vmem:[%s29800_s12 + $0x27e0] sm:$0xff] }
 0x4e0   : > { %18754 = vmatpush.bf16.msra.mxu2 %v29020_v18  ;;  %v29034_v18 = vld [vmem:[%s29800_s12 + $0x2718] sm:$0xff] }
 0x4e1   : > { %18767 = vmatpush.bf16.msra.mxu3 %v29028_v19  ;;  %v29042_v19 = vld [vmem:[%s29800_s12 + $0x2758] sm:$0xff] }
 0x4e2   : > { %18729 = vmatpush.bf16.msra.mxu0 %v29003_v22  ;;  %v18503_v47 = vpop.f32.mrf.mxu2 }
 0x4e3   : > { %18742 = vmatpush.bf16.msra.mxu1 %v29011_v24  ;;  %v18516_v49 = vpop.f32.mrf.mxu3  ;;  %v29078_v47 = vld [vmem:[%s29800_s12 + $0x2878] sm:$0xff] }
 0x4e4   : > { %18755 = vmatpush.bf16.msra.mxu2 %v29019_v25  ;;  %v29086_v49 = vld [vmem:[%s29800_s12 + $0x28b8] sm:$0xff] }
 0x4e5   : > { %18768 = vmatpush.bf16.msra.mxu3 %v29027_v27  ;;  %v29033_v27 = vld [vmem:[%s29800_s12 + $0x2710] sm:$0xff] }
 0x4e6   : > { %18730 = vmatpush.bf16.msra.mxu0 %v29002_v28 }
 0x4e7   : > { %18743 = vmatpush.bf16.msra.mxu1 %v29010_v29  ;;  %v29041_v29 = vld [vmem:[%s29800_s12 + $0x2750] sm:$0xff] }
 0x4e8   : > { %18756 = vmatpush.bf16.msra.mxu2 %v29018_v30  ;;  %v29049_v30 = vld [vmem:[%s29800_s12 + $0x2790] sm:$0xff] }
 0x4e9   : > { %18769 = vmatpush.bf16.msra.mxu3 %v29026_v33  ;;  %v29040_v33 = vld [vmem:[%s29800_s12 + $0x2748] sm:$0xff] }
 0x4ea   : > { %18731 = vmatpush.bf16.msra.mxu0 %v29001_v37 }
 0x4eb   : > { %18744 = vmatpush.bf16.msra.mxu1 %v29009_v39 }
 0x4ec   : > { %18757 = vmatpush.bf16.msra.mxu2 %v29017_v40  ;;  %v29031_v40 = vld [vmem:[%s29800_s12 + $0x2700] sm:$0xff] }
 0x4ed   : > { %18770 = vmatpush.bf16.msra.mxu3 %v29025_v41  ;;  %v4564_v41 = vunpack.c.l.b16 %v372_v35 }
 0x4ee   : > { %18732 = vmatpush.bf16.msra.mxu0 %v29000_v42 }
 0x4ef   : > { %18745 = vmatpush.bf16.msra.mxu1 %v29008_v43  ;;  %v29039_v43 = vld [vmem:[%s29800_s12 + $0x2740] sm:$0xff]  ;;  %v4806_v51 = vpack.c.b16 %v4564_v41, %v4564_v41 }
 0x4f0   : > { %18758 = vmatpush.bf16.msra.mxu2 %v29016_v44  ;;  %v29047_v44 = vld [vmem:[%s29800_s12 + $0x2780] sm:$0xff] }
 0x4f1   : > { %18771 = vmatpush.bf16.msra.mxu3 %v29024_v48 }
 0x4f2   : > { %18733 = vmatpush.bf16.msra.mxu0 %v28999_v50  ;;  %v18527_v10 = vpop.f32.mrf.mxu0  ;;  %v29055_v50 = vld [vmem:[%s29800_s12 + $0x27c0] sm:$0xff] }
 0x4f3   : > { %18746 = vmatpush.bf16.msra.mxu1 %v29007_v53  ;;  %v18528_v11 = vadd.f32 %v18527_v10, %v31211_v36  ;;  %v18540_v13 = vpop.f32.mrf.mxu1  ;;  %v373_v36 = vld [vmem:[%s29795_s8 + $0x278] sm:$0xff] }
 0x4f4   : > { %18759 = vmatpush.bf16.msra.mxu2 %v29015_v54  ;;  %v4566_v42 = vunpack.c.l.b16 %v373_v36  ;;  %v4567_v48 = vunpack.c.h.b16 %v373_v36  ;;  %v29094_v53 = vld [vmem:[%s29800_s12 + $0x28f8] sm:$0xff]  ;;  %v4807_v54 = vpack.c.b16 %v4565_v45, %v4565_v45 }
 0x4f5   : > { %18772 = vmatpush.bf16.msra.mxu3 %v29023_v60  ;;  %18734 = vmatmul.bf16.vlgmr.msra.gmra.mxu0 %v4802_v61  ;;  %v18541_v16 = vadd.f32 %v18540_v13, %v18528_v11  ;;  %v29068_v60 = vld [vmem:[%s29800_s12 + $0x2828] sm:$0xff]  ;;  %v29082_v10 = vld [vmem:[%s29800_s12 + $0x2898] sm:$0xff] }
 0x4f6   : > { %18778 = vmatpush.bf16.msrb.mxu0 %v29038_v56  ;;  %18747 = vmatmul.bf16.vlgmr.msra.gmra.mxu1 %v4803_v0  ;;  %v4808_v52 = vpack.c.b16 %v4566_v42, %v4566_v42  ;;  %v4809_v55 = vpack.c.b16 %v4567_v48, %v4567_v48  ;;  %v29069_v56 = vld [vmem:[%s29800_s12 + $0x2830] sm:$0xff]  ;;  %v29076_v61 = vld [vmem:[%s29800_s12 + $0x2868] sm:$0xff]  ;;  %v29090_v13 = vld [vmem:[%s29800_s12 + $0x28d8] sm:$0xff] }
 0x4f7   : > { %18791 = vmatpush.bf16.msrb.mxu1 %v29046_v57  ;;  %18760 = vmatmul.bf16.vlgmr.msra.gmra.mxu2 %v4804_v62  ;;  %v29077_v57 = vld [vmem:[%s29800_s12 + $0x2870] sm:$0xff]  ;;  %v29084_v62 = vld [vmem:[%s29800_s12 + $0x28a8] sm:$0xff]  ;;  %v29102_v36 = vld [vmem:[%s29800_s12 + $0x2938] sm:$0xff] }
 0x4f8   : > { %18804 = vmatpush.bf16.msrb.mxu2 %v29054_v59  ;;  %18773 = vmatmul.bf16.vlgmr.msra.gmra.mxu3 %v4805_v1  ;;  %v29093_v59 = vld [vmem:[%s29800_s12 + $0x28f0] sm:$0xff] }
 0x4f9   : > { %18817 = vmatpush.bf16.msrb.mxu3 %v29062_v63  ;;  %v29092_v63 = vld [vmem:[%s29800_s12 + $0x28e8] sm:$0xff]  ;;  %v29117_v48 = vld [vmem:[%s29800_s12 + $0x29b0] sm:$0xff] }
 0x4fa   : > { %18779 = vmatpush.bf16.msrb.mxu0 %v29037_v2  ;;  %v18553_v21 = vpop.f32.mrf.mxu2  ;;  %v18529_v25 = vpop.f32.mrf.mxu0  ;;  %v29067_v2 = vld [vmem:[%s29800_s12 + $0x2820] sm:$0xff] }
 0x4fb   : > { %18792 = vmatpush.bf16.msrb.mxu1 %v29045_v3  ;;  %v18554_v22 = vadd.f32 %v18553_v21, %v18541_v16  ;;  %v18566_v24 = vpop.f32.mrf.mxu3  ;;  %v18542_v28 = vpop.f32.mrf.mxu1  ;;  %v29089_v21 = vld [vmem:[%s29800_s12 + $0x28d0] sm:$0xff]  ;;  %v374_v25 = vld [vmem:[%s29795_s8 + $0x280] sm:$0xff] }
 0x4fc   : > { %18805 = vmatpush.bf16.msrb.mxu2 %v29053_v4  ;;  %v29075_v4 = vld [vmem:[%s29800_s12 + $0x2860] sm:$0xff]  ;;  %v29088_v28 = vld [vmem:[%s29800_s12 + $0x28c8] sm:$0xff]  ;;  %v4569_v35 = vunpack.c.h.b16 %v374_v25 }
 0x4fd   : > { %18818 = vmatpush.bf16.msrb.mxu3 %v29061_v5  ;;  %v31248_v26 = vadd.f32 %v18566_v24, %v18554_v22  ;;  %v29083_v5 = vld [vmem:[%s29800_s12 + $0x28a0] sm:$0xff]  ;;  %v29064_v22 = vld [vmem:[%s29800_s12 + $0x2808] sm:$0xff] }
 0x4fe   : > { %18780 = vmatpush.bf16.msrb.mxu0 %v29036_v6  ;;  %v29080_v24 = vld [vmem:[%s29800_s12 + $0x2888] sm:$0xff] }
 0x4ff   : > { %18793 = vmatpush.bf16.msrb.mxu1 %v29044_v7  ;;  %v29091_v7 = vld [vmem:[%s29800_s12 + $0x28e0] sm:$0xff] }
 0x500   : > { %18806 = vmatpush.bf16.msrb.mxu2 %v29052_v8  ;;  %v29066_v8 = vld [vmem:[%s29800_s12 + $0x2818] sm:$0xff] }
 0x501   : > { %18819 = vmatpush.bf16.msrb.mxu3 %v29060_v9  ;;  %v29074_v9 = vld [vmem:[%s29800_s12 + $0x2858] sm:$0xff] }
 0x502   : > { %18781 = vmatpush.bf16.msrb.mxu0 %v29035_v12  ;;  %v18555_v37 = vpop.f32.mrf.mxu2 }
 0x503   : > { %18794 = vmatpush.bf16.msrb.mxu1 %v29043_v14  ;;  %v18568_v39 = vpop.f32.mrf.mxu3  ;;  %v29110_v37 = vld [vmem:[%s29800_s12 + $0x2978] sm:$0xff] }
 0x504   : > { %18807 = vmatpush.bf16.msrb.mxu2 %v29051_v15  ;;  %v29118_v39 = vld [vmem:[%s29800_s12 + $0x29b8] sm:$0xff] }
 0x505   : > { %18820 = vmatpush.bf16.msrb.mxu3 %v29059_v17  ;;  %v29065_v17 = vld [vmem:[%s29800_s12 + $0x2810] sm:$0xff] }
 0x506   : > { %18782 = vmatpush.bf16.msrb.mxu0 %v29034_v18 }
 0x507   : > { %18795 = vmatpush.bf16.msrb.mxu1 %v29042_v19  ;;  %v29073_v19 = vld [vmem:[%s29800_s12 + $0x2850] sm:$0xff] }
 0x508   : > { %18808 = vmatpush.bf16.msrb.mxu2 %v29050_v20  ;;  %v29081_v20 = vld [vmem:[%s29800_s12 + $0x2890] sm:$0xff] }
 0x509   : > { %18821 = vmatpush.bf16.msrb.mxu3 %v29058_v23  ;;  %v29072_v23 = vld [vmem:[%s29800_s12 + $0x2848] sm:$0xff] }
 0x50a   : > { %18783 = vmatpush.bf16.msrb.mxu0 %v29033_v27 }
 0x50b   : > { %18796 = vmatpush.bf16.msrb.mxu1 %v29041_v29 }
 0x50c   : > { %18809 = vmatpush.bf16.msrb.mxu2 %v29049_v30  ;;  %v29063_v30 = vld [vmem:[%s29800_s12 + $0x2800] sm:$0xff] }
 0x50d   : > { %18822 = vmatpush.bf16.msrb.mxu3 %v29057_v31  ;;  %v4568_v31 = vunpack.c.l.b16 %v374_v25 }
 0x50e   : > { %18784 = vmatpush.bf16.msrb.mxu0 %v29032_v32 }
 0x50f   : > { %18797 = vmatpush.bf16.msrb.mxu1 %v29040_v33  ;;  %v29071_v33 = vld [vmem:[%s29800_s12 + $0x2840] sm:$0xff]  ;;  %v4810_v41 = vpack.c.b16 %v4568_v31, %v4568_v31 }
 0x510   : > { %18810 = vmatpush.bf16.msrb.mxu2 %v29048_v34  ;;  %v29079_v34 = vld [vmem:[%s29800_s12 + $0x2880] sm:$0xff] }
 0x511   : > { %18823 = vmatpush.bf16.msrb.mxu3 %v29056_v38 }
 0x512   : > { %18785 = vmatpush.bf16.msrb.mxu0 %v29031_v40  ;;  %v18579_v0 = vpop.f32.mrf.mxu0  ;;  %v29087_v40 = vld [vmem:[%s29800_s12 + $0x28c0] sm:$0xff] }
 0x513   : > { %18798 = vmatpush.bf16.msrb.mxu1 %v29039_v43  ;;  %v18580_v1 = vadd.f32 %v18579_v0, %v31248_v26  ;;  %v18592_v3 = vpop.f32.mrf.mxu1  ;;  %v375_v26 = vld [vmem:[%s29795_s8 + $0x288] sm:$0xff]  ;;  %v29126_v43 = vld [vmem:[%s29800_s12 + $0x29f8] sm:$0xff] }
 0x514   : > { %18811 = vmatpush.bf16.msrb.mxu2 %v29047_v44  ;;  %v4570_v32 = vunpack.c.l.b16 %v375_v26  ;;  %v4571_v38 = vunpack.c.h.b16 %v375_v26  ;;  %v4811_v44 = vpack.c.b16 %v4569_v35, %v4569_v35  ;;  %v29114_v0 = vld [vmem:[%s29800_s12 + $0x2998] sm:$0xff] }
 0x515   : > { %18824 = vmatpush.bf16.msrb.mxu3 %v29055_v50  ;;  %18786 = vmatmul.bf16.vlgmr.msrb.gmra.mxu0 %v4806_v51  ;;  %v18593_v6 = vadd.f32 %v18592_v3, %v18580_v1  ;;  %v29100_v50 = vld [vmem:[%s29800_s12 + $0x2928] sm:$0xff]  ;;  %v29122_v3 = vld [vmem:[%s29800_s12 + $0x29d8] sm:$0xff] }
 0x516   : > { %18830 = vmatpush.bf16.msra.mxu0 %v29070_v46  ;;  %18799 = vmatmul.bf16.vlgmr.msrb.gmra.mxu1 %v4807_v54  ;;  %v4812_v42 = vpack.c.b16 %v4570_v32, %v4570_v32  ;;  %v4813_v45 = vpack.c.b16 %v4571_v38, %v4571_v38  ;;  %v29101_v46 = vld [vmem:[%s29800_s12 + $0x2930] sm:$0xff]  ;;  %v29108_v51 = vld [vmem:[%s29800_s12 + $0x2968] sm:$0xff]  ;;  %v29134_v26 = vld [vmem:[%s29800_s12 + $0x2a38] sm:$0xff] }
 0x517   : > { %18843 = vmatpush.bf16.msra.mxu1 %v29078_v47  ;;  %18812 = vmatmul.bf16.vlgmr.msrb.gmra.mxu2 %v4808_v52  ;;  %v29109_v47 = vld [vmem:[%s29800_s12 + $0x2970] sm:$0xff]  ;;  %v29116_v52 = vld [vmem:[%s29800_s12 + $0x29a8] sm:$0xff] }
 0x518   : > { %18856 = vmatpush.bf16.msra.mxu2 %v29086_v49  ;;  %18825 = vmatmul.bf16.vlgmr.msrb.gmra.mxu3 %v4809_v55  ;;  %v29125_v49 = vld [vmem:[%s29800_s12 + $0x29f0] sm:$0xff] }
 0x519   : > { %18869 = vmatpush.bf16.msra.mxu3 %v29094_v53  ;;  %v29124_v53 = vld [vmem:[%s29800_s12 + $0x29e8] sm:$0xff]  ;;  %v29149_v38 = vld [vmem:[%s29800_s12 + $0x2ab0] sm:$0xff] }
 0x51a   : > { %18831 = vmatpush.bf16.msra.mxu0 %v29069_v56  ;;  %v18605_v11 = vpop.f32.mrf.mxu2  ;;  %v18581_v15 = vpop.f32.mrf.mxu0  ;;  %v29099_v56 = vld [vmem:[%s29800_s12 + $0x2920] sm:$0xff] }
 0x51b   : > { %18844 = vmatpush.bf16.msra.mxu1 %v29077_v57  ;;  %v18606_v12 = vadd.f32 %v18605_v11, %v18593_v6  ;;  %v18618_v14 = vpop.f32.mrf.mxu3  ;;  %v18594_v18 = vpop.f32.mrf.mxu1  ;;  %v29121_v11 = vld [vmem:[%s29800_s12 + $0x29d0] sm:$0xff] }
 0x51c   : > { %18857 = vmatpush.bf16.msra.mxu2 %v29085_v58  ;;  %v29107_v58 = vld [vmem:[%s29800_s12 + $0x2960] sm:$0xff]  ;;  %v376_v15 = vld [vmem:[%s29795_s8 + $0x290] sm:$0xff]  ;;  %v29120_v18 = vld [vmem:[%s29800_s12 + $0x29c8] sm:$0xff] }
 0x51d   : > { %18870 = vmatpush.bf16.msra.mxu3 %v29093_v59  ;;  %v31285_v16 = vadd.f32 %v18618_v14, %v18606_v12  ;;  %v29115_v59 = vld [vmem:[%s29800_s12 + $0x29a0] sm:$0xff]  ;;  %v29096_v12 = vld [vmem:[%s29800_s12 + $0x2908] sm:$0xff]  ;;  %v4573_v25 = vunpack.c.h.b16 %v376_v15 }
 0x51e   : > { %18832 = vmatpush.bf16.msra.mxu0 %v29068_v60  ;;  %v29112_v14 = vld [vmem:[%s29800_s12 + $0x2988] sm:$0xff] }
 0x51f   : > { %18845 = vmatpush.bf16.msra.mxu1 %v29076_v61  ;;  %v29123_v61 = vld [vmem:[%s29800_s12 + $0x29e0] sm:$0xff] }
 0x520   : > { %18858 = vmatpush.bf16.msra.mxu2 %v29084_v62  ;;  %v29098_v62 = vld [vmem:[%s29800_s12 + $0x2918] sm:$0xff] }
 0x521   : > { %18871 = vmatpush.bf16.msra.mxu3 %v29092_v63  ;;  %v29106_v63 = vld [vmem:[%s29800_s12 + $0x2958] sm:$0xff] }
 0x522   : > { %18833 = vmatpush.bf16.msra.mxu0 %v29067_v2  ;;  %v18607_v27 = vpop.f32.mrf.mxu2 }
 0x523   : > { %18846 = vmatpush.bf16.msra.mxu1 %v29075_v4  ;;  %v18620_v29 = vpop.f32.mrf.mxu3  ;;  %v29142_v27 = vld [vmem:[%s29800_s12 + $0x2a78] sm:$0xff] }
 0x524   : > { %18859 = vmatpush.bf16.msra.mxu2 %v29083_v5  ;;  %v29150_v29 = vld [vmem:[%s29800_s12 + $0x2ab8] sm:$0xff] }
 0x525   : > { %18872 = vmatpush.bf16.msra.mxu3 %v29091_v7  ;;  %v29097_v7 = vld [vmem:[%s29800_s12 + $0x2910] sm:$0xff] }
 0x526   : > { %18834 = vmatpush.bf16.msra.mxu0 %v29066_v8 }
 0x527   : > { %18847 = vmatpush.bf16.msra.mxu1 %v29074_v9  ;;  %v29105_v9 = vld [vmem:[%s29800_s12 + $0x2950] sm:$0xff] }
 0x528   : > { %18860 = vmatpush.bf16.msra.mxu2 %v29082_v10  ;;  %v29113_v10 = vld [vmem:[%s29800_s12 + $0x2990] sm:$0xff] }
 0x529   : > { %18873 = vmatpush.bf16.msra.mxu3 %v29090_v13  ;;  %v29104_v13 = vld [vmem:[%s29800_s12 + $0x2948] sm:$0xff] }
 0x52a   : > { %18835 = vmatpush.bf16.msra.mxu0 %v29065_v17 }
 0x52b   : > { %18848 = vmatpush.bf16.msra.mxu1 %v29073_v19 }
 0x52c   : > { %18861 = vmatpush.bf16.msra.mxu2 %v29081_v20  ;;  %v29095_v20 = vld [vmem:[%s29800_s12 + $0x2900] sm:$0xff] }
 0x52d   : > { %18874 = vmatpush.bf16.msra.mxu3 %v29089_v21  ;;  %v4572_v21 = vunpack.c.l.b16 %v376_v15 }
 0x52e   : > { %18836 = vmatpush.bf16.msra.mxu0 %v29064_v22 }
 0x52f   : > { %18849 = vmatpush.bf16.msra.mxu1 %v29072_v23  ;;  %v29103_v23 = vld [vmem:[%s29800_s12 + $0x2940] sm:$0xff]  ;;  %v4814_v31 = vpack.c.b16 %v4572_v21, %v4572_v21 }
 0x530   : > { %18862 = vmatpush.bf16.msra.mxu2 %v29080_v24  ;;  %v29111_v24 = vld [vmem:[%s29800_s12 + $0x2980] sm:$0xff] }
 0x531   : > { %18875 = vmatpush.bf16.msra.mxu3 %v29088_v28 }
 0x532   : > { %18837 = vmatpush.bf16.msra.mxu0 %v29063_v30  ;;  %v18631_v54 = vpop.f32.mrf.mxu0  ;;  %v29119_v30 = vld [vmem:[%s29800_s12 + $0x29c0] sm:$0xff] }
 0x533   : > { %18850 = vmatpush.bf16.msra.mxu1 %v29071_v33  ;;  %v18632_v55 = vadd.f32 %v18631_v54, %v31285_v16  ;;  %v18644_v57 = vpop.f32.mrf.mxu1  ;;  %v377_v16 = vld [vmem:[%s29795_s8 + $0x298] sm:$0xff] }
 0x534   : > { %18863 = vmatpush.bf16.msra.mxu2 %v29079_v34  ;;  %v4574_v22 = vunpack.c.l.b16 %v377_v16  ;;  %v4575_v28 = vunpack.c.h.b16 %v377_v16  ;;  %v29158_v33 = vld [vmem:[%s29800_s12 + $0x2af8] sm:$0xff]  ;;  %v4815_v34 = vpack.c.b16 %v4573_v25, %v4573_v25 }
 0x535   : > { %18876 = vmatpush.bf16.msra.mxu3 %v29087_v40  ;;  %18838 = vmatmul.bf16.vlgmr.msra.gmra.mxu0 %v4810_v41  ;;  %v18645_v60 = vadd.f32 %v18644_v57, %v18632_v55  ;;  %v29132_v40 = vld [vmem:[%s29800_s12 + $0x2a28] sm:$0xff]  ;;  %v29146_v54 = vld [vmem:[%s29800_s12 + $0x2a98] sm:$0xff] }
 0x536   : > { %18882 = vmatpush.bf16.msrb.mxu0 %v29102_v36  ;;  %18851 = vmatmul.bf16.vlgmr.msra.gmra.mxu1 %v4811_v44  ;;  %v4816_v32 = vpack.c.b16 %v4574_v22, %v4574_v22  ;;  %v4817_v35 = vpack.c.b16 %v4575_v28, %v4575_v28  ;;  %v29133_v36 = vld [vmem:[%s29800_s12 + $0x2a30] sm:$0xff]  ;;  %v29140_v41 = vld [vmem:[%s29800_s12 + $0x2a68] sm:$0xff]  ;;  %v29154_v57 = vld [vmem:[%s29800_s12 + $0x2ad8] sm:$0xff] }
 0x537   : > { %18895 = vmatpush.bf16.msrb.mxu1 %v29110_v37  ;;  %18864 = vmatmul.bf16.vlgmr.msra.gmra.mxu2 %v4812_v42  ;;  %v29141_v37 = vld [vmem:[%s29800_s12 + $0x2a70] sm:$0xff]  ;;  %v29148_v42 = vld [vmem:[%s29800_s12 + $0x2aa8] sm:$0xff]  ;;  %v29166_v16 = vld [vmem:[%s29800_s12 + $0x2b38] sm:$0xff] }
 0x538   : > { %18908 = vmatpush.bf16.msrb.mxu2 %v29118_v39  ;;  %18877 = vmatmul.bf16.vlgmr.msra.gmra.mxu3 %v4813_v45  ;;  %v29157_v39 = vld [vmem:[%s29800_s12 + $0x2af0] sm:$0xff] }
 0x539   : > { %18921 = vmatpush.bf16.msrb.mxu3 %v29126_v43  ;;  %v29156_v43 = vld [vmem:[%s29800_s12 + $0x2ae8] sm:$0xff]  ;;  %v29181_v28 = vld [vmem:[%s29800_s12 + $0x2bb0] sm:$0xff] }
 0x53a   : > { %18883 = vmatpush.bf16.msrb.mxu0 %v29101_v46  ;;  %v18657_v1 = vpop.f32.mrf.mxu2  ;;  %v18633_v5 = vpop.f32.mrf.mxu0  ;;  %v29131_v46 = vld [vmem:[%s29800_s12 + $0x2a20] sm:$0xff] }
 0x53b   : > { %18896 = vmatpush.bf16.msrb.mxu1 %v29109_v47  ;;  %v18658_v2 = vadd.f32 %v18657_v1, %v18645_v60  ;;  %v18670_v4 = vpop.f32.mrf.mxu3  ;;  %v18646_v8 = vpop.f32.mrf.mxu1  ;;  %v29153_v1 = vld [vmem:[%s29800_s12 + $0x2ad0] sm:$0xff]  ;;  %v378_v5 = vld [vmem:[%s29795_s8 + $0x2a0] sm:$0xff] }
 0x53c   : > { %18909 = vmatpush.bf16.msrb.mxu2 %v29117_v48  ;;  %v29139_v48 = vld [vmem:[%s29800_s12 + $0x2a60] sm:$0xff]  ;;  %v29152_v8 = vld [vmem:[%s29800_s12 + $0x2ac8] sm:$0xff]  ;;  %v4577_v15 = vunpack.c.h.b16 %v378_v5 }
 0x53d   : > { %18922 = vmatpush.bf16.msrb.mxu3 %v29125_v49  ;;  %v31322_v6 = vadd.f32 %v18670_v4, %v18658_v2  ;;  %v29147_v49 = vld [vmem:[%s29800_s12 + $0x2aa0] sm:$0xff]  ;;  %v29128_v2 = vld [vmem:[%s29800_s12 + $0x2a08] sm:$0xff] }
 0x53e   : > { %18884 = vmatpush.bf16.msrb.mxu0 %v29100_v50  ;;  %v29144_v4 = vld [vmem:[%s29800_s12 + $0x2a88] sm:$0xff] }
 0x53f   : > { %18897 = vmatpush.bf16.msrb.mxu1 %v29108_v51  ;;  %v29155_v51 = vld [vmem:[%s29800_s12 + $0x2ae0] sm:$0xff] }
 0x540   : > { %18910 = vmatpush.bf16.msrb.mxu2 %v29116_v52  ;;  %v29130_v52 = vld [vmem:[%s29800_s12 + $0x2a18] sm:$0xff] }
 0x541   : > { %18923 = vmatpush.bf16.msrb.mxu3 %v29124_v53  ;;  %v29138_v53 = vld [vmem:[%s29800_s12 + $0x2a58] sm:$0xff] }
 0x542   : > { %18885 = vmatpush.bf16.msrb.mxu0 %v29099_v56  ;;  %v18659_v17 = vpop.f32.mrf.mxu2 }
 0x543   : > { %18898 = vmatpush.bf16.msrb.mxu1 %v29107_v58  ;;  %v18672_v19 = vpop.f32.mrf.mxu3  ;;  %v29174_v17 = vld [vmem:[%s29800_s12 + $0x2b78] sm:$0xff] }
 0x544   : > { %18911 = vmatpush.bf16.msrb.mxu2 %v29115_v59  ;;  %v29182_v19 = vld [vmem:[%s29800_s12 + $0x2bb8] sm:$0xff] }
 0x545   : > { %18924 = vmatpush.bf16.msrb.mxu3 %v29123_v61  ;;  %v29129_v61 = vld [vmem:[%s29800_s12 + $0x2a10] sm:$0xff] }
 0x546   : > { %18886 = vmatpush.bf16.msrb.mxu0 %v29098_v62 }
 0x547   : > { %18899 = vmatpush.bf16.msrb.mxu1 %v29106_v63  ;;  %v29137_v63 = vld [vmem:[%s29800_s12 + $0x2a50] sm:$0xff] }
 0x548   : > { %18912 = vmatpush.bf16.msrb.mxu2 %v29114_v0  ;;  %v29145_v0 = vld [vmem:[%s29800_s12 + $0x2a90] sm:$0xff] }
 0x549   : > { %18925 = vmatpush.bf16.msrb.mxu3 %v29122_v3  ;;  %v29136_v3 = vld [vmem:[%s29800_s12 + $0x2a48] sm:$0xff] }
 0x54a   : > { %18887 = vmatpush.bf16.msrb.mxu0 %v29097_v7 }
 0x54b   : > { %18900 = vmatpush.bf16.msrb.mxu1 %v29105_v9 }
 0x54c   : > { %18913 = vmatpush.bf16.msrb.mxu2 %v29113_v10  ;;  %v29127_v10 = vld [vmem:[%s29800_s12 + $0x2a00] sm:$0xff] }
 0x54d   : > { %18926 = vmatpush.bf16.msrb.mxu3 %v29121_v11  ;;  %v4576_v11 = vunpack.c.l.b16 %v378_v5 }
 0x54e   : > { %18888 = vmatpush.bf16.msrb.mxu0 %v29096_v12 }
 0x54f   : > { %18901 = vmatpush.bf16.msrb.mxu1 %v29104_v13  ;;  %v29135_v13 = vld [vmem:[%s29800_s12 + $0x2a40] sm:$0xff]  ;;  %v4818_v21 = vpack.c.b16 %v4576_v11, %v4576_v11 }
 0x550   : > { %18914 = vmatpush.bf16.msrb.mxu2 %v29112_v14  ;;  %v29143_v14 = vld [vmem:[%s29800_s12 + $0x2a80] sm:$0xff] }
 0x551   : > { %18927 = vmatpush.bf16.msrb.mxu3 %v29120_v18 }
 0x552   : > { %18889 = vmatpush.bf16.msrb.mxu0 %v29095_v20  ;;  %v18683_v44 = vpop.f32.mrf.mxu0  ;;  %v29151_v20 = vld [vmem:[%s29800_s12 + $0x2ac0] sm:$0xff] }
 0x553   : > { %18902 = vmatpush.bf16.msrb.mxu1 %v29103_v23  ;;  %v18684_v45 = vadd.f32 %v18683_v44, %v31322_v6  ;;  %v18696_v47 = vpop.f32.mrf.mxu1  ;;  %v379_v6 = vld [vmem:[%s29795_s8 + $0x2a8] sm:$0xff]  ;;  %v29190_v23 = vld [vmem:[%s29800_s12 + $0x2bf8] sm:$0xff] }
 0x554   : > { %18915 = vmatpush.bf16.msrb.mxu2 %v29111_v24  ;;  %v4578_v12 = vunpack.c.l.b16 %v379_v6  ;;  %v4579_v18 = vunpack.c.h.b16 %v379_v6  ;;  %v4819_v24 = vpack.c.b16 %v4577_v15, %v4577_v15  ;;  %v29178_v44 = vld [vmem:[%s29800_s12 + $0x2b98] sm:$0xff] }
 0x555   : > { %18928 = vmatpush.bf16.msrb.mxu3 %v29119_v30  ;;  %18890 = vmatmul.bf16.vlgmr.msrb.gmra.mxu0 %v4814_v31  ;;  %v18697_v50 = vadd.f32 %v18696_v47, %v18684_v45  ;;  %v29164_v30 = vld [vmem:[%s29800_s12 + $0x2b28] sm:$0xff]  ;;  %v29186_v47 = vld [vmem:[%s29800_s12 + $0x2bd8] sm:$0xff] }
 0x556   : > { %18934 = vmatpush.bf16.msra.mxu0 %v29134_v26  ;;  %18903 = vmatmul.bf16.vlgmr.msrb.gmra.mxu1 %v4815_v34  ;;  %v4820_v22 = vpack.c.b16 %v4578_v12, %v4578_v12  ;;  %v4821_v25 = vpack.c.b16 %v4579_v18, %v4579_v18  ;;  %v29165_v26 = vld [vmem:[%s29800_s12 + $0x2b30] sm:$0xff]  ;;  %v29172_v31 = vld [vmem:[%s29800_s12 + $0x2b68] sm:$0xff]  ;;  %v29198_v6 = vld [vmem:[%s29800_s12 + $0x2c38] sm:$0xff] }
 0x557   : > { %18947 = vmatpush.bf16.msra.mxu1 %v29142_v27  ;;  %18916 = vmatmul.bf16.vlgmr.msrb.gmra.mxu2 %v4816_v32  ;;  %v29173_v27 = vld [vmem:[%s29800_s12 + $0x2b70] sm:$0xff]  ;;  %v29180_v32 = vld [vmem:[%s29800_s12 + $0x2ba8] sm:$0xff] }
 0x558   : > { %18960 = vmatpush.bf16.msra.mxu2 %v29150_v29  ;;  %18929 = vmatmul.bf16.vlgmr.msrb.gmra.mxu3 %v4817_v35  ;;  %v29189_v29 = vld [vmem:[%s29800_s12 + $0x2bf0] sm:$0xff] }
 0x559   : > { %18973 = vmatpush.bf16.msra.mxu3 %v29158_v33  ;;  %v29188_v33 = vld [vmem:[%s29800_s12 + $0x2be8] sm:$0xff]  ;;  %v29213_v18 = vld [vmem:[%s29800_s12 + $0x2cb0] sm:$0xff] }
 0x55a   : > { %18935 = vmatpush.bf16.msra.mxu0 %v29133_v36  ;;  %v18709_v55 = vpop.f32.mrf.mxu2  ;;  %v18685_v59 = vpop.f32.mrf.mxu0  ;;  %v29163_v36 = vld [vmem:[%s29800_s12 + $0x2b20] sm:$0xff] }
 0x55b   : > { %18948 = vmatpush.bf16.msra.mxu1 %v29141_v37  ;;  %v18710_v56 = vadd.f32 %v18709_v55, %v18697_v50  ;;  %v18722_v58 = vpop.f32.mrf.mxu3  ;;  %v18698_v62 = vpop.f32.mrf.mxu1  ;;  %v29185_v55 = vld [vmem:[%s29800_s12 + $0x2bd0] sm:$0xff] }
 0x55c   : > { %18961 = vmatpush.bf16.msra.mxu2 %v29149_v38  ;;  %v29171_v38 = vld [vmem:[%s29800_s12 + $0x2b60] sm:$0xff]  ;;  %v380_v59 = vld [vmem:[%s29795_s8 + $0x2b0] sm:$0xff]  ;;  %v29184_v62 = vld [vmem:[%s29800_s12 + $0x2bc8] sm:$0xff] }
 0x55d   : > { %18974 = vmatpush.bf16.msra.mxu3 %v29157_v39  ;;  %v31359_v60 = vadd.f32 %v18722_v58, %v18710_v56  ;;  %v29179_v39 = vld [vmem:[%s29800_s12 + $0x2ba0] sm:$0xff]  ;;  %v29160_v56 = vld [vmem:[%s29800_s12 + $0x2b08] sm:$0xff]  ;;  %v4581_v5 = vunpack.c.h.b16 %v380_v59 }
 0x55e   : > { %18936 = vmatpush.bf16.msra.mxu0 %v29132_v40  ;;  %v29176_v58 = vld [vmem:[%s29800_s12 + $0x2b88] sm:$0xff] }
 0x55f   : > { %18949 = vmatpush.bf16.msra.mxu1 %v29140_v41  ;;  %v29187_v41 = vld [vmem:[%s29800_s12 + $0x2be0] sm:$0xff] }
 0x560   : > { %18962 = vmatpush.bf16.msra.mxu2 %v29148_v42  ;;  %v29162_v42 = vld [vmem:[%s29800_s12 + $0x2b18] sm:$0xff] }
 0x561   : > { %18975 = vmatpush.bf16.msra.mxu3 %v29156_v43  ;;  %v29170_v43 = vld [vmem:[%s29800_s12 + $0x2b58] sm:$0xff] }
 0x562   : > { %18937 = vmatpush.bf16.msra.mxu0 %v29131_v46  ;;  %v18711_v7 = vpop.f32.mrf.mxu2 }
 0x563   : > { %18950 = vmatpush.bf16.msra.mxu1 %v29139_v48  ;;  %v18724_v9 = vpop.f32.mrf.mxu3  ;;  %v29206_v7 = vld [vmem:[%s29800_s12 + $0x2c78] sm:$0xff] }
 0x564   : > { %18963 = vmatpush.bf16.msra.mxu2 %v29147_v49  ;;  %v29214_v9 = vld [vmem:[%s29800_s12 + $0x2cb8] sm:$0xff] }
 0x565   : > { %18976 = vmatpush.bf16.msra.mxu3 %v29155_v51  ;;  %v29161_v51 = vld [vmem:[%s29800_s12 + $0x2b10] sm:$0xff] }
 0x566   : > { %18938 = vmatpush.bf16.msra.mxu0 %v29130_v52 }
 0x567   : > { %18951 = vmatpush.bf16.msra.mxu1 %v29138_v53  ;;  %v29169_v53 = vld [vmem:[%s29800_s12 + $0x2b50] sm:$0xff] }
 0x568   : > { %18964 = vmatpush.bf16.msra.mxu2 %v29146_v54  ;;  %v29177_v54 = vld [vmem:[%s29800_s12 + $0x2b90] sm:$0xff] }
 0x569   : > { %18977 = vmatpush.bf16.msra.mxu3 %v29154_v57  ;;  %v29168_v57 = vld [vmem:[%s29800_s12 + $0x2b48] sm:$0xff] }
 0x56a   : > { %18939 = vmatpush.bf16.msra.mxu0 %v29129_v61 }
 0x56b   : > { %18952 = vmatpush.bf16.msra.mxu1 %v29137_v63 }
 0x56c   : > { %18965 = vmatpush.bf16.msra.mxu2 %v29145_v0  ;;  %v29159_v0 = vld [vmem:[%s29800_s12 + $0x2b00] sm:$0xff] }
 0x56d   : > { %18978 = vmatpush.bf16.msra.mxu3 %v29153_v1  ;;  %v4580_v1 = vunpack.c.l.b16 %v380_v59 }
 0x56e   : > { %18940 = vmatpush.bf16.msra.mxu0 %v29128_v2 }
 0x56f   : > { %18953 = vmatpush.bf16.msra.mxu1 %v29136_v3  ;;  %v29167_v3 = vld [vmem:[%s29800_s12 + $0x2b40] sm:$0xff]  ;;  %v4822_v11 = vpack.c.b16 %v4580_v1, %v4580_v1 }
 0x570   : > { %18966 = vmatpush.bf16.msra.mxu2 %v29144_v4  ;;  %v29175_v4 = vld [vmem:[%s29800_s12 + $0x2b80] sm:$0xff] }
 0x571   : > { %18979 = vmatpush.bf16.msra.mxu3 %v29152_v8 }
 0x572   : > { %18941 = vmatpush.bf16.msra.mxu0 %v29127_v10  ;;  %v18735_v34 = vpop.f32.mrf.mxu0  ;;  %v29183_v10 = vld [vmem:[%s29800_s12 + $0x2bc0] sm:$0xff] }
 0x573   : > { %18954 = vmatpush.bf16.msra.mxu1 %v29135_v13  ;;  %v18736_v35 = vadd.f32 %v18735_v34, %v31359_v60  ;;  %v18748_v37 = vpop.f32.mrf.mxu1  ;;  %v381_v60 = vld [vmem:[%s29795_s8 + $0x2b8] sm:$0xff] }
 0x574   : > { %18967 = vmatpush.bf16.msra.mxu2 %v29143_v14  ;;  %v4582_v2 = vunpack.c.l.b16 %v381_v60  ;;  %v4583_v8 = vunpack.c.h.b16 %v381_v60  ;;  %v29222_v13 = vld [vmem:[%s29800_s12 + $0x2cf8] sm:$0xff]  ;;  %v4823_v14 = vpack.c.b16 %v4581_v5, %v4581_v5 }
 0x575   : > { %18980 = vmatpush.bf16.msra.mxu3 %v29151_v20  ;;  %18942 = vmatmul.bf16.vlgmr.msra.gmra.mxu0 %v4818_v21  ;;  %v18749_v40 = vadd.f32 %v18748_v37, %v18736_v35  ;;  %v29196_v20 = vld [vmem:[%s29800_s12 + $0x2c28] sm:$0xff]  ;;  %v29210_v34 = vld [vmem:[%s29800_s12 + $0x2c98] sm:$0xff] }
 0x576   : > { %18986 = vmatpush.bf16.msrb.mxu0 %v29166_v16  ;;  %18955 = vmatmul.bf16.vlgmr.msra.gmra.mxu1 %v4819_v24  ;;  %v4824_v12 = vpack.c.b16 %v4582_v2, %v4582_v2  ;;  %v4825_v15 = vpack.c.b16 %v4583_v8, %v4583_v8  ;;  %v29197_v16 = vld [vmem:[%s29800_s12 + $0x2c30] sm:$0xff]  ;;  %v29204_v21 = vld [vmem:[%s29800_s12 + $0x2c68] sm:$0xff]  ;;  %v29218_v37 = vld [vmem:[%s29800_s12 + $0x2cd8] sm:$0xff] }
 0x577   : > { %18999 = vmatpush.bf16.msrb.mxu1 %v29174_v17  ;;  %18968 = vmatmul.bf16.vlgmr.msra.gmra.mxu2 %v4820_v22  ;;  %v29205_v17 = vld [vmem:[%s29800_s12 + $0x2c70] sm:$0xff]  ;;  %v29212_v22 = vld [vmem:[%s29800_s12 + $0x2ca8] sm:$0xff]  ;;  %v29230_v60 = vld [vmem:[%s29800_s12 + $0x2d38] sm:$0xff] }
 0x578   : > { %19012 = vmatpush.bf16.msrb.mxu2 %v29182_v19  ;;  %18981 = vmatmul.bf16.vlgmr.msra.gmra.mxu3 %v4821_v25  ;;  %v29221_v19 = vld [vmem:[%s29800_s12 + $0x2cf0] sm:$0xff] }
 0x579   : > { %19025 = vmatpush.bf16.msrb.mxu3 %v29190_v23  ;;  %v29220_v23 = vld [vmem:[%s29800_s12 + $0x2ce8] sm:$0xff]  ;;  %v29245_v8 = vld [vmem:[%s29800_s12 + $0x2db0] sm:$0xff] }
 0x57a   : > { %18987 = vmatpush.bf16.msrb.mxu0 %v29165_v26  ;;  %v18761_v45 = vpop.f32.mrf.mxu2  ;;  %v18737_v49 = vpop.f32.mrf.mxu0  ;;  %v29195_v26 = vld [vmem:[%s29800_s12 + $0x2c20] sm:$0xff] }
 0x57b   : > { %19000 = vmatpush.bf16.msrb.mxu1 %v29173_v27  ;;  %v18762_v46 = vadd.f32 %v18761_v45, %v18749_v40  ;;  %v18774_v48 = vpop.f32.mrf.mxu3  ;;  %v18750_v52 = vpop.f32.mrf.mxu1  ;;  %v29217_v45 = vld [vmem:[%s29800_s12 + $0x2cd0] sm:$0xff]  ;;  %v382_v49 = vld [vmem:[%s29795_s8 + $0x2c0] sm:$0xff] }
 0x57c   : > { %19013 = vmatpush.bf16.msrb.mxu2 %v29181_v28  ;;  %v29203_v28 = vld [vmem:[%s29800_s12 + $0x2c60] sm:$0xff]  ;;  %v29216_v52 = vld [vmem:[%s29800_s12 + $0x2cc8] sm:$0xff]  ;;  %v4585_v59 = vunpack.c.h.b16 %v382_v49 }
 0x57d   : > { %19026 = vmatpush.bf16.msrb.mxu3 %v29189_v29  ;;  %v31396_v50 = vadd.f32 %v18774_v48, %v18762_v46  ;;  %v29211_v29 = vld [vmem:[%s29800_s12 + $0x2ca0] sm:$0xff]  ;;  %v29192_v46 = vld [vmem:[%s29800_s12 + $0x2c08] sm:$0xff] }
 0x57e   : > { %18988 = vmatpush.bf16.msrb.mxu0 %v29164_v30  ;;  %v29208_v48 = vld [vmem:[%s29800_s12 + $0x2c88] sm:$0xff] }
 0x57f   : > { %19001 = vmatpush.bf16.msrb.mxu1 %v29172_v31  ;;  %v29219_v31 = vld [vmem:[%s29800_s12 + $0x2ce0] sm:$0xff] }
 0x580   : > { %19014 = vmatpush.bf16.msrb.mxu2 %v29180_v32  ;;  %v29194_v32 = vld [vmem:[%s29800_s12 + $0x2c18] sm:$0xff] }
 0x581   : > { %19027 = vmatpush.bf16.msrb.mxu3 %v29188_v33  ;;  %v29202_v33 = vld [vmem:[%s29800_s12 + $0x2c58] sm:$0xff] }
 0x582   : > { %18989 = vmatpush.bf16.msrb.mxu0 %v29163_v36  ;;  %v18763_v61 = vpop.f32.mrf.mxu2 }
 0x583   : > { %19002 = vmatpush.bf16.msrb.mxu1 %v29171_v38  ;;  %v18776_v63 = vpop.f32.mrf.mxu3  ;;  %v29238_v61 = vld [vmem:[%s29800_s12 + $0x2d78] sm:$0xff] }
 0x584   : > { %19015 = vmatpush.bf16.msrb.mxu2 %v29179_v39  ;;  %v29246_v63 = vld [vmem:[%s29800_s12 + $0x2db8] sm:$0xff] }
 0x585   : > { %19028 = vmatpush.bf16.msrb.mxu3 %v29187_v41  ;;  %v29193_v41 = vld [vmem:[%s29800_s12 + $0x2c10] sm:$0xff] }
 0x586   : > { %18990 = vmatpush.bf16.msrb.mxu0 %v29162_v42 }
 0x587   : > { %19003 = vmatpush.bf16.msrb.mxu1 %v29170_v43  ;;  %v29201_v43 = vld [vmem:[%s29800_s12 + $0x2c50] sm:$0xff] }
 0x588   : > { %19016 = vmatpush.bf16.msrb.mxu2 %v29178_v44  ;;  %v29209_v44 = vld [vmem:[%s29800_s12 + $0x2c90] sm:$0xff] }
 0x589   : > { %19029 = vmatpush.bf16.msrb.mxu3 %v29186_v47  ;;  %v29200_v47 = vld [vmem:[%s29800_s12 + $0x2c48] sm:$0xff] }
 0x58a   : > { %18991 = vmatpush.bf16.msrb.mxu0 %v29161_v51 }
 0x58b   : > { %19004 = vmatpush.bf16.msrb.mxu1 %v29169_v53 }
 0x58c   : > { %19017 = vmatpush.bf16.msrb.mxu2 %v29177_v54  ;;  %v29191_v54 = vld [vmem:[%s29800_s12 + $0x2c00] sm:$0xff] }
 0x58d   : > { %19030 = vmatpush.bf16.msrb.mxu3 %v29185_v55  ;;  %v4584_v55 = vunpack.c.l.b16 %v382_v49 }
 0x58e   : > { %18992 = vmatpush.bf16.msrb.mxu0 %v29160_v56 }
 0x58f   : > { %19005 = vmatpush.bf16.msrb.mxu1 %v29168_v57  ;;  %v29199_v57 = vld [vmem:[%s29800_s12 + $0x2c40] sm:$0xff]  ;;  %v4826_v1 = vpack.c.b16 %v4584_v55, %v4584_v55 }
 0x590   : > { %19018 = vmatpush.bf16.msrb.mxu2 %v29176_v58  ;;  %v29207_v58 = vld [vmem:[%s29800_s12 + $0x2c80] sm:$0xff] }
 0x591   : > { %19031 = vmatpush.bf16.msrb.mxu3 %v29184_v62 }
 0x592   : > { %18993 = vmatpush.bf16.msrb.mxu0 %v29159_v0  ;;  %v18787_v24 = vpop.f32.mrf.mxu0  ;;  %v29215_v0 = vld [vmem:[%s29800_s12 + $0x2cc0] sm:$0xff] }
 0x593   : > { %19006 = vmatpush.bf16.msrb.mxu1 %v29167_v3  ;;  %v18788_v25 = vadd.f32 %v18787_v24, %v31396_v50  ;;  %v18800_v27 = vpop.f32.mrf.mxu1  ;;  %v383_v50 = vld [vmem:[%s29795_s8 + $0x2c8] sm:$0xff]  ;;  %v29254_v3 = vld [vmem:[%s29800_s12 + $0x2df8] sm:$0xff] }
 0x594   : > { %19019 = vmatpush.bf16.msrb.mxu2 %v29175_v4  ;;  %v4586_v56 = vunpack.c.l.b16 %v383_v50  ;;  %v4587_v62 = vunpack.c.h.b16 %v383_v50  ;;  %v4827_v4 = vpack.c.b16 %v4585_v59, %v4585_v59  ;;  %v29242_v24 = vld [vmem:[%s29800_s12 + $0x2d98] sm:$0xff] }
 0x595   : > { %19032 = vmatpush.bf16.msrb.mxu3 %v29183_v10  ;;  %18994 = vmatmul.bf16.vlgmr.msrb.gmra.mxu0 %v4822_v11  ;;  %v18801_v30 = vadd.f32 %v18800_v27, %v18788_v25  ;;  %v29228_v10 = vld [vmem:[%s29800_s12 + $0x2d28] sm:$0xff]  ;;  %v29250_v27 = vld [vmem:[%s29800_s12 + $0x2dd8] sm:$0xff] }
 0x596   : > { %19038 = vmatpush.bf16.msra.mxu0 %v29198_v6  ;;  %19007 = vmatmul.bf16.vlgmr.msrb.gmra.mxu1 %v4823_v14  ;;  %v4828_v2 = vpack.c.b16 %v4586_v56, %v4586_v56  ;;  %v4829_v5 = vpack.c.b16 %v4587_v62, %v4587_v62  ;;  %v29229_v6 = vld [vmem:[%s29800_s12 + $0x2d30] sm:$0xff]  ;;  %v29236_v11 = vld [vmem:[%s29800_s12 + $0x2d68] sm:$0xff]  ;;  %v29262_v50 = vld [vmem:[%s29800_s12 + $0x2e38] sm:$0xff] }
 0x597   : > { %19051 = vmatpush.bf16.msra.mxu1 %v29206_v7  ;;  %19020 = vmatmul.bf16.vlgmr.msrb.gmra.mxu2 %v4824_v12  ;;  %v29237_v7 = vld [vmem:[%s29800_s12 + $0x2d70] sm:$0xff]  ;;  %v29244_v12 = vld [vmem:[%s29800_s12 + $0x2da8] sm:$0xff] }
 0x598   : > { %19064 = vmatpush.bf16.msra.mxu2 %v29214_v9  ;;  %19033 = vmatmul.bf16.vlgmr.msrb.gmra.mxu3 %v4825_v15  ;;  %v29253_v9 = vld [vmem:[%s29800_s12 + $0x2df0] sm:$0xff] }
 0x599   : > { %19077 = vmatpush.bf16.msra.mxu3 %v29222_v13  ;;  %v29252_v13 = vld [vmem:[%s29800_s12 + $0x2de8] sm:$0xff]  ;;  %v29277_v62 = vld [vmem:[%s29800_s12 + $0x2eb0] sm:$0xff] }
 0x59a   : > { %19039 = vmatpush.bf16.msra.mxu0 %v29197_v16  ;;  %v18813_v35 = vpop.f32.mrf.mxu2  ;;  %v18789_v39 = vpop.f32.mrf.mxu0  ;;  %v29227_v16 = vld [vmem:[%s29800_s12 + $0x2d20] sm:$0xff] }
 0x59b   : > { %19052 = vmatpush.bf16.msra.mxu1 %v29205_v17  ;;  %v18814_v36 = vadd.f32 %v18813_v35, %v18801_v30  ;;  %v18826_v38 = vpop.f32.mrf.mxu3  ;;  %v18802_v42 = vpop.f32.mrf.mxu1  ;;  %v29249_v35 = vld [vmem:[%s29800_s12 + $0x2dd0] sm:$0xff] }
 0x59c   : > { %19065 = vmatpush.bf16.msra.mxu2 %v29213_v18  ;;  %v29235_v18 = vld [vmem:[%s29800_s12 + $0x2d60] sm:$0xff]  ;;  %v384_v39 = vld [vmem:[%s29795_s8 + $0x2d0] sm:$0xff]  ;;  %v29248_v42 = vld [vmem:[%s29800_s12 + $0x2dc8] sm:$0xff] }
 0x59d   : > { %19078 = vmatpush.bf16.msra.mxu3 %v29221_v19  ;;  %v31433_v40 = vadd.f32 %v18826_v38, %v18814_v36  ;;  %v29243_v19 = vld [vmem:[%s29800_s12 + $0x2da0] sm:$0xff]  ;;  %v29224_v36 = vld [vmem:[%s29800_s12 + $0x2d08] sm:$0xff]  ;;  %v4589_v49 = vunpack.c.h.b16 %v384_v39 }
 0x59e   : > { %19040 = vmatpush.bf16.msra.mxu0 %v29196_v20  ;;  %v29240_v38 = vld [vmem:[%s29800_s12 + $0x2d88] sm:$0xff] }
 0x59f   : > { %19053 = vmatpush.bf16.msra.mxu1 %v29204_v21  ;;  %v29251_v21 = vld [vmem:[%s29800_s12 + $0x2de0] sm:$0xff] }
 0x5a0   : > { %19066 = vmatpush.bf16.msra.mxu2 %v29212_v22  ;;  %v29226_v22 = vld [vmem:[%s29800_s12 + $0x2d18] sm:$0xff] }
 0x5a1   : > { %19079 = vmatpush.bf16.msra.mxu3 %v29220_v23  ;;  %v29234_v23 = vld [vmem:[%s29800_s12 + $0x2d58] sm:$0xff] }
 0x5a2   : > { %19041 = vmatpush.bf16.msra.mxu0 %v29195_v26  ;;  %v18815_v51 = vpop.f32.mrf.mxu2 }
 0x5a3   : > { %19054 = vmatpush.bf16.msra.mxu1 %v29203_v28  ;;  %v18828_v53 = vpop.f32.mrf.mxu3  ;;  %v29270_v51 = vld [vmem:[%s29800_s12 + $0x2e78] sm:$0xff] }
 0x5a4   : > { %19067 = vmatpush.bf16.msra.mxu2 %v29211_v29  ;;  %v29278_v53 = vld [vmem:[%s29800_s12 + $0x2eb8] sm:$0xff] }
 0x5a5   : > { %19080 = vmatpush.bf16.msra.mxu3 %v29219_v31  ;;  %v29225_v31 = vld [vmem:[%s29800_s12 + $0x2d10] sm:$0xff] }
 0x5a6   : > { %19042 = vmatpush.bf16.msra.mxu0 %v29194_v32 }
 0x5a7   : > { %19055 = vmatpush.bf16.msra.mxu1 %v29202_v33  ;;  %v29233_v33 = vld [vmem:[%s29800_s12 + $0x2d50] sm:$0xff] }
 0x5a8   : > { %19068 = vmatpush.bf16.msra.mxu2 %v29210_v34  ;;  %v29241_v34 = vld [vmem:[%s29800_s12 + $0x2d90] sm:$0xff] }
 0x5a9   : > { %19081 = vmatpush.bf16.msra.mxu3 %v29218_v37  ;;  %v29232_v37 = vld [vmem:[%s29800_s12 + $0x2d48] sm:$0xff] }
 0x5aa   : > { %19043 = vmatpush.bf16.msra.mxu0 %v29193_v41 }
 0x5ab   : > { %19056 = vmatpush.bf16.msra.mxu1 %v29201_v43 }
 0x5ac   : > { %19069 = vmatpush.bf16.msra.mxu2 %v29209_v44  ;;  %v29223_v44 = vld [vmem:[%s29800_s12 + $0x2d00] sm:$0xff] }
 0x5ad   : > { %19082 = vmatpush.bf16.msra.mxu3 %v29217_v45  ;;  %v4588_v45 = vunpack.c.l.b16 %v384_v39 }
 0x5ae   : > { %19044 = vmatpush.bf16.msra.mxu0 %v29192_v46 }
 0x5af   : > { %19057 = vmatpush.bf16.msra.mxu1 %v29200_v47  ;;  %v29231_v47 = vld [vmem:[%s29800_s12 + $0x2d40] sm:$0xff]  ;;  %v4830_v55 = vpack.c.b16 %v4588_v45, %v4588_v45 }
 0x5b0   : > { %19070 = vmatpush.bf16.msra.mxu2 %v29208_v48  ;;  %v29239_v48 = vld [vmem:[%s29800_s12 + $0x2d80] sm:$0xff] }
 0x5b1   : > { %19083 = vmatpush.bf16.msra.mxu3 %v29216_v52 }
 0x5b2   : > { %19045 = vmatpush.bf16.msra.mxu0 %v29191_v54  ;;  %v18839_v14 = vpop.f32.mrf.mxu0  ;;  %v29247_v54 = vld [vmem:[%s29800_s12 + $0x2dc0] sm:$0xff] }
 0x5b3   : > { %19058 = vmatpush.bf16.msra.mxu1 %v29199_v57  ;;  %v18840_v15 = vadd.f32 %v18839_v14, %v31433_v40  ;;  %v18852_v17 = vpop.f32.mrf.mxu1  ;;  %v385_v40 = vld [vmem:[%s29795_s8 + $0x2d8] sm:$0xff] }
 0x5b4   : > { %19071 = vmatpush.bf16.msra.mxu2 %v29207_v58  ;;  %v4590_v46 = vunpack.c.l.b16 %v385_v40  ;;  %v4591_v52 = vunpack.c.h.b16 %v385_v40  ;;  %v29286_v57 = vld [vmem:[%s29800_s12 + $0x2ef8] sm:$0xff]  ;;  %v4831_v58 = vpack.c.b16 %v4589_v49, %v4589_v49 }
 0x5b5   : > { %19084 = vmatpush.bf16.msra.mxu3 %v29215_v0  ;;  %19046 = vmatmul.bf16.vlgmr.msra.gmra.mxu0 %v4826_v1  ;;  %v18853_v20 = vadd.f32 %v18852_v17, %v18840_v15  ;;  %v29260_v0 = vld [vmem:[%s29800_s12 + $0x2e28] sm:$0xff]  ;;  %v29274_v14 = vld [vmem:[%s29800_s12 + $0x2e98] sm:$0xff] }
 0x5b6   : > { %19090 = vmatpush.bf16.msrb.mxu0 %v29230_v60  ;;  %19059 = vmatmul.bf16.vlgmr.msra.gmra.mxu1 %v4827_v4  ;;  %v4832_v56 = vpack.c.b16 %v4590_v46, %v4590_v46  ;;  %v4833_v59 = vpack.c.b16 %v4591_v52, %v4591_v52  ;;  %v29261_v60 = vld [vmem:[%s29800_s12 + $0x2e30] sm:$0xff]  ;;  %v29268_v1 = vld [vmem:[%s29800_s12 + $0x2e68] sm:$0xff]  ;;  %v29282_v17 = vld [vmem:[%s29800_s12 + $0x2ed8] sm:$0xff] }
 0x5b7   : > { %19103 = vmatpush.bf16.msrb.mxu1 %v29238_v61  ;;  %19072 = vmatmul.bf16.vlgmr.msra.gmra.mxu2 %v4828_v2  ;;  %v29269_v61 = vld [vmem:[%s29800_s12 + $0x2e70] sm:$0xff]  ;;  %v29276_v2 = vld [vmem:[%s29800_s12 + $0x2ea8] sm:$0xff]  ;;  %v29294_v40 = vld [vmem:[%s29800_s12 + $0x2f38] sm:$0xff] }
 0x5b8   : > { %19116 = vmatpush.bf16.msrb.mxu2 %v29246_v63  ;;  %19085 = vmatmul.bf16.vlgmr.msra.gmra.mxu3 %v4829_v5  ;;  %v29285_v63 = vld [vmem:[%s29800_s12 + $0x2ef0] sm:$0xff] }
 0x5b9   : > { %19129 = vmatpush.bf16.msrb.mxu3 %v29254_v3  ;;  %v29284_v3 = vld [vmem:[%s29800_s12 + $0x2ee8] sm:$0xff]  ;;  %v29309_v52 = vld [vmem:[%s29800_s12 + $0x2fb0] sm:$0xff] }
 0x5ba   : > { %19091 = vmatpush.bf16.msrb.mxu0 %v29229_v6  ;;  %v18865_v25 = vpop.f32.mrf.mxu2  ;;  %v18841_v29 = vpop.f32.mrf.mxu0  ;;  %v29259_v6 = vld [vmem:[%s29800_s12 + $0x2e20] sm:$0xff] }
 0x5bb   : > { %19104 = vmatpush.bf16.msrb.mxu1 %v29237_v7  ;;  %v18866_v26 = vadd.f32 %v18865_v25, %v18853_v20  ;;  %v18878_v28 = vpop.f32.mrf.mxu3  ;;  %v18854_v32 = vpop.f32.mrf.mxu1  ;;  %v29281_v25 = vld [vmem:[%s29800_s12 + $0x2ed0] sm:$0xff]  ;;  %v386_v29 = vld [vmem:[%s29795_s8 + $0x2e0] sm:$0xff] }
 0x5bc   : > { %19117 = vmatpush.bf16.msrb.mxu2 %v29245_v8  ;;  %v29267_v8 = vld [vmem:[%s29800_s12 + $0x2e60] sm:$0xff]  ;;  %v29280_v32 = vld [vmem:[%s29800_s12 + $0x2ec8] sm:$0xff]  ;;  %v4593_v39 = vunpack.c.h.b16 %v386_v29 }
 0x5bd   : > { %19130 = vmatpush.bf16.msrb.mxu3 %v29253_v9  ;;  %v31470_v30 = vadd.f32 %v18878_v28, %v18866_v26  ;;  %v29275_v9 = vld [vmem:[%s29800_s12 + $0x2ea0] sm:$0xff]  ;;  %v29256_v26 = vld [vmem:[%s29800_s12 + $0x2e08] sm:$0xff] }
 0x5be   : > { %19092 = vmatpush.bf16.msrb.mxu0 %v29228_v10  ;;  %v29272_v28 = vld [vmem:[%s29800_s12 + $0x2e88] sm:$0xff] }
 0x5bf   : > { %19105 = vmatpush.bf16.msrb.mxu1 %v29236_v11  ;;  %v29283_v11 = vld [vmem:[%s29800_s12 + $0x2ee0] sm:$0xff] }
 0x5c0   : > { %19118 = vmatpush.bf16.msrb.mxu2 %v29244_v12  ;;  %v29258_v12 = vld [vmem:[%s29800_s12 + $0x2e18] sm:$0xff] }
 0x5c1   : > { %19131 = vmatpush.bf16.msrb.mxu3 %v29252_v13  ;;  %v29266_v13 = vld [vmem:[%s29800_s12 + $0x2e58] sm:$0xff] }
 0x5c2   : > { %19093 = vmatpush.bf16.msrb.mxu0 %v29227_v16  ;;  %v18867_v41 = vpop.f32.mrf.mxu2 }
 0x5c3   : > { %19106 = vmatpush.bf16.msrb.mxu1 %v29235_v18  ;;  %v18880_v43 = vpop.f32.mrf.mxu3  ;;  %v29302_v41 = vld [vmem:[%s29800_s12 + $0x2f78] sm:$0xff] }
 0x5c4   : > { %19119 = vmatpush.bf16.msrb.mxu2 %v29243_v19  ;;  %v29310_v43 = vld [vmem:[%s29800_s12 + $0x2fb8] sm:$0xff] }
 0x5c5   : > { %19132 = vmatpush.bf16.msrb.mxu3 %v29251_v21  ;;  %v29257_v21 = vld [vmem:[%s29800_s12 + $0x2e10] sm:$0xff] }
 0x5c6   : > { %19094 = vmatpush.bf16.msrb.mxu0 %v29226_v22 }
 0x5c7   : > { %19107 = vmatpush.bf16.msrb.mxu1 %v29234_v23  ;;  %v29265_v23 = vld [vmem:[%s29800_s12 + $0x2e50] sm:$0xff] }
 0x5c8   : > { %19120 = vmatpush.bf16.msrb.mxu2 %v29242_v24  ;;  %v29273_v24 = vld [vmem:[%s29800_s12 + $0x2e90] sm:$0xff] }
 0x5c9   : > { %19133 = vmatpush.bf16.msrb.mxu3 %v29250_v27  ;;  %v29264_v27 = vld [vmem:[%s29800_s12 + $0x2e48] sm:$0xff] }
 0x5ca   : > { %19095 = vmatpush.bf16.msrb.mxu0 %v29225_v31 }
 0x5cb   : > { %19108 = vmatpush.bf16.msrb.mxu1 %v29233_v33 }
 0x5cc   : > { %19121 = vmatpush.bf16.msrb.mxu2 %v29241_v34  ;;  %v29255_v34 = vld [vmem:[%s29800_s12 + $0x2e00] sm:$0xff] }
 0x5cd   : > { %19134 = vmatpush.bf16.msrb.mxu3 %v29249_v35  ;;  %v4592_v35 = vunpack.c.l.b16 %v386_v29 }
 0x5ce   : > { %19096 = vmatpush.bf16.msrb.mxu0 %v29224_v36 }
 0x5cf   : > { %19109 = vmatpush.bf16.msrb.mxu1 %v29232_v37  ;;  %v29263_v37 = vld [vmem:[%s29800_s12 + $0x2e40] sm:$0xff]  ;;  %v4834_v45 = vpack.c.b16 %v4592_v35, %v4592_v35 }
 0x5d0   : > { %19122 = vmatpush.bf16.msrb.mxu2 %v29240_v38  ;;  %v29271_v38 = vld [vmem:[%s29800_s12 + $0x2e80] sm:$0xff] }
 0x5d1   : > { %19135 = vmatpush.bf16.msrb.mxu3 %v29248_v42 }
 0x5d2   : > { %19097 = vmatpush.bf16.msrb.mxu0 %v29223_v44  ;;  %v18891_v4 = vpop.f32.mrf.mxu0  ;;  %v29279_v44 = vld [vmem:[%s29800_s12 + $0x2ec0] sm:$0xff] }
 0x5d3   : > { %19110 = vmatpush.bf16.msrb.mxu1 %v29231_v47  ;;  %v18892_v5 = vadd.f32 %v18891_v4, %v31470_v30  ;;  %v18904_v7 = vpop.f32.mrf.mxu1  ;;  %v387_v30 = vld [vmem:[%s29795_s8 + $0x2e8] sm:$0xff]  ;;  %v29318_v47 = vld [vmem:[%s29800_s12 + $0x2ff8] sm:$0xff] }
 0x5d4   : > { %19123 = vmatpush.bf16.msrb.mxu2 %v29239_v48  ;;  %v4594_v36 = vunpack.c.l.b16 %v387_v30  ;;  %v4595_v42 = vunpack.c.h.b16 %v387_v30  ;;  %v4835_v48 = vpack.c.b16 %v4593_v39, %v4593_v39  ;;  %v29306_v4 = vld [vmem:[%s29800_s12 + $0x2f98] sm:$0xff] }
 0x5d5   : > { %19136 = vmatpush.bf16.msrb.mxu3 %v29247_v54  ;;  %19098 = vmatmul.bf16.vlgmr.msrb.gmra.mxu0 %v4830_v55  ;;  %v18905_v10 = vadd.f32 %v18904_v7, %v18892_v5  ;;  %v29292_v54 = vld [vmem:[%s29800_s12 + $0x2f28] sm:$0xff]  ;;  %v29314_v7 = vld [vmem:[%s29800_s12 + $0x2fd8] sm:$0xff] }
 0x5d6   : > { %19142 = vmatpush.bf16.msra.mxu0 %v29262_v50  ;;  %19111 = vmatmul.bf16.vlgmr.msrb.gmra.mxu1 %v4831_v58  ;;  %v4836_v46 = vpack.c.b16 %v4594_v36, %v4594_v36  ;;  %v4837_v49 = vpack.c.b16 %v4595_v42, %v4595_v42  ;;  %v29293_v50 = vld [vmem:[%s29800_s12 + $0x2f30] sm:$0xff]  ;;  %v29300_v55 = vld [vmem:[%s29800_s12 + $0x2f68] sm:$0xff]  ;;  %v29326_v30 = vld [vmem:[%s29800_s12 + $0x3038] sm:$0xff] }
 0x5d7   : > { %19155 = vmatpush.bf16.msra.mxu1 %v29270_v51  ;;  %19124 = vmatmul.bf16.vlgmr.msrb.gmra.mxu2 %v4832_v56  ;;  %v29301_v51 = vld [vmem:[%s29800_s12 + $0x2f70] sm:$0xff]  ;;  %v29308_v56 = vld [vmem:[%s29800_s12 + $0x2fa8] sm:$0xff] }
 0x5d8   : > { %19168 = vmatpush.bf16.msra.mxu2 %v29278_v53  ;;  %19137 = vmatmul.bf16.vlgmr.msrb.gmra.mxu3 %v4833_v59  ;;  %v29317_v53 = vld [vmem:[%s29800_s12 + $0x2ff0] sm:$0xff] }
 0x5d9   : > { %19181 = vmatpush.bf16.msra.mxu3 %v29286_v57  ;;  %v29316_v57 = vld [vmem:[%s29800_s12 + $0x2fe8] sm:$0xff]  ;;  %v29341_v42 = vld [vmem:[%s29800_s12 + $0x30b0] sm:$0xff] }
 0x5da   : > { %19143 = vmatpush.bf16.msra.mxu0 %v29261_v60  ;;  %v18917_v15 = vpop.f32.mrf.mxu2  ;;  %v18893_v19 = vpop.f32.mrf.mxu0  ;;  %v29291_v60 = vld [vmem:[%s29800_s12 + $0x2f20] sm:$0xff] }
 0x5db   : > { %19156 = vmatpush.bf16.msra.mxu1 %v29269_v61  ;;  %v18918_v16 = vadd.f32 %v18917_v15, %v18905_v10  ;;  %v18930_v18 = vpop.f32.mrf.mxu3  ;;  %v18906_v22 = vpop.f32.mrf.mxu1  ;;  %v29313_v15 = vld [vmem:[%s29800_s12 + $0x2fd0] sm:$0xff] }
 0x5dc   : > { %19169 = vmatpush.bf16.msra.mxu2 %v29277_v62  ;;  %v29299_v62 = vld [vmem:[%s29800_s12 + $0x2f60] sm:$0xff]  ;;  %v388_v19 = vld [vmem:[%s29795_s8 + $0x2f0] sm:$0xff]  ;;  %v29312_v22 = vld [vmem:[%s29800_s12 + $0x2fc8] sm:$0xff] }
 0x5dd   : > { %19182 = vmatpush.bf16.msra.mxu3 %v29285_v63  ;;  %v31507_v20 = vadd.f32 %v18930_v18, %v18918_v16  ;;  %v29307_v63 = vld [vmem:[%s29800_s12 + $0x2fa0] sm:$0xff]  ;;  %v29288_v16 = vld [vmem:[%s29800_s12 + $0x2f08] sm:$0xff]  ;;  %v4597_v29 = vunpack.c.h.b16 %v388_v19 }
 0x5de   : > { %19144 = vmatpush.bf16.msra.mxu0 %v29260_v0  ;;  %v29304_v18 = vld [vmem:[%s29800_s12 + $0x2f88] sm:$0xff] }
 0x5df   : > { %19157 = vmatpush.bf16.msra.mxu1 %v29268_v1  ;;  %v29315_v1 = vld [vmem:[%s29800_s12 + $0x2fe0] sm:$0xff] }
 0x5e0   : > { %19170 = vmatpush.bf16.msra.mxu2 %v29276_v2  ;;  %v29290_v2 = vld [vmem:[%s29800_s12 + $0x2f18] sm:$0xff] }
 0x5e1   : > { %19183 = vmatpush.bf16.msra.mxu3 %v29284_v3  ;;  %v29298_v3 = vld [vmem:[%s29800_s12 + $0x2f58] sm:$0xff] }
 0x5e2   : > { %19145 = vmatpush.bf16.msra.mxu0 %v29259_v6  ;;  %v18919_v31 = vpop.f32.mrf.mxu2 }
 0x5e3   : > { %19158 = vmatpush.bf16.msra.mxu1 %v29267_v8  ;;  %v18932_v33 = vpop.f32.mrf.mxu3  ;;  %v29334_v31 = vld [vmem:[%s29800_s12 + $0x3078] sm:$0xff] }
 0x5e4   : > { %19171 = vmatpush.bf16.msra.mxu2 %v29275_v9  ;;  %v29342_v33 = vld [vmem:[%s29800_s12 + $0x30b8] sm:$0xff] }
 0x5e5   : > { %19184 = vmatpush.bf16.msra.mxu3 %v29283_v11  ;;  %v29289_v11 = vld [vmem:[%s29800_s12 + $0x2f10] sm:$0xff] }
 0x5e6   : > { %19146 = vmatpush.bf16.msra.mxu0 %v29258_v12 }
 0x5e7   : > { %19159 = vmatpush.bf16.msra.mxu1 %v29266_v13  ;;  %v29297_v13 = vld [vmem:[%s29800_s12 + $0x2f50] sm:$0xff] }
 0x5e8   : > { %19172 = vmatpush.bf16.msra.mxu2 %v29274_v14  ;;  %v29305_v14 = vld [vmem:[%s29800_s12 + $0x2f90] sm:$0xff] }
 0x5e9   : > { %19185 = vmatpush.bf16.msra.mxu3 %v29282_v17  ;;  %v29296_v17 = vld [vmem:[%s29800_s12 + $0x2f48] sm:$0xff] }
 0x5ea   : > { %19147 = vmatpush.bf16.msra.mxu0 %v29257_v21 }
 0x5eb   : > { %19160 = vmatpush.bf16.msra.mxu1 %v29265_v23 }
 0x5ec   : > { %19173 = vmatpush.bf16.msra.mxu2 %v29273_v24  ;;  %v29287_v24 = vld [vmem:[%s29800_s12 + $0x2f00] sm:$0xff] }
 0x5ed   : > { %19186 = vmatpush.bf16.msra.mxu3 %v29281_v25  ;;  %v4596_v25 = vunpack.c.l.b16 %v388_v19 }
 0x5ee   : > { %19148 = vmatpush.bf16.msra.mxu0 %v29256_v26 }
 0x5ef   : > { %19161 = vmatpush.bf16.msra.mxu1 %v29264_v27  ;;  %v29295_v27 = vld [vmem:[%s29800_s12 + $0x2f40] sm:$0xff]  ;;  %v4838_v35 = vpack.c.b16 %v4596_v25, %v4596_v25 }
 0x5f0   : > { %19174 = vmatpush.bf16.msra.mxu2 %v29272_v28  ;;  %v29303_v28 = vld [vmem:[%s29800_s12 + $0x2f80] sm:$0xff] }
 0x5f1   : > { %19187 = vmatpush.bf16.msra.mxu3 %v29280_v32 }
 0x5f2   : > { %19149 = vmatpush.bf16.msra.mxu0 %v29255_v34  ;;  %v18943_v58 = vpop.f32.mrf.mxu0  ;;  %v29311_v34 = vld [vmem:[%s29800_s12 + $0x2fc0] sm:$0xff] }
 0x5f3   : > { %19162 = vmatpush.bf16.msra.mxu1 %v29263_v37  ;;  %v18944_v59 = vadd.f32 %v18943_v58, %v31507_v20  ;;  %v18956_v61 = vpop.f32.mrf.mxu1  ;;  %v389_v20 = vld [vmem:[%s29795_s8 + $0x2f8] sm:$0xff] }
 0x5f4   : > { %19175 = vmatpush.bf16.msra.mxu2 %v29271_v38  ;;  %v4598_v26 = vunpack.c.l.b16 %v389_v20  ;;  %v4599_v32 = vunpack.c.h.b16 %v389_v20  ;;  %v29350_v37 = vld [vmem:[%s29800_s12 + $0x30f8] sm:$0xff]  ;;  %v4839_v38 = vpack.c.b16 %v4597_v29, %v4597_v29 }
 0x5f5   : > { %19188 = vmatpush.bf16.msra.mxu3 %v29279_v44  ;;  %19150 = vmatmul.bf16.vlgmr.msra.gmra.mxu0 %v4834_v45  ;;  %v18957_v0 = vadd.f32 %v18956_v61, %v18944_v59  ;;  %v29324_v44 = vld [vmem:[%s29800_s12 + $0x3028] sm:$0xff]  ;;  %v29338_v58 = vld [vmem:[%s29800_s12 + $0x3098] sm:$0xff] }
 0x5f6   : > { %19194 = vmatpush.bf16.msrb.mxu0 %v29294_v40  ;;  %19163 = vmatmul.bf16.vlgmr.msra.gmra.mxu1 %v4835_v48  ;;  %v4840_v36 = vpack.c.b16 %v4598_v26, %v4598_v26  ;;  %v4841_v39 = vpack.c.b16 %v4599_v32, %v4599_v32  ;;  %v29325_v40 = vld [vmem:[%s29800_s12 + $0x3030] sm:$0xff]  ;;  %v29332_v45 = vld [vmem:[%s29800_s12 + $0x3068] sm:$0xff]  ;;  %v29346_v61 = vld [vmem:[%s29800_s12 + $0x30d8] sm:$0xff] }
 0x5f7   : > { %19207 = vmatpush.bf16.msrb.mxu1 %v29302_v41  ;;  %19176 = vmatmul.bf16.vlgmr.msra.gmra.mxu2 %v4836_v46  ;;  %v29333_v41 = vld [vmem:[%s29800_s12 + $0x3070] sm:$0xff]  ;;  %v29340_v46 = vld [vmem:[%s29800_s12 + $0x30a8] sm:$0xff]  ;;  %v29358_v20 = vld [vmem:[%s29800_s12 + $0x3138] sm:$0xff] }
 0x5f8   : > { %19220 = vmatpush.bf16.msrb.mxu2 %v29310_v43  ;;  %19189 = vmatmul.bf16.vlgmr.msra.gmra.mxu3 %v4837_v49  ;;  %v29349_v43 = vld [vmem:[%s29800_s12 + $0x30f0] sm:$0xff] }
 0x5f9   : > { %19233 = vmatpush.bf16.msrb.mxu3 %v29318_v47  ;;  %v29348_v47 = vld [vmem:[%s29800_s12 + $0x30e8] sm:$0xff]  ;;  %v29373_v32 = vld [vmem:[%s29800_s12 + $0x31b0] sm:$0xff] }
 0x5fa   : > { %19195 = vmatpush.bf16.msrb.mxu0 %v29293_v50  ;;  %v18969_v5 = vpop.f32.mrf.mxu2  ;;  %v18945_v9 = vpop.f32.mrf.mxu0  ;;  %v29323_v50 = vld [vmem:[%s29800_s12 + $0x3020] sm:$0xff] }
 0x5fb   : > { %19208 = vmatpush.bf16.msrb.mxu1 %v29301_v51  ;;  %v18970_v6 = vadd.f32 %v18969_v5, %v18957_v0  ;;  %v18982_v8 = vpop.f32.mrf.mxu3  ;;  %v18958_v12 = vpop.f32.mrf.mxu1  ;;  %v29345_v5 = vld [vmem:[%s29800_s12 + $0x30d0] sm:$0xff]  ;;  %v390_v9 = vld [vmem:[%s29795_s8 + $0x300] sm:$0xff] }
 0x5fc   : > { %19221 = vmatpush.bf16.msrb.mxu2 %v29309_v52  ;;  %v29331_v52 = vld [vmem:[%s29800_s12 + $0x3060] sm:$0xff]  ;;  %v29344_v12 = vld [vmem:[%s29800_s12 + $0x30c8] sm:$0xff]  ;;  %v4601_v19 = vunpack.c.h.b16 %v390_v9 }
 0x5fd   : > { %19234 = vmatpush.bf16.msrb.mxu3 %v29317_v53  ;;  %v31544_v10 = vadd.f32 %v18982_v8, %v18970_v6  ;;  %v29339_v53 = vld [vmem:[%s29800_s12 + $0x30a0] sm:$0xff]  ;;  %v29320_v6 = vld [vmem:[%s29800_s12 + $0x3008] sm:$0xff] }
 0x5fe   : > { %19196 = vmatpush.bf16.msrb.mxu0 %v29292_v54  ;;  %v29336_v8 = vld [vmem:[%s29800_s12 + $0x3088] sm:$0xff] }
 0x5ff   : > { %19209 = vmatpush.bf16.msrb.mxu1 %v29300_v55  ;;  %v29347_v55 = vld [vmem:[%s29800_s12 + $0x30e0] sm:$0xff] }
 0x600   : > { %19222 = vmatpush.bf16.msrb.mxu2 %v29308_v56  ;;  %v29322_v56 = vld [vmem:[%s29800_s12 + $0x3018] sm:$0xff] }
 0x601   : > { %19235 = vmatpush.bf16.msrb.mxu3 %v29316_v57  ;;  %v29330_v57 = vld [vmem:[%s29800_s12 + $0x3058] sm:$0xff] }
 0x602   : > { %19197 = vmatpush.bf16.msrb.mxu0 %v29291_v60  ;;  %v18971_v21 = vpop.f32.mrf.mxu2 }
 0x603   : > { %19210 = vmatpush.bf16.msrb.mxu1 %v29299_v62  ;;  %v18984_v23 = vpop.f32.mrf.mxu3  ;;  %v29366_v21 = vld [vmem:[%s29800_s12 + $0x3178] sm:$0xff] }
 0x604   : > { %19223 = vmatpush.bf16.msrb.mxu2 %v29307_v63  ;;  %v29374_v23 = vld [vmem:[%s29800_s12 + $0x31b8] sm:$0xff] }
 0x605   : > { %19236 = vmatpush.bf16.msrb.mxu3 %v29315_v1  ;;  %v29321_v1 = vld [vmem:[%s29800_s12 + $0x3010] sm:$0xff] }
 0x606   : > { %19198 = vmatpush.bf16.msrb.mxu0 %v29290_v2 }
 0x607   : > { %19211 = vmatpush.bf16.msrb.mxu1 %v29298_v3  ;;  %v29329_v3 = vld [vmem:[%s29800_s12 + $0x3050] sm:$0xff] }
 0x608   : > { %19224 = vmatpush.bf16.msrb.mxu2 %v29306_v4  ;;  %v29337_v4 = vld [vmem:[%s29800_s12 + $0x3090] sm:$0xff] }
 0x609   : > { %19237 = vmatpush.bf16.msrb.mxu3 %v29314_v7  ;;  %v29328_v7 = vld [vmem:[%s29800_s12 + $0x3048] sm:$0xff] }
 0x60a   : > { %19199 = vmatpush.bf16.msrb.mxu0 %v29289_v11 }
 0x60b   : > { %19212 = vmatpush.bf16.msrb.mxu1 %v29297_v13 }
 0x60c   : > { %19225 = vmatpush.bf16.msrb.mxu2 %v29305_v14  ;;  %v29319_v14 = vld [vmem:[%s29800_s12 + $0x3000] sm:$0xff] }
 0x60d   : > { %19238 = vmatpush.bf16.msrb.mxu3 %v29313_v15  ;;  %v4600_v15 = vunpack.c.l.b16 %v390_v9 }
 0x60e   : > { %19200 = vmatpush.bf16.msrb.mxu0 %v29288_v16 }
 0x60f   : > { %19213 = vmatpush.bf16.msrb.mxu1 %v29296_v17  ;;  %v29327_v17 = vld [vmem:[%s29800_s12 + $0x3040] sm:$0xff]  ;;  %v4842_v25 = vpack.c.b16 %v4600_v15, %v4600_v15 }
 0x610   : > { %19226 = vmatpush.bf16.msrb.mxu2 %v29304_v18  ;;  %v29335_v18 = vld [vmem:[%s29800_s12 + $0x3080] sm:$0xff] }
 0x611   : > { %19239 = vmatpush.bf16.msrb.mxu3 %v29312_v22 }
 0x612   : > { %19201 = vmatpush.bf16.msrb.mxu0 %v29287_v24  ;;  %v18995_v48 = vpop.f32.mrf.mxu0  ;;  %v29343_v24 = vld [vmem:[%s29800_s12 + $0x30c0] sm:$0xff] }
 0x613   : > { %19214 = vmatpush.bf16.msrb.mxu1 %v29295_v27  ;;  %v18996_v49 = vadd.f32 %v18995_v48, %v31544_v10  ;;  %v19008_v51 = vpop.f32.mrf.mxu1  ;;  %v391_v10 = vld [vmem:[%s29795_s8 + $0x308] sm:$0xff]  ;;  %v29382_v27 = vld [vmem:[%s29800_s12 + $0x31f8] sm:$0xff] }
 0x614   : > { %19227 = vmatpush.bf16.msrb.mxu2 %v29303_v28  ;;  %v4602_v16 = vunpack.c.l.b16 %v391_v10  ;;  %v4603_v22 = vunpack.c.h.b16 %v391_v10  ;;  %v4843_v28 = vpack.c.b16 %v4601_v19, %v4601_v19  ;;  %v29370_v48 = vld [vmem:[%s29800_s12 + $0x3198] sm:$0xff] }
 0x615   : > { %19240 = vmatpush.bf16.msrb.mxu3 %v29311_v34  ;;  %19202 = vmatmul.bf16.vlgmr.msrb.gmra.mxu0 %v4838_v35  ;;  %v19009_v54 = vadd.f32 %v19008_v51, %v18996_v49  ;;  %v29356_v34 = vld [vmem:[%s29800_s12 + $0x3128] sm:$0xff]  ;;  %v29378_v51 = vld [vmem:[%s29800_s12 + $0x31d8] sm:$0xff] }
 0x616   : > { %19246 = vmatpush.bf16.msra.mxu0 %v29326_v30  ;;  %19215 = vmatmul.bf16.vlgmr.msrb.gmra.mxu1 %v4839_v38  ;;  %v4844_v26 = vpack.c.b16 %v4602_v16, %v4602_v16  ;;  %v4845_v29 = vpack.c.b16 %v4603_v22, %v4603_v22  ;;  %v29357_v30 = vld [vmem:[%s29800_s12 + $0x3130] sm:$0xff]  ;;  %v29364_v35 = vld [vmem:[%s29800_s12 + $0x3168] sm:$0xff]  ;;  %v29390_v10 = vld [vmem:[%s29800_s12 + $0x3238] sm:$0xff] }
 0x617   : > { %19259 = vmatpush.bf16.msra.mxu1 %v29334_v31  ;;  %19228 = vmatmul.bf16.vlgmr.msrb.gmra.mxu2 %v4840_v36  ;;  %v29365_v31 = vld [vmem:[%s29800_s12 + $0x3170] sm:$0xff]  ;;  %v29372_v36 = vld [vmem:[%s29800_s12 + $0x31a8] sm:$0xff] }
 0x618   : > { %19272 = vmatpush.bf16.msra.mxu2 %v29342_v33  ;;  %19241 = vmatmul.bf16.vlgmr.msrb.gmra.mxu3 %v4841_v39  ;;  %v29381_v33 = vld [vmem:[%s29800_s12 + $0x31f0] sm:$0xff] }
 0x619   : > { %19285 = vmatpush.bf16.msra.mxu3 %v29350_v37  ;;  %v29380_v37 = vld [vmem:[%s29800_s12 + $0x31e8] sm:$0xff]  ;;  %v29405_v22 = vld [vmem:[%s29800_s12 + $0x32b0] sm:$0xff] }
 0x61a   : > { %19247 = vmatpush.bf16.msra.mxu0 %v29325_v40  ;;  %v19021_v59 = vpop.f32.mrf.mxu2  ;;  %v18997_v63 = vpop.f32.mrf.mxu0  ;;  %v29355_v40 = vld [vmem:[%s29800_s12 + $0x3120] sm:$0xff] }
 0x61b   : > { %19260 = vmatpush.bf16.msra.mxu1 %v29333_v41  ;;  %v19022_v60 = vadd.f32 %v19021_v59, %v19009_v54  ;;  %v19034_v62 = vpop.f32.mrf.mxu3  ;;  %v19010_v2 = vpop.f32.mrf.mxu1  ;;  %v29377_v59 = vld [vmem:[%s29800_s12 + $0x31d0] sm:$0xff] }
 0x61c   : > { %19273 = vmatpush.bf16.msra.mxu2 %v29341_v42  ;;  %v29363_v42 = vld [vmem:[%s29800_s12 + $0x3160] sm:$0xff]  ;;  %v392_v63 = vld [vmem:[%s29795_s8 + $0x310] sm:$0xff]  ;;  %v29376_v2 = vld [vmem:[%s29800_s12 + $0x31c8] sm:$0xff] }
 0x61d   : > { %19286 = vmatpush.bf16.msra.mxu3 %v29349_v43  ;;  %v31581_v0 = vadd.f32 %v19034_v62, %v19022_v60  ;;  %v29371_v43 = vld [vmem:[%s29800_s12 + $0x31a0] sm:$0xff]  ;;  %v29352_v60 = vld [vmem:[%s29800_s12 + $0x3108] sm:$0xff]  ;;  %v4605_v9 = vunpack.c.h.b16 %v392_v63 }
 0x61e   : > { %19248 = vmatpush.bf16.msra.mxu0 %v29324_v44  ;;  %v29368_v62 = vld [vmem:[%s29800_s12 + $0x3188] sm:$0xff] }
 0x61f   : > { %19261 = vmatpush.bf16.msra.mxu1 %v29332_v45  ;;  %v29379_v45 = vld [vmem:[%s29800_s12 + $0x31e0] sm:$0xff] }
 0x620   : > { %19274 = vmatpush.bf16.msra.mxu2 %v29340_v46  ;;  %v29354_v46 = vld [vmem:[%s29800_s12 + $0x3118] sm:$0xff] }
 0x621   : > { %19287 = vmatpush.bf16.msra.mxu3 %v29348_v47  ;;  %v29362_v47 = vld [vmem:[%s29800_s12 + $0x3158] sm:$0xff] }
 0x622   : > { %19249 = vmatpush.bf16.msra.mxu0 %v29323_v50  ;;  %v19023_v11 = vpop.f32.mrf.mxu2 }
 0x623   : > { %19262 = vmatpush.bf16.msra.mxu1 %v29331_v52  ;;  %v19036_v13 = vpop.f32.mrf.mxu3  ;;  %v29398_v11 = vld [vmem:[%s29800_s12 + $0x3278] sm:$0xff] }
 0x624   : > { %19275 = vmatpush.bf16.msra.mxu2 %v29339_v53  ;;  %v29406_v13 = vld [vmem:[%s29800_s12 + $0x32b8] sm:$0xff] }
 0x625   : > { %19288 = vmatpush.bf16.msra.mxu3 %v29347_v55  ;;  %v29353_v55 = vld [vmem:[%s29800_s12 + $0x3110] sm:$0xff] }
 0x626   : > { %19250 = vmatpush.bf16.msra.mxu0 %v29322_v56 }
 0x627   : > { %19263 = vmatpush.bf16.msra.mxu1 %v29330_v57  ;;  %v29361_v57 = vld [vmem:[%s29800_s12 + $0x3150] sm:$0xff] }
 0x628   : > { %19276 = vmatpush.bf16.msra.mxu2 %v29338_v58  ;;  %v29369_v58 = vld [vmem:[%s29800_s12 + $0x3190] sm:$0xff] }
 0x629   : > { %19289 = vmatpush.bf16.msra.mxu3 %v29346_v61  ;;  %v29360_v61 = vld [vmem:[%s29800_s12 + $0x3148] sm:$0xff] }
 0x62a   : > { %19251 = vmatpush.bf16.msra.mxu0 %v29321_v1 }
 0x62b   : > { %19264 = vmatpush.bf16.msra.mxu1 %v29329_v3 }
 0x62c   : > { %19277 = vmatpush.bf16.msra.mxu2 %v29337_v4  ;;  %v29351_v4 = vld [vmem:[%s29800_s12 + $0x3100] sm:$0xff] }
 0x62d   : > { %19290 = vmatpush.bf16.msra.mxu3 %v29345_v5  ;;  %v4604_v5 = vunpack.c.l.b16 %v392_v63 }
 0x62e   : > { %19252 = vmatpush.bf16.msra.mxu0 %v29320_v6 }
 0x62f   : > { %19265 = vmatpush.bf16.msra.mxu1 %v29328_v7  ;;  %v29359_v7 = vld [vmem:[%s29800_s12 + $0x3140] sm:$0xff]  ;;  %v4846_v15 = vpack.c.b16 %v4604_v5, %v4604_v5 }
 0x630   : > { %19278 = vmatpush.bf16.msra.mxu2 %v29336_v8  ;;  %v29367_v8 = vld [vmem:[%s29800_s12 + $0x3180] sm:$0xff] }
 0x631   : > { %19291 = vmatpush.bf16.msra.mxu3 %v29344_v12 }
 0x632   : > { %19253 = vmatpush.bf16.msra.mxu0 %v29319_v14  ;;  %v19047_v38 = vpop.f32.mrf.mxu0  ;;  %v29375_v14 = vld [vmem:[%s29800_s12 + $0x31c0] sm:$0xff] }
 0x633   : > { %19266 = vmatpush.bf16.msra.mxu1 %v29327_v17  ;;  %v19048_v39 = vadd.f32 %v19047_v38, %v31581_v0  ;;  %v19060_v41 = vpop.f32.mrf.mxu1  ;;  %v393_v0 = vld [vmem:[%s29795_s8 + $0x318] sm:$0xff] }
 0x634   : > { %19279 = vmatpush.bf16.msra.mxu2 %v29335_v18  ;;  %v4606_v6 = vunpack.c.l.b16 %v393_v0  ;;  %v4607_v12 = vunpack.c.h.b16 %v393_v0  ;;  %v29414_v17 = vld [vmem:[%s29800_s12 + $0x32f8] sm:$0xff]  ;;  %v4847_v18 = vpack.c.b16 %v4605_v9, %v4605_v9 }
 0x635   : > { %19292 = vmatpush.bf16.msra.mxu3 %v29343_v24  ;;  %19254 = vmatmul.bf16.vlgmr.msra.gmra.mxu0 %v4842_v25  ;;  %v19061_v44 = vadd.f32 %v19060_v41, %v19048_v39  ;;  %v29388_v24 = vld [vmem:[%s29800_s12 + $0x3228] sm:$0xff]  ;;  %v29402_v38 = vld [vmem:[%s29800_s12 + $0x3298] sm:$0xff] }
 0x636   : > { %19298 = vmatpush.bf16.msrb.mxu0 %v29358_v20  ;;  %19267 = vmatmul.bf16.vlgmr.msra.gmra.mxu1 %v4843_v28  ;;  %v4848_v16 = vpack.c.b16 %v4606_v6, %v4606_v6  ;;  %v4849_v19 = vpack.c.b16 %v4607_v12, %v4607_v12  ;;  %v29389_v20 = vld [vmem:[%s29800_s12 + $0x3230] sm:$0xff]  ;;  %v29396_v25 = vld [vmem:[%s29800_s12 + $0x3268] sm:$0xff]  ;;  %v29410_v41 = vld [vmem:[%s29800_s12 + $0x32d8] sm:$0xff] }
 0x637   : > { %19311 = vmatpush.bf16.msrb.mxu1 %v29366_v21  ;;  %19280 = vmatmul.bf16.vlgmr.msra.gmra.mxu2 %v4844_v26  ;;  %v29397_v21 = vld [vmem:[%s29800_s12 + $0x3270] sm:$0xff]  ;;  %v29404_v26 = vld [vmem:[%s29800_s12 + $0x32a8] sm:$0xff]  ;;  %v29422_v0 = vld [vmem:[%s29800_s12 + $0x3338] sm:$0xff] }
 0x638   : > { %19324 = vmatpush.bf16.msrb.mxu2 %v29374_v23  ;;  %19293 = vmatmul.bf16.vlgmr.msra.gmra.mxu3 %v4845_v29  ;;  %v29413_v23 = vld [vmem:[%s29800_s12 + $0x32f0] sm:$0xff] }
 0x639   : > { %19337 = vmatpush.bf16.msrb.mxu3 %v29382_v27  ;;  %v29412_v27 = vld [vmem:[%s29800_s12 + $0x32e8] sm:$0xff]  ;;  %v29437_v12 = vld [vmem:[%s29800_s12 + $0x33b0] sm:$0xff] }
 0x63a   : > { %19299 = vmatpush.bf16.msrb.mxu0 %v29357_v30  ;;  %v19073_v49 = vpop.f32.mrf.mxu2  ;;  %v19049_v53 = vpop.f32.mrf.mxu0  ;;  %v29387_v30 = vld [vmem:[%s29800_s12 + $0x3220] sm:$0xff] }
 0x63b   : > { %19312 = vmatpush.bf16.msrb.mxu1 %v29365_v31  ;;  %v19074_v50 = vadd.f32 %v19073_v49, %v19061_v44  ;;  %v19086_v52 = vpop.f32.mrf.mxu3  ;;  %v19062_v56 = vpop.f32.mrf.mxu1  ;;  %v29409_v49 = vld [vmem:[%s29800_s12 + $0x32d0] sm:$0xff]  ;;  %v394_v53 = vld [vmem:[%s29795_s8 + $0x320] sm:$0xff] }
 0x63c   : > { %19325 = vmatpush.bf16.msrb.mxu2 %v29373_v32  ;;  %v29395_v32 = vld [vmem:[%s29800_s12 + $0x3260] sm:$0xff]  ;;  %v29408_v56 = vld [vmem:[%s29800_s12 + $0x32c8] sm:$0xff]  ;;  %v4609_v63 = vunpack.c.h.b16 %v394_v53 }
 0x63d   : > { %19338 = vmatpush.bf16.msrb.mxu3 %v29381_v33  ;;  %v31618_v54 = vadd.f32 %v19086_v52, %v19074_v50  ;;  %v29403_v33 = vld [vmem:[%s29800_s12 + $0x32a0] sm:$0xff]  ;;  %v29384_v50 = vld [vmem:[%s29800_s12 + $0x3208] sm:$0xff] }
 0x63e   : > { %19300 = vmatpush.bf16.msrb.mxu0 %v29356_v34  ;;  %v29400_v52 = vld [vmem:[%s29800_s12 + $0x3288] sm:$0xff] }
 0x63f   : > { %19313 = vmatpush.bf16.msrb.mxu1 %v29364_v35  ;;  %v29411_v35 = vld [vmem:[%s29800_s12 + $0x32e0] sm:$0xff] }
 0x640   : > { %19326 = vmatpush.bf16.msrb.mxu2 %v29372_v36  ;;  %v29386_v36 = vld [vmem:[%s29800_s12 + $0x3218] sm:$0xff] }
 0x641   : > { %19339 = vmatpush.bf16.msrb.mxu3 %v29380_v37  ;;  %v29394_v37 = vld [vmem:[%s29800_s12 + $0x3258] sm:$0xff] }
 0x642   : > { %19301 = vmatpush.bf16.msrb.mxu0 %v29355_v40  ;;  %v19075_v1 = vpop.f32.mrf.mxu2 }
 0x643   : > { %19314 = vmatpush.bf16.msrb.mxu1 %v29363_v42  ;;  %v19088_v3 = vpop.f32.mrf.mxu3  ;;  %v29430_v1 = vld [vmem:[%s29800_s12 + $0x3378] sm:$0xff] }
 0x644   : > { %19327 = vmatpush.bf16.msrb.mxu2 %v29371_v43  ;;  %v29438_v3 = vld [vmem:[%s29800_s12 + $0x33b8] sm:$0xff] }
 0x645   : > { %19340 = vmatpush.bf16.msrb.mxu3 %v29379_v45  ;;  %v29385_v45 = vld [vmem:[%s29800_s12 + $0x3210] sm:$0xff] }
 0x646   : > { %19302 = vmatpush.bf16.msrb.mxu0 %v29354_v46 }
 0x647   : > { %19315 = vmatpush.bf16.msrb.mxu1 %v29362_v47  ;;  %v29393_v47 = vld [vmem:[%s29800_s12 + $0x3250] sm:$0xff] }
 0x648   : > { %19328 = vmatpush.bf16.msrb.mxu2 %v29370_v48  ;;  %v29401_v48 = vld [vmem:[%s29800_s12 + $0x3290] sm:$0xff] }
 0x649   : > { %19341 = vmatpush.bf16.msrb.mxu3 %v29378_v51  ;;  %v29392_v51 = vld [vmem:[%s29800_s12 + $0x3248] sm:$0xff] }
 0x64a   : > { %19303 = vmatpush.bf16.msrb.mxu0 %v29353_v55 }
 0x64b   : > { %19316 = vmatpush.bf16.msrb.mxu1 %v29361_v57 }
 0x64c   : > { %19329 = vmatpush.bf16.msrb.mxu2 %v29369_v58  ;;  %v29383_v58 = vld [vmem:[%s29800_s12 + $0x3200] sm:$0xff] }
 0x64d   : > { %19342 = vmatpush.bf16.msrb.mxu3 %v29377_v59  ;;  %v4608_v59 = vunpack.c.l.b16 %v394_v53 }
 0x64e   : > { %19304 = vmatpush.bf16.msrb.mxu0 %v29352_v60 }
 0x64f   : > { %19317 = vmatpush.bf16.msrb.mxu1 %v29360_v61  ;;  %v29391_v61 = vld [vmem:[%s29800_s12 + $0x3240] sm:$0xff]  ;;  %v4850_v5 = vpack.c.b16 %v4608_v59, %v4608_v59 }
 0x650   : > { %19330 = vmatpush.bf16.msrb.mxu2 %v29368_v62  ;;  %v29399_v62 = vld [vmem:[%s29800_s12 + $0x3280] sm:$0xff] }
 0x651   : > { %19343 = vmatpush.bf16.msrb.mxu3 %v29376_v2 }
 0x652   : > { %19305 = vmatpush.bf16.msrb.mxu0 %v29351_v4  ;;  %v19099_v28 = vpop.f32.mrf.mxu0  ;;  %v29407_v4 = vld [vmem:[%s29800_s12 + $0x32c0] sm:$0xff] }
 0x653   : > { %19318 = vmatpush.bf16.msrb.mxu1 %v29359_v7  ;;  %v19100_v29 = vadd.f32 %v19099_v28, %v31618_v54  ;;  %v19112_v31 = vpop.f32.mrf.mxu1  ;;  %v395_v54 = vld [vmem:[%s29795_s8 + $0x328] sm:$0xff]  ;;  %v29446_v7 = vld [vmem:[%s29800_s12 + $0x33f8] sm:$0xff] }
 0x654   : > { %19331 = vmatpush.bf16.msrb.mxu2 %v29367_v8  ;;  %v4610_v60 = vunpack.c.l.b16 %v395_v54  ;;  %v4611_v2 = vunpack.c.h.b16 %v395_v54  ;;  %v4851_v8 = vpack.c.b16 %v4609_v63, %v4609_v63  ;;  %v29434_v28 = vld [vmem:[%s29800_s12 + $0x3398] sm:$0xff] }
 0x655   : > { %19344 = vmatpush.bf16.msrb.mxu3 %v29375_v14  ;;  %19306 = vmatmul.bf16.vlgmr.msrb.gmra.mxu0 %v4846_v15  ;;  %v19113_v34 = vadd.f32 %v19112_v31, %v19100_v29  ;;  %v29420_v14 = vld [vmem:[%s29800_s12 + $0x3328] sm:$0xff]  ;;  %v29442_v31 = vld [vmem:[%s29800_s12 + $0x33d8] sm:$0xff] }
 0x656   : > { %19350 = vmatpush.bf16.msra.mxu0 %v29390_v10  ;;  %19319 = vmatmul.bf16.vlgmr.msrb.gmra.mxu1 %v4847_v18  ;;  %v4852_v6 = vpack.c.b16 %v4610_v60, %v4610_v60  ;;  %v4853_v9 = vpack.c.b16 %v4611_v2, %v4611_v2  ;;  %v29421_v10 = vld [vmem:[%s29800_s12 + $0x3330] sm:$0xff]  ;;  %v29428_v15 = vld [vmem:[%s29800_s12 + $0x3368] sm:$0xff]  ;;  %v29454_v54 = vld [vmem:[%s29800_s12 + $0x3438] sm:$0xff] }
 0x657   : > { %19363 = vmatpush.bf16.msra.mxu1 %v29398_v11  ;;  %19332 = vmatmul.bf16.vlgmr.msrb.gmra.mxu2 %v4848_v16  ;;  %v29429_v11 = vld [vmem:[%s29800_s12 + $0x3370] sm:$0xff]  ;;  %v29436_v16 = vld [vmem:[%s29800_s12 + $0x33a8] sm:$0xff] }
 0x658   : > { %19376 = vmatpush.bf16.msra.mxu2 %v29406_v13  ;;  %19345 = vmatmul.bf16.vlgmr.msrb.gmra.mxu3 %v4849_v19  ;;  %v29445_v13 = vld [vmem:[%s29800_s12 + $0x33f0] sm:$0xff] }
 0x659   : > { %19389 = vmatpush.bf16.msra.mxu3 %v29414_v17  ;;  %v29444_v17 = vld [vmem:[%s29800_s12 + $0x33e8] sm:$0xff]  ;;  %v29469_v2 = vld [vmem:[%s29800_s12 + $0x34b0] sm:$0xff] }
 0x65a   : > { %19351 = vmatpush.bf16.msra.mxu0 %v29389_v20  ;;  %v19125_v39 = vpop.f32.mrf.mxu2  ;;  %v19101_v43 = vpop.f32.mrf.mxu0  ;;  %v29419_v20 = vld [vmem:[%s29800_s12 + $0x3320] sm:$0xff] }
 0x65b   : > { %19364 = vmatpush.bf16.msra.mxu1 %v29397_v21  ;;  %v19126_v40 = vadd.f32 %v19125_v39, %v19113_v34  ;;  %v19138_v42 = vpop.f32.mrf.mxu3  ;;  %v19114_v46 = vpop.f32.mrf.mxu1  ;;  %v29441_v39 = vld [vmem:[%s29800_s12 + $0x33d0] sm:$0xff] }
 0x65c   : > { %19377 = vmatpush.bf16.msra.mxu2 %v29405_v22  ;;  %v29427_v22 = vld [vmem:[%s29800_s12 + $0x3360] sm:$0xff]  ;;  %v396_v43 = vld [vmem:[%s29795_s8 + $0x330] sm:$0xff]  ;;  %v29440_v46 = vld [vmem:[%s29800_s12 + $0x33c8] sm:$0xff] }
 0x65d   : > { %19390 = vmatpush.bf16.msra.mxu3 %v29413_v23  ;;  %v31655_v44 = vadd.f32 %v19138_v42, %v19126_v40  ;;  %v29435_v23 = vld [vmem:[%s29800_s12 + $0x33a0] sm:$0xff]  ;;  %v29416_v40 = vld [vmem:[%s29800_s12 + $0x3308] sm:$0xff]  ;;  %v4613_v53 = vunpack.c.h.b16 %v396_v43 }
 0x65e   : > { %19352 = vmatpush.bf16.msra.mxu0 %v29388_v24  ;;  %v29432_v42 = vld [vmem:[%s29800_s12 + $0x3388] sm:$0xff] }
 0x65f   : > { %19365 = vmatpush.bf16.msra.mxu1 %v29396_v25  ;;  %v29443_v25 = vld [vmem:[%s29800_s12 + $0x33e0] sm:$0xff] }
 0x660   : > { %19378 = vmatpush.bf16.msra.mxu2 %v29404_v26  ;;  %v29418_v26 = vld [vmem:[%s29800_s12 + $0x3318] sm:$0xff] }
 0x661   : > { %19391 = vmatpush.bf16.msra.mxu3 %v29412_v27  ;;  %v29426_v27 = vld [vmem:[%s29800_s12 + $0x3358] sm:$0xff] }
 0x662   : > { %19353 = vmatpush.bf16.msra.mxu0 %v29387_v30  ;;  %v19127_v55 = vpop.f32.mrf.mxu2 }
 0x663   : > { %19366 = vmatpush.bf16.msra.mxu1 %v29395_v32  ;;  %v19140_v57 = vpop.f32.mrf.mxu3  ;;  %v29462_v55 = vld [vmem:[%s29800_s12 + $0x3478] sm:$0xff] }
 0x664   : > { %19379 = vmatpush.bf16.msra.mxu2 %v29403_v33  ;;  %v29470_v57 = vld [vmem:[%s29800_s12 + $0x34b8] sm:$0xff] }
 0x665   : > { %19392 = vmatpush.bf16.msra.mxu3 %v29411_v35  ;;  %v29417_v35 = vld [vmem:[%s29800_s12 + $0x3310] sm:$0xff] }
 0x666   : > { %19354 = vmatpush.bf16.msra.mxu0 %v29386_v36 }
 0x667   : > { %19367 = vmatpush.bf16.msra.mxu1 %v29394_v37  ;;  %v29425_v37 = vld [vmem:[%s29800_s12 + $0x3350] sm:$0xff] }
 0x668   : > { %19380 = vmatpush.bf16.msra.mxu2 %v29402_v38  ;;  %v29433_v38 = vld [vmem:[%s29800_s12 + $0x3390] sm:$0xff] }
 0x669   : > { %19393 = vmatpush.bf16.msra.mxu3 %v29410_v41  ;;  %v29424_v41 = vld [vmem:[%s29800_s12 + $0x3348] sm:$0xff] }
 0x66a   : > { %19355 = vmatpush.bf16.msra.mxu0 %v29385_v45 }
 0x66b   : > { %19368 = vmatpush.bf16.msra.mxu1 %v29393_v47 }
 0x66c   : > { %19381 = vmatpush.bf16.msra.mxu2 %v29401_v48  ;;  %v29415_v48 = vld [vmem:[%s29800_s12 + $0x3300] sm:$0xff] }
 0x66d   : > { %19394 = vmatpush.bf16.msra.mxu3 %v29409_v49  ;;  %v4612_v49 = vunpack.c.l.b16 %v396_v43 }
 0x66e   : > { %19356 = vmatpush.bf16.msra.mxu0 %v29384_v50 }
 0x66f   : > { %19369 = vmatpush.bf16.msra.mxu1 %v29392_v51  ;;  %v29423_v51 = vld [vmem:[%s29800_s12 + $0x3340] sm:$0xff]  ;;  %v4854_v59 = vpack.c.b16 %v4612_v49, %v4612_v49 }
 0x670   : > { %19382 = vmatpush.bf16.msra.mxu2 %v29400_v52  ;;  %v29431_v52 = vld [vmem:[%s29800_s12 + $0x3380] sm:$0xff] }
 0x671   : > { %19395 = vmatpush.bf16.msra.mxu3 %v29408_v56 }
 0x672   : > { %19357 = vmatpush.bf16.msra.mxu0 %v29383_v58  ;;  %v19151_v18 = vpop.f32.mrf.mxu0  ;;  %v29439_v58 = vld [vmem:[%s29800_s12 + $0x33c0] sm:$0xff] }
 0x673   : > { %19370 = vmatpush.bf16.msra.mxu1 %v29391_v61  ;;  %v19152_v19 = vadd.f32 %v19151_v18, %v31655_v44  ;;  %v19164_v21 = vpop.f32.mrf.mxu1  ;;  %v397_v44 = vld [vmem:[%s29795_s8 + $0x338] sm:$0xff] }
 0x674   : > { %19383 = vmatpush.bf16.msra.mxu2 %v29399_v62  ;;  %v4614_v50 = vunpack.c.l.b16 %v397_v44  ;;  %v4615_v56 = vunpack.c.h.b16 %v397_v44  ;;  %v29478_v61 = vld [vmem:[%s29800_s12 + $0x34f8] sm:$0xff]  ;;  %v4855_v62 = vpack.c.b16 %v4613_v53, %v4613_v53 }
 0x675   : > { %19396 = vmatpush.bf16.msra.mxu3 %v29407_v4  ;;  %19358 = vmatmul.bf16.vlgmr.msra.gmra.mxu0 %v4850_v5  ;;  %v19165_v24 = vadd.f32 %v19164_v21, %v19152_v19  ;;  %v29452_v4 = vld [vmem:[%s29800_s12 + $0x3428] sm:$0xff]  ;;  %v29466_v18 = vld [vmem:[%s29800_s12 + $0x3498] sm:$0xff] }
 0x676   : > { %19402 = vmatpush.bf16.msrb.mxu0 %v29422_v0  ;;  %19371 = vmatmul.bf16.vlgmr.msra.gmra.mxu1 %v4851_v8  ;;  %v4856_v60 = vpack.c.b16 %v4614_v50, %v4614_v50  ;;  %v4857_v63 = vpack.c.b16 %v4615_v56, %v4615_v56  ;;  %v29453_v0 = vld [vmem:[%s29800_s12 + $0x3430] sm:$0xff]  ;;  %v29460_v5 = vld [vmem:[%s29800_s12 + $0x3468] sm:$0xff]  ;;  %v29474_v21 = vld [vmem:[%s29800_s12 + $0x34d8] sm:$0xff] }
 0x677   : > { %19415 = vmatpush.bf16.msrb.mxu1 %v29430_v1  ;;  %19384 = vmatmul.bf16.vlgmr.msra.gmra.mxu2 %v4852_v6  ;;  %v29461_v1 = vld [vmem:[%s29800_s12 + $0x3470] sm:$0xff]  ;;  %v29468_v6 = vld [vmem:[%s29800_s12 + $0x34a8] sm:$0xff]  ;;  %v29486_v44 = vld [vmem:[%s29800_s12 + $0x3538] sm:$0xff] }
 0x678   : > { %19428 = vmatpush.bf16.msrb.mxu2 %v29438_v3  ;;  %19397 = vmatmul.bf16.vlgmr.msra.gmra.mxu3 %v4853_v9  ;;  %v29477_v3 = vld [vmem:[%s29800_s12 + $0x34f0] sm:$0xff] }
 0x679   : > { %19441 = vmatpush.bf16.msrb.mxu3 %v29446_v7  ;;  %v29476_v7 = vld [vmem:[%s29800_s12 + $0x34e8] sm:$0xff]  ;;  %v29501_v56 = vld [vmem:[%s29800_s12 + $0x35b0] sm:$0xff] }
 0x67a   : > { %19403 = vmatpush.bf16.msrb.mxu0 %v29421_v10  ;;  %v19177_v29 = vpop.f32.mrf.mxu2  ;;  %v19153_v33 = vpop.f32.mrf.mxu0  ;;  %v29451_v10 = vld [vmem:[%s29800_s12 + $0x3420] sm:$0xff] }
 0x67b   : > { %19416 = vmatpush.bf16.msrb.mxu1 %v29429_v11  ;;  %v19178_v30 = vadd.f32 %v19177_v29, %v19165_v24  ;;  %v19190_v32 = vpop.f32.mrf.mxu3  ;;  %v19166_v36 = vpop.f32.mrf.mxu1  ;;  %v29473_v29 = vld [vmem:[%s29800_s12 + $0x34d0] sm:$0xff]  ;;  %v398_v33 = vld [vmem:[%s29795_s8 + $0x340] sm:$0xff] }
 0x67c   : > { %19429 = vmatpush.bf16.msrb.mxu2 %v29437_v12  ;;  %v29459_v12 = vld [vmem:[%s29800_s12 + $0x3460] sm:$0xff]  ;;  %v29472_v36 = vld [vmem:[%s29800_s12 + $0x34c8] sm:$0xff]  ;;  %v4617_v43 = vunpack.c.h.b16 %v398_v33 }
 0x67d   : > { %19442 = vmatpush.bf16.msrb.mxu3 %v29445_v13  ;;  %v31692_v34 = vadd.f32 %v19190_v32, %v19178_v30  ;;  %v29467_v13 = vld [vmem:[%s29800_s12 + $0x34a0] sm:$0xff]  ;;  %v29448_v30 = vld [vmem:[%s29800_s12 + $0x3408] sm:$0xff] }
 0x67e   : > { %19404 = vmatpush.bf16.msrb.mxu0 %v29420_v14  ;;  %v29464_v32 = vld [vmem:[%s29800_s12 + $0x3488] sm:$0xff] }
 0x67f   : > { %19417 = vmatpush.bf16.msrb.mxu1 %v29428_v15  ;;  %v29475_v15 = vld [vmem:[%s29800_s12 + $0x34e0] sm:$0xff] }
 0x680   : > { %19430 = vmatpush.bf16.msrb.mxu2 %v29436_v16  ;;  %v29450_v16 = vld [vmem:[%s29800_s12 + $0x3418] sm:$0xff] }
 0x681   : > { %19443 = vmatpush.bf16.msrb.mxu3 %v29444_v17  ;;  %v29458_v17 = vld [vmem:[%s29800_s12 + $0x3458] sm:$0xff] }
 0x682   : > { %19405 = vmatpush.bf16.msrb.mxu0 %v29419_v20  ;;  %v19179_v45 = vpop.f32.mrf.mxu2 }
 0x683   : > { %19418 = vmatpush.bf16.msrb.mxu1 %v29427_v22  ;;  %v19192_v47 = vpop.f32.mrf.mxu3  ;;  %v29494_v45 = vld [vmem:[%s29800_s12 + $0x3578] sm:$0xff] }
 0x684   : > { %19431 = vmatpush.bf16.msrb.mxu2 %v29435_v23  ;;  %v29502_v47 = vld [vmem:[%s29800_s12 + $0x35b8] sm:$0xff] }
 0x685   : > { %19444 = vmatpush.bf16.msrb.mxu3 %v29443_v25  ;;  %v29449_v25 = vld [vmem:[%s29800_s12 + $0x3410] sm:$0xff] }
 0x686   : > { %19406 = vmatpush.bf16.msrb.mxu0 %v29418_v26 }
 0x687   : > { %19419 = vmatpush.bf16.msrb.mxu1 %v29426_v27  ;;  %v29457_v27 = vld [vmem:[%s29800_s12 + $0x3450] sm:$0xff] }
 0x688   : > { %19432 = vmatpush.bf16.msrb.mxu2 %v29434_v28  ;;  %v29465_v28 = vld [vmem:[%s29800_s12 + $0x3490] sm:$0xff] }
 0x689   : > { %19445 = vmatpush.bf16.msrb.mxu3 %v29442_v31  ;;  %v29456_v31 = vld [vmem:[%s29800_s12 + $0x3448] sm:$0xff] }
 0x68a   : > { %19407 = vmatpush.bf16.msrb.mxu0 %v29417_v35 }
 0x68b   : > { %19420 = vmatpush.bf16.msrb.mxu1 %v29425_v37 }
 0x68c   : > { %19433 = vmatpush.bf16.msrb.mxu2 %v29433_v38  ;;  %v29447_v38 = vld [vmem:[%s29800_s12 + $0x3400] sm:$0xff] }
 0x68d   : > { %19446 = vmatpush.bf16.msrb.mxu3 %v29441_v39  ;;  %v4616_v39 = vunpack.c.l.b16 %v398_v33 }
 0x68e   : > { %19408 = vmatpush.bf16.msrb.mxu0 %v29416_v40 }
 0x68f   : > { %19421 = vmatpush.bf16.msrb.mxu1 %v29424_v41  ;;  %v29455_v41 = vld [vmem:[%s29800_s12 + $0x3440] sm:$0xff]  ;;  %v4858_v49 = vpack.c.b16 %v4616_v39, %v4616_v39 }
 0x690   : > { %19434 = vmatpush.bf16.msrb.mxu2 %v29432_v42  ;;  %v29463_v42 = vld [vmem:[%s29800_s12 + $0x3480] sm:$0xff] }
 0x691   : > { %19447 = vmatpush.bf16.msrb.mxu3 %v29440_v46 }
 0x692   : > { %19409 = vmatpush.bf16.msrb.mxu0 %v29415_v48  ;;  %v19203_v8 = vpop.f32.mrf.mxu0  ;;  %v29471_v48 = vld [vmem:[%s29800_s12 + $0x34c0] sm:$0xff] }
 0x693   : > { %19422 = vmatpush.bf16.msrb.mxu1 %v29423_v51  ;;  %v19204_v9 = vadd.f32 %v19203_v8, %v31692_v34  ;;  %v19216_v11 = vpop.f32.mrf.mxu1  ;;  %v399_v34 = vld [vmem:[%s29795_s8 + $0x348] sm:$0xff]  ;;  %v29510_v51 = vld [vmem:[%s29800_s12 + $0x35f8] sm:$0xff] }
 0x694   : > { %19435 = vmatpush.bf16.msrb.mxu2 %v29431_v52  ;;  %v4618_v40 = vunpack.c.l.b16 %v399_v34  ;;  %v4619_v46 = vunpack.c.h.b16 %v399_v34  ;;  %v4859_v52 = vpack.c.b16 %v4617_v43, %v4617_v43  ;;  %v29498_v8 = vld [vmem:[%s29800_s12 + $0x3598] sm:$0xff] }
 0x695   : > { %19448 = vmatpush.bf16.msrb.mxu3 %v29439_v58  ;;  %19410 = vmatmul.bf16.vlgmr.msrb.gmra.mxu0 %v4854_v59  ;;  %v19217_v14 = vadd.f32 %v19216_v11, %v19204_v9  ;;  %v29484_v58 = vld [vmem:[%s29800_s12 + $0x3528] sm:$0xff]  ;;  %v29506_v11 = vld [vmem:[%s29800_s12 + $0x35d8] sm:$0xff] }
 0x696   : > { %19454 = vmatpush.bf16.msra.mxu0 %v29454_v54  ;;  %19423 = vmatmul.bf16.vlgmr.msrb.gmra.mxu1 %v4855_v62  ;;  %v4860_v50 = vpack.c.b16 %v4618_v40, %v4618_v40  ;;  %v4861_v53 = vpack.c.b16 %v4619_v46, %v4619_v46  ;;  %v29485_v54 = vld [vmem:[%s29800_s12 + $0x3530] sm:$0xff]  ;;  %v29492_v59 = vld [vmem:[%s29800_s12 + $0x3568] sm:$0xff]  ;;  %v29518_v34 = vld [vmem:[%s29800_s12 + $0x3638] sm:$0xff] }
 0x697   : > { %19467 = vmatpush.bf16.msra.mxu1 %v29462_v55  ;;  %19436 = vmatmul.bf16.vlgmr.msrb.gmra.mxu2 %v4856_v60  ;;  %v29493_v55 = vld [vmem:[%s29800_s12 + $0x3570] sm:$0xff]  ;;  %v29500_v60 = vld [vmem:[%s29800_s12 + $0x35a8] sm:$0xff] }
 0x698   : > { %19480 = vmatpush.bf16.msra.mxu2 %v29470_v57  ;;  %19449 = vmatmul.bf16.vlgmr.msrb.gmra.mxu3 %v4857_v63  ;;  %v29509_v57 = vld [vmem:[%s29800_s12 + $0x35f0] sm:$0xff] }
 0x699   : > { %19493 = vmatpush.bf16.msra.mxu3 %v29478_v61  ;;  %v29508_v61 = vld [vmem:[%s29800_s12 + $0x35e8] sm:$0xff]  ;;  %v29533_v46 = vld [vmem:[%s29800_s12 + $0x36b0] sm:$0xff] }
 0x69a   : > { %19455 = vmatpush.bf16.msra.mxu0 %v29453_v0  ;;  %v19229_v19 = vpop.f32.mrf.mxu2  ;;  %v19205_v23 = vpop.f32.mrf.mxu0  ;;  %v29483_v0 = vld [vmem:[%s29800_s12 + $0x3520] sm:$0xff] }
 0x69b   : > { %19468 = vmatpush.bf16.msra.mxu1 %v29461_v1  ;;  %v19230_v20 = vadd.f32 %v19229_v19, %v19217_v14  ;;  %v19242_v22 = vpop.f32.mrf.mxu3  ;;  %v19218_v26 = vpop.f32.mrf.mxu1  ;;  %v29505_v19 = vld [vmem:[%s29800_s12 + $0x35d0] sm:$0xff] }
 0x69c   : > { %19481 = vmatpush.bf16.msra.mxu2 %v29469_v2  ;;  %v29491_v2 = vld [vmem:[%s29800_s12 + $0x3560] sm:$0xff]  ;;  %v400_v23 = vld [vmem:[%s29795_s8 + $0x350] sm:$0xff]  ;;  %v29504_v26 = vld [vmem:[%s29800_s12 + $0x35c8] sm:$0xff] }
 0x69d   : > { %19494 = vmatpush.bf16.msra.mxu3 %v29477_v3  ;;  %v31729_v24 = vadd.f32 %v19242_v22, %v19230_v20  ;;  %v29499_v3 = vld [vmem:[%s29800_s12 + $0x35a0] sm:$0xff]  ;;  %v29480_v20 = vld [vmem:[%s29800_s12 + $0x3508] sm:$0xff]  ;;  %v4621_v33 = vunpack.c.h.b16 %v400_v23 }
 0x69e   : > { %19456 = vmatpush.bf16.msra.mxu0 %v29452_v4  ;;  %v29496_v22 = vld [vmem:[%s29800_s12 + $0x3588] sm:$0xff] }
 0x69f   : > { %19469 = vmatpush.bf16.msra.mxu1 %v29460_v5  ;;  %v29507_v5 = vld [vmem:[%s29800_s12 + $0x35e0] sm:$0xff] }
 0x6a0   : > { %19482 = vmatpush.bf16.msra.mxu2 %v29468_v6  ;;  %v29482_v6 = vld [vmem:[%s29800_s12 + $0x3518] sm:$0xff] }
 0x6a1   : > { %19495 = vmatpush.bf16.msra.mxu3 %v29476_v7  ;;  %v29490_v7 = vld [vmem:[%s29800_s12 + $0x3558] sm:$0xff] }
 0x6a2   : > { %19457 = vmatpush.bf16.msra.mxu0 %v29451_v10  ;;  %v19231_v35 = vpop.f32.mrf.mxu2 }
 0x6a3   : > { %19470 = vmatpush.bf16.msra.mxu1 %v29459_v12  ;;  %v19244_v37 = vpop.f32.mrf.mxu3  ;;  %v29526_v35 = vld [vmem:[%s29800_s12 + $0x3678] sm:$0xff] }
 0x6a4   : > { %19483 = vmatpush.bf16.msra.mxu2 %v29467_v13  ;;  %v29534_v37 = vld [vmem:[%s29800_s12 + $0x36b8] sm:$0xff] }
 0x6a5   : > { %19496 = vmatpush.bf16.msra.mxu3 %v29475_v15  ;;  %v29481_v15 = vld [vmem:[%s29800_s12 + $0x3510] sm:$0xff] }
 0x6a6   : > { %19458 = vmatpush.bf16.msra.mxu0 %v29450_v16 }
 0x6a7   : > { %19471 = vmatpush.bf16.msra.mxu1 %v29458_v17  ;;  %v29489_v17 = vld [vmem:[%s29800_s12 + $0x3550] sm:$0xff] }
 0x6a8   : > { %19484 = vmatpush.bf16.msra.mxu2 %v29466_v18  ;;  %v29497_v18 = vld [vmem:[%s29800_s12 + $0x3590] sm:$0xff] }
 0x6a9   : > { %19497 = vmatpush.bf16.msra.mxu3 %v29474_v21  ;;  %v29488_v21 = vld [vmem:[%s29800_s12 + $0x3548] sm:$0xff] }
 0x6aa   : > { %19459 = vmatpush.bf16.msra.mxu0 %v29449_v25 }
 0x6ab   : > { %19472 = vmatpush.bf16.msra.mxu1 %v29457_v27 }
 0x6ac   : > { %19485 = vmatpush.bf16.msra.mxu2 %v29465_v28  ;;  %v29479_v28 = vld [vmem:[%s29800_s12 + $0x3500] sm:$0xff] }
 0x6ad   : > { %19498 = vmatpush.bf16.msra.mxu3 %v29473_v29  ;;  %v4620_v29 = vunpack.c.l.b16 %v400_v23 }
 0x6ae   : > { %19460 = vmatpush.bf16.msra.mxu0 %v29448_v30 }
 0x6af   : > { %19473 = vmatpush.bf16.msra.mxu1 %v29456_v31  ;;  %v29487_v31 = vld [vmem:[%s29800_s12 + $0x3540] sm:$0xff]  ;;  %v4862_v39 = vpack.c.b16 %v4620_v29, %v4620_v29 }
 0x6b0   : > { %19486 = vmatpush.bf16.msra.mxu2 %v29464_v32  ;;  %v29495_v32 = vld [vmem:[%s29800_s12 + $0x3580] sm:$0xff] }
 0x6b1   : > { %19499 = vmatpush.bf16.msra.mxu3 %v29472_v36 }
 0x6b2   : > { %19461 = vmatpush.bf16.msra.mxu0 %v29447_v38  ;;  %v19255_v62 = vpop.f32.mrf.mxu0  ;;  %v29503_v38 = vld [vmem:[%s29800_s12 + $0x35c0] sm:$0xff] }
 0x6b3   : > { %19474 = vmatpush.bf16.msra.mxu1 %v29455_v41  ;;  %v19256_v63 = vadd.f32 %v19255_v62, %v31729_v24  ;;  %v19268_v1 = vpop.f32.mrf.mxu1  ;;  %v401_v24 = vld [vmem:[%s29795_s8 + $0x358] sm:$0xff] }
 0x6b4   : > { %19487 = vmatpush.bf16.msra.mxu2 %v29463_v42  ;;  %v4622_v30 = vunpack.c.l.b16 %v401_v24  ;;  %v4623_v36 = vunpack.c.h.b16 %v401_v24  ;;  %v29542_v41 = vld [vmem:[%s29800_s12 + $0x36f8] sm:$0xff]  ;;  %v4863_v42 = vpack.c.b16 %v4621_v33, %v4621_v33 }
 0x6b5   : > { %19500 = vmatpush.bf16.msra.mxu3 %v29471_v48  ;;  %19462 = vmatmul.bf16.vlgmr.msra.gmra.mxu0 %v4858_v49  ;;  %v19269_v4 = vadd.f32 %v19268_v1, %v19256_v63  ;;  %v29516_v48 = vld [vmem:[%s29800_s12 + $0x3628] sm:$0xff]  ;;  %v29530_v62 = vld [vmem:[%s29800_s12 + $0x3698] sm:$0xff] }
 0x6b6   : > { %19506 = vmatpush.bf16.msrb.mxu0 %v29486_v44  ;;  %19475 = vmatmul.bf16.vlgmr.msra.gmra.mxu1 %v4859_v52  ;;  %v4864_v40 = vpack.c.b16 %v4622_v30, %v4622_v30  ;;  %v4865_v43 = vpack.c.b16 %v4623_v36, %v4623_v36  ;;  %v29517_v44 = vld [vmem:[%s29800_s12 + $0x3630] sm:$0xff]  ;;  %v29524_v49 = vld [vmem:[%s29800_s12 + $0x3668] sm:$0xff]  ;;  %v29538_v1 = vld [vmem:[%s29800_s12 + $0x36d8] sm:$0xff] }
 0x6b7   : > { %19519 = vmatpush.bf16.msrb.mxu1 %v29494_v45  ;;  %19488 = vmatmul.bf16.vlgmr.msra.gmra.mxu2 %v4860_v50  ;;  %v29525_v45 = vld [vmem:[%s29800_s12 + $0x3670] sm:$0xff]  ;;  %v29532_v50 = vld [vmem:[%s29800_s12 + $0x36a8] sm:$0xff]  ;;  %v29550_v24 = vld [vmem:[%s29800_s12 + $0x3738] sm:$0xff] }
 0x6b8   : > { %19532 = vmatpush.bf16.msrb.mxu2 %v29502_v47  ;;  %19501 = vmatmul.bf16.vlgmr.msra.gmra.mxu3 %v4861_v53  ;;  %v29541_v47 = vld [vmem:[%s29800_s12 + $0x36f0] sm:$0xff] }
 0x6b9   : > { %19545 = vmatpush.bf16.msrb.mxu3 %v29510_v51  ;;  %v29540_v51 = vld [vmem:[%s29800_s12 + $0x36e8] sm:$0xff]  ;;  %v29565_v36 = vld [vmem:[%s29800_s12 + $0x37b0] sm:$0xff] }
 0x6ba   : > { %19507 = vmatpush.bf16.msrb.mxu0 %v29485_v54  ;;  %v19281_v9 = vpop.f32.mrf.mxu2  ;;  %v19257_v13 = vpop.f32.mrf.mxu0  ;;  %v29515_v54 = vld [vmem:[%s29800_s12 + $0x3620] sm:$0xff] }
 0x6bb   : > { %19520 = vmatpush.bf16.msrb.mxu1 %v29493_v55  ;;  %v19282_v10 = vadd.f32 %v19281_v9, %v19269_v4  ;;  %v19294_v12 = vpop.f32.mrf.mxu3  ;;  %v19270_v16 = vpop.f32.mrf.mxu1  ;;  %v29537_v9 = vld [vmem:[%s29800_s12 + $0x36d0] sm:$0xff]  ;;  %v402_v13 = vld [vmem:[%s29795_s8 + $0x360] sm:$0xff] }
 0x6bc   : > { %19533 = vmatpush.bf16.msrb.mxu2 %v29501_v56  ;;  %v29523_v56 = vld [vmem:[%s29800_s12 + $0x3660] sm:$0xff]  ;;  %v29536_v16 = vld [vmem:[%s29800_s12 + $0x36c8] sm:$0xff]  ;;  %v4625_v23 = vunpack.c.h.b16 %v402_v13 }
 0x6bd   : > { %19546 = vmatpush.bf16.msrb.mxu3 %v29509_v57  ;;  %v31766_v14 = vadd.f32 %v19294_v12, %v19282_v10  ;;  %v29531_v57 = vld [vmem:[%s29800_s12 + $0x36a0] sm:$0xff]  ;;  %v29512_v10 = vld [vmem:[%s29800_s12 + $0x3608] sm:$0xff] }
 0x6be   : > { %19508 = vmatpush.bf16.msrb.mxu0 %v29484_v58  ;;  %v29528_v12 = vld [vmem:[%s29800_s12 + $0x3688] sm:$0xff] }
 0x6bf   : > { %19521 = vmatpush.bf16.msrb.mxu1 %v29492_v59  ;;  %v29539_v59 = vld [vmem:[%s29800_s12 + $0x36e0] sm:$0xff] }
 0x6c0   : > { %19534 = vmatpush.bf16.msrb.mxu2 %v29500_v60  ;;  %v29514_v60 = vld [vmem:[%s29800_s12 + $0x3618] sm:$0xff] }
 0x6c1   : > { %19547 = vmatpush.bf16.msrb.mxu3 %v29508_v61  ;;  %v29522_v61 = vld [vmem:[%s29800_s12 + $0x3658] sm:$0xff] }
 0x6c2   : > { %19509 = vmatpush.bf16.msrb.mxu0 %v29483_v0  ;;  %v19283_v25 = vpop.f32.mrf.mxu2 }
 0x6c3   : > { %19522 = vmatpush.bf16.msrb.mxu1 %v29491_v2  ;;  %v19296_v27 = vpop.f32.mrf.mxu3  ;;  %v29558_v25 = vld [vmem:[%s29800_s12 + $0x3778] sm:$0xff] }
 0x6c4   : > { %19535 = vmatpush.bf16.msrb.mxu2 %v29499_v3  ;;  %v29566_v27 = vld [vmem:[%s29800_s12 + $0x37b8] sm:$0xff] }
 0x6c5   : > { %19548 = vmatpush.bf16.msrb.mxu3 %v29507_v5  ;;  %v29513_v5 = vld [vmem:[%s29800_s12 + $0x3610] sm:$0xff] }
 0x6c6   : > { %19510 = vmatpush.bf16.msrb.mxu0 %v29482_v6 }
 0x6c7   : > { %19523 = vmatpush.bf16.msrb.mxu1 %v29490_v7  ;;  %v29521_v7 = vld [vmem:[%s29800_s12 + $0x3650] sm:$0xff] }
 0x6c8   : > { %19536 = vmatpush.bf16.msrb.mxu2 %v29498_v8  ;;  %v29529_v8 = vld [vmem:[%s29800_s12 + $0x3690] sm:$0xff] }
 0x6c9   : > { %19549 = vmatpush.bf16.msrb.mxu3 %v29506_v11  ;;  %v29520_v11 = vld [vmem:[%s29800_s12 + $0x3648] sm:$0xff] }
 0x6ca   : > { %19511 = vmatpush.bf16.msrb.mxu0 %v29481_v15 }
 0x6cb   : > { %19524 = vmatpush.bf16.msrb.mxu1 %v29489_v17 }
 0x6cc   : > { %19537 = vmatpush.bf16.msrb.mxu2 %v29497_v18  ;;  %v29511_v18 = vld [vmem:[%s29800_s12 + $0x3600] sm:$0xff] }
 0x6cd   : > { %19550 = vmatpush.bf16.msrb.mxu3 %v29505_v19  ;;  %v4624_v19 = vunpack.c.l.b16 %v402_v13 }
 0x6ce   : > { %19512 = vmatpush.bf16.msrb.mxu0 %v29480_v20 }
 0x6cf   : > { %19525 = vmatpush.bf16.msrb.mxu1 %v29488_v21  ;;  %v29519_v21 = vld [vmem:[%s29800_s12 + $0x3640] sm:$0xff]  ;;  %v4866_v29 = vpack.c.b16 %v4624_v19, %v4624_v19 }
 0x6d0   : > { %19538 = vmatpush.bf16.msrb.mxu2 %v29496_v22  ;;  %v29527_v22 = vld [vmem:[%s29800_s12 + $0x3680] sm:$0xff] }
 0x6d1   : > { %19551 = vmatpush.bf16.msrb.mxu3 %v29504_v26 }
 0x6d2   : > { %19513 = vmatpush.bf16.msrb.mxu0 %v29479_v28  ;;  %v19307_v52 = vpop.f32.mrf.mxu0  ;;  %v29535_v28 = vld [vmem:[%s29800_s12 + $0x36c0] sm:$0xff] }
 0x6d3   : > { %19526 = vmatpush.bf16.msrb.mxu1 %v29487_v31  ;;  %v19308_v53 = vadd.f32 %v19307_v52, %v31766_v14  ;;  %v19320_v55 = vpop.f32.mrf.mxu1  ;;  %v403_v14 = vld [vmem:[%s29795_s8 + $0x368] sm:$0xff]  ;;  %v29574_v31 = vld [vmem:[%s29800_s12 + $0x37f8] sm:$0xff] }
 0x6d4   : > { %19539 = vmatpush.bf16.msrb.mxu2 %v29495_v32  ;;  %v4626_v20 = vunpack.c.l.b16 %v403_v14  ;;  %v4627_v26 = vunpack.c.h.b16 %v403_v14  ;;  %v4867_v32 = vpack.c.b16 %v4625_v23, %v4625_v23  ;;  %v29562_v52 = vld [vmem:[%s29800_s12 + $0x3798] sm:$0xff] }
 0x6d5   : > { %19552 = vmatpush.bf16.msrb.mxu3 %v29503_v38  ;;  %19514 = vmatmul.bf16.vlgmr.msrb.gmra.mxu0 %v4862_v39  ;;  %v19321_v58 = vadd.f32 %v19320_v55, %v19308_v53  ;;  %v29548_v38 = vld [vmem:[%s29800_s12 + $0x3728] sm:$0xff]  ;;  %v29570_v55 = vld [vmem:[%s29800_s12 + $0x37d8] sm:$0xff] }
 0x6d6   : > { %19558 = vmatpush.bf16.msra.mxu0 %v29518_v34  ;;  %19527 = vmatmul.bf16.vlgmr.msrb.gmra.mxu1 %v4863_v42  ;;  %v4868_v30 = vpack.c.b16 %v4626_v20, %v4626_v20  ;;  %v4869_v33 = vpack.c.b16 %v4627_v26, %v4627_v26  ;;  %v29549_v34 = vld [vmem:[%s29800_s12 + $0x3730] sm:$0xff]  ;;  %v29556_v39 = vld [vmem:[%s29800_s12 + $0x3768] sm:$0xff]  ;;  %v29582_v14 = vld [vmem:[%s29800_s12 + $0x3838] sm:$0xff] }
 0x6d7   : > { %19571 = vmatpush.bf16.msra.mxu1 %v29526_v35  ;;  %19540 = vmatmul.bf16.vlgmr.msrb.gmra.mxu2 %v4864_v40  ;;  %v29557_v35 = vld [vmem:[%s29800_s12 + $0x3770] sm:$0xff]  ;;  %v29564_v40 = vld [vmem:[%s29800_s12 + $0x37a8] sm:$0xff] }
 0x6d8   : > { %19584 = vmatpush.bf16.msra.mxu2 %v29534_v37  ;;  %19553 = vmatmul.bf16.vlgmr.msrb.gmra.mxu3 %v4865_v43  ;;  %v29573_v37 = vld [vmem:[%s29800_s12 + $0x37f0] sm:$0xff] }
 0x6d9   : > { %19597 = vmatpush.bf16.msra.mxu3 %v29542_v41  ;;  %v29572_v41 = vld [vmem:[%s29800_s12 + $0x37e8] sm:$0xff]  ;;  %v29597_v26 = vld [vmem:[%s29800_s12 + $0x38b0] sm:$0xff] }
 0x6da   : > { %19559 = vmatpush.bf16.msra.mxu0 %v29517_v44  ;;  %v19333_v63 = vpop.f32.mrf.mxu2  ;;  %v19309_v3 = vpop.f32.mrf.mxu0  ;;  %v29547_v44 = vld [vmem:[%s29800_s12 + $0x3720] sm:$0xff] }
 0x6db   : > { %19572 = vmatpush.bf16.msra.mxu1 %v29525_v45  ;;  %v19334_v0 = vadd.f32 %v19333_v63, %v19321_v58  ;;  %v19346_v2 = vpop.f32.mrf.mxu3  ;;  %v19322_v6 = vpop.f32.mrf.mxu1  ;;  %v29569_v63 = vld [vmem:[%s29800_s12 + $0x37d0] sm:$0xff] }
 0x6dc   : > { %19585 = vmatpush.bf16.msra.mxu2 %v29533_v46  ;;  %v29555_v46 = vld [vmem:[%s29800_s12 + $0x3760] sm:$0xff]  ;;  %v404_v3 = vld [vmem:[%s29795_s8 + $0x370] sm:$0xff]  ;;  %v29568_v6 = vld [vmem:[%s29800_s12 + $0x37c8] sm:$0xff] }
 0x6dd   : > { %19598 = vmatpush.bf16.msra.mxu3 %v29541_v47  ;;  %v31803_v4 = vadd.f32 %v19346_v2, %v19334_v0  ;;  %v29563_v47 = vld [vmem:[%s29800_s12 + $0x37a0] sm:$0xff]  ;;  %v29544_v0 = vld [vmem:[%s29800_s12 + $0x3708] sm:$0xff]  ;;  %v4629_v13 = vunpack.c.h.b16 %v404_v3 }
 0x6de   : > { %19560 = vmatpush.bf16.msra.mxu0 %v29516_v48  ;;  %v29560_v2 = vld [vmem:[%s29800_s12 + $0x3788] sm:$0xff] }
 0x6df   : > { %19573 = vmatpush.bf16.msra.mxu1 %v29524_v49  ;;  %v29571_v49 = vld [vmem:[%s29800_s12 + $0x37e0] sm:$0xff] }
 0x6e0   : > { %19586 = vmatpush.bf16.msra.mxu2 %v29532_v50  ;;  %v29546_v50 = vld [vmem:[%s29800_s12 + $0x3718] sm:$0xff] }
 0x6e1   : > { %19599 = vmatpush.bf16.msra.mxu3 %v29540_v51  ;;  %v29554_v51 = vld [vmem:[%s29800_s12 + $0x3758] sm:$0xff] }
 0x6e2   : > { %19561 = vmatpush.bf16.msra.mxu0 %v29515_v54  ;;  %v19335_v15 = vpop.f32.mrf.mxu2 }
 0x6e3   : > { %19574 = vmatpush.bf16.msra.mxu1 %v29523_v56  ;;  %v19348_v17 = vpop.f32.mrf.mxu3  ;;  %v29590_v15 = vld [vmem:[%s29800_s12 + $0x3878] sm:$0xff] }
 0x6e4   : > { %19587 = vmatpush.bf16.msra.mxu2 %v29531_v57  ;;  %v29598_v17 = vld [vmem:[%s29800_s12 + $0x38b8] sm:$0xff] }
 0x6e5   : > { %19600 = vmatpush.bf16.msra.mxu3 %v29539_v59  ;;  %v29545_v59 = vld [vmem:[%s29800_s12 + $0x3710] sm:$0xff] }
 0x6e6   : > { %19562 = vmatpush.bf16.msra.mxu0 %v29514_v60 }
 0x6e7   : > { %19575 = vmatpush.bf16.msra.mxu1 %v29522_v61  ;;  %v29553_v61 = vld [vmem:[%s29800_s12 + $0x3750] sm:$0xff] }
 0x6e8   : > { %19588 = vmatpush.bf16.msra.mxu2 %v29530_v62  ;;  %v29561_v62 = vld [vmem:[%s29800_s12 + $0x3790] sm:$0xff] }
 0x6e9   : > { %19601 = vmatpush.bf16.msra.mxu3 %v29538_v1  ;;  %v29552_v1 = vld [vmem:[%s29800_s12 + $0x3748] sm:$0xff] }
 0x6ea   : > { %19563 = vmatpush.bf16.msra.mxu0 %v29513_v5 }
 0x6eb   : > { %19576 = vmatpush.bf16.msra.mxu1 %v29521_v7 }
 0x6ec   : > { %19589 = vmatpush.bf16.msra.mxu2 %v29529_v8  ;;  %v29543_v8 = vld [vmem:[%s29800_s12 + $0x3700] sm:$0xff] }
 0x6ed   : > { %19602 = vmatpush.bf16.msra.mxu3 %v29537_v9  ;;  %v4628_v9 = vunpack.c.l.b16 %v404_v3 }
 0x6ee   : > { %19564 = vmatpush.bf16.msra.mxu0 %v29512_v10 }
 0x6ef   : > { %19577 = vmatpush.bf16.msra.mxu1 %v29520_v11  ;;  %v29551_v11 = vld [vmem:[%s29800_s12 + $0x3740] sm:$0xff]  ;;  %v4870_v19 = vpack.c.b16 %v4628_v9, %v4628_v9 }
 0x6f0   : > { %19590 = vmatpush.bf16.msra.mxu2 %v29528_v12  ;;  %v29559_v12 = vld [vmem:[%s29800_s12 + $0x3780] sm:$0xff] }
 0x6f1   : > { %19603 = vmatpush.bf16.msra.mxu3 %v29536_v16 }
 0x6f2   : > { %19565 = vmatpush.bf16.msra.mxu0 %v29511_v18  ;;  %v19359_v42 = vpop.f32.mrf.mxu0  ;;  %v29567_v18 = vld [vmem:[%s29800_s12 + $0x37c0] sm:$0xff] }
 0x6f3   : > { %19578 = vmatpush.bf16.msra.mxu1 %v29519_v21  ;;  %v19360_v43 = vadd.f32 %v19359_v42, %v31803_v4  ;;  %v19372_v45 = vpop.f32.mrf.mxu1  ;;  %v405_v4 = vld [vmem:[%s29795_s8 + $0x378] sm:$0xff] }
 0x6f4   : > { %19591 = vmatpush.bf16.msra.mxu2 %v29527_v22  ;;  %v4630_v10 = vunpack.c.l.b16 %v405_v4  ;;  %v4631_v16 = vunpack.c.h.b16 %v405_v4  ;;  %v29606_v21 = vld [vmem:[%s29800_s12 + $0x38f8] sm:$0xff]  ;;  %v4871_v22 = vpack.c.b16 %v4629_v13, %v4629_v13 }
 0x6f5   : > { %19604 = vmatpush.bf16.msra.mxu3 %v29535_v28  ;;  %19566 = vmatmul.bf16.vlgmr.msra.gmra.mxu0 %v4866_v29  ;;  %v19373_v48 = vadd.f32 %v19372_v45, %v19360_v43  ;;  %v29580_v28 = vld [vmem:[%s29800_s12 + $0x3828] sm:$0xff]  ;;  %v29594_v42 = vld [vmem:[%s29800_s12 + $0x3898] sm:$0xff] }
 0x6f6   : > { %19610 = vmatpush.bf16.msrb.mxu0 %v29550_v24  ;;  %19579 = vmatmul.bf16.vlgmr.msra.gmra.mxu1 %v4867_v32  ;;  %v4872_v20 = vpack.c.b16 %v4630_v10, %v4630_v10  ;;  %v4873_v23 = vpack.c.b16 %v4631_v16, %v4631_v16  ;;  %v29581_v24 = vld [vmem:[%s29800_s12 + $0x3830] sm:$0xff]  ;;  %v29588_v29 = vld [vmem:[%s29800_s12 + $0x3868] sm:$0xff]  ;;  %v29602_v45 = vld [vmem:[%s29800_s12 + $0x38d8] sm:$0xff] }
 0x6f7   : > { %19623 = vmatpush.bf16.msrb.mxu1 %v29558_v25  ;;  %19592 = vmatmul.bf16.vlgmr.msra.gmra.mxu2 %v4868_v30  ;;  %v29589_v25 = vld [vmem:[%s29800_s12 + $0x3870] sm:$0xff]  ;;  %v29596_v30 = vld [vmem:[%s29800_s12 + $0x38a8] sm:$0xff]  ;;  %v29614_v4 = vld [vmem:[%s29800_s12 + $0x3938] sm:$0xff] }
 0x6f8   : > { %19636 = vmatpush.bf16.msrb.mxu2 %v29566_v27  ;;  %19605 = vmatmul.bf16.vlgmr.msra.gmra.mxu3 %v4869_v33  ;;  %v29605_v27 = vld [vmem:[%s29800_s12 + $0x38f0] sm:$0xff] }
 0x6f9   : > { %19649 = vmatpush.bf16.msrb.mxu3 %v29574_v31  ;;  %v29604_v31 = vld [vmem:[%s29800_s12 + $0x38e8] sm:$0xff]  ;;  %v29629_v16 = vld [vmem:[%s29800_s12 + $0x39b0] sm:$0xff] }
 0x6fa   : > { %19611 = vmatpush.bf16.msrb.mxu0 %v29549_v34  ;;  %v19385_v53 = vpop.f32.mrf.mxu2  ;;  %v19361_v57 = vpop.f32.mrf.mxu0  ;;  %v29579_v34 = vld [vmem:[%s29800_s12 + $0x3820] sm:$0xff] }
 0x6fb   : > { %19624 = vmatpush.bf16.msrb.mxu1 %v29557_v35  ;;  %v19386_v54 = vadd.f32 %v19385_v53, %v19373_v48  ;;  %v19398_v56 = vpop.f32.mrf.mxu3  ;;  %v19374_v60 = vpop.f32.mrf.mxu1  ;;  %v29601_v53 = vld [vmem:[%s29800_s12 + $0x38d0] sm:$0xff]  ;;  %v406_v57 = vld [vmem:[%s29795_s8 + $0x380] sm:$0xff] }
 0x6fc   : > { %19637 = vmatpush.bf16.msrb.mxu2 %v29565_v36  ;;  %v29587_v36 = vld [vmem:[%s29800_s12 + $0x3860] sm:$0xff]  ;;  %v29600_v60 = vld [vmem:[%s29800_s12 + $0x38c8] sm:$0xff]  ;;  %v4633_v3 = vunpack.c.h.b16 %v406_v57 }
 0x6fd   : > { %19650 = vmatpush.bf16.msrb.mxu3 %v29573_v37  ;;  %v31840_v58 = vadd.f32 %v19398_v56, %v19386_v54  ;;  %v29595_v37 = vld [vmem:[%s29800_s12 + $0x38a0] sm:$0xff]  ;;  %v29576_v54 = vld [vmem:[%s29800_s12 + $0x3808] sm:$0xff] }
 0x6fe   : > { %19612 = vmatpush.bf16.msrb.mxu0 %v29548_v38  ;;  %v29592_v56 = vld [vmem:[%s29800_s12 + $0x3888] sm:$0xff] }
 0x6ff   : > { %19625 = vmatpush.bf16.msrb.mxu1 %v29556_v39  ;;  %v29603_v39 = vld [vmem:[%s29800_s12 + $0x38e0] sm:$0xff] }
 0x700   : > { %19638 = vmatpush.bf16.msrb.mxu2 %v29564_v40  ;;  %v29578_v40 = vld [vmem:[%s29800_s12 + $0x3818] sm:$0xff] }
 0x701   : > { %19651 = vmatpush.bf16.msrb.mxu3 %v29572_v41  ;;  %v29586_v41 = vld [vmem:[%s29800_s12 + $0x3858] sm:$0xff] }
 0x702   : > { %19613 = vmatpush.bf16.msrb.mxu0 %v29547_v44  ;;  %v19387_v5 = vpop.f32.mrf.mxu2 }
 0x703   : > { %19626 = vmatpush.bf16.msrb.mxu1 %v29555_v46  ;;  %v19400_v7 = vpop.f32.mrf.mxu3  ;;  %v29622_v5 = vld [vmem:[%s29800_s12 + $0x3978] sm:$0xff] }
 0x704   : > { %19639 = vmatpush.bf16.msrb.mxu2 %v29563_v47  ;;  %v29630_v7 = vld [vmem:[%s29800_s12 + $0x39b8] sm:$0xff] }
 0x705   : > { %19652 = vmatpush.bf16.msrb.mxu3 %v29571_v49  ;;  %v29577_v49 = vld [vmem:[%s29800_s12 + $0x3810] sm:$0xff] }
 0x706   : > { %19614 = vmatpush.bf16.msrb.mxu0 %v29546_v50 }
 0x707   : > { %19627 = vmatpush.bf16.msrb.mxu1 %v29554_v51  ;;  %v29585_v51 = vld [vmem:[%s29800_s12 + $0x3850] sm:$0xff] }
 0x708   : > { %19640 = vmatpush.bf16.msrb.mxu2 %v29562_v52  ;;  %v29593_v52 = vld [vmem:[%s29800_s12 + $0x3890] sm:$0xff] }
 0x709   : > { %19653 = vmatpush.bf16.msrb.mxu3 %v29570_v55  ;;  %v29584_v55 = vld [vmem:[%s29800_s12 + $0x3848] sm:$0xff] }
 0x70a   : > { %19615 = vmatpush.bf16.msrb.mxu0 %v29545_v59 }
 0x70b   : > { %19628 = vmatpush.bf16.msrb.mxu1 %v29553_v61 }
 0x70c   : > { %19641 = vmatpush.bf16.msrb.mxu2 %v29561_v62  ;;  %v29575_v62 = vld [vmem:[%s29800_s12 + $0x3800] sm:$0xff] }
 0x70d   : > { %19654 = vmatpush.bf16.msrb.mxu3 %v29569_v63  ;;  %v4632_v63 = vunpack.c.l.b16 %v406_v57 }
 0x70e   : > { %19616 = vmatpush.bf16.msrb.mxu0 %v29544_v0 }
 0x70f   : > { %19629 = vmatpush.bf16.msrb.mxu1 %v29552_v1  ;;  %v29583_v1 = vld [vmem:[%s29800_s12 + $0x3840] sm:$0xff]  ;;  %v4874_v9 = vpack.c.b16 %v4632_v63, %v4632_v63 }
 0x710   : > { %19642 = vmatpush.bf16.msrb.mxu2 %v29560_v2  ;;  %v29591_v2 = vld [vmem:[%s29800_s12 + $0x3880] sm:$0xff] }
 0x711   : > { %19655 = vmatpush.bf16.msrb.mxu3 %v29568_v6 }
 0x712   : > { %19617 = vmatpush.bf16.msrb.mxu0 %v29543_v8  ;;  %v19411_v32 = vpop.f32.mrf.mxu0  ;;  %v29599_v8 = vld [vmem:[%s29800_s12 + $0x38c0] sm:$0xff] }
 0x713   : > { %19630 = vmatpush.bf16.msrb.mxu1 %v29551_v11  ;;  %v19412_v33 = vadd.f32 %v19411_v32, %v31840_v58  ;;  %v19424_v35 = vpop.f32.mrf.mxu1  ;;  %v407_v58 = vld [vmem:[%s29795_s8 + $0x388] sm:$0xff]  ;;  %v29638_v11 = vld [vmem:[%s29800_s12 + $0x39f8] sm:$0xff] }
 0x714   : > { %19643 = vmatpush.bf16.msrb.mxu2 %v29559_v12  ;;  %v4634_v0 = vunpack.c.l.b16 %v407_v58  ;;  %v4635_v6 = vunpack.c.h.b16 %v407_v58  ;;  %v4875_v12 = vpack.c.b16 %v4633_v3, %v4633_v3  ;;  %v29626_v32 = vld [vmem:[%s29800_s12 + $0x3998] sm:$0xff] }
 0x715   : > { %19656 = vmatpush.bf16.msrb.mxu3 %v29567_v18  ;;  %19618 = vmatmul.bf16.vlgmr.msrb.gmra.mxu0 %v4870_v19  ;;  %v19425_v38 = vadd.f32 %v19424_v35, %v19412_v33  ;;  %v29612_v18 = vld [vmem:[%s29800_s12 + $0x3928] sm:$0xff]  ;;  %v29634_v35 = vld [vmem:[%s29800_s12 + $0x39d8] sm:$0xff] }
 0x716   : > { %19662 = vmatpush.bf16.msra.mxu0 %v29582_v14  ;;  %19631 = vmatmul.bf16.vlgmr.msrb.gmra.mxu1 %v4871_v22  ;;  %v4876_v10 = vpack.c.b16 %v4634_v0, %v4634_v0  ;;  %v4877_v13 = vpack.c.b16 %v4635_v6, %v4635_v6  ;;  %v29613_v14 = vld [vmem:[%s29800_s12 + $0x3930] sm:$0xff]  ;;  %v29620_v19 = vld [vmem:[%s29800_s12 + $0x3968] sm:$0xff]  ;;  %v29646_v58 = vld [vmem:[%s29800_s12 + $0x3a38] sm:$0xff] }
 0x717   : > { %19675 = vmatpush.bf16.msra.mxu1 %v29590_v15  ;;  %19644 = vmatmul.bf16.vlgmr.msrb.gmra.mxu2 %v4872_v20  ;;  %v29621_v15 = vld [vmem:[%s29800_s12 + $0x3970] sm:$0xff]  ;;  %v29628_v20 = vld [vmem:[%s29800_s12 + $0x39a8] sm:$0xff] }
 0x718   : > { %19688 = vmatpush.bf16.msra.mxu2 %v29598_v17  ;;  %19657 = vmatmul.bf16.vlgmr.msrb.gmra.mxu3 %v4873_v23  ;;  %v29637_v17 = vld [vmem:[%s29800_s12 + $0x39f0] sm:$0xff] }
 0x719   : > { %19701 = vmatpush.bf16.msra.mxu3 %v29606_v21  ;;  %v29636_v21 = vld [vmem:[%s29800_s12 + $0x39e8] sm:$0xff]  ;;  %v29661_v6 = vld [vmem:[%s29800_s12 + $0x3ab0] sm:$0xff] }
 0x71a   : > { %19663 = vmatpush.bf16.msra.mxu0 %v29581_v24  ;;  %v19437_v43 = vpop.f32.mrf.mxu2  ;;  %v19413_v47 = vpop.f32.mrf.mxu0  ;;  %v29611_v24 = vld [vmem:[%s29800_s12 + $0x3920] sm:$0xff] }
 0x71b   : > { %19676 = vmatpush.bf16.msra.mxu1 %v29589_v25  ;;  %v19438_v44 = vadd.f32 %v19437_v43, %v19425_v38  ;;  %v19450_v46 = vpop.f32.mrf.mxu3  ;;  %v19426_v50 = vpop.f32.mrf.mxu1  ;;  %v29633_v43 = vld [vmem:[%s29800_s12 + $0x39d0] sm:$0xff] }
 0x71c   : > { %19689 = vmatpush.bf16.msra.mxu2 %v29597_v26  ;;  %v29619_v26 = vld [vmem:[%s29800_s12 + $0x3960] sm:$0xff]  ;;  %v408_v47 = vld [vmem:[%s29795_s8 + $0x390] sm:$0xff]  ;;  %v29632_v50 = vld [vmem:[%s29800_s12 + $0x39c8] sm:$0xff] }
 0x71d   : > { %19702 = vmatpush.bf16.msra.mxu3 %v29605_v27  ;;  %v31877_v48 = vadd.f32 %v19450_v46, %v19438_v44  ;;  %v29627_v27 = vld [vmem:[%s29800_s12 + $0x39a0] sm:$0xff]  ;;  %v29608_v44 = vld [vmem:[%s29800_s12 + $0x3908] sm:$0xff]  ;;  %v4637_v57 = vunpack.c.h.b16 %v408_v47 }
 0x71e   : > { %19664 = vmatpush.bf16.msra.mxu0 %v29580_v28  ;;  %v29624_v46 = vld [vmem:[%s29800_s12 + $0x3988] sm:$0xff] }
 0x71f   : > { %19677 = vmatpush.bf16.msra.mxu1 %v29588_v29  ;;  %v29635_v29 = vld [vmem:[%s29800_s12 + $0x39e0] sm:$0xff] }
 0x720   : > { %19690 = vmatpush.bf16.msra.mxu2 %v29596_v30  ;;  %v29610_v30 = vld [vmem:[%s29800_s12 + $0x3918] sm:$0xff] }
 0x721   : > { %19703 = vmatpush.bf16.msra.mxu3 %v29604_v31  ;;  %v29618_v31 = vld [vmem:[%s29800_s12 + $0x3958] sm:$0xff] }
 0x722   : > { %19665 = vmatpush.bf16.msra.mxu0 %v29579_v34  ;;  %v19439_v59 = vpop.f32.mrf.mxu2 }
 0x723   : > { %19678 = vmatpush.bf16.msra.mxu1 %v29587_v36  ;;  %v19452_v61 = vpop.f32.mrf.mxu3  ;;  %v29654_v59 = vld [vmem:[%s29800_s12 + $0x3a78] sm:$0xff] }
 0x724   : > { %19691 = vmatpush.bf16.msra.mxu2 %v29595_v37  ;;  %v29662_v61 = vld [vmem:[%s29800_s12 + $0x3ab8] sm:$0xff] }
 0x725   : > { %19704 = vmatpush.bf16.msra.mxu3 %v29603_v39  ;;  %v29609_v39 = vld [vmem:[%s29800_s12 + $0x3910] sm:$0xff] }
 0x726   : > { %19666 = vmatpush.bf16.msra.mxu0 %v29578_v40 }
 0x727   : > { %19679 = vmatpush.bf16.msra.mxu1 %v29586_v41  ;;  %v29617_v41 = vld [vmem:[%s29800_s12 + $0x3950] sm:$0xff] }
 0x728   : > { %19692 = vmatpush.bf16.msra.mxu2 %v29594_v42  ;;  %v29625_v42 = vld [vmem:[%s29800_s12 + $0x3990] sm:$0xff] }
 0x729   : > { %19705 = vmatpush.bf16.msra.mxu3 %v29602_v45  ;;  %v29616_v45 = vld [vmem:[%s29800_s12 + $0x3948] sm:$0xff] }
 0x72a   : > { %19667 = vmatpush.bf16.msra.mxu0 %v29577_v49 }
 0x72b   : > { %19680 = vmatpush.bf16.msra.mxu1 %v29585_v51 }
 0x72c   : > { %19693 = vmatpush.bf16.msra.mxu2 %v29593_v52  ;;  %v29607_v52 = vld [vmem:[%s29800_s12 + $0x3900] sm:$0xff] }
 0x72d   : > { %19706 = vmatpush.bf16.msra.mxu3 %v29601_v53  ;;  %v4636_v53 = vunpack.c.l.b16 %v408_v47 }
 0x72e   : > { %19668 = vmatpush.bf16.msra.mxu0 %v29576_v54 }
 0x72f   : > { %19681 = vmatpush.bf16.msra.mxu1 %v29584_v55  ;;  %v29615_v55 = vld [vmem:[%s29800_s12 + $0x3940] sm:$0xff]  ;;  %v4878_v63 = vpack.c.b16 %v4636_v53, %v4636_v53 }
 0x730   : > { %19694 = vmatpush.bf16.msra.mxu2 %v29592_v56  ;;  %v29623_v56 = vld [vmem:[%s29800_s12 + $0x3980] sm:$0xff] }
 0x731   : > { %19707 = vmatpush.bf16.msra.mxu3 %v29600_v60 }
 0x732   : > { %19669 = vmatpush.bf16.msra.mxu0 %v29575_v62  ;;  %v19463_v22 = vpop.f32.mrf.mxu0  ;;  %v29631_v62 = vld [vmem:[%s29800_s12 + $0x39c0] sm:$0xff] }
 0x733   : > { %19682 = vmatpush.bf16.msra.mxu1 %v29583_v1  ;;  %v19464_v23 = vadd.f32 %v19463_v22, %v31877_v48  ;;  %v19476_v25 = vpop.f32.mrf.mxu1  ;;  %v409_v48 = vld [vmem:[%s29795_s8 + $0x398] sm:$0xff] }
 0x734   : > { %19695 = vmatpush.bf16.msra.mxu2 %v29591_v2  ;;  %v4638_v54 = vunpack.c.l.b16 %v409_v48  ;;  %v4639_v60 = vunpack.c.h.b16 %v409_v48  ;;  %v29670_v1 = vld [vmem:[%s29800_s12 + $0x3af8] sm:$0xff]  ;;  %v4879_v2 = vpack.c.b16 %v4637_v57, %v4637_v57 }
 0x735   : > { %19708 = vmatpush.bf16.msra.mxu3 %v29599_v8  ;;  %19670 = vmatmul.bf16.vlgmr.msra.gmra.mxu0 %v4874_v9  ;;  %v19477_v28 = vadd.f32 %v19476_v25, %v19464_v23  ;;  %v29644_v8 = vld [vmem:[%s29800_s12 + $0x3a28] sm:$0xff]  ;;  %v29658_v22 = vld [vmem:[%s29800_s12 + $0x3a98] sm:$0xff] }
 0x736   : > { %19714 = vmatpush.bf16.msrb.mxu0 %v29614_v4  ;;  %19683 = vmatmul.bf16.vlgmr.msra.gmra.mxu1 %v4875_v12  ;;  %v4880_v0 = vpack.c.b16 %v4638_v54, %v4638_v54  ;;  %v4881_v3 = vpack.c.b16 %v4639_v60, %v4639_v60  ;;  %v29645_v4 = vld [vmem:[%s29800_s12 + $0x3a30] sm:$0xff]  ;;  %v29652_v9 = vld [vmem:[%s29800_s12 + $0x3a68] sm:$0xff]  ;;  %v29666_v25 = vld [vmem:[%s29800_s12 + $0x3ad8] sm:$0xff] }
 0x737   : > { %19727 = vmatpush.bf16.msrb.mxu1 %v29622_v5  ;;  %19696 = vmatmul.bf16.vlgmr.msra.gmra.mxu2 %v4876_v10  ;;  %v29653_v5 = vld [vmem:[%s29800_s12 + $0x3a70] sm:$0xff]  ;;  %v29660_v10 = vld [vmem:[%s29800_s12 + $0x3aa8] sm:$0xff]  ;;  %v29678_v48 = vld [vmem:[%s29800_s12 + $0x3b38] sm:$0xff] }
 0x738   : > { %19740 = vmatpush.bf16.msrb.mxu2 %v29630_v7  ;;  %19709 = vmatmul.bf16.vlgmr.msra.gmra.mxu3 %v4877_v13  ;;  %v29669_v7 = vld [vmem:[%s29800_s12 + $0x3af0] sm:$0xff] }
 0x739   : > { %19753 = vmatpush.bf16.msrb.mxu3 %v29638_v11  ;;  %v29668_v11 = vld [vmem:[%s29800_s12 + $0x3ae8] sm:$0xff]  ;;  %v29693_v60 = vld [vmem:[%s29800_s12 + $0x3bb0] sm:$0xff] }
 0x73a   : > { %19715 = vmatpush.bf16.msrb.mxu0 %v29613_v14  ;;  %v19489_v33 = vpop.f32.mrf.mxu2  ;;  %v19465_v37 = vpop.f32.mrf.mxu0  ;;  %v29643_v14 = vld [vmem:[%s29800_s12 + $0x3a20] sm:$0xff] }
 0x73b   : > { %19728 = vmatpush.bf16.msrb.mxu1 %v29621_v15  ;;  %v19490_v34 = vadd.f32 %v19489_v33, %v19477_v28  ;;  %v19502_v36 = vpop.f32.mrf.mxu3  ;;  %v19478_v40 = vpop.f32.mrf.mxu1  ;;  %v29665_v33 = vld [vmem:[%s29800_s12 + $0x3ad0] sm:$0xff]  ;;  %v410_v37 = vld [vmem:[%s29795_s8 + $0x3a0] sm:$0xff] }
 0x73c   : > { %19741 = vmatpush.bf16.msrb.mxu2 %v29629_v16  ;;  %v29651_v16 = vld [vmem:[%s29800_s12 + $0x3a60] sm:$0xff]  ;;  %v29664_v40 = vld [vmem:[%s29800_s12 + $0x3ac8] sm:$0xff]  ;;  %v4641_v47 = vunpack.c.h.b16 %v410_v37 }
 0x73d   : > { %19754 = vmatpush.bf16.msrb.mxu3 %v29637_v17  ;;  %v31914_v38 = vadd.f32 %v19502_v36, %v19490_v34  ;;  %v29659_v17 = vld [vmem:[%s29800_s12 + $0x3aa0] sm:$0xff]  ;;  %v29640_v34 = vld [vmem:[%s29800_s12 + $0x3a08] sm:$0xff] }
 0x73e   : > { %19716 = vmatpush.bf16.msrb.mxu0 %v29612_v18  ;;  %v29656_v36 = vld [vmem:[%s29800_s12 + $0x3a88] sm:$0xff] }
 0x73f   : > { %19729 = vmatpush.bf16.msrb.mxu1 %v29620_v19  ;;  %v29667_v19 = vld [vmem:[%s29800_s12 + $0x3ae0] sm:$0xff] }
 0x740   : > { %19742 = vmatpush.bf16.msrb.mxu2 %v29628_v20  ;;  %v29642_v20 = vld [vmem:[%s29800_s12 + $0x3a18] sm:$0xff] }
 0x741   : > { %19755 = vmatpush.bf16.msrb.mxu3 %v29636_v21  ;;  %v29650_v21 = vld [vmem:[%s29800_s12 + $0x3a58] sm:$0xff] }
 0x742   : > { %19717 = vmatpush.bf16.msrb.mxu0 %v29611_v24  ;;  %v19491_v49 = vpop.f32.mrf.mxu2 }
 0x743   : > { %19730 = vmatpush.bf16.msrb.mxu1 %v29619_v26  ;;  %v19504_v51 = vpop.f32.mrf.mxu3  ;;  %v29686_v49 = vld [vmem:[%s29800_s12 + $0x3b78] sm:$0xff] }
 0x744   : > { %19743 = vmatpush.bf16.msrb.mxu2 %v29627_v27  ;;  %v29694_v51 = vld [vmem:[%s29800_s12 + $0x3bb8] sm:$0xff] }
 0x745   : > { %19756 = vmatpush.bf16.msrb.mxu3 %v29635_v29  ;;  %v29641_v29 = vld [vmem:[%s29800_s12 + $0x3a10] sm:$0xff] }
 0x746   : > { %19718 = vmatpush.bf16.msrb.mxu0 %v29610_v30 }
 0x747   : > { %19731 = vmatpush.bf16.msrb.mxu1 %v29618_v31  ;;  %v29649_v31 = vld [vmem:[%s29800_s12 + $0x3a50] sm:$0xff] }
 0x748   : > { %19744 = vmatpush.bf16.msrb.mxu2 %v29626_v32  ;;  %v29657_v32 = vld [vmem:[%s29800_s12 + $0x3a90] sm:$0xff] }
 0x749   : > { %19757 = vmatpush.bf16.msrb.mxu3 %v29634_v35  ;;  %v29648_v35 = vld [vmem:[%s29800_s12 + $0x3a48] sm:$0xff] }
 0x74a   : > { %19719 = vmatpush.bf16.msrb.mxu0 %v29609_v39 }
 0x74b   : > { %19732 = vmatpush.bf16.msrb.mxu1 %v29617_v41 }
 0x74c   : > { %19745 = vmatpush.bf16.msrb.mxu2 %v29625_v42  ;;  %v29639_v42 = vld [vmem:[%s29800_s12 + $0x3a00] sm:$0xff] }
 0x74d   : > { %19758 = vmatpush.bf16.msrb.mxu3 %v29633_v43  ;;  %v4640_v43 = vunpack.c.l.b16 %v410_v37  ;;  %v29687_v37 = vld [vmem:[%s29800_s12 + $0x3b80] sm:$0xff] }
 0x74e   : > { %19720 = vmatpush.bf16.msrb.mxu0 %v29608_v44 }
 0x74f   : > { %19733 = vmatpush.bf16.msrb.mxu1 %v29616_v45  ;;  %v29647_v45 = vld [vmem:[%s29800_s12 + $0x3a40] sm:$0xff]  ;;  %v4882_v53 = vpack.c.b16 %v4640_v43, %v4640_v43 }
 0x750   : > { %19746 = vmatpush.bf16.msrb.mxu2 %v29624_v46  ;;  %v29655_v46 = vld [vmem:[%s29800_s12 + $0x3a80] sm:$0xff] }
 0x751   : > { %19759 = vmatpush.bf16.msrb.mxu3 %v29632_v50 }
 0x752   : > { %19721 = vmatpush.bf16.msrb.mxu0 %v29607_v52  ;;  %v19515_v12 = vpop.f32.mrf.mxu0  ;;  %v29663_v52 = vld [vmem:[%s29800_s12 + $0x3ac0] sm:$0xff] }
 0x753   : > { %19734 = vmatpush.bf16.msrb.mxu1 %v29615_v55  ;;  %v19516_v13 = vadd.f32 %v19515_v12, %v31914_v38  ;;  %v19528_v15 = vpop.f32.mrf.mxu1  ;;  %v411_v38 = vld [vmem:[%s29795_s8 + $0x3a8] sm:$0xff]  ;;  %v29702_v55 = vld [vmem:[%s29800_s12 + $0x3bf8] sm:$0xff] }
 0x754   : > { %19747 = vmatpush.bf16.msrb.mxu2 %v29623_v56  ;;  %v4642_v44 = vunpack.c.l.b16 %v411_v38  ;;  %v4643_v50 = vunpack.c.h.b16 %v411_v38  ;;  %v4883_v56 = vpack.c.b16 %v4641_v47, %v4641_v47  ;;  %v29690_v12 = vld [vmem:[%s29800_s12 + $0x3b98] sm:$0xff]  ;;  %v29717_v47 = vld [vmem:[%s29800_s12 + $0x3c70] sm:$0xff] }
 0x755   : > { %19760 = vmatpush.bf16.msrb.mxu3 %v29631_v62  ;;  %19722 = vmatmul.bf16.vlgmr.msrb.gmra.mxu0 %v4878_v63  ;;  %v19529_v18 = vadd.f32 %v19528_v15, %v19516_v13  ;;  %v29676_v62 = vld [vmem:[%s29800_s12 + $0x3b28] sm:$0xff]  ;;  %v29698_v15 = vld [vmem:[%s29800_s12 + $0x3bd8] sm:$0xff] }
 0x756   : > { %19766 = vmatpush.bf16.msra.mxu0 %v29646_v58  ;;  %19735 = vmatmul.bf16.vlgmr.msrb.gmra.mxu1 %v4879_v2  ;;  %v4884_v54 = vpack.c.b16 %v4642_v44, %v4642_v44  ;;  %v4885_v57 = vpack.c.b16 %v4643_v50, %v4643_v50  ;;  %v29677_v58 = vld [vmem:[%s29800_s12 + $0x3b30] sm:$0xff]  ;;  %v29684_v63 = vld [vmem:[%s29800_s12 + $0x3b68] sm:$0xff]  ;;  %v29710_v38 = vld [vmem:[%s29800_s12 + $0x3c38] sm:$0xff] }
 0x757   : > { %19779 = vmatpush.bf16.msra.mxu1 %v29654_v59  ;;  %19748 = vmatmul.bf16.vlgmr.msrb.gmra.mxu2 %v4880_v0  ;;  %v29685_v59 = vld [vmem:[%s29800_s12 + $0x3b70] sm:$0xff]  ;;  %v29692_v0 = vld [vmem:[%s29800_s12 + $0x3ba8] sm:$0xff] }
 0x758   : > { %19792 = vmatpush.bf16.msra.mxu2 %v29662_v61  ;;  %19761 = vmatmul.bf16.vlgmr.msrb.gmra.mxu3 %v4881_v3  ;;  %v29701_v61 = vld [vmem:[%s29800_s12 + $0x3bf0] sm:$0xff] }
 0x759   : > { %19805 = vmatpush.bf16.msra.mxu3 %v29670_v1  ;;  %v29700_v1 = vld [vmem:[%s29800_s12 + $0x3be8] sm:$0xff] }
 0x75a   : > { %19767 = vmatpush.bf16.msra.mxu0 %v29645_v4  ;;  %v19541_v23 = vpop.f32.mrf.mxu2  ;;  %v19517_v27 = vpop.f32.mrf.mxu0  ;;  %v29675_v4 = vld [vmem:[%s29800_s12 + $0x3b20] sm:$0xff] }
 0x75b   : > { %19780 = vmatpush.bf16.msra.mxu1 %v29653_v5  ;;  %v19542_v24 = vadd.f32 %v19541_v23, %v19529_v18  ;;  %v19554_v26 = vpop.f32.mrf.mxu3  ;;  %v19530_v30 = vpop.f32.mrf.mxu1  ;;  %v29697_v23 = vld [vmem:[%s29800_s12 + $0x3bd0] sm:$0xff]  ;;  %v29688_v27 = vld [vmem:[%s29800_s12 + $0x3b88] sm:$0xff] }
 0x75c   : > { %19793 = vmatpush.bf16.msra.mxu2 %v29661_v6  ;;  %v29683_v6 = vld [vmem:[%s29800_s12 + $0x3b60] sm:$0xff]  ;;  %v29696_v30 = vld [vmem:[%s29800_s12 + $0x3bc8] sm:$0xff] }
 0x75d   : > { %19806 = vmatpush.bf16.msra.mxu3 %v29669_v7  ;;  %v31951_v28 = vadd.f32 %v19554_v26, %v19542_v24  ;;  %v29691_v7 = vld [vmem:[%s29800_s12 + $0x3ba0] sm:$0xff]  ;;  %v29672_v24 = vld [vmem:[%s29800_s12 + $0x3b08] sm:$0xff] }
 0x75e   : > { %19768 = vmatpush.bf16.msra.mxu0 %v29644_v8  ;;  %v29680_v26 = vld [vmem:[%s29800_s12 + $0x3b48] sm:$0xff] }
 0x75f   : > { %19781 = vmatpush.bf16.msra.mxu1 %v29652_v9  ;;  %v29699_v9 = vld [vmem:[%s29800_s12 + $0x3be0] sm:$0xff] }
 0x760   : > { %19794 = vmatpush.bf16.msra.mxu2 %v29660_v10  ;;  %v29674_v10 = vld [vmem:[%s29800_s12 + $0x3b18] sm:$0xff] }
 0x761   : > { %19807 = vmatpush.bf16.msra.mxu3 %v29668_v11  ;;  %v29682_v11 = vld [vmem:[%s29800_s12 + $0x3b58] sm:$0xff] }
 0x762   : > { %19769 = vmatpush.bf16.msra.mxu0 %v29643_v14  ;;  %v19543_v39 = vpop.f32.mrf.mxu2 }
 0x763   : > { %19782 = vmatpush.bf16.msra.mxu1 %v29651_v16  ;;  %v19556_v41 = vpop.f32.mrf.mxu3  ;;  %v29718_v39 = vld [vmem:[%s29800_s12 + $0x3c78] sm:$0xff] }
 0x764   : > { %19795 = vmatpush.bf16.msra.mxu2 %v29659_v17  ;;  %v29695_v41 = vld [vmem:[%s29800_s12 + $0x3bc0] sm:$0xff] }
 0x765   : > { %19808 = vmatpush.bf16.msra.mxu3 %v29667_v19  ;;  %v29673_v19 = vld [vmem:[%s29800_s12 + $0x3b10] sm:$0xff] }
 0x766   : > { %19770 = vmatpush.bf16.msra.mxu0 %v29642_v20 }
 0x767   : > { %19783 = vmatpush.bf16.msra.mxu1 %v29650_v21  ;;  %v29681_v21 = vld [vmem:[%s29800_s12 + $0x3b50] sm:$0xff] }
 0x768   : > { %19796 = vmatpush.bf16.msra.mxu2 %v29658_v22  ;;  %v29689_v22 = vld [vmem:[%s29800_s12 + $0x3b90] sm:$0xff] }
 0x769   : > { %19809 = vmatpush.bf16.msra.mxu3 %v29666_v25  ;;  %v412_v25 = vld [vmem:[%s29795_s8 + $0x3b0] sm:$0xff] }
 0x76a   : > { %19771 = vmatpush.bf16.msra.mxu0 %v29641_v29 }
 0x76b   : > { %19784 = vmatpush.bf16.msra.mxu1 %v29649_v31  ;;  %v4644_v31 = vunpack.c.l.b16 %v412_v25 }
 0x76c   : > { %19797 = vmatpush.bf16.msra.mxu2 %v29657_v32 }
 0x76d   : > { %19810 = vmatpush.bf16.msra.mxu3 %v29665_v33  ;;  %v29671_v33 = vld [vmem:[%s29800_s12 + $0x3b00] sm:$0xff] }
 0x76e   : > { %19772 = vmatpush.bf16.msra.mxu0 %v29640_v34 }
 0x76f   : > { %19785 = vmatpush.bf16.msra.mxu1 %v29648_v35  ;;  %v4645_v35 = vunpack.c.h.b16 %v412_v25 }
 0x770   : > { %19798 = vmatpush.bf16.msra.mxu2 %v29656_v36  ;;  %v29679_v36 = vld [vmem:[%s29800_s12 + $0x3b40] sm:$0xff] }
 0x771   : > { %19811 = vmatpush.bf16.msra.mxu3 %v29664_v40  ;;  %v4887_v44 = vpack.c.b16 %v4645_v35, %v4645_v35 }
 0x772   : > { %19773 = vmatpush.bf16.msra.mxu0 %v29639_v42  ;;  %v19567_v2 = vpop.f32.mrf.mxu0  ;;  %v4886_v42 = vpack.c.b16 %v4644_v31, %v4644_v31 }
 0x773   : > { %19786 = vmatpush.bf16.msra.mxu1 %v29647_v45  ;;  %v19568_v3 = vadd.f32 %v19567_v2, %v31951_v28  ;;  %v19580_v5 = vpop.f32.mrf.mxu1  ;;  %v413_v28 = vld [vmem:[%s29795_s8 + $0x3b8] sm:$0xff]  ;;  %v29704_v2 = vld [vmem:[%s29800_s12 + $0x3c08] sm:$0xff] }
 0x774   : > { %19799 = vmatpush.bf16.msra.mxu2 %v29655_v46  ;;  %v4646_v34 = vunpack.c.l.b16 %v413_v28  ;;  %v4647_v40 = vunpack.c.h.b16 %v413_v28  ;;  %v29709_v46 = vld [vmem:[%s29800_s12 + $0x3c30] sm:$0xff] }
 0x775   : > { %19812 = vmatpush.bf16.msra.mxu3 %v29663_v52  ;;  %19774 = vmatmul.bf16.vlgmr.msra.gmra.mxu0 %v4882_v53  ;;  %v19581_v8 = vadd.f32 %v19580_v5, %v19568_v3  ;;  %v29707_v52 = vld [vmem:[%s29800_s12 + $0x3c20] sm:$0xff] }
 0x776   : > { %19818 = vmatpush.bf16.msrb.mxu0 %v29678_v48  ;;  %19787 = vmatmul.bf16.vlgmr.msra.gmra.mxu1 %v4883_v56  ;;  %v4888_v43 = vpack.c.b16 %v4646_v34, %v4646_v34  ;;  %v4889_v45 = vpack.c.b16 %v4647_v40, %v4647_v40  ;;  %v29708_v48 = vld [vmem:[%s29800_s12 + $0x3c28] sm:$0xff]  ;;  %v29706_v56 = vld [vmem:[%s29800_s12 + $0x3c18] sm:$0xff]  ;;  %v414_v3 = vld [vmem:[%s29795_s8 + $0x3c0] sm:$0xff] }
 0x777   : > { %19831 = vmatpush.bf16.msrb.mxu1 %v29686_v49  ;;  %19800 = vmatmul.bf16.vlgmr.msra.gmra.mxu2 %v4884_v54  ;;  %v29716_v49 = vld [vmem:[%s29800_s12 + $0x3c68] sm:$0xff]  ;;  %v29715_v54 = vld [vmem:[%s29800_s12 + $0x3c60] sm:$0xff] }
 0x778   : > { %19844 = vmatpush.bf16.msrb.mxu2 %v29694_v51  ;;  %19813 = vmatmul.bf16.vlgmr.msra.gmra.mxu3 %v4885_v57  ;;  %v29714_v57 = vld [vmem:[%s29800_s12 + $0x3c58] sm:$0xff] }
 0x779   : > { %19857 = vmatpush.bf16.msrb.mxu3 %v29702_v55 }
 0x77a   : > { %19819 = vmatpush.bf16.msrb.mxu0 %v29677_v58  ;;  %v19593_v13 = vpop.f32.mrf.mxu2  ;;  %v19569_v17 = vpop.f32.mrf.mxu0 }
 0x77b   : > { %19832 = vmatpush.bf16.msrb.mxu1 %v29685_v59  ;;  %v19594_v14 = vadd.f32 %v19593_v13, %v19581_v8  ;;  %v19606_v16 = vpop.f32.mrf.mxu3  ;;  %v19582_v20 = vpop.f32.mrf.mxu1  ;;  %v29703_v8 = vld [vmem:[%s29800_s12 + $0x3c00] sm:$0xff] }
 0x77c   : > { %19845 = vmatpush.bf16.msrb.mxu2 %v29693_v60 }
 0x77d   : > { %19858 = vmatpush.bf16.msrb.mxu3 %v29701_v61  ;;  %v19607_v18 = vadd.f32 %v19606_v16, %v19594_v14 }
 0x77e   : > { %19820 = vmatpush.bf16.msrb.mxu0 %v29676_v62 }
 0x77f   : > { %19833 = vmatpush.bf16.msrb.mxu1 %v29684_v63  ;;  %v29705_v63 = vld [vmem:[%s29800_s12 + $0x3c10] sm:$0xff] }
 0x780   : > { %19846 = vmatpush.bf16.msrb.mxu2 %v29692_v0 }
 0x781   : > { %19859 = vmatpush.bf16.msrb.mxu3 %v29700_v1  ;;  %v29713_v1 = vld [vmem:[%s29800_s12 + $0x3c50] sm:$0xff] }
 0x782   : > { %19821 = vmatpush.bf16.msrb.mxu0 %v29675_v4  ;;  %v19595_v29 = vpop.f32.mrf.mxu2  ;;  %v29712_v4 = vld [vmem:[%s29800_s12 + $0x3c48] sm:$0xff] }
 0x783   : > { %19834 = vmatpush.bf16.msrb.mxu1 %v29683_v6  ;;  %v19608_v32 = vpop.f32.mrf.mxu3  ;;  %v4648_v6 = vunpack.c.l.b16 %v414_v3 }
 0x784   : > { %19847 = vmatpush.bf16.msrb.mxu2 %v29691_v7 }
 0x785   : > { %19860 = vmatpush.bf16.msrb.mxu3 %v29699_v9  ;;  %v4649_v9 = vunpack.c.h.b16 %v414_v3 }
 0x786   : > { %19822 = vmatpush.bf16.msrb.mxu0 %v29674_v10  ;;  %v29711_v10 = vld [vmem:[%s29800_s12 + $0x3c40] sm:$0xff] }
 0x787   : > { %19835 = vmatpush.bf16.msrb.mxu1 %v29682_v11  ;;  %v4890_v11 = vpack.c.b16 %v4648_v6, %v4648_v6 }
 0x788   : > { %19848 = vmatpush.bf16.msrb.mxu2 %v29690_v12  ;;  %v4891_v12 = vpack.c.b16 %v4649_v9, %v4649_v9 }
 0x789   : > { %19861 = vmatpush.bf16.msrb.mxu3 %v29698_v15 }
 0x78a   : > { %19823 = vmatpush.bf16.msrb.mxu0 %v29673_v19 }
 0x78b   : > { %19836 = vmatpush.bf16.msrb.mxu1 %v29681_v21 }
 0x78c   : > { %19849 = vmatpush.bf16.msrb.mxu2 %v29689_v22 }
 0x78d   : > { %19862 = vmatpush.bf16.msrb.mxu3 %v29697_v23 }
 0x78e   : > { %19824 = vmatpush.bf16.msrb.mxu0 %v29672_v24 }
 0x78f   : > { %19837 = vmatpush.bf16.msrb.mxu1 %v29680_v26 }
 0x790   : > { %19850 = vmatpush.bf16.msrb.mxu2 %v29688_v27 }
 0x791   : > { %19863 = vmatpush.bf16.msrb.mxu3 %v29696_v30 }
 0x792   : > { %19825 = vmatpush.bf16.msrb.mxu0 %v29671_v33  ;;  %v19619_v50 = vpop.f32.mrf.mxu0 }
 0x793   : > { %19838 = vmatpush.bf16.msrb.mxu1 %v29679_v36  ;;  %v19620_v51 = vadd.f32 %v19619_v50, %v19607_v18  ;;  %v19632_v53 = vpop.f32.mrf.mxu1 }
 0x794   : > { %19851 = vmatpush.bf16.msrb.mxu2 %v29687_v37 }
 0x795   : > { %19864 = vmatpush.bf16.msrb.mxu3 %v29695_v41  ;;  %19826 = vmatmul.bf16.vlgmr.msrb.gmra.mxu0 %v4886_v42  ;;  %v19633_v55 = vadd.f32 %v19632_v53, %v19620_v51 }
 0x796   : > { %19870 = vmatpush.bf16.msra.mxu0 %v29710_v38  ;;  %19839 = vmatmul.bf16.vlgmr.msrb.gmra.mxu1 %v4887_v44 }
 0x797   : > { %19883 = vmatpush.bf16.msra.mxu1 %v29718_v39  ;;  %19852 = vmatmul.bf16.vlgmr.msrb.gmra.mxu2 %v4888_v43 }
 0x798   : > { %19865 = vmatmul.bf16.vlgmr.msrb.gmra.mxu3 %v4889_v45 }
 0x79a   : > { %19871 = vmatpush.bf16.msra.mxu0 %v29709_v46  ;;  %v19645_v58 = vpop.f32.mrf.mxu2  ;;  %v19621_v61 = vpop.f32.mrf.mxu0 }
 0x79b   : > { %19884 = vmatpush.bf16.msra.mxu1 %v29717_v47  ;;  %v19646_v59 = vadd.f32 %v19645_v58, %v19633_v55  ;;  %v19658_v60 = vpop.f32.mrf.mxu3  ;;  %v19634_v0 = vpop.f32.mrf.mxu1 }
 0x79c   : > { %v293_v0 = vld [vmem:[#allocation2] sm:$0xff] }
 0x79d   : > { %v19659_v62 = vadd.f32 %v19658_v60, %v19646_v59 }
 0x79e   : > { %19872 = vmatpush.bf16.msra.mxu0 %v29708_v48 }
 0x79f   : > { %19885 = vmatpush.bf16.msra.mxu1 %v29716_v49 }
 0x7a2   : > { %19873 = vmatpush.bf16.msra.mxu0 %v29707_v52  ;;  %v19647_v5 = vpop.f32.mrf.mxu2 }
 0x7a3   : > { %19886 = vmatpush.bf16.msra.mxu1 %v29715_v54  ;;  %v19660_v7 = vpop.f32.mrf.mxu3 }
 0x7a6   : > { %19874 = vmatpush.bf16.msra.mxu0 %v29706_v56 }
 0x7a7   : > { %19887 = vmatpush.bf16.msra.mxu1 %v29714_v57 }
 0x7aa   : > { %19875 = vmatpush.bf16.msra.mxu0 %v29705_v63 }
 0x7ab   : > { %19888 = vmatpush.bf16.msra.mxu1 %v29713_v1 }
 0x7ae   : > { %19876 = vmatpush.bf16.msra.mxu0 %v29704_v2 }
 0x7af   : > { %19889 = vmatpush.bf16.msra.mxu1 %v29712_v4 }
 0x7b2   : > { %19877 = vmatpush.bf16.msra.mxu0 %v29703_v8  ;;  %v19671_v13 = vpop.f32.mrf.mxu0 }
 0x7b3   : > { %19890 = vmatpush.bf16.msra.mxu1 %v29711_v10  ;;  %v19672_v14 = vadd.f32 %v19671_v13, %v19659_v62  ;;  %v19684_v15 = vpop.f32.mrf.mxu1 }
 0x7b5   : > { %19878 = vmatmul.bf16.vlgmr.msra.gmra.mxu0 %v4890_v11  ;;  %v19685_v16 = vadd.f32 %v19684_v15, %v19672_v14 }
 0x7b6   : > { %19891 = vmatmul.bf16.vlgmr.msra.gmra.mxu1 %v4891_v12 }
 0x7ba   : > { %v19697_v17 = vpop.f32.mrf.mxu2  ;;  %v19673_v20 = vpop.f32.mrf.mxu0 }
 0x7bb   : > { %v19698_v18 = vadd.f32 %v19697_v17, %v19685_v16  ;;  %v19710_v19 = vpop.f32.mrf.mxu3  ;;  %v19686_v22 = vpop.f32.mrf.mxu1 }
 0x7bd   : > { %v19711_v21 = vadd.f32 %v19710_v19, %v19698_v18 }
 0x7c2   : > { %v19699_v23 = vpop.f32.mrf.mxu2 }
 0x7c3   : > { %v19712_v24 = vpop.f32.mrf.mxu3 }
 0x7d2   : > { %v19723_v25 = vpop.f32.mrf.mxu0 }
 0x7d3   : > { %v19724_v26 = vadd.f32 %v19723_v25, %v19711_v21  ;;  %v19736_v27 = vpop.f32.mrf.mxu1 }
 0x7d5   : > { %v19737_v28 = vadd.f32 %v19736_v27, %v19724_v26 }
 0x7da   : > { %v19749_v29 = vpop.f32.mrf.mxu2  ;;  %v19725_v31 = vpop.f32.mrf.mxu0 }
 0x7db   : > { %v19762_v30 = vpop.f32.mrf.mxu3  ;;  %v19738_v32 = vpop.f32.mrf.mxu1  ;;  %v19750_v44 = vadd.f32 %v19749_v29, %v19737_v28 }
 0x7dd   : > { %v19763_v46 = vadd.f32 %v19762_v30, %v19750_v44 }
 0x7e2   : > { %v19751_v33 = vpop.f32.mrf.mxu2 }
 0x7e3   : > { %v19764_v34 = vpop.f32.mrf.mxu3 }
 0x7f2   : > { %v19775_v35 = vpop.f32.mrf.mxu0 }
 0x7f3   : > { %v19788_v36 = vpop.f32.mrf.mxu1  ;;  %v19776_v47 = vadd.f32 %v19775_v35, %v19763_v46 }
 0x7f5   : > { %v19789_v52 = vadd.f32 %v19788_v36, %v19776_v47 }
 0x7fa   : > { %v19801_v37 = vpop.f32.mrf.mxu2  ;;  %v19777_v39 = vpop.f32.mrf.mxu0 }
 0x7fb   : > { %v19814_v38 = vpop.f32.mrf.mxu3  ;;  %v19790_v40 = vpop.f32.mrf.mxu1  ;;  %v19802_v53 = vadd.f32 %v19801_v37, %v19789_v52 }
 0x7fd   : > { %v19815_v55 = vadd.f32 %v19814_v38, %v19802_v53 }
 0x802   : > { %v19803_v41 = vpop.f32.mrf.mxu2 }
 0x803   : > { %v19816_v42 = vpop.f32.mrf.mxu3 }
 0x812   : > { %v19827_v43 = vpop.f32.mrf.mxu0 }
 0x813   : > { %v19840_v45 = vpop.f32.mrf.mxu1  ;;  %v19828_v57 = vadd.f32 %v19827_v43, %v19815_v55 }
 0x815   : > { %v19841_v58 = vadd.f32 %v19840_v45, %v19828_v57 }
 0x81a   : > { %v19853_v48 = vpop.f32.mrf.mxu2  ;;  %v19829_v49 = vpop.f32.mrf.mxu0 }
 0x81b   : > { %v19866_v50 = vpop.f32.mrf.mxu3  ;;  %v19842_v51 = vpop.f32.mrf.mxu1  ;;  %v19854_v59 = vadd.f32 %v19853_v48, %v19841_v58 }
 0x81d   : > { %v19867_v60 = vadd.f32 %v19866_v50, %v19854_v59 }
 0x822   : > { %v19855_v54 = vpop.f32.mrf.mxu2 }
 0x823   : > { %v19868_v56 = vpop.f32.mrf.mxu3 }
 0x832   : > { %v19879_v61 = vpop.f32.mrf.mxu0 }
 0x833   : > { %v19880_v62 = vadd.f32 %v19879_v61, %v19867_v60  ;;  %v19892_v63 = vpop.f32.mrf.mxu1 }
 0x835   : > { %v19893_v1 = vadd.f32 %v19892_v63, %v19880_v62 }
 0x837   : > { %v19896_v2 = vadd.f32 %v19893_v1, %v293_v0  ;;  %19901 = sbr.rel (%p27779_p6) target bundleno = 2399 (0x95f), region = 56 }
 0x839   : > { %19897 = vst [vmem:[#allocation2] sm:$0xff] %v19896_v2 }
 0x83a   : > { %v19881_v3 = vpop.f32.mrf.mxu0 }
 0x83b   : > { %v19894_v4 = vpop.f32.mrf.mxu1 }
 0x83c   : > { %v19924_v5 = vld [vmem:[%s32110_s3 + $0x78] sm:$0xff]  ;;  %v19923_v6 = vld [vmem:[%s32110_s3 + $0x70] sm:$0xff]  ;;  %v19922_v7 = vld [vmem:[%s32110_s3 + $0x68] sm:$0xff]  ;;  %vm19962_vm0 = vcmask 523264   ;;  %vm19986_vm1 = vcmask 15360  }
 0x83d   : > { %19929 = vmatpush.msra.mxu0 %v19924_v5  ;;  %v19921_v8 = vld [vmem:[%s32110_s3 + $0x60] sm:$0xff]  ;;  %v19920_v9 = vld [vmem:[%s32110_s3 + $0x58] sm:$0xff]  ;;  %v19956_v11 = vld [vmem:[%s32112_s5 + $0x30] sm:$0xff] }
 0x83e   : > { %v19957_v10 = vld [vmem:[%s32112_s5 + $0x38] sm:$0xff]  ;;  %v19919_v12 = vld [vmem:[%s32110_s3 + $0x50] sm:$0xff]  ;;  %v19955_v13 = vld [vmem:[%s32112_s5 + $0x28] sm:$0xff] }
 0x83f   : > { %19930 = vmatpush.msra.mxu0 %v19923_v6  ;;  %19974 = vmatpush.msra.mxu1 %v19957_v10  ;;  %v19918_v14 = vld [vmem:[%s32110_s3 + $0x48] sm:$0xff]  ;;  %v19954_v15 = vld [vmem:[%s32112_s5 + $0x20] sm:$0xff]  ;;  %v19953_v17 = vld [vmem:[%s32112_s5 + $0x18] sm:$0xff] }
 0x840   : > { %v19917_v16 = vld [vmem:[%s32110_s3 + $0x40] sm:$0xff]  ;;  %v19916_v18 = vld [vmem:[%s32110_s3 + $0x38] sm:$0xff]  ;;  %v19915_v19 = vld [vmem:[%s32110_s3 + $0x30] sm:$0xff] }
 0x841   : > { %19931 = vmatpush.msra.mxu0 %v19922_v7  ;;  %19975 = vmatpush.msra.mxu1 %v19956_v11  ;;  %v19914_v20 = vld [vmem:[%s32110_s3 + $0x28] sm:$0xff]  ;;  %v19913_v21 = vld [vmem:[%s32110_s3 + $0x20] sm:$0xff]  ;;  %v19912_v24 = vld [vmem:[%s32110_s3 + $0x18] sm:$0xff] }
 0x842   : > { %v29728_v22 = vld [vmem:[%s32109_s2] ss:$0 sm:$0xff]  ;;  %v19911_v25 = vld [vmem:[%s32110_s3 + $0x10] sm:$0xff]  ;;  %v19910_v27 = vld [vmem:[%s32110_s3 + $0x8] sm:$0xff] }
 0x843   : > { %19932 = vmatpush.msra.mxu0 %v19921_v8  ;;  %19976 = vmatpush.msra.mxu1 %v19955_v13  ;;  %v19902_v23 = vld [vmem:[#allocation2] sm:$0xff]  ;;  %v19952_v30 = vld [vmem:[%s32112_s5 + $0x10] sm:$0xff]  ;;  %v19951_v31 = vld [vmem:[%s32112_s5 + $0x8] sm:$0xff] }
 0x844   : > { %v19907_v26 = vadd.f32 %v29728_v22, %v19902_v23  ;;  %v19909_v28 = vld [vmem:[%s32110_s3] sm:$0xff] }
 0x845   : > { %19933 = vmatpush.msra.mxu0 %v19920_v9  ;;  %19977 = vmatpush.msra.mxu1 %v19954_v15  ;;  %v19950_v32 = vld [vmem:[%s32112_s5] sm:$0xff] }
 0x846   : > { %v19908_v29 = vmax.f32 %v19907_v26, 0.0  ;;  %v29729_v33 = vld [vmem:[%s32111_s4] ss:$0 sm:$0xff] }
 0x847   : > { %19934 = vmatpush.msra.mxu0 %v19919_v12  ;;  %19978 = vmatpush.msra.mxu1 %v19953_v17  ;;  %v29730_v37 = vld [vmem:[%s32113_s6] ss:$0 sm:$0xff] }
 0x849   : > { %19935 = vmatpush.msra.mxu0 %v19918_v14  ;;  %19979 = vmatpush.msra.mxu1 %v19952_v30 }
 0x84b   : > { %19936 = vmatpush.msra.mxu0 %v19917_v16  ;;  %19980 = vmatpush.msra.mxu1 %v19951_v31 }
 0x84d   : > { %19937 = vmatpush.msra.mxu0 %v19916_v18  ;;  %19981 = vmatpush.msra.mxu1 %v19950_v32 }
 0x84f   : > { %19938 = vmatpush.msra.mxu0 %v19915_v19 }
 0x851   : > { %19939 = vmatpush.msra.mxu0 %v19914_v20 }
 0x853   : > { %19940 = vmatpush.msra.mxu0 %v19913_v21 }
 0x855   : > { %19941 = vmatpush.msra.mxu0 %v19912_v24 }
 0x857   : > { %19942 = vmatpush.msra.mxu0 %v19911_v25 }
 0x859   : > { %19943 = vmatpush.msra.mxu0 %v19910_v27 }
 0x85b   : > { %19944 = vmatpush.msra.mxu0 %v19909_v28 }
 0x85c   : > { %19945 = vmatmul.f32.vlgmr.msra.gmra.mxu0 %v19908_v29 }
 0x8d9   : > { %v19946_v34 = vpop.f32.mrf.mxu0 }
 0x8da   : > { %v19947_v35 = vadd.f32 %v29729_v33, %v19946_v34 }
 0x8dc   : > { %v19949_v36 = vmax.f32 %v19947_v35, 0.0 }
 0x8de   : > { %27780 = vmatmul.msk.f32.vlgmr.msra.gmra.mxu1 %vm19962_vm0, %v19949_v36 }
 0x95b   : > { %v19983_v38 = vpop.f32.mrf.mxu1 }
 0x95c   : > { %v19984_v39 = vadd.f32 %v29730_v37, %v19983_v38 }
 0x95e   : > { %19987 = vst.msk [vmem:[%s32114_s7] sm:$0xff] %vm19986_vm1, %v19984_v39 }
 0x95f PF: > { %s17_s24 = sadd.s32 1, %s29737_s24  }
 0x960   : > { %p14_p7 = scmp.ge.s32.totalorder %s17_s24, 4  }
 0x962   :  { %16 = sbr.rel (!%p14_p7) target bundleno = 1 (0x1), region = 85 }

</bundles_post_ra>
